<compile_context>
chip_gen: v7x
topology: tpu7x:2x2x1
jax: 0.10.0
libtpu: 0.0.40
codegen_flags: <defaults>
</compile_context>

<pallas_src>
import functools

import jax
import jax.numpy as jnp
from jax.experimental import pallas as pl
from jax.experimental.pallas import tpu as pltpu

MAX_LEN = 77          # CLIP context length used by the module
L_PAD = 80            # sequence zero-padded only to a sublane multiple (not 128)
HIDDEN = 32           # hidden_size
OUTPUT = 32           # output_size
VOCAB = 128           # synthetic vocabulary for the surrogate text encoders
PATCH = 8             # patch size for the surrogate CLIP image encoder
N_GROUPS = 4          # title / ingredients / instructions / description
TB = 8                # batch items per grid step (must be a multiple of 8)

_RAW_OUT = 2 * OUTPUT + HIDDEN                     # img + recipe + description
OUT_SLAB = ((_RAW_OUT + 127) // 128) * 128         # lane-dense output width
PAD_OUT = OUT_SLAB - _RAW_OUT


# ----------------------------- fused kernel ---------------------------------

def _car_kernel(tok_ref, patch_ref, table_ref, bbig_ref, wmerge_ref, bmerge_ref,
                wrec_ref, brec_ref, wimg_ref, bimg_ref, out_ref,
                *, n_ing, n_ins, tb):
    f32 = jnp.float32
    H = HIDDEN

    # Type-major packed rows for TB batch items:
    #   rows [0, tb)                         : titles
    #   rows [tb, tb*(1+n_ing))              : ingredient rows      (3D case)
    #   rows [tb*(1+n_ing), tb*(1+ni+ns))    : instruction rows     (3D case)
    #   rows [tb*(1+ni+ns), tb*R)            : descriptions
    toks = tok_ref[0]                                   # (RR, L) int32
    RR, L = toks.shape
    V = table_ref.shape[0]
    n3 = tb * (1 + n_ing)
    n4 = tb * (1 + n_ing + n_ins)

    # ---------------- AvgPoolSequence masks ----------------
    nonzero = toks != 0
    row_ids = jax.lax.broadcasted_iota(jnp.int32, (RR, L), 0)
    col_ids = jax.lax.broadcasted_iota(jnp.int32, (RR, L), 1)
    # ignore_mask[:, 0] = 0 applies only to the 3D (ingredient/instruction) rows
    three_d = (row_ids >= tb) & (row_ids < n4)
    keep = nonzero | (three_d & (col_ids == 0))
    count = jnp.sum(keep.astype(f32), axis=1, keepdims=True)            # (RR, 1)
    inv_count = pl.reciprocal(jnp.maximum(count, 1.0), approx=True)     # guard empty rows
    # "row has at least one real token" (for the mergers) — reuse `nonzero`
    valid = (jnp.sum(nonzero.astype(f32), axis=1, keepdims=True) > 0).astype(f32)

    # -------- in-kernel embedding lookup + masked mean pooling --------
    # Masked token histogram: VOCAB on the lane axis, L on sublanes, so the
    # reduction over L is VPU adds + one sublane fold (no cross-lane XLU storm).
    toks_m = jnp.where(keep, toks, -1)                                   # masked -> no match
    viota = jax.lax.broadcasted_iota(jnp.int32, (RR, L, V), 2)
    onehot = (toks_m[:, :, None] == viota).astype(f32)                   # (RR, L, V)
    hist = jnp.sum(onehot, axis=1)                                       # (RR, V)

    # NOTE: pooling commutes with the (linear) surrogate encoders; this fusion is
    # NOT valid if real non-linear ClipLora encoders are substituted.
    # table_ref already holds table @ enc_w (folded offline); lanes [g*H,(g+1)*H)
    # of row r are branch-g's encoder output for row r's pooled tokens.
    y = (jnp.dot(hist, table_ref[...], preferred_element_type=f32) * inv_count
         + bbig_ref[...])                                                # (RR, 128)

    title_y = y[0:tb]                                                    # (tb, 128)
    desc_y = y[n4:n4 + tb]                                               # (tb, 128)

    # -------- mergers over valid (non-empty) sub-rows --------
    # TODO(synk): SingleTransformerEncoder attention merger replaced by a masked
    # mean over valid rows + linear (padded to 128 lanes, output at its slab offset).
    def merged(lo, n, k):
        rows = y[lo:lo + n * tb].reshape(n, tb, y.shape[1])              # (n, tb, 128)
        vm = valid[lo:lo + n * tb].reshape(n, tb, 1)                     # (n, tb, 1)
        cnt = jnp.maximum(jnp.sum(vm, axis=0), 1.0)                      # (tb, 1)
        pooled = jnp.sum(rows * vm, axis=0) * pl.reciprocal(cnt, approx=True)
        return (jnp.dot(pooled, wmerge_ref[k], preferred_element_type=f32)
                + bmerge_ref[k:k + 1, :])                                # (tb, 128)

    ingr_m = merged(tb, n_ing, 0)          # nonzero only in lanes [H:2H]
    instr_m = merged(n3, n_ins, 1)         # nonzero only in lanes [2H:3H]

    # -------- recipe head: Linear(3H -> OUT) + Tanh, all dots 128-lane wide -----
    lane = jax.lax.broadcasted_iota(jnp.int32, (1, y.shape[1]), 1)
    rec_in = jnp.where(lane < H, title_y, 0.0) + ingr_m + instr_m        # (tb, 128)
    recipe = jnp.tanh(jnp.dot(rec_in, wrec_ref[...], preferred_element_type=f32)
                      + brec_ref[...])                                   # (tb, OUT)

    # -------- description head: Tanh --------
    desc = jnp.tanh(desc_y[:, 3 * H:4 * H])                              # (tb, H)

    # -------- image branch: normalize+patch-embed+pool+project folded offline ---
    img = (jnp.dot(patch_ref[...], wimg_ref[...], preferred_element_type=f32)
           + bimg_ref[...])                                              # (tb, OUT)

    # -------- one lane-dense (tb, 128) unmasked store: [img | recipe | desc | pad]
    parts = [img, recipe, desc]
    if PAD_OUT:
        parts.append(jnp.zeros((tb, PAD_OUT), f32))
    out_ref[...] = jnp.concatenate(parts, axis=1)


# ----------------------------- glue / wrapper --------------------------------

def img_to_patches(img):
    b, c, h, w = img.shape
    nh, nw = h // PATCH, w // PATCH
    x = img.reshape(b, c, nh, PATCH, nw, PATCH)
    x = x.transpose(0, 2, 4, 1, 3, 5)                    # (B, nh, nw, C, ph, pw)
    return x.reshape(b, nh * nw, c * PATCH * PATCH)


def pack_tokens(title, ingrs, instrs, description, tb):
    """Pack [title | ingredients | instructions | description] rows, truncate/pad
    the sequence to L_PAD, pad the batch to a multiple of tb and reorder rows
    type-major within each tb-sized block (layout plumbing for the kernel)."""
    def prep(t):
        t = t[..., :MAX_LEN]
        return jnp.pad(t, [(0, 0)] * (t.ndim - 1) + [(0, L_PAD - t.shape[-1])])
    rows = jnp.concatenate([prep(title)[:, None, :],
                            prep(ingrs),
                            prep(instrs),
                            prep(description)[:, None, :]], axis=1).astype(jnp.int32)
    b, r, l = rows.shape
    b_pad = ((b + tb - 1) // tb) * tb
    rows = jnp.pad(rows, ((0, b_pad - b), (0, 0), (0, 0)))
    nb = b_pad // tb
    rows = rows.reshape(nb, tb, r, l).transpose(0, 2, 1, 3).reshape(nb, r * tb, l)
    return rows                                           # (NB, R*tb, L_PAD)


def car_forward(kparams, img, title, ingrs, instrs, description, tb=TB):
    B = img.shape[0]
    n_ing, n_ins = ingrs.shape[1], instrs.shape[1]

    toks = pack_tokens(title, ingrs, instrs, description, tb)   # (NB, R*tb, L)
    patches = img_to_patches(img).reshape(B, -1).astype(jnp.float32)     # (B, P*Dp)
    NB, RR, L = toks.shape
    b_pad = NB * tb
    patches = jnp.pad(patches, ((0, b_pad - B), (0, 0)))
    PD = patches.shape[1]

    weights = (kparams["table_eff"], kparams["b_big"],
               kparams["w_merge_pad"], kparams["b_merge_pad"],
               kparams["w_rec_pad"], kparams["b_recipe"],
               kparams["w_img"], kparams["b_img"])

    def full_spec(a):
        nd = a.ndim
        return pl.BlockSpec(a.shape, lambda i, _n=nd: (0,) * _n)

    out = pl.pallas_call(
        functools.partial(_car_kernel, n_ing=n_ing, n_ins=n_ins, tb=tb),
        out_shape=jax.ShapeDtypeStruct((b_pad, OUT_SLAB), jnp.float32),
        grid=(NB,),
        in_specs=[pl.BlockSpec((1, RR, L), lambda i: (i, 0, 0)),
                  pl.BlockSpec((tb, PD), lambda i: (i, 0))]
                 + [full_spec(w) for w in weights],
        out_specs=pl.BlockSpec((tb, OUT_SLAB), lambda i: (i, 0)),
        compiler_params=pltpu.CompilerParams(
            dimension_semantics=("parallel",),
            vmem_limit_bytes=48 * 1024 * 1024),
    )(toks, patches, *weights)

    out = out[:B]
    return {"img": out[:, :OUTPUT],
            "recipe": out[:, OUTPUT:2 * OUTPUT],
            "description": out[:, 2 * OUTPUT:2 * OUTPUT + HIDDEN]}


# ----------------------------- params ----------------------------------------

def init_params(key):
    keys = iter(jax.random.split(key, 32))

    def nrm(shape, scale):
        return (scale * jax.random.normal(next(keys), shape)).astype(jnp.float32)

    # TODO(synk): pretrained ClipLoraTextEncoder / ClipLoraImageEncoder / LLM
    # weights unavailable; synthetic embedding + linear surrogates stand in.
    tables = jnp.stack([nrm((VOCAB, HIDDEN), 1.0) for _ in range(N_GROUPS)])
    enc_w = jnp.stack([nrm((HIDDEN, HIDDEN), 0.1) for _ in range(N_GROUPS)])
    enc_b = jnp.stack([nrm((HIDDEN,), 0.1) for _ in range(N_GROUPS)])
    dp = 3 * PATCH * PATCH
    mean = jnp.array([0.485, 0.456, 0.406], jnp.float32)
    std = jnp.array([0.229, 0.224, 0.225], jnp.float32)
    return dict(
        tables=tables, enc_w=enc_w, enc_b=enc_b,
        w_merge=jnp.stack([nrm((HIDDEN, HIDDEN), 0.1) for _ in range(2)]),
        b_merge=jnp.stack([nrm((HIDDEN,), 0.1) for _ in range(2)]),
        w_recipe=nrm((3 * HIDDEN, OUTPUT), 0.1), b_recipe=nrm((OUTPUT,), 0.1),
        # per-patch-element mean / 1/std, ordered (C, ph, pw) to match patches
        mean_vec=jnp.repeat(mean, PATCH * PATCH)[None, :],
        istd_vec=(1.0 / jnp.repeat(std, PATCH * PATCH))[None, :],
        w_patch=nrm((dp, HIDDEN), 0.1), b_patch=nrm((HIDDEN,), 0.1),
        w_proj=nrm((HIDDEN, OUTPUT), 0.1), b_proj=nrm((OUTPUT,), 0.1),
    )


def fold_params(p, n_patches):
    """Offline fold of every static linear chain into the kernel-ready weights."""
    H, K, F = HIDDEN, OUTPUT, N_GROUPS * HIDDEN

    # per-branch: (embedding table) @ (encoder linear); packed column-group-wise
    table_eff = jnp.concatenate(
        [p["tables"][g] @ p["enc_w"][g] for g in range(N_GROUPS)], axis=1)   # (V, 4H)
    b_big = p["enc_b"].reshape(1, F)

    # mergers padded to 128 input lanes; outputs land at their 32-lane slab offset
    w_merge_pad = jnp.zeros((2, F, F), jnp.float32)
    b_merge_pad = jnp.zeros((2, F), jnp.float32)
    for k in range(2):
        lo = (1 + k) * H
        w_merge_pad = w_merge_pad.at[k, lo:lo + H, lo:lo + H].set(p["w_merge"][k])
        b_merge_pad = b_merge_pad.at[k, lo:lo + H].set(p["b_merge"][k])

    # recipe Linear(3H -> OUT), input padded to 128 lanes
    w_rec_pad = jnp.zeros((F, K), jnp.float32).at[:3 * H, :].set(p["w_recipe"])
    b_recipe = p["b_recipe"].reshape(1, K)

    # image branch: (x - mean) * istd @ w_patch + b_patch, mean over patches,
    # then @ w_proj + b_proj — all folded into one (P*Dp, OUT) weight.
    istd, meanv = p["istd_vec"], p["mean_vec"]
    w_ie = istd.reshape(-1, 1) * p["w_patch"]                              # (Dp, H)
    b_ie = p["b_patch"].reshape(1, H) - (meanv * istd) @ p["w_patch"]      # (1, H)
    w_img_elem = w_ie @ p["w_proj"]                                        # (Dp, K)
    b_img = b_ie @ p["w_proj"] + p["b_proj"].reshape(1, K)                 # (1, K)
    w_img = jnp.tile(w_img_elem, (n_patches, 1)) / float(n_patches)        # (P*Dp, K)

    return dict(table_eff=table_eff, b_big=b_big,
                w_merge_pad=w_merge_pad, b_merge_pad=b_merge_pad,
                w_rec_pad=w_rec_pad, b_recipe=b_recipe,
                w_img=w_img, b_img=b_img)


def make_tokens(key, shape, lengths):
    toks = jax.random.randint(key, shape, 1, VOCAB, dtype=jnp.int32)
    pos = jnp.arange(shape[-1])
    mask = pos[None] < jnp.asarray(lengths)[..., None]
    return jnp.where(mask, toks, 0).astype(jnp.int32)


if __name__ == "__main__":
    B = 2
    key = jax.random.PRNGKey(0)
    k_img, k_t, k_ing, k_ins, k_d, k_p = jax.random.split(key, 6)

    img = jax.random.uniform(k_img, (B, 3, 16, 16), jnp.float32)
    title = make_tokens(k_t, (B, MAX_LEN), [12, 7])
    ingrs = make_tokens(k_ing, (B, 4, MAX_LEN), [[10, 8, 0, 5], [6, 4, 3, 0]])
    instrs = make_tokens(k_ins, (B, 4, MAX_LEN), [[15, 9, 7, 0], [11, 0, 6, 4]])
    description = make_tokens(k_d, (B, MAX_LEN), [30, 22])

    raw = init_params(k_p)
    n_patches = (16 // PATCH) * (16 // PATCH)
    kparams = fold_params(raw, n_patches)

    embs = car_forward(kparams, img, title, ingrs, instrs, description)
    embs = jax.tree_util.tree_map(jax.block_until_ready, embs)

    assert embs["img"].shape == (B, OUTPUT)
    assert embs["recipe"].shape == (B, OUTPUT)
    assert embs["description"].shape == (B, HIDDEN)
    assert all(bool(jnp.all(jnp.isfinite(v))) for v in embs.values())
    print("KERNEL_OK")
</pallas_src>

<mosaic_0001>
module attributes {stable_mosaic.version = 11 : i64} {
  func.func @_car_kernel(%arg0: i32, %arg1: memref<1x80x80xi32, #tpu.memory_space<vmem>>, %arg2: memref<8x768xf32, #tpu.memory_space<vmem>>, %arg3: memref<128x128xf32, #tpu.memory_space<vmem>>, %arg4: memref<1x128xf32, #tpu.memory_space<vmem>>, %arg5: memref<2x128x128xf32, #tpu.memory_space<vmem>>, %arg6: memref<2x128xf32, #tpu.memory_space<vmem>>, %arg7: memref<128x32xf32, #tpu.memory_space<vmem>>, %arg8: memref<1x32xf32, #tpu.memory_space<vmem>>, %arg9: memref<768x32xf32, #tpu.memory_space<vmem>>, %arg10: memref<1x32xf32, #tpu.memory_space<vmem>>, %arg11: memref<8x128xf32, #tpu.memory_space<vmem>>) attributes {dimension_semantics = [#tpu.dimension_semantics<parallel>], iteration_bounds = array<i64: 1>, scalar_prefetch = 0 : i64, scratch_operands = 0 : i64, tpu.core_type = #tpu.core_type<tc>, window_params = [{transform_indices = @transform_0, window_bounds = array<i64: 1, 80, 80>}, {transform_indices = @transform_1, window_bounds = array<i64: 8, 768>}, {pipeline_mode = #tpu.pipeline_mode<synchronous>, transform_indices = @transform_2, window_bounds = array<i64: 128, 128>}, {pipeline_mode = #tpu.pipeline_mode<synchronous>, transform_indices = @transform_3, window_bounds = array<i64: 1, 128>}, {pipeline_mode = #tpu.pipeline_mode<synchronous>, transform_indices = @transform_4, window_bounds = array<i64: 2, 128, 128>}, {pipeline_mode = #tpu.pipeline_mode<synchronous>, transform_indices = @transform_5, window_bounds = array<i64: 2, 128>}, {pipeline_mode = #tpu.pipeline_mode<synchronous>, transform_indices = @transform_6, window_bounds = array<i64: 128, 32>}, {pipeline_mode = #tpu.pipeline_mode<synchronous>, transform_indices = @transform_7, window_bounds = array<i64: 1, 32>}, {pipeline_mode = #tpu.pipeline_mode<synchronous>, transform_indices = @transform_8, window_bounds = array<i64: 768, 32>}, {pipeline_mode = #tpu.pipeline_mode<synchronous>, transform_indices = @transform_9, window_bounds = array<i64: 1, 32>}, {transform_indices = @transform_10, window_bounds = array<i64: 8, 128>}]} {
    %c0 = arith.constant 0 : index
    %c0_0 = arith.constant 0 : index
    %c0_1 = arith.constant 0 : index
    %0 = vector.load %arg1[%c0, %c0_0, %c0_1] : memref<1x80x80xi32, #tpu.memory_space<vmem>>, vector<1x80x80xi32>
    %1 = vector.shape_cast %0 : vector<1x80x80xi32> to vector<80x80xi32>
    %c0_i32 = arith.constant 0 : i32
    %2 = vector.broadcast %c0_i32 : i32 to vector<80x80xi32>
    %3 = arith.cmpi ne, %1, %2 : vector<80x80xi32>
    %4 = tpu.iota {dimensions = array<i32: 0>} : vector<80x80xi32>
    %5 = tpu.iota {dimensions = array<i32: 1>} : vector<80x80xi32>
    %c8_i32 = arith.constant 8 : i32
    %6 = vector.broadcast %c8_i32 : i32 to vector<80x80xi32>
    %7 = arith.cmpi sge, %4, %6 : vector<80x80xi32>
    %c72_i32 = arith.constant 72 : i32
    %8 = vector.broadcast %c72_i32 : i32 to vector<80x80xi32>
    %9 = arith.cmpi slt, %4, %8 : vector<80x80xi32>
    %10 = arith.andi %7, %9 : vector<80x80xi1>
    %c0_i32_2 = arith.constant 0 : i32
    %11 = vector.broadcast %c0_i32_2 : i32 to vector<80x80xi32>
    %12 = arith.cmpi eq, %5, %11 : vector<80x80xi32>
    %13 = arith.andi %10, %12 : vector<80x80xi1>
    %14 = arith.ori %3, %13 : vector<80x80xi1>
    %15 = arith.extui %14 : vector<80x80xi1> to vector<80x80xi32>
    %16 = arith.sitofp %15 : vector<80x80xi32> to vector<80x80xf32>
    %cst = arith.constant dense<0.000000e+00> : vector<80xf32>
    %17 = vector.multi_reduction <add>, %16, %cst [1] : vector<80x80xf32> to vector<80xf32>
    %18 = vector.shape_cast %17 : vector<80xf32> to vector<80x1xf32>
    %cst_3 = arith.constant 1.000000e+00 : f32
    %19 = vector.broadcast %cst_3 : f32 to vector<80x1xf32>
    %20 = arith.maximumf %18, %19 : vector<80x1xf32>
    %21 = tpu.reciprocal %20 {approx = true} : vector<80x1xf32> -> vector<80x1xf32>
    %22 = arith.extui %3 : vector<80x80xi1> to vector<80x80xi32>
    %23 = arith.sitofp %22 : vector<80x80xi32> to vector<80x80xf32>
    %cst_4 = arith.constant dense<0.000000e+00> : vector<80xf32>
    %24 = vector.multi_reduction <add>, %23, %cst_4 [1] : vector<80x80xf32> to vector<80xf32>
    %25 = vector.shape_cast %24 : vector<80xf32> to vector<80x1xf32>
    %cst_5 = arith.constant 0.000000e+00 : f32
    %26 = vector.broadcast %cst_5 : f32 to vector<80x1xf32>
    %27 = arith.cmpf ogt, %25, %26 : vector<80x1xf32>
    %28 = arith.extui %27 : vector<80x1xi1> to vector<80x1xi32>
    %29 = arith.sitofp %28 : vector<80x1xi32> to vector<80x1xf32>
    %c-1_i32 = arith.constant -1 : i32
    %30 = vector.broadcast %c-1_i32 : i32 to vector<80x80xi32>
    %31 = arith.select %14, %1, %30 : vector<80x80xi1>, vector<80x80xi32>
    %32 = tpu.iota {dimensions = array<i32: 2>} : vector<80x80x128xi32>
    %33 = vector.shape_cast %31 : vector<80x80xi32> to vector<80x80x1xi32>
    %34 = vector.broadcast %33 : vector<80x80x1xi32> to vector<80x80x128xi32>
    %35 = arith.cmpi eq, %34, %32 : vector<80x80x128xi32>
    %36 = arith.extui %35 : vector<80x80x128xi1> to vector<80x80x128xi32>
    %37 = arith.sitofp %36 : vector<80x80x128xi32> to vector<80x80x128xf32>
    %cst_6 = arith.constant dense<0.000000e+00> : vector<80x128xf32>
    %38 = vector.multi_reduction <add>, %37, %cst_6 [1] : vector<80x80x128xf32> to vector<80x128xf32>
    %c0_7 = arith.constant 0 : index
    %c0_8 = arith.constant 0 : index
    %39 = vector.load %arg3[%c0_7, %c0_8] : memref<128x128xf32, #tpu.memory_space<vmem>>, vector<128x128xf32>
    %cst_9 = arith.constant dense<0.000000e+00> : vector<80x128xf32>
    %40 = tpu.matmul %38, %39, %cst_9 {dimension_numbers = #tpu.dot_dimension_numbers<[1], [0], [0], [1], [0, 0, 1, 1], [], []>} : vector<80x128xf32>, vector<128x128xf32>, vector<80x128xf32> -> vector<80x128xf32>
    %41 = vector.broadcast %21 : vector<80x1xf32> to vector<80x128xf32>
    %42 = arith.mulf %40, %41 : vector<80x128xf32>
    %c0_10 = arith.constant 0 : index
    %c0_11 = arith.constant 0 : index
    %43 = vector.load %arg4[%c0_10, %c0_11] : memref<1x128xf32, #tpu.memory_space<vmem>>, vector<1x128xf32>
    %44 = vector.broadcast %43 : vector<1x128xf32> to vector<80x128xf32>
    %45 = arith.addf %42, %44 : vector<80x128xf32>
    %46 = vector.extract_strided_slice %45 {offsets = [0, 0], sizes = [8, 128], strides = [1, 1]} : vector<80x128xf32> to vector<8x128xf32>
    %47 = vector.extract_strided_slice %45 {offsets = [72, 0], sizes = [8, 128], strides = [1, 1]} : vector<80x128xf32> to vector<8x128xf32>
    %48 = vector.extract_strided_slice %45 {offsets = [8, 0], sizes = [32, 128], strides = [1, 1]} : vector<80x128xf32> to vector<32x128xf32>
    %49 = vector.shape_cast %48 : vector<32x128xf32> to vector<4x8x128xf32>
    %50 = vector.extract_strided_slice %29 {offsets = [8, 0], sizes = [32, 1], strides = [1, 1]} : vector<80x1xf32> to vector<32x1xf32>
    %51 = vector.shape_cast %50 : vector<32x1xf32> to vector<4x8x1xf32>
    %cst_12 = arith.constant dense<0.000000e+00> : vector<8x1xf32>
    %52 = vector.multi_reduction <add>, %51, %cst_12 [0] : vector<4x8x1xf32> to vector<8x1xf32>
    %cst_13 = arith.constant 1.000000e+00 : f32
    %53 = vector.broadcast %cst_13 : f32 to vector<8x1xf32>
    %54 = arith.maximumf %52, %53 : vector<8x1xf32>
    %55 = vector.broadcast %51 : vector<4x8x1xf32> to vector<4x8x128xf32>
    %56 = arith.mulf %49, %55 : vector<4x8x128xf32>
    %cst_14 = arith.constant dense<0.000000e+00> : vector<8x128xf32>
    %57 = vector.multi_reduction <add>, %56, %cst_14 [0] : vector<4x8x128xf32> to vector<8x128xf32>
    %58 = tpu.reciprocal %54 {approx = true} : vector<8x1xf32> -> vector<8x1xf32>
    %59 = vector.broadcast %58 : vector<8x1xf32> to vector<8x128xf32>
    %60 = arith.mulf %57, %59 : vector<8x128xf32>
    %c0_15 = arith.constant 0 : index
    %c0_16 = arith.constant 0 : index
    %c0_17 = arith.constant 0 : index
    %61 = vector.load %arg5[%c0_15, %c0_16, %c0_17] : memref<2x128x128xf32, #tpu.memory_space<vmem>>, vector<1x128x128xf32>
    %62 = vector.shape_cast %61 : vector<1x128x128xf32> to vector<128x128xf32>
    %cst_18 = arith.constant dense<0.000000e+00> : vector<8x128xf32>
    %63 = tpu.matmul %60, %62, %cst_18 {dimension_numbers = #tpu.dot_dimension_numbers<[1], [0], [0], [1], [0, 0, 1, 1], [], []>} : vector<8x128xf32>, vector<128x128xf32>, vector<8x128xf32> -> vector<8x128xf32>
    %c0_19 = arith.constant 0 : index
    %c0_20 = arith.constant 0 : index
    %64 = vector.load %arg6[%c0_19, %c0_20] : memref<2x128xf32, #tpu.memory_space<vmem>>, vector<1x128xf32>
    %65 = vector.broadcast %64 : vector<1x128xf32> to vector<8x128xf32>
    %66 = arith.addf %63, %65 : vector<8x128xf32>
    %67 = vector.extract_strided_slice %45 {offsets = [40, 0], sizes = [32, 128], strides = [1, 1]} : vector<80x128xf32> to vector<32x128xf32>
    %68 = vector.shape_cast %67 : vector<32x128xf32> to vector<4x8x128xf32>
    %69 = vector.extract_strided_slice %29 {offsets = [40, 0], sizes = [32, 1], strides = [1, 1]} : vector<80x1xf32> to vector<32x1xf32>
    %70 = vector.shape_cast %69 : vector<32x1xf32> to vector<4x8x1xf32>
    %cst_21 = arith.constant dense<0.000000e+00> : vector<8x1xf32>
    %71 = vector.multi_reduction <add>, %70, %cst_21 [0] : vector<4x8x1xf32> to vector<8x1xf32>
    %cst_22 = arith.constant 1.000000e+00 : f32
    %72 = vector.broadcast %cst_22 : f32 to vector<8x1xf32>
    %73 = arith.maximumf %71, %72 : vector<8x1xf32>
    %74 = vector.broadcast %70 : vector<4x8x1xf32> to vector<4x8x128xf32>
    %75 = arith.mulf %68, %74 : vector<4x8x128xf32>
    %cst_23 = arith.constant dense<0.000000e+00> : vector<8x128xf32>
    %76 = vector.multi_reduction <add>, %75, %cst_23 [0] : vector<4x8x128xf32> to vector<8x128xf32>
    %77 = tpu.reciprocal %73 {approx = true} : vector<8x1xf32> -> vector<8x1xf32>
    %78 = vector.broadcast %77 : vector<8x1xf32> to vector<8x128xf32>
    %79 = arith.mulf %76, %78 : vector<8x128xf32>
    %c1 = arith.constant 1 : index
    %c0_24 = arith.constant 0 : index
    %c0_25 = arith.constant 0 : index
    %80 = vector.load %arg5[%c1, %c0_24, %c0_25] : memref<2x128x128xf32, #tpu.memory_space<vmem>>, vector<1x128x128xf32>
    %81 = vector.shape_cast %80 : vector<1x128x128xf32> to vector<128x128xf32>
    %cst_26 = arith.constant dense<0.000000e+00> : vector<8x128xf32>
    %82 = tpu.matmul %79, %81, %cst_26 {dimension_numbers = #tpu.dot_dimension_numbers<[1], [0], [0], [1], [0, 0, 1, 1], [], []>} : vector<8x128xf32>, vector<128x128xf32>, vector<8x128xf32> -> vector<8x128xf32>
    %c1_27 = arith.constant 1 : index
    %c0_28 = arith.constant 0 : index
    %83 = vector.load %arg6[%c1_27, %c0_28] : memref<2x128xf32, #tpu.memory_space<vmem>>, vector<1x128xf32>
    %84 = vector.broadcast %83 : vector<1x128xf32> to vector<8x128xf32>
    %85 = arith.addf %82, %84 : vector<8x128xf32>
    %86 = tpu.iota {dimensions = array<i32: 1>} : vector<1x128xi32>
    %c32_i32 = arith.constant 32 : i32
    %87 = vector.broadcast %c32_i32 : i32 to vector<1x128xi32>
    %88 = arith.cmpi slt, %86, %87 : vector<1x128xi32>
    %cst_29 = arith.constant 0.000000e+00 : f32
    %89 = vector.shape_cast %88 : vector<1x128xi1> to vector<1x128xi1>
    %90 = vector.broadcast %89 : vector<1x128xi1> to vector<8x128xi1>
    %91 = vector.broadcast %cst_29 : f32 to vector<8x128xf32>
    %92 = arith.select %90, %46, %91 : vector<8x128xi1>, vector<8x128xf32>
    %93 = arith.addf %92, %66 : vector<8x128xf32>
    %94 = arith.addf %93, %85 : vector<8x128xf32>
    %c0_30 = arith.constant 0 : index
    %c0_31 = arith.constant 0 : index
    %95 = vector.load %arg7[%c0_30, %c0_31] : memref<128x32xf32, #tpu.memory_space<vmem>>, vector<128x32xf32>
    %cst_32 = arith.constant dense<0.000000e+00> : vector<8x32xf32>
    %96 = tpu.matmul %94, %95, %cst_32 {dimension_numbers = #tpu.dot_dimension_numbers<[1], [0], [0], [1], [0, 0, 1, 1], [], []>} : vector<8x128xf32>, vector<128x32xf32>, vector<8x32xf32> -> vector<8x32xf32>
    %c0_33 = arith.constant 0 : index
    %c0_34 = arith.constant 0 : index
    %97 = vector.load %arg8[%c0_33, %c0_34] : memref<1x32xf32, #tpu.memory_space<vmem>>, vector<1x32xf32>
    %98 = vector.broadcast %97 : vector<1x32xf32> to vector<8x32xf32>
    %99 = arith.addf %96, %98 : vector<8x32xf32>
    %100 = math.tanh %99 : vector<8x32xf32>
    %101 = vector.extract_strided_slice %47 {offsets = [0, 96], sizes = [8, 32], strides = [1, 1]} : vector<8x128xf32> to vector<8x32xf32>
    %102 = math.tanh %101 : vector<8x32xf32>
    %c0_35 = arith.constant 0 : index
    %c0_36 = arith.constant 0 : index
    %103 = vector.load %arg2[%c0_35, %c0_36] : memref<8x768xf32, #tpu.memory_space<vmem>>, vector<8x768xf32>
    %c0_37 = arith.constant 0 : index
    %c0_38 = arith.constant 0 : index
    %104 = vector.load %arg9[%c0_37, %c0_38] : memref<768x32xf32, #tpu.memory_space<vmem>>, vector<768x32xf32>
    %cst_39 = arith.constant dense<0.000000e+00> : vector<8x32xf32>
    %105 = tpu.matmul %103, %104, %cst_39 {dimension_numbers = #tpu.dot_dimension_numbers<[1], [0], [0], [1], [0, 0, 1, 1], [], []>} : vector<8x768xf32>, vector<768x32xf32>, vector<8x32xf32> -> vector<8x32xf32>
    %c0_40 = arith.constant 0 : index
    %c0_41 = arith.constant 0 : index
    %106 = vector.load %arg10[%c0_40, %c0_41] : memref<1x32xf32, #tpu.memory_space<vmem>>, vector<1x32xf32>
    %107 = vector.broadcast %106 : vector<1x32xf32> to vector<8x32xf32>
    %108 = arith.addf %105, %107 : vector<8x32xf32>
    %cst_42 = arith.constant 0.000000e+00 : f32
    %109 = vector.broadcast %cst_42 : f32 to vector<8x32xf32>
    %110 = tpu.concatenate %108, %100, %102, %109 in 1 : vector<8x32xf32>, vector<8x32xf32>, vector<8x32xf32>, vector<8x32xf32> -> vector<8x128xf32>
    %c0_43 = arith.constant 0 : index
    %c0_44 = arith.constant 0 : index
    %111 = vector.load %arg11[%c0_43, %c0_44] : memref<8x128xf32, #tpu.memory_space<vmem>>, vector<8x128xf32>
    tpu.vector_store %arg11[%c0_43, %c0_44], %110 {strides = array<i32>} : memref<8x128xf32, #tpu.memory_space<vmem>>, vector<8x128xf32>,
    return
  }
  func.func @transform_0(%arg0: i32) -> (i32, i32, i32) {
    %c0_i32 = arith.constant 0 : i32
    %c0_i32_0 = arith.constant 0 : i32
    %c0_i32_1 = arith.constant 0 : i32
    return %arg0, %c0_i32, %c0_i32_0 : i32, i32, i32
  }
  func.func @transform_1(%arg0: i32) -> (i32, i32) {
    %c0_i32 = arith.constant 0 : i32
    %c0_i32_0 = arith.constant 0 : i32
    return %arg0, %c0_i32 : i32, i32
  }
  func.func @transform_2(%arg0: i32) -> (i32, i32) {
    %c0_i32 = arith.constant 0 : i32
    %c0_i32_0 = arith.constant 0 : i32
    %c0_i32_1 = arith.constant 0 : i32
    return %c0_i32, %c0_i32_0 : i32, i32
  }
  func.func @transform_3(%arg0: i32) -> (i32, i32) {
    %c0_i32 = arith.constant 0 : i32
    %c0_i32_0 = arith.constant 0 : i32
    %c0_i32_1 = arith.constant 0 : i32
    return %c0_i32, %c0_i32_0 : i32, i32
  }
  func.func @transform_4(%arg0: i32) -> (i32, i32, i32) {
    %c0_i32 = arith.constant 0 : i32
    %c0_i32_0 = arith.constant 0 : i32
    %c0_i32_1 = arith.constant 0 : i32
    %c0_i32_2 = arith.constant 0 : i32
    return %c0_i32, %c0_i32_0, %c0_i32_1 : i32, i32, i32
  }
  func.func @transform_5(%arg0: i32) -> (i32, i32) {
    %c0_i32 = arith.constant 0 : i32
    %c0_i32_0 = arith.constant 0 : i32
    %c0_i32_1 = arith.constant 0 : i32
    return %c0_i32, %c0_i32_0 : i32, i32
  }
  func.func @transform_6(%arg0: i32) -> (i32, i32) {
    %c0_i32 = arith.constant 0 : i32
    %c0_i32_0 = arith.constant 0 : i32
    %c0_i32_1 = arith.constant 0 : i32
    return %c0_i32, %c0_i32_0 : i32, i32
  }
  func.func @transform_7(%arg0: i32) -> (i32, i32) {
    %c0_i32 = arith.constant 0 : i32
    %c0_i32_0 = arith.constant 0 : i32
    %c0_i32_1 = arith.constant 0 : i32
    return %c0_i32, %c0_i32_0 : i32, i32
  }
  func.func @transform_8(%arg0: i32) -> (i32, i32) {
    %c0_i32 = arith.constant 0 : i32
    %c0_i32_0 = arith.constant 0 : i32
    %c0_i32_1 = arith.constant 0 : i32
    return %c0_i32, %c0_i32_0 : i32, i32
  }
  func.func @transform_9(%arg0: i32) -> (i32, i32) {
    %c0_i32 = arith.constant 0 : i32
    %c0_i32_0 = arith.constant 0 : i32
    %c0_i32_1 = arith.constant 0 : i32
    return %c0_i32, %c0_i32_0 : i32, i32
  }
  func.func @transform_10(%arg0: i32) -> (i32, i32) {
    %c0_i32 = arith.constant 0 : i32
    %c0_i32_0 = arith.constant 0 : i32
    return %arg0, %c0_i32 : i32, i32
  }
}

</mosaic_0001>

<bundles_post_ra>
// kernel: tpu_custom_call.1
= control target key start
LH: loop header
LB: loop body
LE: loop exit
PB: predicated region body
PF: predicated region fallthrough
CT: control target
= control target key end

     0   :  { %v67_v1 = vlaneseq  ;;  %vm140_vm0 = vcmask 654336   ;;  %v16367_v4 = vmov 0.0   ;;  %s16356_s0 = inlined_call_operand.vmem [shape: s32[1,80,80], index: 0, kind: input, shape index: {}]   ;;  %s16357_s1 = inlined_call_operand.vmem [shape: f32[8,768], index: 1, kind: input, shape index: {}]   ;;  %s16358_s2 = inlined_call_operand.vmem [shape: f32[128,128], index: 2, kind: input, shape index: {}]   ;;  %s16359_s3 = inlined_call_operand.vmem [shape: f32[1,128], index: 3, kind: input, shape index: {}]   ;;  %s16360_s4 = inlined_call_operand.vmem [shape: f32[2,128,128], index: 4, kind: input, shape index: {}]   ;;  %s16361_s5 = inlined_call_operand.vmem [shape: f32[2,128], index: 5, kind: input, shape index: {}]   ;;  %s16362_s6 = inlined_call_operand.vmem [shape: f32[128,32], index: 6, kind: input, shape index: {}]   ;;  %s16363_s7 = inlined_call_operand.vmem [shape: f32[1,32], index: 7, kind: input, shape index: {}]   ;;  %s16364_s8 = inlined_call_operand.vmem [shape: f32[768,32], index: 8, kind: input, shape index: {}]   ;;  %s16365_s9 = inlined_call_operand.vmem [shape: f32[1,32], index: 9, kind: input, shape index: {}]   ;;  %s16366_s10 = inlined_call_operand.hbm [shape: f32[8,128], index: 10, kind: output, shape index: {}]  }
   0x1   :  { %v36_v0 = vld [vmem:[%s16356_s0] sm:$0xff]  ;;  %v38_v2 = vld [vmem:[%s16356_s0 + $0x10] sm:$0xff]  ;;  %v37_v3 = vld [vmem:[%s16356_s0 + $0x8] sm:$0xff] }
   0x2   :  { %vm46_vm1 = vcmp.ne.s32.totalorder %v36_v0, 0  ;;  %v266_v6 = vshrl.u32 %v67_v1, 7  ;;  %v9809_v8 = vld [vmem:[%s16356_s0 + $0x18] sm:$0xff]  ;;  %v9814_v9 = vld [vmem:[%s16356_s0 + $0x20] sm:$0xff]  ;;  %v9819_v10 = vld [vmem:[%s16356_s0 + $0x28] sm:$0xff]  ;;  %v9821_v11 = vand.u32 127, %v67_v1 }
   0x3   :  { %v8288_v5 = vsel %vm46_vm1, 1.0, %v16367_v4  ;;  %v9823_v12 = vsel %vm46_vm1, %v36_v0, 4294967295  ;;  %vm48_vm2 = vcmp.ne.s32.totalorder %v38_v2, 0  ;;  %vm47_vm3 = vcmp.ne.s32.totalorder %v37_v3, 0 }
   0x4   :  { %v141_v7 = vsel %vm140_vm0, %v8288_v5, 0.0 }
   0x5   :  { %142 = vadd.xlane.f32.xlu0 %v141_v7 }
   0x6   :  { %15 = vsyncpa [#allocation3], 0  ;;  %v9825_v13 = vsub.s32 4, %v266_v6  ;;  %v9827_v14 = vsub.s32 5, %v266_v6  ;;  %v9829_v15 = vsub.s32 6, %v266_v6  ;;  %v9831_v16 = vsub.s32 7, %v266_v6 }
   0x7   :  { %v9833_v17 = vsub.s32 0, %v266_v6  ;;  %vm49_vm4 = vcmp.ne.s32.totalorder %v9809_v8, 0  ;;  %vm50_vm5 = vcmp.ne.s32.totalorder %v9814_v9, 0  ;;  %vm51_vm6 = vcmp.ne.s32.totalorder %v9819_v10, 0  ;;  %v9841_v18 = vld [vmem:[%s16356_s0 + $0x30] sm:$0xff]  ;;  %v45_v19 = vld [vmem:[%s16356_s0 + $0x48] sm:$0xff] }
   0x8   :  { %v9848_v20 = vrot.slane %v9823_v12, %v9825_v13  ;;  %v9852_v21 = vrot.slane %v9823_v12, %v9827_v14  ;;  %v9856_v22 = vrot.slane %v9823_v12, %v9829_v15  ;;  %v9860_v23 = vrot.slane %v9823_v12, %v9831_v16  ;;  %v9865_v24 = vld [vmem:[%s16356_s0 + $0x38] sm:$0xff]  ;;  %v9903_v34 = vld [vmem:[%s16356_s0 + $0x40] sm:$0xff] }
   0x9   :  { %v9867_v25 = vsub.s32 1, %v266_v6  ;;  %v9869_v26 = vsub.s32 2, %v266_v6  ;;  %v9871_v27 = vsub.s32 3, %v266_v6  ;;  %vm99_vm7 = vcmp.eq.s32.totalorder %v9821_v11, 0 }
   0xa   :  { %vm112_vm8 = vmor %vm48_vm2, %vm99_vm7  ;;  %vm52_vm9 = vcmp.ne.s32.totalorder %v9841_v18, 0  ;;  %vm55_vm10 = vcmp.ne.s32.totalorder %v45_v19, 0  ;;  %v9880_v28 = vsel %vm47_vm3, 1.0, %v16367_v4  ;;  %v9884_v29 = vsel %vm48_vm2, 1.0, %v16367_v4 }
   0xb   :  { %v9889_v30 = vsel %vm49_vm4, 1.0, %v16367_v4  ;;  %v8290_v31 = vsel %vm112_vm8, 1.0, %v16367_v4  ;;  %v257_v32 = vsel %vm112_vm8, %v38_v2, 4294967295  ;;  %vm9895_vm11 = vmor %vm47_vm3, %vm99_vm7  ;;  %vm53_vm12 = vcmp.ne.s32.totalorder %v9865_v24, 0 }
   0xc   :  { %v9906_v35 = vsel %vm55_vm10, 1.0, %v16367_v4  ;;  %v9908_v36 = vsel %vm55_vm10, %v45_v19, 4294967295  ;;  %v147_v37 = vsel %vm140_vm0, %v8290_v31, 0.0  ;;  %v9912_v38 = vrot.slane %v257_v32, %v9833_v17  ;;  %vm9924_vm13 = vmor %vm49_vm4, %vm99_vm7 }
   0xd   :  { %v9915_v39 = vrot.slane %v257_v32, %v9867_v25  ;;  %v9918_v40 = vrot.slane %v257_v32, %v9869_v26  ;;  %v9929_v42 = vrot.slane %v257_v32, %v9871_v27  ;;  %v9932_v43 = vrot.slane %v257_v32, %v9825_v13  ;;  %148 = vadd.xlane.f32.xlu1 %v147_v37  ;;  %vm9955_vm14 = vmor %vm50_vm5, %vm99_vm7 }
   0xe   :  { %v9935_v44 = vrot.slane %v257_v32, %v9827_v14  ;;  %v9938_v45 = vrot.slane %v257_v32, %v9829_v15  ;;  %v9941_v46 = vrot.slane %v257_v32, %v9831_v16  ;;  %v8289_v47 = vsel %vm9895_vm11, 1.0, %v16367_v4  ;;  %vm115_vm1 = vmor %vm51_vm6, %vm99_vm7 }
   0xf   :  { %16507 = vst [vmem:[#allocation5_spill] sm:$0xff] %v9932_v43  ;;  %v256_v48 = vsel %vm9895_vm11, %v37_v3, 4294967295  ;;  %v8291_v49 = vsel %vm9924_vm13, 1.0, %v16367_v4  ;;  %vm54_vm15 = vcmp.ne.s32.totalorder %v9903_v34, 0  ;;  %v144_v51 = vsel %vm140_vm0, %v8289_v47, 0.0  ;;  %vm10042_vm2 = vmor %vm52_vm9, %vm99_vm7 }
  0x10   :  { %16508 = vst [vmem:[#allocation6_spill] sm:$0xff] %v9935_v44  ;;  %16509 = vst [vmem:[#allocation7_spill] sm:$0xff] %v9938_v45  ;;  %v9962_v52 = vrot.slane %v256_v48, %v9833_v17  ;;  %v9965_v53 = vrot.slane %v256_v48, %v9867_v25  ;;  %v9968_v54 = vrot.slane %v256_v48, %v9869_v26  ;;  %145 = vadd.xlane.f32.xlu0 %v144_v51 }
  0x11   :  { %16510 = vst [vmem:[#allocation8_spill] sm:$0xff] %v9941_v46  ;;  %v9971_v55 = vrot.slane %v256_v48, %v9871_v27  ;;  %v9974_v56 = vrot.slane %v256_v48, %v9825_v13  ;;  %v9977_v57 = vrot.slane %v256_v48, %v9827_v14  ;;  %v9980_v58 = vrot.slane %v256_v48, %v9829_v15  ;;  %vm10062_vm3 = vmor %vm53_vm12, %vm99_vm7 }
  0x12   :  { %v9983_v59 = vrot.slane %v256_v48, %v9831_v16  ;;  %v150_v60 = vsel %vm140_vm0, %v8291_v49, 0.0  ;;  %v258_v61 = vsel %vm9924_vm13, %v9809_v8, 4294967295  ;;  %v8292_v62 = vsel %vm9955_vm14, 1.0, %v16367_v4  ;;  %vm10104_vm4 = vmor %vm54_vm15, %vm99_vm7 }
  0x13   :  { %v9997_v63 = vrot.slane %v258_v61, %v9833_v17  ;;  %v10000_v0 = vrot.slane %v258_v61, %v9867_v25  ;;  %v10003_v1 = vrot.slane %v258_v61, %v9869_v26  ;;  %v10006_v2 = vrot.slane %v258_v61, %v9871_v27  ;;  %151 = vadd.xlane.f32.xlu1 %v150_v60 }
  0x14   :  { %v10009_v3 = vrot.slane %v258_v61, %v9825_v13  ;;  %v10012_v5 = vrot.slane %v258_v61, %v9827_v14  ;;  %v10015_v6 = vrot.slane %v258_v61, %v9829_v15  ;;  %v10018_v7 = vrot.slane %v258_v61, %v9831_v16 }
  0x15   :  { %16513 = vst [vmem:[#allocation9_spill] sm:$0xff] %v9997_v63  ;;  %16514 = vst [vmem:[#allocation10_spill] sm:$0xff] %v10000_v0  ;;  %v153_v8 = vsel %vm140_vm0, %v8292_v62, 0.0  ;;  %v259_v19 = vsel %vm9955_vm14, %v9814_v9, 4294967295  ;;  %v8293_v31 = vsel %vm115_vm1, 1.0, %v16367_v4  ;;  %v260_v32 = vsel %vm115_vm1, %v9819_v10, 4294967295 }
  0x16   :  { %16515 = vst [vmem:[#allocation11_spill] sm:$0xff] %v10003_v1  ;;  %16516 = vst [vmem:[#allocation12_spill] sm:$0xff] %v10006_v2  ;;  %v10027_v33 = vrot.slane %v259_v19, %v9833_v17  ;;  %v10030_v37 = vrot.slane %v259_v19, %v9867_v25  ;;  %v10033_v41 = vrot.slane %v259_v19, %v9869_v26  ;;  %154 = vadd.xlane.f32.xlu0 %v153_v8 }
  0x17   :  { %16517 = vst [vmem:[#allocation13_spill] sm:$0xff] %v10009_v3  ;;  %16518 = vst [vmem:[#allocation14_spill] sm:$0xff] %v10012_v5  ;;  %v10036_v47 = vrot.slane %v259_v19, %v9871_v27  ;;  %v10047_v49 = vrot.slane %v259_v19, %v9825_v13  ;;  %v10050_v50 = vrot.slane %v259_v19, %v9827_v14  ;;  %v156_v62 = vsel %vm140_vm0, %v8293_v31, 0.0 }
  0x18   :  { %16519 = vst [vmem:[#allocation15_spill] sm:$0xff] %v10015_v6  ;;  %16520 = vst [vmem:[#allocation16_spill] sm:$0xff] %v10018_v7  ;;  %v10053_v51 = vrot.slane %v259_v19, %v9829_v15  ;;  %v10056_v60 = vrot.slane %v259_v19, %v9831_v16  ;;  %v10068_v8 = vrot.slane %v260_v32, %v9833_v17  ;;  %157 = vadd.xlane.f32.xlu1 %v156_v62 }
  0x19   :  { %16521 = vst [vmem:[#allocation17_spill] sm:$0xff] %v10027_v33  ;;  %16522 = vst [vmem:[#allocation18_spill] sm:$0xff] %v10030_v37  ;;  %v10071_v4 = vrot.slane %v260_v32, %v9867_v25  ;;  %v10077_v19 = vrot.slane %v260_v32, %v9871_v27  ;;  %v10086_v31 = vrot.slane %v260_v32, %v9829_v15 }
  0x1a   :  { %16523 = vst [vmem:[#allocation19_spill] sm:$0xff] %v10033_v41  ;;  %16524 = vst [vmem:[#allocation20_spill] sm:$0xff] %v10036_v47 }
  0x1b   :  { %16527 = vst [vmem:[#allocation21_spill] sm:$0xff] %v10047_v49  ;;  %16528 = vst [vmem:[#allocation22_spill] sm:$0xff] %v10050_v50  ;;  %v10083_v50 = vrot.slane %v260_v32, %v9827_v14 }
  0x1c   :  { %16529 = vst [vmem:[#allocation23_spill] sm:$0xff] %v10053_v51  ;;  %16530 = vst [vmem:[#allocation24_spill] sm:$0xff] %v10056_v60  ;;  %v10074_v51 = vrot.slane %v260_v32, %v9869_v26  ;;  %v10080_v60 = vrot.slane %v260_v32, %v9825_v13 }
  0x1d   :  { %16533 = vst [vmem:[#allocation25_spill] sm:$0xff] %v10068_v8  ;;  %16534 = vst [vmem:[#allocation26_spill] sm:$0xff] %v10071_v4  ;;  %v10089_v8 = vrot.slane %v260_v32, %v9831_v16  ;;  %v16541_v4 = vmov 0.0  }
  0x1e   :  { %16535 = vst [vmem:[#allocation27_spill] sm:$0xff] %v10074_v51  ;;  %16536 = vst [vmem:[#allocation28_spill] sm:$0xff] %v10077_v19  ;;  %v8294_v51 = vsel %vm10042_vm2, 1.0, %v16541_v4  ;;  %v261_v19 = vsel %vm10042_vm2, %v9841_v18, 4294967295 }
  0x1f   :  { %16537 = vst [vmem:[#allocation29_spill] sm:$0xff] %v10080_v60  ;;  %16538 = vst [vmem:[#allocation30_spill] sm:$0xff] %v10083_v50  ;;  %v8295_v60 = vsel %vm10062_vm3, 1.0, %v16541_v4  ;;  %v159_v32 = vsel %vm140_vm0, %v8294_v51, 0.0  ;;  %v10113_v48 = vrot.slane %v261_v19, %v9867_v25  ;;  %v10119_v50 = vrot.slane %v261_v19, %v9871_v27 }
  0x20   :  { %16539 = vst [vmem:[#allocation31_spill] sm:$0xff] %v10086_v31  ;;  %16540 = vst [vmem:[#allocation32_spill] sm:$0xff] %v10089_v8  ;;  %v10110_v8 = vrot.slane %v261_v19, %v9833_v17  ;;  %v10116_v31 = vrot.slane %v261_v19, %v9869_v26  ;;  %v10122_v49 = vrot.slane %v261_v19, %v9825_v13  ;;  %160 = vadd.xlane.f32.xlu0 %v159_v32 }
  0x21   :  { %16545 = vst [vmem:[#allocation34_spill] sm:$0xff] %v10113_v48  ;;  %16547 = vst [vmem:[#allocation36_spill] sm:$0xff] %v10119_v50  ;;  %v10125_v47 = vrot.slane %v261_v19, %v9827_v14  ;;  %v10128_v51 = vrot.slane %v261_v19, %v9829_v15  ;;  %v162_v48 = vsel %vm140_vm0, %v8295_v60, 0.0 }
  0x22   :  { %16544 = vst [vmem:[#allocation33_spill] sm:$0xff] %v10110_v8  ;;  %16546 = vst [vmem:[#allocation35_spill] sm:$0xff] %v10116_v31  ;;  %v10131_v8 = vrot.slane %v261_v19, %v9831_v16  ;;  %v262_v31 = vsel %vm10062_vm3, %v9865_v24, 4294967295  ;;  %163 = vadd.xlane.f32.xlu1 %v162_v48  ;;  %v168_v48 = vsel %vm140_vm0, %v9906_v35, 0.0  ;;  %v311_v24 = vrot.slane %v9823_v12, %v9867_v25 }
  0x23   :  { %16548 = vst [vmem:[#allocation37_spill] sm:$0xff] %v10122_v49  ;;  %16549 = vst [vmem:[#allocation38_spill] sm:$0xff] %v10125_v47  ;;  %v8296_v49 = vsel %vm10104_vm4, 1.0, %v16541_v4  ;;  %v10141_v50 = vrot.slane %v262_v31, %v9833_v17  ;;  %v10144_v47 = vrot.slane %v262_v31, %v9867_v25  ;;  %v10147_v32 = vrot.slane %v262_v31, %v9869_v26 }
  0x24   :  { %16550 = vst [vmem:[#allocation39_spill] sm:$0xff] %v10128_v51  ;;  %16551 = vst [vmem:[#allocation40_spill] sm:$0xff] %v10131_v8  ;;  %v10150_v19 = vrot.slane %v262_v31, %v9871_v27  ;;  %v10153_v60 = vrot.slane %v262_v31, %v9825_v13  ;;  %v10156_v61 = vrot.slane %v262_v31, %v9827_v14 }
  0x25   :  { %16552 = vst [vmem:[#allocation41_spill] sm:$0xff] %v10141_v50  ;;  %16553 = vst [vmem:[#allocation42_spill] sm:$0xff] %v10144_v47  ;;  %v10159_v8 = vrot.slane %v262_v31, %v9829_v15  ;;  %v10162_v51 = vrot.slane %v262_v31, %v9831_v16  ;;  %v165_v47 = vsel %vm140_vm0, %v8296_v49, 0.0 }
  0x26   :  { %16554 = vst [vmem:[#allocation43_spill] sm:$0xff] %v10147_v32  ;;  %16555 = vst [vmem:[#allocation44_spill] sm:$0xff] %v10150_v19  ;;  %v263_v32 = vsel %vm10104_vm4, %v9903_v34, 4294967295  ;;  %166 = vadd.xlane.f32.xlu0 %v165_v47  ;;  %169 = vadd.xlane.f32.xlu1 %v168_v48  ;;  %v10204_v47 = vrot.slane %v9908_v36, %v9869_v26  ;;  %v10220_v48 = vrot.slane %v9908_v36, %v9829_v15 }
  0x27   :  { %16556 = vst [vmem:[#allocation45_spill] sm:$0xff] %v10153_v60  ;;  %16557 = vst [vmem:[#allocation46_spill] sm:$0xff] %v10156_v61  ;;  %v10172_v60 = vrot.slane %v9908_v36, %v9833_v17  ;;  %v10175_v61 = vrot.slane %v263_v32, %v9833_v17  ;;  %v10181_v31 = vrot.slane %v263_v32, %v9869_v26 }
  0x28   :  { %16558 = vst [vmem:[#allocation47_spill] sm:$0xff] %v10159_v8  ;;  %16559 = vst [vmem:[#allocation48_spill] sm:$0xff] %v10162_v51  ;;  %v10178_v8 = vrot.slane %v263_v32, %v9867_v25  ;;  %v10184_v49 = vrot.slane %v263_v32, %v9871_v27  ;;  %v10187_v62 = vrot.slane %v263_v32, %v9825_v13 }
  0x29   :  { %16560 = vst [vmem:[#allocation49_spill] sm:$0xff] %v10172_v60  ;;  %16561 = vst [vmem:[#allocation50_spill] sm:$0xff] %v10175_v61  ;;  %v10190_v35 = vrot.slane %v263_v32, %v9827_v14  ;;  %v10193_v51 = vrot.slane %v263_v32, %v9829_v15  ;;  %v10196_v60 = vrot.slane %v263_v32, %v9831_v16  ;;  %v213_v15 = vsel %vm140_vm0, %v9889_v30, 0.0 }
  0x2a   :  { %16562 = vst [vmem:[#allocation51_spill] sm:$0xff] %v10178_v8  ;;  %16563 = vst [vmem:[#allocation52_spill] sm:$0xff] %v10181_v31  ;;  %v10200_v31 = vrot.slane %v9908_v36, %v9867_v25  ;;  %v10216_v32 = vrot.slane %v9908_v36, %v9827_v14  ;;  %v8301_v14 = vsel %vm50_vm5, 1.0, %v16541_v4  ;;  %v8304_v30 = vsel %vm53_vm12, 1.0, %v16541_v4 }
  0x2b   :  { %16564 = vst [vmem:[#allocation53_spill] sm:$0xff] %v10184_v49  ;;  %16565 = vst [vmem:[#allocation54_spill] sm:$0xff] %v10187_v62  ;;  %v10208_v62 = vrot.slane %v9908_v36, %v9871_v27  ;;  %v225_v10 = vsel %vm140_vm0, %v8304_v30, 0.0  ;;  %v397_v25 = vrot.slane %v9823_v12, %v9871_v27 }
  0x2c   :  { %16566 = vst [vmem:[#allocation55_spill] sm:$0xff] %v10190_v35  ;;  %16567 = vst [vmem:[#allocation56_spill] sm:$0xff] %v10193_v51  ;;  %v10212_v35 = vrot.slane %v9908_v36, %v9825_v13  ;;  %v207_v51 = vsel %vm140_vm0, %v9880_v28, 0.0  ;;  %v210_v13 = vsel %vm140_vm0, %v9884_v29, 0.0  ;;  %v8303_v28 = vsel %vm52_vm9, 1.0, %v16541_v4 }
  0x2d   :  { %16568 = vst [vmem:[#allocation57_spill] sm:$0xff] %v10196_v60  ;;  %16569 = vst [vmem:[#allocation58_spill] sm:$0xff] %v10200_v31  ;;  %v10224_v60 = vrot.slane %v9908_v36, %v9831_v16  ;;  %208 = vadd.xlane.f32.xlu0 %v207_v51  ;;  %211 = vadd.xlane.f32.xlu1 %v210_v13  ;;  %v8302_v16 = vsel %vm51_vm6, 1.0, %v16541_v4  ;;  %v222_v9 = vsel %vm140_vm0, %v8303_v28, 0.0  ;;  %v8305_v36 = vsel %vm54_vm15, 1.0, %v16541_v4 }
  0x2e   :  { %16570 = vst [vmem:[#allocation59_spill] sm:$0xff] %v10204_v47  ;;  %16571 = vst [vmem:[#allocation60_spill] sm:$0xff] %v10208_v62  ;;  %v219_v29 = vsel %vm140_vm0, %v8302_v16, 0.0  ;;  %v228_v18 = vsel %vm140_vm0, %v8305_v36, 0.0  ;;  %v268_v51 = vrot.slane %v9823_v12, %v9833_v17  ;;  %v354_v17 = vrot.slane %v9823_v12, %v9869_v26 }
  0x2f   :  { %16572 = vst [vmem:[#allocation61_spill] sm:$0xff] %v10212_v35  ;;  %16573 = vst [vmem:[#allocation62_spill] sm:$0xff] %v10216_v32 }
  0x30   :  { %16574 = vst [vmem:[#allocation63_spill] sm:$0xff] %v10220_v48  ;;  %16575 = vst [vmem:[#allocation64_spill] sm:$0xff] %v10224_v60  ;;  %v216_v48 = vsel %vm140_vm0, %v8301_v14, 0.0 }
  0x31   :  { %214 = vadd.xlane.f32.xlu0 %v213_v15  ;;  %217 = vadd.xlane.f32.xlu1 %v216_v48 }
  0x35   :  { %220 = vadd.xlane.f32.xlu0 %v219_v29  ;;  %223 = vadd.xlane.f32.xlu1 %v222_v9 }
  0x39   :  { %226 = vadd.xlane.f32.xlu0 %v225_v10  ;;  %229 = vadd.xlane.f32.xlu1 %v228_v18 }
  0x4a   :  { %274 = vbcast.lane.b32.xlu1 %v268_v51, 264 }
  0x4e   :  { %278 = vbcast.lane.b32.xlu1 %v268_v51, 272 }
  0x4f   :  { %270 = vbcast.lane.b32.xlu0 %v268_v51, 256 }
  0x52   :  { %282 = vbcast.lane.b32.xlu1 %v268_v51, 280 }
  0x53   :  { %286 = vbcast.lane.b32.xlu0 %v268_v51, 288 }
  0x56   :  { %290 = vbcast.lane.b32.xlu1 %v268_v51, 296 }
  0x57   :  { %294 = vbcast.lane.b32.xlu0 %v268_v51, 304 }
  0x5a   :  { %298 = vbcast.lane.b32.xlu1 %v268_v51, 312 }
  0x5b   :  { %302 = vbcast.lane.b32.xlu0 %v268_v51, 320 }
  0x5e   :  { %306 = vbcast.lane.b32.xlu1 %v268_v51, 328 }
  0x5f   :  { %313 = vbcast.lane.b32.xlu0 %v311_v24, 256 }
  0x62   :  { %317 = vbcast.lane.b32.xlu1 %v311_v24, 264 }
  0x63   :  { %321 = vbcast.lane.b32.xlu0 %v311_v24, 272 }
  0x66   :  { %325 = vbcast.lane.b32.xlu1 %v311_v24, 280 }
  0x67   :  { %329 = vbcast.lane.b32.xlu0 %v311_v24, 288 }
  0x6a   :  { %333 = vbcast.lane.b32.xlu1 %v311_v24, 296 }
  0x6b   :  { %337 = vbcast.lane.b32.xlu0 %v311_v24, 304 }
  0x6e   :  { %341 = vbcast.lane.b32.xlu1 %v311_v24, 312 }
  0x6f   :  { %345 = vbcast.lane.b32.xlu0 %v311_v24, 320 }
  0x72   :  { %349 = vbcast.lane.b32.xlu1 %v311_v24, 328 }
  0x73   :  { %356 = vbcast.lane.b32.xlu0 %v354_v17, 256 }
  0x76   :  { %360 = vbcast.lane.b32.xlu1 %v354_v17, 264 }
  0x77   :  { %364 = vbcast.lane.b32.xlu0 %v354_v17, 272 }
  0x7a   :  { %368 = vbcast.lane.b32.xlu1 %v354_v17, 280 }
  0x7b   :  { %372 = vbcast.lane.b32.xlu0 %v354_v17, 288 }
  0x7e   :  { %376 = vbcast.lane.b32.xlu1 %v354_v17, 296 }
  0x7f   :  { %380 = vbcast.lane.b32.xlu0 %v354_v17, 304 }
  0x82   :  { %384 = vbcast.lane.b32.xlu1 %v354_v17, 312 }
  0x83   :  { %388 = vbcast.lane.b32.xlu0 %v354_v17, 320 }
  0x86   :  { %392 = vbcast.lane.b32.xlu1 %v354_v17, 328 }
  0x87   :  { %399 = vbcast.lane.b32.xlu0 %v397_v25, 256 }
  0x8a   :  { %403 = vbcast.lane.b32.xlu1 %v397_v25, 264 }
  0x8b   :  { %407 = vbcast.lane.b32.xlu0 %v397_v25, 272 }
  0x8e   :  { %411 = vbcast.lane.b32.xlu1 %v397_v25, 280 }
  0x8f   :  { %415 = vbcast.lane.b32.xlu0 %v397_v25, 288 }
  0x92   :  { %419 = vbcast.lane.b32.xlu1 %v397_v25, 296  ;;  %v10263_v12 = vpop.xlane.xlu0 %142 }
  0x93   :  { %423 = vbcast.lane.b32.xlu0 %v397_v25, 304  ;;  %16576 = vst [vmem:[#allocation65_spill] sm:$0xff] %v10263_v12 }
  0x96   :  { %427 = vbcast.lane.b32.xlu1 %v397_v25, 312 }
  0x97   :  { %431 = vbcast.lane.b32.xlu0 %v397_v25, 320 }
  0x9a   :  { %435 = vbcast.lane.b32.xlu1 %v397_v25, 328  ;;  %v10265_v26 = vpop.xlane.xlu1 %148 }
  0x9b   :  { %442 = vbcast.lane.b32.xlu0 %v9848_v20, 256  ;;  %16577 = vst [vmem:[#allocation66_spill] sm:$0xff] %v10265_v26 }
  0x9d   :  { %v10269_v27 = vpop.xlane.xlu0 %145 }
  0x9e   :  { %446 = vbcast.lane.b32.xlu1 %v9848_v20, 264  ;;  %16578 = vst [vmem:[#allocation67_spill] sm:$0xff] %v10269_v27 }
  0x9f   :  { %450 = vbcast.lane.b32.xlu0 %v9848_v20, 272 }
  0xa0   :  { %v10273_v34 = vpop.xlane.xlu1 %151 }
  0xa1   :  { %16579 = vst [vmem:[#allocation68_spill] sm:$0xff] %v10273_v34 }
  0xa2   :  { %454 = vbcast.lane.b32.xlu1 %v9848_v20, 280 }
  0xa3   :  { %458 = vbcast.lane.b32.xlu0 %v9848_v20, 288  ;;  %v10275_v48 = vpop.xlane.xlu0 %154 }
  0xa4   :  { %16580 = vst [vmem:[#allocation69_spill] sm:$0xff] %v10275_v48 }
  0xa5   :  { %v10279_v13 = vpop.xlane.xlu1 %157 }
  0xa6   :  { %462 = vbcast.lane.b32.xlu1 %v9848_v20, 296  ;;  %16581 = vst [vmem:[#allocation70_spill] sm:$0xff] %v10279_v13 }
  0xa7   :  { %466 = vbcast.lane.b32.xlu0 %v9848_v20, 304 }
  0xaa   :  { %470 = vbcast.lane.b32.xlu1 %v9848_v20, 312 }
  0xab   :  { %474 = vbcast.lane.b32.xlu0 %v9848_v20, 320 }
  0xad   :  { %v10283_v14 = vpop.xlane.xlu0 %160 }
  0xae   :  { %478 = vbcast.lane.b32.xlu1 %v9848_v20, 328  ;;  %16582 = vst [vmem:[#allocation71_spill] sm:$0xff] %v10283_v14 }
  0xaf   :  { %485 = vbcast.lane.b32.xlu0 %v9852_v21, 256  ;;  %v10285_v15 = vpop.xlane.xlu1 %163 }
  0xb0   :  { %16583 = vst [vmem:[#allocation72_spill] sm:$0xff] %v10285_v15 }
  0xb2   :  { %489 = vbcast.lane.b32.xlu1 %v9852_v21, 264 }
  0xb3   :  { %493 = vbcast.lane.b32.xlu0 %v9852_v21, 272  ;;  %v10289_v16 = vpop.xlane.xlu0 %166  ;;  %v10291_v28 = vpop.xlane.xlu1 %169 }
  0xb4   :  { %16584 = vst [vmem:[#allocation73_spill] sm:$0xff] %v10289_v16  ;;  %16585 = vst [vmem:[#allocation74_spill] sm:$0xff] %v10291_v28 }
  0xb6   :  { %497 = vbcast.lane.b32.xlu1 %v9852_v21, 280 }
  0xb7   :  { %501 = vbcast.lane.b32.xlu0 %v9852_v21, 288 }
  0xba   :  { %v10295_v29 = vpop.xlane.xlu0 %208  ;;  %v10297_v9 = vpop.xlane.xlu1 %211  ;;  %505 = vbcast.lane.b32.xlu1 %v9852_v21, 296 }
  0xbb   :  { %16586 = vst [vmem:[#allocation75_spill] sm:$0xff] %v10295_v29  ;;  %16587 = vst [vmem:[#allocation76_spill] sm:$0xff] %v10297_v9  ;;  %509 = vbcast.lane.b32.xlu0 %v9852_v21, 304 }
  0xbe   :  { %v10301_v20 = vpop.xlane.xlu0 %214  ;;  %v10303_v30 = vpop.xlane.xlu1 %217  ;;  %513 = vbcast.lane.b32.xlu1 %v9852_v21, 312 }
  0xbf   :  { %16588 = vst [vmem:[#allocation77_spill] sm:$0xff] %v10301_v20  ;;  %16589 = vst [vmem:[#allocation78_spill] sm:$0xff] %v10303_v30  ;;  %517 = vbcast.lane.b32.xlu0 %v9852_v21, 320 }
  0xc2   :  { %v10307_v36 = vpop.xlane.xlu0 %220  ;;  %v10309_v10 = vpop.xlane.xlu1 %223  ;;  %521 = vbcast.lane.b32.xlu1 %v9852_v21, 328 }
  0xc3   :  { %16590 = vst [vmem:[#allocation79_spill] sm:$0xff] %v10307_v36  ;;  %16591 = vst [vmem:[#allocation80_spill] sm:$0xff] %v10309_v10  ;;  %528 = vbcast.lane.b32.xlu0 %v9856_v22, 256 }
  0xc6   :  { %v10313_v18 = vpop.xlane.xlu0 %226  ;;  %v10315_v51 = vpop.xlane.xlu1 %229  ;;  %532 = vbcast.lane.b32.xlu1 %v9856_v22, 264 }
  0xc7   :  { %16592 = vst [vmem:[#allocation81_spill] sm:$0xff] %v10313_v18  ;;  %16593 = vst [vmem:[#allocation82_spill] sm:$0xff] %v10315_v51  ;;  %536 = vbcast.lane.b32.xlu0 %v9856_v22, 272 }
  0xca   :  { %v10319_v24 = vpop.permute.xlu0 %270  ;;  %v10321_v17 = vpop.permute.xlu1 %274  ;;  %540 = vbcast.lane.b32.xlu1 %v9856_v22, 280 }
  0xcb   :  { %544 = vbcast.lane.b32.xlu0 %v9856_v22, 288  ;;  %vm3705_vm0 = vcmp.eq.s32.totalorder %v10319_v24, %v9821_v11  ;;  %vm3706_vm5 = vcmp.eq.s32.totalorder %v10321_v17, %v9821_v11 }
  0xcc   :  { %v8314_v24 = vsel %vm3705_vm0, 1.0, %v16541_v4  ;;  %v8315_v17 = vsel %vm3706_vm5, 1.0, %v16541_v4 }
  0xce   :  { %v10325_v25 = vpop.permute.xlu0 %286  ;;  %v10327_v12 = vpop.permute.xlu1 %278  ;;  %548 = vbcast.lane.b32.xlu1 %v9856_v22, 296 }
  0xcf   :  { %552 = vbcast.lane.b32.xlu0 %v9856_v22, 304  ;;  %vm3707_vm6 = vcmp.eq.s32.totalorder %v10327_v12, %v9821_v11  ;;  %vm3709_vm11 = vcmp.eq.s32.totalorder %v10325_v25, %v9821_v11 }
  0xd0   :  { %v8316_v1 = vsel %vm3707_vm6, 1.0, %v16541_v4 }
  0xd2   :  { %v10331_v21 = vpop.permute.xlu0 %294  ;;  %v10333_v16 = vpop.permute.xlu1 %282  ;;  %556 = vbcast.lane.b32.xlu1 %v9856_v22, 312 }
  0xd3   :  { %560 = vbcast.lane.b32.xlu0 %v9856_v22, 320  ;;  %vm3708_vm9 = vcmp.eq.s32.totalorder %v10333_v16, %v9821_v11  ;;  %vm3711_vm2 = vcmp.eq.s32.totalorder %v10331_v21, %v9821_v11 }
  0xd4   :  { %v8317_v16 = vsel %vm3708_vm9, 1.0, %v16541_v4  ;;  %v8320_v21 = vsel %vm3711_vm2, 1.0, %v16541_v4 }
  0xd6   :  { %v10337_v28 = vpop.permute.xlu0 %302  ;;  %v10339_v51 = vpop.permute.xlu1 %290  ;;  %564 = vbcast.lane.b32.xlu1 %v9856_v22, 328 }
  0xd7   :  { %571 = vbcast.lane.b32.xlu0 %v9860_v23, 256  ;;  %vm3710_vm13 = vcmp.eq.s32.totalorder %v10339_v51, %v9821_v11 }
  0xda   :  { %v10343_v18 = vpop.permute.xlu0 %313  ;;  %v10345_v10 = vpop.permute.xlu1 %298  ;;  %575 = vbcast.lane.b32.xlu1 %v9860_v23, 264 }
  0xdb   :  { %579 = vbcast.lane.b32.xlu0 %v9860_v23, 272  ;;  %vm3715_vm7 = vcmp.eq.s32.totalorder %v10343_v18, %v9821_v11  ;;  %vm3712_vm0 = vcmp.eq.s32.totalorder %v10345_v10, %v9821_v11 }
  0xdc   :  { %v8324_v0 = vsel %vm3715_vm7, 1.0, %v16541_v4  ;;  %vm3713_vm7 = vcmp.eq.s32.totalorder %v10337_v28, %v9821_v11 }
  0xde   :  { %v10349_v36 = vpop.permute.xlu0 %321  ;;  %v10351_v14 = vpop.permute.xlu1 %306  ;;  %583 = vbcast.lane.b32.xlu1 %v9860_v23, 280 }
  0xdf   :  { %587 = vbcast.lane.b32.xlu0 %v9860_v23, 288  ;;  %vm3717_vm10 = vcmp.eq.s32.totalorder %v10349_v36, %v9821_v11  ;;  %v8318_v36 = vsel %vm3709_vm11, 1.0, %v16541_v4 }
  0xe0   :  { %v8326_v44 = vsel %vm3717_vm10, 1.0, %v16541_v4 }
  0xe2   :  { %v10355_v15 = vpop.permute.xlu0 %329  ;;  %v10357_v13 = vpop.permute.xlu1 %317  ;;  %591 = vbcast.lane.b32.xlu1 %v9860_v23, 296 }
  0xe3   :  { %595 = vbcast.lane.b32.xlu0 %v9860_v23, 304  ;;  %vm3716_vm8 = vcmp.eq.s32.totalorder %v10357_v13, %v9821_v11  ;;  %v6105_v13 = vadd.f32 %v8315_v17, %v8314_v24  ;;  %vm3719_vm14 = vcmp.eq.s32.totalorder %v10355_v15, %v9821_v11 }
  0xe4   :  { %v8325_v12 = vsel %vm3716_vm8, 1.0, %v16541_v4  ;;  %v8328_v51 = vsel %vm3719_vm14, 1.0, %v16541_v4 }
  0xe5   :  { %v6106_v18 = vadd.f32 %v8316_v1, %v6105_v13  ;;  %v6120_v46 = vadd.f32 %v8325_v12, %v8324_v0 }
  0xe6   :  { %v10361_v22 = vpop.permute.xlu0 %337  ;;  %v10363_v48 = vpop.permute.xlu1 %325  ;;  %599 = vbcast.lane.b32.xlu1 %v9860_v23, 312 }
  0xe7   :  { %603 = vbcast.lane.b32.xlu0 %v9860_v23, 320  ;;  %v6107_v24 = vadd.f32 %v8317_v16, %v6106_v18  ;;  %vm3718_vm12 = vcmp.eq.s32.totalorder %v10363_v48, %v9821_v11  ;;  %v6121_v0 = vadd.f32 %v8326_v44, %v6120_v46  ;;  %v8319_v48 = vsel %vm3710_vm13, 1.0, %v16541_v4 }
  0xe8   :  { %v8327_v25 = vsel %vm3718_vm12, 1.0, %v16541_v4  ;;  %vm3721_vm5 = vcmp.eq.s32.totalorder %v10361_v22, %v9821_v11 }
  0xe9   :  { %v6122_v44 = vadd.f32 %v8327_v25, %v6121_v0  ;;  %v8321_v0 = vsel %vm3712_vm0, 1.0, %v16541_v4  ;;  %v8330_v22 = vsel %vm3721_vm5, 1.0, %v16541_v4 }
  0xea   :  { %v10367_v30 = vpop.permute.xlu0 %345  ;;  %v10369_v60 = vpop.permute.xlu1 %333  ;;  %607 = vbcast.lane.b32.xlu1 %v9860_v23, 328 }
  0xeb   :  { %614 = vbcast.lane.b32.xlu0 %v9962_v52, 256  ;;  %vm3720_vm3 = vcmp.eq.s32.totalorder %v10369_v60, %v9821_v11  ;;  %v6123_v13 = vadd.f32 %v8328_v51, %v6122_v44 }
  0xec   :  { %v8329_v18 = vsel %vm3720_vm3, 1.0, %v16541_v4 }
  0xed   :  { %v6124_v10 = vadd.f32 %v8329_v18, %v6123_v13 }
  0xee   :  { %v10373_v32 = vpop.permute.xlu0 %356  ;;  %v10375_v35 = vpop.permute.xlu1 %341  ;;  %618 = vbcast.lane.b32.xlu1 %v9962_v52, 264 }
  0xef   :  { %622 = vbcast.lane.b32.xlu0 %v9962_v52, 272  ;;  %vm3725_vm15 = vcmp.eq.s32.totalorder %v10373_v32, %v9821_v11  ;;  %vm3722_vm14 = vcmp.eq.s32.totalorder %v10375_v35, %v9821_v11  ;;  %v6125_v51 = vadd.f32 %v8330_v22, %v6124_v10 }
  0xf0   :  { %v8331_v13 = vsel %vm3722_vm14, 1.0, %v16541_v4 }
  0xf2   :  { %v10379_v62 = vpop.permute.xlu0 %364  ;;  %v10381_v47 = vpop.permute.xlu1 %349  ;;  %626 = vbcast.lane.b32.xlu1 %v9962_v52, 280 }
  0xf3   :  { %630 = vbcast.lane.b32.xlu0 %v9962_v52, 288  ;;  %vm3727_vm4 = vcmp.eq.s32.totalorder %v10379_v62, %v9821_v11 }
  0xf4   :  { %v8336_v62 = vsel %vm3727_vm4, 1.0, %v16541_v4  ;;  %vm3723_vm4 = vcmp.eq.s32.totalorder %v10367_v30, %v9821_v11 }
  0xf6   :  { %v10385_v49 = vpop.permute.xlu0 %372  ;;  %v10387_v31 = vpop.permute.xlu1 %360  ;;  %634 = vbcast.lane.b32.xlu1 %v9962_v52, 296 }
  0xf7   :  { %638 = vbcast.lane.b32.xlu0 %v9962_v52, 304  ;;  %vm3726_vm1 = vcmp.eq.s32.totalorder %v10387_v31, %v9821_v11  ;;  %v8334_v31 = vsel %vm3725_vm15, 1.0, %v16541_v4  ;;  %vm3729_vm15 = vcmp.eq.s32.totalorder %v10385_v49, %v9821_v11  ;;  %v8322_v49 = vsel %vm3713_vm7, 1.0, %v16541_v4 }
  0xf8   :  { %v8335_v32 = vsel %vm3726_vm1, 1.0, %v16541_v4  ;;  %v8338_v18 = vsel %vm3729_vm15, 1.0, %v16541_v4 }
  0xfa   :  { %v10391_v23 = vpop.permute.xlu0 %380  ;;  %v10393_v8 = vpop.permute.xlu1 %368  ;;  %642 = vbcast.lane.b32.xlu1 %v9962_v52, 312 }
  0xfb   :  { %646 = vbcast.lane.b32.xlu0 %v9962_v52, 320  ;;  %vm3728_vm6 = vcmp.eq.s32.totalorder %v10393_v8, %v9821_v11 }
  0xfc   :  { %v8337_v44 = vsel %vm3728_vm6, 1.0, %v16541_v4 }
  0xfe   :  { %v10397_v61 = vpop.permute.xlu0 %388  ;;  %v10399_v19 = vpop.permute.xlu1 %376  ;;  %650 = vbcast.lane.b32.xlu1 %v9962_v52, 328 }
  0xff   :  { %657 = vbcast.lane.b32.xlu0 %v9965_v53, 256  ;;  %vm3730_vm0 = vcmp.eq.s32.totalorder %v10399_v19, %v9821_v11 }
 0x100   :  { %v8339_v28 = vsel %vm3730_vm0, 1.0, %v16541_v4 }
 0x102   :  { %v10403_v20 = vpop.permute.xlu0 %399  ;;  %v10405_v9 = vpop.permute.xlu1 %384  ;;  %661 = vbcast.lane.b32.xlu1 %v9965_v53, 264 }
 0x103   :  { %665 = vbcast.lane.b32.xlu0 %v9965_v53, 272  ;;  %vm3735_vm8 = vcmp.eq.s32.totalorder %v10403_v20, %v9821_v11  ;;  %vm3732_vm14 = vcmp.eq.s32.totalorder %v10405_v9, %v9821_v11 }
 0x106   :  { %v10409_v29 = vpop.permute.xlu0 %407  ;;  %v10411_v26 = vpop.permute.xlu1 %392  ;;  %669 = vbcast.lane.b32.xlu1 %v9965_v53, 280 }
 0x107   :  { %673 = vbcast.lane.b32.xlu0 %v9965_v53, 288  ;;  %vm3737_vm1 = vcmp.eq.s32.totalorder %v10409_v29, %v9821_v11 }
 0x10a   :  { %v10415_v34 = vpop.permute.xlu0 %415  ;;  %v10417_v27 = vpop.permute.xlu1 %403  ;;  %677 = vbcast.lane.b32.xlu1 %v9965_v53, 296 }
 0x10b   :  { %681 = vbcast.lane.b32.xlu0 %v9965_v53, 304  ;;  %vm3736_vm9 = vcmp.eq.s32.totalorder %v10417_v27, %v9821_v11 }
 0x10e   :  { %v10421_v52 = vpop.permute.xlu0 %423  ;;  %v10423_v50 = vpop.permute.xlu1 %411  ;;  %685 = vbcast.lane.b32.xlu1 %v9965_v53, 312 }
 0x10f   :  { %689 = vbcast.lane.b32.xlu0 %v9965_v53, 320  ;;  %vm3738_vm5 = vcmp.eq.s32.totalorder %v10423_v50, %v9821_v11 }
 0x112   :  { %v10427_v41 = vpop.permute.xlu0 %431  ;;  %v10429_v37 = vpop.permute.xlu1 %419  ;;  %693 = vbcast.lane.b32.xlu1 %v9965_v53, 328 }
 0x113   :  { %700 = vbcast.lane.b32.xlu0 %v9968_v54, 256  ;;  %vm3740_vm15 = vcmp.eq.s32.totalorder %v10429_v37, %v9821_v11 }
 0x116   :  { %v10433_v33 = vpop.permute.xlu0 %442  ;;  %v10435_v7 = vpop.permute.xlu1 %427  ;;  %704 = vbcast.lane.b32.xlu1 %v9968_v54, 264 }
 0x117   :  { %708 = vbcast.lane.b32.xlu0 %v9968_v54, 272  ;;  %vm3745_vm10 = vcmp.eq.s32.totalorder %v10433_v33, %v9821_v11  ;;  %v8345_v33 = vsel %vm3736_vm9, 1.0, %v16541_v4  ;;  %vm3724_vm9 = vcmp.eq.s32.totalorder %v10381_v47, %v9821_v11 }
 0x11a   :  { %v10439_v6 = vpop.permute.xlu0 %450  ;;  %v10441_v5 = vpop.permute.xlu1 %435  ;;  %712 = vbcast.lane.b32.xlu1 %v9968_v54, 280 }
 0x11b   :  { %716 = vbcast.lane.b32.xlu0 %v9968_v54, 288  ;;  %vm3747_vm2 = vcmp.eq.s32.totalorder %v10439_v6, %v9821_v11  ;;  %v8332_v6 = vsel %vm3723_vm4, 1.0, %v16541_v4 }
 0x11e   :  { %v10449_v53 = vpop.permute.xlu0 %458  ;;  %v10451_v3 = vpop.permute.xlu1 %446  ;;  %720 = vbcast.lane.b32.xlu1 %v9968_v54, 296 }
 0x11f   :  { %724 = vbcast.lane.b32.xlu0 %v9968_v54, 304  ;;  %vm3746_vm11 = vcmp.eq.s32.totalorder %v10451_v3, %v9821_v11  ;;  %v8344_v3 = vsel %vm3735_vm8, 1.0, %v16541_v4  ;;  %vm3731_vm8 = vcmp.eq.s32.totalorder %v10391_v23, %v9821_v11 }
 0x122   :  { %v10465_v2 = vpop.permute.xlu0 %466  ;;  %v10470_v63 = vpop.permute.xlu1 %454  ;;  %728 = vbcast.lane.b32.xlu1 %v9968_v54, 312 }
 0x123   :  { %732 = vbcast.lane.b32.xlu0 %v9968_v54, 320  ;;  %vm3748_vm6 = vcmp.eq.s32.totalorder %v10470_v63, %v9821_v11 }
 0x124   :  { %v8357_v19 = vsel %vm3748_vm6, 1.0, %v16541_v4  ;;  %vm3751_vm6 = vcmp.eq.s32.totalorder %v10465_v2, %v9821_v11 }
 0x126   :  { %v10479_v45 = vpop.permute.xlu0 %474  ;;  %v10482_v43 = vpop.permute.xlu1 %462  ;;  %736 = vbcast.lane.b32.xlu1 %v9968_v54, 328  ;;  %v6108_v54 = vadd.f32 %v8318_v36, %v6107_v24  ;;  %v6135_v24 = vadd.f32 %v8335_v32, %v8334_v31 }
 0x127   :  { %743 = vbcast.lane.b32.xlu0 %v9971_v55, 256 }
 0x128   :  { %v6109_v15 = vadd.f32 %v8319_v48, %v6108_v54  ;;  %v6136_v54 = vadd.f32 %v8336_v62, %v6135_v24  ;;  %v6150_v24 = vadd.f32 %v8345_v33, %v8344_v3  ;;  %v6126_v62 = vadd.f32 %v8331_v13, %v6125_v51 }
 0x129   :  { %v8340_v33 = vsel %vm3731_vm8, 1.0, %v16541_v4 }
 0x12a   :  { %v10491_v1 = vpop.permute.xlu0 %485  ;;  %v10494_v17 = vpop.permute.xlu1 %470  ;;  %747 = vbcast.lane.b32.xlu1 %v9971_v55, 264  ;;  %v6110_v60 = vadd.f32 %v8320_v21, %v6109_v15  ;;  %v8355_v15 = vsel %vm3746_vm11, 1.0, %v16541_v4  ;;  %v6137_v32 = vadd.f32 %v8337_v44, %v6136_v54  ;;  %v8347_v54 = vsel %vm3738_vm5, 1.0, %v16541_v4 }
 0x12b   :  { %751 = vbcast.lane.b32.xlu0 %v9971_v55, 272  ;;  %vm3755_vm12 = vcmp.eq.s32.totalorder %v10491_v1, %v9821_v11  ;;  %v8354_v1 = vsel %vm3745_vm10, 1.0, %v16541_v4  ;;  %vm3739_vm10 = vcmp.eq.s32.totalorder %v10415_v34, %v9821_v11  ;;  %v10636_v44 = vadd.f32 %v8332_v6, %v6126_v62 }
 0x12c   :  { %v6111_v48 = vadd.f32 %v8321_v0, %v6110_v60  ;;  %v8364_v20 = vsel %vm3755_vm12, 1.0, %v16541_v4  ;;  %v6165_v35 = vadd.f32 %v8355_v15, %v8354_v1  ;;  %v6138_v0 = vadd.f32 %v8338_v18, %v6137_v32 }
 0x12d   :  { %vm3749_vm11 = vcmp.eq.s32.totalorder %v10449_v53, %v9821_v11  ;;  %v10653_v53 = vsel %vm3724_vm9, 1.0, %v16541_v4  ;;  %v8348_v1 = vsel %vm3739_vm10, 1.0, %v16541_v4  ;;  %vm3742_vm9 = vcmp.eq.s32.totalorder %v10435_v7, %v9821_v11 }
 0x12e   :  { %v10507_v46 = vpop.permute.xlu0 %493  ;;  %v10510_v12 = vpop.permute.xlu1 %478  ;;  %755 = vbcast.lane.b32.xlu1 %v9971_v55, 280  ;;  %v10623_v63 = vadd.f32 %v8322_v49, %v6111_v48  ;;  %v6139_v3 = vadd.f32 %v8339_v28, %v6138_v0  ;;  %vm3714_vm10 = vcmp.eq.s32.totalorder %v10351_v14, %v9821_v11  ;;  %v8360_v28 = vsel %vm3751_vm6, 1.0, %v16541_v4 }
 0x12f   :  { %759 = vbcast.lane.b32.xlu0 %v9971_v55, 288  ;;  %vm3757_vm3 = vcmp.eq.s32.totalorder %v10507_v46, %v9821_v11  ;;  %v8356_v46 = vsel %vm3747_vm2, 1.0, %v16541_v4  ;;  %vm3750_vm2 = vcmp.eq.s32.totalorder %v10482_v43, %v9821_v11  ;;  %v8349_v43 = vsel %vm3740_vm15, 1.0, %v16541_v4 }
 0x130   :  { %v8366_v29 = vsel %vm3757_vm3, 1.0, %v16541_v4  ;;  %v6166_v30 = vadd.f32 %v8356_v46, %v6165_v35  ;;  %vm3741_vm3 = vcmp.eq.s32.totalorder %v10421_v52, %v9821_v11  ;;  %v8359_v49 = vsel %vm3750_vm2, 1.0, %v16541_v4 }
 0x131   :  { %v8350_v37 = vsel %vm3741_vm3, 1.0, %v16541_v4  ;;  %vm3734_vm2 = vcmp.eq.s32.totalorder %v10411_v26, %v9821_v11  ;;  %vm3753_vm3 = vcmp.eq.s32.totalorder %v10479_v45, %v9821_v11  ;;  %vm3744_vm6 = vcmp.eq.s32.totalorder %v10441_v5, %v9821_v11 }
 0x132   :  { %v10523_v16 = vpop.permute.xlu0 %501  ;;  %v490_v36 = vpop.permute.xlu1 %489  ;;  %763 = vbcast.lane.b32.xlu1 %v9971_v55, 296  ;;  %v6167_v15 = vadd.f32 %v8357_v19, %v6166_v30 }
 0x133   :  { %767 = vbcast.lane.b32.xlu0 %v9971_v55, 304  ;;  %vm3756_vm13 = vcmp.eq.s32.totalorder %v490_v36, %v9821_v11  ;;  %vm3759_vm12 = vcmp.eq.s32.totalorder %v10523_v16, %v9821_v11  ;;  %v8358_v16 = vsel %vm3749_vm11, 1.0, %v16541_v4 }
 0x134   :  { %v8365_v21 = vsel %vm3756_vm13, 1.0, %v16541_v4 }
 0x135   :  { %v6180_v36 = vadd.f32 %v8365_v21, %v8364_v20  ;;  %v6140_v20 = vadd.f32 %v8340_v33, %v6139_v3  ;;  %v8368_v21 = vsel %vm3759_vm12, 1.0, %v16541_v4  ;;  %vm3733_vm12 = vcmp.eq.s32.totalorder %v10397_v61, %v9821_v11 }
 0x136   :  { %v10540_v25 = vpop.permute.xlu0 %509  ;;  %v498_v8 = vpop.permute.xlu1 %497  ;;  %771 = vbcast.lane.b32.xlu1 %v9971_v55, 312  ;;  %v8342_v7 = vsel %vm3733_vm12, 1.0, %v16541_v4 }
 0x137   :  { %775 = vbcast.lane.b32.xlu0 %v9971_v55, 320  ;;  %vm3758_vm7 = vcmp.eq.s32.totalorder %v498_v8, %v9821_v11  ;;  %v6181_v8 = vadd.f32 %v8366_v29, %v6180_v36 }
 0x138   :  { %v8367_v50 = vsel %vm3758_vm7, 1.0, %v16541_v4  ;;  %vm3761_vm7 = vcmp.eq.s32.totalorder %v10540_v25, %v9821_v11 }
 0x139   :  { %v6182_v32 = vadd.f32 %v8367_v50, %v6181_v8  ;;  %v8370_v8 = vsel %vm3761_vm7, 1.0, %v16541_v4  ;;  %vm3754_vm7 = vcmp.eq.s32.totalorder %v10510_v12, %v9821_v11  ;;  %v8323_v12 = vsel %vm3714_vm10, 1.0, %v16541_v4 }
 0x13a   :  { %v10569_v31 = vpop.permute.xlu0 %517  ;;  %v10575_v27 = vpop.permute.xlu1 %505  ;;  %779 = vbcast.lane.b32.xlu1 %v9971_v55, 328  ;;  %v8346_v55 = vsel %vm3737_vm1, 1.0, %v16541_v4 }
 0x13b   :  { %786 = vbcast.lane.b32.xlu0 %v9974_v56, 256  ;;  %v6151_v22 = vadd.f32 %v8346_v55, %v6150_v24  ;;  %vm3760_vm4 = vcmp.eq.s32.totalorder %v10575_v27, %v9821_v11  ;;  %v6168_v24 = vadd.f32 %v8358_v16, %v6167_v15  ;;  %v6183_v46 = vadd.f32 %v8368_v21, %v6182_v32 }
 0x13c   :  { %v8341_v27 = vsel %vm3732_vm14, 1.0, %v16541_v4 }
 0x13d   :  { %v6152_v51 = vadd.f32 %v8347_v54, %v6151_v22  ;;  %v6169_v29 = vadd.f32 %v8359_v49, %v6168_v24  ;;  %v6141_v19 = vadd.f32 %v8341_v27, %v6140_v20  ;;  %v8353_v49 = vsel %vm3744_vm6, 1.0, %v16541_v4 }
 0x13e   :  { %v529_v60 = vpop.permute.xlu0 %528  ;;  %v10610_v10 = vpop.permute.xlu1 %513  ;;  %790 = vbcast.lane.b32.xlu1 %v9974_v56, 264  ;;  %vm7405_vm6 = vcmask 1043459  }
 0x13f   :  { %794 = vbcast.lane.b32.xlu0 %v9974_v56, 272  ;;  %vm3765_vm13 = vcmp.eq.s32.totalorder %v529_v60, %v9821_v11  ;;  %v6153_v18 = vadd.f32 %v8348_v1, %v6152_v51  ;;  %v8369_v60 = vsel %vm3760_vm4, 1.0, %v16541_v4  ;;  %vm3762_vm14 = vcmp.eq.s32.totalorder %v10610_v10, %v9821_v11 }
 0x140   :  { %v8374_v13 = vsel %vm3765_vm13, 1.0, %v16541_v4  ;;  %v6184_v22 = vadd.f32 %v8369_v60, %v6183_v46  ;;  %vm3752_vm13 = vcmp.eq.s32.totalorder %v10494_v17, %v9821_v11  ;;  %v8351_v17 = vsel %vm3742_vm9, 1.0, %v16541_v4 }
 0x141   :  { %v6154_v0 = vadd.f32 %v8349_v43, %v6153_v18  ;;  %v6170_v33 = vadd.f32 %v8360_v28, %v6169_v29  ;;  %v8371_v16 = vsel %vm3762_vm14, 1.0, %v16541_v4  ;;  %vm3763_vm4 = vcmp.eq.s32.totalorder %v10569_v31, %v9821_v11 }
 0x142   :  { %v537_v48 = vpop.permute.xlu0 %536  ;;  %v10641_v23 = vpop.permute.xlu1 %521  ;;  %798 = vbcast.lane.b32.xlu1 %v9974_v56, 280  ;;  %v6185_v10 = vadd.f32 %v8370_v8, %v6184_v22  ;;  %v8343_v43 = vsel %vm3734_vm2, 1.0, %v16541_v4 }
 0x143   :  { %802 = vbcast.lane.b32.xlu0 %v9974_v56, 288  ;;  %vm3767_vm1 = vcmp.eq.s32.totalorder %v537_v48, %v9821_v11  ;;  %v6155_v3 = vadd.f32 %v8350_v37, %v6154_v0  ;;  %v6113_v0 = vadd.f32 %v8323_v12, %v10623_v63 }
 0x144   :  { %v8376_v55 = vsel %vm3767_vm1, 1.0, %v16541_v4  ;;  %vm3743_vm1 = vcmp.eq.s32.totalorder %v10427_v41, %v9821_v11  ;;  %v6186_v31 = vadd.f32 %v8371_v16, %v6185_v10  ;;  %v8372_v41 = vsel %vm3763_vm4, 1.0, %v16541_v4 }
 0x145   :  { %v8352_v20 = vsel %vm3743_vm1, 1.0, %v16541_v4  ;;  %v6114_v63 = vrot.slane %v6113_v0, 4 }
 0x146   :  { %v545_v47 = vpop.permute.xlu0 %544  ;;  %v533_v34 = vpop.permute.xlu1 %532  ;;  %806 = vbcast.lane.b32.xlu1 %v9974_v56, 296 }
 0x147   :  { %810 = vbcast.lane.b32.xlu0 %v9974_v56, 304  ;;  %vm3766_vm0 = vcmp.eq.s32.totalorder %v533_v34, %v9821_v11  ;;  %vm3769_vm5 = vcmp.eq.s32.totalorder %v545_v47, %v9821_v11  ;;  %v6156_v47 = vadd.f32 %v8351_v17, %v6155_v3  ;;  %v8362_v34 = vsel %vm3753_vm3, 1.0, %v16541_v4 }
 0x148   :  { %v8375_v35 = vsel %vm3766_vm0, 1.0, %v16541_v4  ;;  %v8378_v2 = vsel %vm3769_vm5, 1.0, %v16541_v4  ;;  %v6115_v16 = vadd.f32 %v6114_v63, %v6113_v0 }
 0x149   :  { %v6195_v52 = vadd.f32 %v8375_v35, %v8374_v13  ;;  %v6142_v13 = vadd.f32 %v8342_v7, %v6141_v19  ;;  %v6157_v35 = vadd.f32 %v8352_v20, %v6156_v47 }
 0x14a   :  { %v553_v36 = vpop.permute.xlu0 %552  ;;  %v541_v62 = vpop.permute.xlu1 %540  ;;  %814 = vbcast.lane.b32.xlu1 %v9974_v56, 312 }
 0x14b   :  { %818 = vbcast.lane.b32.xlu0 %v9974_v56, 320  ;;  %vm3768_vm8 = vcmp.eq.s32.totalorder %v541_v62, %v9821_v11  ;;  %v6196_v9 = vadd.f32 %v8376_v55, %v6195_v52  ;;  %vm3771_vm11 = vcmp.eq.s32.totalorder %v553_v36, %v9821_v11  ;;  %v8363_v52 = vsel %vm3754_vm7, 1.0, %v16541_v4 }
 0x14c   :  { %v8377_v6 = vsel %vm3768_vm8, 1.0, %v16541_v4  ;;  %v8380_v25 = vsel %vm3771_vm11, 1.0, %v16541_v4  ;;  %vm3764_vm8 = vcmp.eq.s32.totalorder %v10641_v23, %v9821_v11  ;;  %v6128_v23 = vadd.f32 %v10653_v53, %v10636_v44 }
 0x14d   :  { %v6197_v54 = vadd.f32 %v8377_v6, %v6196_v9  ;;  %v6187_v36 = vadd.f32 %v8372_v41, %v6186_v31  ;;  %v6143_v37 = vadd.f32 %v8343_v43, %v6142_v13  ;;  %v8373_v14 = vsel %vm3764_vm8, 1.0, %v16541_v4 }
 0x14e   :  { %v561_v30 = vpop.permute.xlu0 %560  ;;  %v549_v48 = vpop.permute.xlu1 %548  ;;  %822 = vbcast.lane.b32.xlu1 %v9974_v56, 328  ;;  %v8361_v56 = vsel %vm3752_vm13, 1.0, %v16541_v4  ;;  %v6158_v44 = vadd.f32 %v8353_v49, %v6157_v35  ;;  %v6129_v6 = vrot.slane %v6128_v23, 4  ;;  %v6116_v41 = vrot.slane %v6115_v16, 2 }
 0x14f   :  { %829 = vbcast.lane.b32.xlu0 %v9977_v57, 256  ;;  %vm3770_vm15 = vcmp.eq.s32.totalorder %v549_v48, %v9821_v11  ;;  %v6198_v50 = vadd.f32 %v8378_v2, %v6197_v54  ;;  %v6171_v45 = vadd.f32 %v8361_v56, %v6170_v33  ;;  %vm3773_vm5 = vcmp.eq.s32.totalorder %v561_v30, %v9821_v11 }
 0x150   :  { %v8379_v51 = vsel %vm3770_vm15, 1.0, %v16541_v4  ;;  %v8382_v26 = vsel %vm3773_vm5, 1.0, %v16541_v4  ;;  %v6188_v28 = vadd.f32 %v8373_v14, %v6187_v36  ;;  %v6144_v30 = vrot.slane %v6143_v37, 4 }
 0x151   :  { %v6199_v1 = vadd.f32 %v8379_v51, %v6198_v50  ;;  %v6172_v46 = vadd.f32 %v8362_v34, %v6171_v45  ;;  %v6159_v48 = vrot.slane %v6158_v44, 4  ;;  %v6117_v14 = vadd.f32 %v6116_v41, %v6115_v16  ;;  %v7305_v41 = vld [vmem:[%s16358_s2] sm:$0xff] }
 0x152   :  { %v572_v15 = vpop.permute.xlu0 %571  ;;  %v557_v32 = vpop.permute.xlu1 %556  ;;  %833 = vbcast.lane.b32.xlu1 %v9977_v57, 264  ;;  %v6189_v51 = vrot.slane %v6188_v28, 4  ;;  %vm7403_vm5 = vcmask 1042434   ;;  %vm7407_vm7 = vcmask 1044484   ;;  %vm16475_vm8 = vcmask 1045509  }
 0x153   :  { %837 = vbcast.lane.b32.xlu0 %v9977_v57, 272  ;;  %vm3772_vm0 = vcmp.eq.s32.totalorder %v557_v32, %v9821_v11  ;;  %v6200_v61 = vadd.f32 %v8380_v25, %v6199_v1  ;;  %vm3775_vm9 = vcmp.eq.s32.totalorder %v572_v15, %v9821_v11  ;;  %v6173_v9 = vadd.f32 %v8363_v52, %v6172_v46 }
 0x154   :  { %v8381_v21 = vsel %vm3772_vm0, 1.0, %v16541_v4  ;;  %v8384_v60 = vsel %vm3775_vm9, 1.0, %v16541_v4  ;;  %v6130_v25 = vadd.f32 %v6129_v6, %v6128_v23  ;;  %v6145_v1 = vadd.f32 %v6144_v30, %v6143_v37 }
 0x155   :  { %v6201_v24 = vadd.f32 %v8381_v21, %v6200_v61  ;;  %v6174_v50 = vrot.slane %v6173_v9, 4  ;;  %v6160_v32 = vadd.f32 %v6159_v48, %v6158_v44  ;;  %v6190_v13 = vadd.f32 %v6189_v51, %v6188_v28 }
 0x156   :  { %v580_v18 = vpop.permute.xlu0 %579  ;;  %v565_v55 = vpop.permute.xlu1 %564  ;;  %841 = vbcast.lane.b32.xlu1 %v9977_v57, 280  ;;  %v6131_v21 = vrot.slane %v6130_v25, 2  ;;  %vm7401_vm0 = vcmask 1041409   ;;  %vm16430_vm9 = vcmask 1046534  }
 0x157   :  { %845 = vbcast.lane.b32.xlu0 %v9977_v57, 288  ;;  %vm3774_vm11 = vcmp.eq.s32.totalorder %v565_v55, %v9821_v11  ;;  %vm3777_vm12 = vcmp.eq.s32.totalorder %v580_v18, %v9821_v11  ;;  %v6202_v62 = vadd.f32 %v8382_v26, %v6201_v24  ;;  %v6175_v61 = vadd.f32 %v6174_v50, %v6173_v9 }
 0x158   :  { %v8383_v53 = vsel %vm3774_vm11, 1.0, %v16541_v4  ;;  %v8386_v29 = vsel %vm3777_vm12, 1.0, %v16541_v4  ;;  %v6146_v18 = vrot.slane %v6145_v1, 2  ;;  %v6161_v24 = vrot.slane %v6160_v32, 2 }
 0x159   :  { %v6203_v19 = vadd.f32 %v8383_v53, %v6202_v62  ;;  %v6176_v35 = vrot.slane %v6175_v61, 2  ;;  %v6132_v49 = vadd.f32 %v6131_v21, %v6130_v25  ;;  %v6191_v46 = vrot.slane %v6190_v13, 2 }
 0x15a   :  { %v588_v27 = vpop.permute.xlu0 %587  ;;  %v576_v5 = vpop.permute.xlu1 %575  ;;  %849 = vbcast.lane.b32.xlu1 %v9977_v57, 296  ;;  %v6147_v36 = vadd.f32 %v6146_v18, %v6145_v1  ;;  %vm16429_vm11 = vcmask 1047559  }
 0x15b   :  { %853 = vbcast.lane.b32.xlu0 %v9977_v57, 304  ;;  %vm3776_vm10 = vcmp.eq.s32.totalorder %v576_v5, %v9821_v11  ;;  %vm3779_vm13 = vcmp.eq.s32.totalorder %v588_v27, %v9821_v11  ;;  %v6204_v15 = vrot.slane %v6203_v19, 4  ;;  %v6177_v5 = vadd.f32 %v6176_v35, %v6175_v61 }
 0x15c   :  { %v8385_v2 = vsel %vm3776_vm10, 1.0, %v16541_v4  ;;  %v8388_v17 = vsel %vm3779_vm13, 1.0, %v16541_v4  ;;  %v6133_v44 = vrot.slane %v6132_v49, 1  ;;  %v6192_v53 = vadd.f32 %v6191_v46, %v6190_v13 }
 0x15d   :  { %v6210_v22 = vadd.f32 %v8385_v2, %v8384_v60  ;;  %v6205_v43 = vadd.f32 %v6204_v15, %v6203_v19  ;;  %v6162_v60 = vadd.f32 %v6161_v24, %v6160_v32  ;;  %v6148_v2 = vrot.slane %v6147_v36, 1  ;;  %v7306_v24 = vld [vmem:[%s16358_s2 + $0x8] sm:$0xff] }
 0x15e   :  { %v596_v54 = vpop.permute.xlu0 %595  ;;  %v584_v8 = vpop.permute.xlu1 %583  ;;  %857 = vbcast.lane.b32.xlu1 %v9977_v57, 312  ;;  %v6178_v19 = vrot.slane %v6177_v5, 1  ;;  %v6193_v63 = vrot.slane %v6192_v53, 1  ;;  %v9469_v35 = vpack.c.bf16 %v7306_v24, %v7305_v41 }
 0x15f   :  { %861 = vbcast.lane.b32.xlu0 %v9977_v57, 320  ;;  %vm3778_vm14 = vcmp.eq.s32.totalorder %v584_v8, %v9821_v11  ;;  %v6211_v3 = vadd.f32 %v8386_v29, %v6210_v22  ;;  %vm3781_vm15 = vcmp.eq.s32.totalorder %v596_v54, %v9821_v11  ;;  %v6206_v27 = vrot.slane %v6205_v43, 2 }
 0x160   :  { %v8387_v33 = vsel %vm3778_vm14, 1.0, %v16541_v4  ;;  %v8390_v20 = vsel %vm3781_vm15, 1.0, %v16541_v4  ;;  %v6118_v22 = vrot.slane %v6117_v14, 1  ;;  %v6163_v54 = vrot.slane %v6162_v60, 1  ;;  %9470 = vmatprep.subr.bf16.mxu0 %v9469_v35 }
 0x161   :  { %v6212_v56 = vadd.f32 %v8387_v33, %v6211_v3  ;;  %v6207_v6 = vadd.f32 %v6206_v27, %v6205_v43  ;;  %v6134_v8 = vadd.f32 %v6133_v44, %v6132_v49  ;;  %v6149_v50 = vadd.f32 %v6148_v2, %v6147_v36  ;;  %9472 = vmatpush3.bf16.msra.mxu0 %v9469_v35  ;;  %v7308_v49 = vld [vmem:[%s16358_s2 + $0x18] sm:$0xff]  ;;  %v7309_v27 = vld [vmem:[%s16358_s2 + $0x20] sm:$0xff] }
 0x162   :  { %v604_v10 = vpop.permute.xlu0 %603  ;;  %v592_v7 = vpop.permute.xlu1 %591  ;;  %865 = vbcast.lane.b32.xlu1 %v9977_v57, 328  ;;  %v6119_v25 = vadd.f32 %v6118_v22, %v6117_v14  ;;  %v6164_v51 = vadd.f32 %v6163_v54, %v6162_v60  ;;  %v6194_v15 = vadd.f32 %v6193_v63, %v6192_v53  ;;  %v7313_v2 = vld [vmem:[%s16358_s2 + $0x40] sm:$0xff] }
 0x163   :  { %872 = vbcast.lane.b32.xlu0 %v9980_v58, 256  ;;  %vm3780_vm1 = vcmp.eq.s32.totalorder %v592_v7, %v9821_v11  ;;  %v6213_v47 = vadd.f32 %v8388_v17, %v6212_v56  ;;  %vm3783_vm2 = vcmp.eq.s32.totalorder %v604_v10, %v9821_v11  ;;  %v6208_v33 = vrot.slane %v6207_v6, 1 }
 0x164   :  { %v8389_v45 = vsel %vm3780_vm1, 1.0, %v16541_v4  ;;  %v8392_v26 = vsel %vm3783_vm2, 1.0, %v16541_v4  ;;  %v6179_v10 = vadd.f32 %v6178_v19, %v6177_v5  ;;  %v7402_v16 = vsel %vm7401_vm0, %v6134_v8, %v6119_v25  ;;  %v7311_v5 = vld [vmem:[%s16358_s2 + $0x30] sm:$0xff]  ;;  %v7316_v19 = vld [vmem:[%s16358_s2 + $0x58] sm:$0xff] }
 0x165   :  { %v6214_v34 = vadd.f32 %v8389_v45, %v6213_v47  ;;  %v6209_v47 = vadd.f32 %v6208_v33, %v6207_v6  ;;  %v7404_v61 = vsel %vm7403_vm5, %v6149_v50, %v7402_v16  ;;  %v7314_v6 = vld [vmem:[%s16358_s2 + $0x48] sm:$0xff]  ;;  %v7317_v50 = vld [vmem:[%s16358_s2 + $0x60] sm:$0xff] }
 0x166   :  { %v10804_v31 = vpop.permute.xlu0 %614  ;;  %v600_v57 = vpop.permute.xlu1 %599  ;;  %876 = vbcast.lane.b32.xlu1 %v9980_v58, 264  ;;  %v7406_v45 = vsel %vm7405_vm6, %v6164_v51, %v7404_v61  ;;  %v9485_v54 = vpack.c.bf16 %v7314_v6, %v7313_v2  ;;  %v7318_v33 = vld [vmem:[%s16358_s2 + $0x68] sm:$0xff] }
 0x167   :  { %880 = vbcast.lane.b32.xlu0 %v9980_v58, 272  ;;  %vm3782_vm3 = vcmp.eq.s32.totalorder %v600_v57, %v9821_v11  ;;  %v6215_v55 = vadd.f32 %v8390_v20, %v6214_v34  ;;  %v7408_v21 = vsel %vm7407_vm7, %v6179_v10, %v7406_v45  ;;  %v9493_v51 = vpack.c.bf16 %v7318_v33, %v7317_v50  ;;  %v7319_v10 = vld [vmem:[%s16358_s2 + $0x70] sm:$0xff] }
 0x168   :  { %v8391_v12 = vsel %vm3782_vm3, 1.0, %v16541_v4  ;;  %v7410_v18 = vsel %vm16475_vm8, %v6194_v15, %v7408_v21  ;;  %v7320_v15 = vld [vmem:[%s16358_s2 + $0x78] sm:$0xff]  ;;  %vm3785_vm12 = vcmp.eq.s32.totalorder %v10804_v31, %v9821_v11 }
 0x169   :  { %v6216_v23 = vadd.f32 %v8391_v12, %v6215_v55  ;;  %v7412_v57 = vsel %vm16430_vm9, %v6209_v47, %v7410_v18  ;;  %v7307_v12 = vld [vmem:[%s16358_s2 + $0x10] sm:$0xff]  ;;  %v9497_v16 = vpack.c.bf16 %v7320_v15, %v7319_v10 }
 0x16a   :  { %v10811_v52 = vpop.permute.xlu0 %622  ;;  %v608_v37 = vpop.permute.xlu1 %607  ;;  %884 = vbcast.lane.b32.xlu1 %v9980_v58, 280 }
 0x16b   :  { %888 = vbcast.lane.b32.xlu0 %v9980_v58, 288  ;;  %vm3784_vm4 = vcmp.eq.s32.totalorder %v608_v37, %v9821_v11  ;;  %v6217_v62 = vadd.f32 %v8392_v26, %v6216_v23  ;;  %v9473_v23 = vpack.c.bf16 %v7308_v49, %v7307_v12  ;;  %v7310_v37 = vld [vmem:[%s16358_s2 + $0x28] sm:$0xff]  ;;  %vm3787_vm13 = vcmp.eq.s32.totalorder %v10811_v52, %v9821_v11 }
 0x16c   :  { %v8393_v0 = vsel %vm3784_vm4, 1.0, %v16541_v4  ;;  %v9477_v60 = vpack.c.bf16 %v7310_v37, %v7309_v27 }
 0x16d   :  { %v6218_v9 = vadd.f32 %v8393_v0, %v6217_v62  ;;  %9474 = vmatprep.subr.bf16.mxu0 %v9473_v23  ;;  %v7312_v0 = vld [vmem:[%s16358_s2 + $0x38] sm:$0xff] }
 0x16e   :  { %v10817_v29 = vpop.permute.xlu0 %630  ;;  %v10819_v28 = vpop.permute.xlu1 %618  ;;  %892 = vbcast.lane.b32.xlu1 %v9980_v58, 296  ;;  %9476 = vmatpush3.bf16.msra.mxu0 %v9473_v23  ;;  %v9481_v53 = vpack.c.bf16 %v7312_v0, %v7311_v5  ;;  %v8396_v5 = vsel %vm3787_vm13, 1.0, %v16541_v4 }
 0x16f   :  { %896 = vbcast.lane.b32.xlu0 %v9980_v58, 304  ;;  %v6219_v30 = vrot.slane %v6218_v9, 4  ;;  %9478 = vmatprep.subr.bf16.mxu0 %v9477_v60  ;;  %vm3786_vm10 = vcmp.eq.s32.totalorder %v10819_v28, %v9821_v11  ;;  %vm3789_vm3 = vcmp.eq.s32.totalorder %v10817_v29, %v9821_v11 }
 0x170   :  { %v8395_v37 = vsel %vm3786_vm10, 1.0, %v16541_v4 }
 0x171   :  { %v6220_v48 = vadd.f32 %v6219_v30, %v6218_v9 }
 0x172   :  { %v10823_v3 = vpop.permute.xlu0 %638  ;;  %v10825_v17 = vpop.permute.xlu1 %626  ;;  %900 = vbcast.lane.b32.xlu1 %v9980_v58, 312  ;;  %9480 = vmatpush3.bf16.msra.mxu0 %v9477_v60 }
 0x173   :  { %904 = vbcast.lane.b32.xlu0 %v9980_v58, 320  ;;  %v6221_v56 = vrot.slane %v6220_v48, 2  ;;  %9482 = vmatprep.subr.bf16.mxu0 %v9481_v53  ;;  %vm3788_vm1 = vcmp.eq.s32.totalorder %v10825_v17, %v9821_v11 }
 0x175   :  { %v6222_v7 = vadd.f32 %v6221_v56, %v6220_v48 }
 0x176   :  { %v10829_v1 = vpop.permute.xlu0 %646  ;;  %v10832_v32 = vpop.permute.xlu1 %634  ;;  %908 = vbcast.lane.b32.xlu1 %v9980_v58, 328  ;;  %9484 = vmatpush3.bf16.msra.mxu0 %v9481_v53 }
 0x177   :  { %915 = vbcast.lane.b32.xlu0 %v9983_v59, 256  ;;  %v6223_v20 = vrot.slane %v6222_v7, 1  ;;  %9486 = vmatprep.subr.bf16.mxu0 %v9485_v54 }
 0x179   :  { %v6224_v34 = vadd.f32 %v6223_v20, %v6222_v7 }
 0x17a   :  { %v10839_v13 = vpop.permute.xlu0 %657  ;;  %v10842_v43 = vpop.permute.xlu1 %642  ;;  %919 = vbcast.lane.b32.xlu1 %v9983_v59, 264  ;;  %9488 = vmatpush3.bf16.msra.mxu0 %v9485_v54 }
 0x17b   :  { %923 = vbcast.lane.b32.xlu0 %v9983_v59, 272  ;;  %v7414_v58 = vsel %vm16429_vm11, %v6224_v34, %v7412_v57  ;;  %vm3795_vm14 = vcmp.eq.s32.totalorder %v10839_v13, %v9821_v11 }
 0x17c   :  { %9349 = vmatprep.mubr.f32.mxu0 %v7414_v58  ;;  %v8404_v0 = vsel %vm3795_vm14, 1.0, %v16541_v4 }
 0x17e   :  { %v10854_v55 = vpop.permute.xlu0 %665  ;;  %v10856_v26 = vpop.permute.xlu1 %650  ;;  %927 = vbcast.lane.b32.xlu1 %v9983_v59, 280 }
 0x17f   :  { %931 = vbcast.lane.b32.xlu0 %v9983_v59, 288  ;;  %vm3797_vm2 = vcmp.eq.s32.totalorder %v10854_v55, %v9821_v11  ;;  %v8398_v55 = vsel %vm3789_vm3, 1.0, %v16541_v4  ;;  %vm3792_vm3 = vcmp.eq.s32.totalorder %v10842_v43, %v9821_v11 }
 0x180   :  { %v8406_v54 = vsel %vm3797_vm2, 1.0, %v16541_v4 }
 0x182   :  { %v10866_v46 = vpop.permute.xlu0 %673  ;;  %v10868_v36 = vpop.permute.xlu1 %661  ;;  %935 = vbcast.lane.b32.xlu1 %v9983_v59, 296 }
 0x183   :  { %939 = vbcast.lane.b32.xlu0 %v9983_v59, 304  ;;  %vm3796_vm15 = vcmp.eq.s32.totalorder %v10868_v36, %v9821_v11  ;;  %v8397_v36 = vsel %vm3788_vm1, 1.0, %v16541_v4  ;;  %vm3799_vm10 = vcmp.eq.s32.totalorder %v10866_v46, %v9821_v11 }
 0x184   :  { %v8405_v53 = vsel %vm3796_vm15, 1.0, %v16541_v4  ;;  %vm3791_vm15 = vcmp.eq.s32.totalorder %v10823_v3, %v9821_v11  ;;  %v8408_v10 = vsel %vm3799_vm10, 1.0, %v16541_v4  ;;  %vm3793_vm10 = vcmp.eq.s32.totalorder %v10829_v1, %v9821_v11 }
 0x185   :  { %v6240_v17 = vadd.f32 %v8405_v53, %v8404_v0  ;;  %v8400_v3 = vsel %vm3791_vm15, 1.0, %v16541_v4  ;;  %v8401_v0 = vsel %vm3792_vm3, 1.0, %v16541_v4 }
 0x186   :  { %v10878_v14 = vpop.permute.xlu0 %681  ;;  %v10880_v62 = vpop.permute.xlu1 %669  ;;  %943 = vbcast.lane.b32.xlu1 %v9983_v59, 312 }
 0x187   :  { %947 = vbcast.lane.b32.xlu0 %v9983_v59, 320  ;;  %vm3798_vm4 = vcmp.eq.s32.totalorder %v10880_v62, %v9821_v11  ;;  %v6241_v29 = vadd.f32 %v8406_v54, %v6240_v17 }
 0x188   :  { %v8407_v50 = vsel %vm3798_vm4, 1.0, %v16541_v4  ;;  %vm3801_vm4 = vcmp.eq.s32.totalorder %v10878_v14, %v9821_v11 }
 0x189   :  { %v8410_v14 = vsel %vm3801_vm4, 1.0, %v16541_v4 }
 0x18a   :  { %v10890_v44 = vpop.permute.xlu0 %689  ;;  %v10892_v9 = vpop.permute.xlu1 %677  ;;  %951 = vbcast.lane.b32.xlu1 %v9983_v59, 328  ;;  %v7315_v59 = vld [vmem:[%s16358_s2 + $0x50] sm:$0xff]  ;;  %s9737_s2 = smov 96  }
 0x18b   :  { %958 = vbcast.lane.b32.xlu0 %v9912_v38, 256  ;;  %v9489_v63 = vpack.c.bf16 %v7316_v19, %v7315_v59  ;;  %vm3800_vm1 = vcmp.eq.s32.totalorder %v10892_v9, %v9821_v11 }
 0x18d   :  { %9490 = vmatprep.subr.bf16.mxu0 %v9489_v63 }
 0x18e   :  { %v10902_v22 = vpop.permute.xlu0 %700  ;;  %v10904_v30 = vpop.permute.xlu1 %685  ;;  %962 = vbcast.lane.b32.xlu1 %v9912_v38, 264  ;;  %9492 = vmatpush3.bf16.msra.mxu0 %v9489_v63 }
 0x18f   :  { %966 = vbcast.lane.b32.xlu0 %v9912_v38, 272  ;;  %9494 = vmatprep.subr.bf16.mxu0 %v9493_v51  ;;  %vm3805_vm13 = vcmp.eq.s32.totalorder %v10902_v22, %v9821_v11  ;;  %vm3802_vm4 = vcmp.eq.s32.totalorder %v10904_v30, %v9821_v11 }
 0x190   :  { %v8414_v22 = vsel %vm3805_vm13, 1.0, %v16541_v4 }
 0x192   :  { %v10914_v8 = vpop.permute.xlu0 %708  ;;  %v10916_v48 = vpop.permute.xlu1 %693  ;;  %970 = vbcast.lane.b32.xlu1 %v9912_v38, 280  ;;  %9496 = vmatpush3.bf16.msra.mxu0 %v9493_v51 }
 0x193   :  { %974 = vbcast.lane.b32.xlu0 %v9912_v38, 288  ;;  %9498 = vmatprep.subr.bf16.mxu0 %v9497_v16  ;;  %vm3807_vm2 = vcmp.eq.s32.totalorder %v10914_v8, %v9821_v11 }
 0x194   :  { %v8416_v8 = vsel %vm3807_vm2, 1.0, %v16541_v4 }
 0x196   :  { %v10926_v25 = vpop.permute.xlu0 %716  ;;  %v10928_v56 = vpop.permute.xlu1 %704  ;;  %978 = vbcast.lane.b32.xlu1 %v9912_v38, 296  ;;  %9500 = vmatpush3.bf16.msra.mxu0 %v9497_v16 }
 0x197   :  { %982 = vbcast.lane.b32.xlu0 %v9912_v38, 304  ;;  %vm3806_vm14 = vcmp.eq.s32.totalorder %v10928_v56, %v9821_v11  ;;  %vm3809_vm11 = vcmp.eq.s32.totalorder %v10926_v25, %v9821_v11  ;;  %v8402_v25 = vsel %vm3793_vm10, 1.0, %v16541_v4 }
 0x198   :  { %v8415_v56 = vsel %vm3806_vm14, 1.0, %v16541_v4 }
 0x19a   :  { %v10938_v7 = vpop.permute.xlu0 %724  ;;  %v10940_v47 = vpop.permute.xlu1 %712  ;;  %986 = vbcast.lane.b32.xlu1 %v9912_v38, 312 }
 0x19b   :  { %990 = vbcast.lane.b32.xlu0 %v9912_v38, 320  ;;  %vm3811_vm10 = vcmp.eq.s32.totalorder %v10938_v7, %v9821_v11 }
 0x19e   :  { %v10944_v61 = vpop.permute.xlu0 %732  ;;  %v10946_v20 = vpop.permute.xlu1 %720  ;;  %994 = vbcast.lane.b32.xlu1 %v9912_v38, 328 }
 0x19f   :  { %1001 = vbcast.lane.b32.xlu0 %v9915_v39, 256 }
 0x1a2   :  { %v10950_v45 = vpop.permute.xlu0 %743  ;;  %v10952_v21 = vpop.permute.xlu1 %728  ;;  %1005 = vbcast.lane.b32.xlu1 %v9915_v39, 264 }
 0x1a3   :  { %1009 = vbcast.lane.b32.xlu0 %v9915_v39, 272  ;;  %vm3815_vm13 = vcmp.eq.s32.totalorder %v10950_v45, %v9821_v11 }
 0x1a6   :  { %v10956_v34 = vpop.permute.xlu0 %751  ;;  %v10958_v18 = vpop.permute.xlu1 %736  ;;  %1013 = vbcast.lane.b32.xlu1 %v9915_v39, 280 }
 0x1a7   :  { %1017 = vbcast.lane.b32.xlu0 %v9915_v39, 288 }
 0x1aa   :  { %v10962_v57 = vpop.permute.xlu0 %759  ;;  %v10964_v58 = vpop.permute.xlu1 %747  ;;  %1021 = vbcast.lane.b32.xlu1 %v9915_v39, 296 }
 0x1ab   :  { %1025 = vbcast.lane.b32.xlu0 %v9915_v39, 304  ;;  %vm3816_vm14 = vcmp.eq.s32.totalorder %v10964_v58, %v9821_v11 }
 0x1ae   :  { %v10968_v38 = vpop.permute.xlu0 %767  ;;  %v10970_v41 = vpop.permute.xlu1 %755  ;;  %1029 = vbcast.lane.b32.xlu1 %v9915_v39, 312 }
 0x1af   :  { %1033 = vbcast.lane.b32.xlu0 %v9915_v39, 320 }
 0x1b2   :  { %v10974_v24 = vpop.permute.xlu0 %775  ;;  %v10976_v35 = vpop.permute.xlu1 %763  ;;  %1037 = vbcast.lane.b32.xlu1 %v9915_v39, 328  ;;  %v8394_v39 = vsel %vm3785_vm12, 1.0, %v16541_v4  ;;  %vm3790_vm12 = vcmp.eq.s32.totalorder %v10832_v32, %v9821_v11  ;;  %v6242_v32 = vadd.f32 %v8407_v50, %v6241_v29 }
 0x1b3   :  { %1044 = vbcast.lane.b32.xlu0 %v9918_v40, 256  ;;  %v6225_v28 = vadd.f32 %v8395_v37, %v8394_v39  ;;  %v8399_v62 = vsel %vm3790_vm12, 1.0, %v16541_v4  ;;  %v8409_v37 = vsel %vm3800_vm1, 1.0, %v16541_v4  ;;  %vm3808_vm12 = vcmp.eq.s32.totalorder %v10940_v47, %v9821_v11 }
 0x1b4   :  { %v6243_v16 = vadd.f32 %v8408_v10, %v6242_v32  ;;  %v8417_v17 = vsel %vm3808_vm12, 1.0, %v16541_v4  ;;  %vm3817_vm12 = vcmp.eq.s32.totalorder %v10956_v34, %v9821_v11  ;;  %v8418_v32 = vsel %vm3809_vm11, 1.0, %v16541_v4 }
 0x1b5   :  { %v6226_v13 = vadd.f32 %v8396_v5, %v6225_v28  ;;  %v6255_v28 = vadd.f32 %v8415_v56, %v8414_v22  ;;  %vm3818_vm11 = vcmp.eq.s32.totalorder %v10970_v41, %v9821_v11 }
 0x1b6   :  { %v10980_v12 = vpop.permute.xlu0 %786  ;;  %v10982_v49 = vpop.permute.xlu1 %771  ;;  %1048 = vbcast.lane.b32.xlu1 %v9918_v40, 264  ;;  %v6244_v43 = vadd.f32 %v8409_v37, %v6243_v16 }
 0x1b7   :  { %1052 = vbcast.lane.b32.xlu0 %v9918_v40, 272  ;;  %v6227_v19 = vadd.f32 %v8397_v36, %v6226_v13  ;;  %v6256_v13 = vadd.f32 %v8416_v8, %v6255_v28  ;;  %vm3825_vm15 = vcmp.eq.s32.totalorder %v10980_v12, %v9821_v11  ;;  %v8424_v12 = vsel %vm3815_vm13, 1.0, %v16541_v4 }
 0x1b8   :  { %v6245_v54 = vadd.f32 %v8410_v14, %v6244_v43  ;;  %v8427_v28 = vsel %vm3818_vm11, 1.0, %v16541_v4  ;;  %v8420_v43 = vsel %vm3811_vm10, 1.0, %v16541_v4 }
 0x1ba   :  { %v10990_v23 = vpop.permute.xlu0 %794  ;;  %v10992_v27 = vpop.permute.xlu1 %779  ;;  %1056 = vbcast.lane.b32.xlu1 %v9918_v40, 280 }
 0x1bb   :  { %1060 = vbcast.lane.b32.xlu0 %v9918_v40, 288  ;;  %vm3827_vm9 = vcmp.eq.s32.totalorder %v10990_v23, %v9821_v11 }
 0x1be   :  { %v11000_v60 = vpop.permute.xlu0 %802  ;;  %v11002_v31 = vpop.permute.xlu1 %790  ;;  %1064 = vbcast.lane.b32.xlu1 %v9918_v40, 296 }
 0x1bf   :  { %1068 = vbcast.lane.b32.xlu0 %v9918_v40, 304  ;;  %vm3826_vm1 = vcmp.eq.s32.totalorder %v11002_v31, %v9821_v11  ;;  %v8425_v31 = vsel %vm3816_vm14, 1.0, %v16541_v4  ;;  %vm3803_vm14 = vcmp.eq.s32.totalorder %v10890_v44, %v9821_v11 }
 0x1c0   :  { %v6270_v10 = vadd.f32 %v8425_v31, %v8424_v12  ;;  %v8412_v1 = vsel %vm3803_vm14, 1.0, %v16541_v4  ;;  %vm3812_vm14 = vcmp.eq.s32.totalorder %v10952_v21, %v9821_v11 }
 0x1c2   :  { %v11013_v52 = vpop.permute.xlu0 %810  ;;  %v11017_v2 = vpop.permute.xlu1 %798  ;;  %1072 = vbcast.lane.b32.xlu1 %v9918_v40, 312 }
 0x1c3   :  { %1076 = vbcast.lane.b32.xlu0 %v9918_v40, 320 }
 0x1c6   :  { %v11026_v6 = vpop.permute.xlu0 %818  ;;  %v11029_v59 = vpop.permute.xlu1 %806  ;;  %1080 = vbcast.lane.b32.xlu1 %v9918_v40, 328  ;;  %v6228_v40 = vadd.f32 %v8398_v55, %v6227_v19  ;;  %v8434_v19 = vsel %vm3825_vm15, 1.0, %v16541_v4  ;;  %v8435_v55 = vsel %vm3826_vm1, 1.0, %v16541_v4  ;;  %vm3810_vm15 = vcmp.eq.s32.totalorder %v10946_v20, %v9821_v11 }
 0x1c7   :  { %1087 = vbcast.lane.b32.xlu0 %v9929_v42, 256  ;;  %v6285_v30 = vadd.f32 %v8435_v55, %v8434_v19  ;;  %vm3828_vm1 = vcmp.eq.s32.totalorder %v11017_v2, %v9821_v11  ;;  %v8419_v23 = vsel %vm3810_vm15, 1.0, %v16541_v4  ;;  %vm3820_vm15 = vcmp.eq.s32.totalorder %v10976_v35, %v9821_v11 }
 0x1c8   :  { %v6229_v46 = vadd.f32 %v8399_v62, %v6228_v40  ;;  %v16594_v40 = vld [vmem:[#allocation5_spill] sm:$0xff]  ;;  %v8411_v62 = vsel %vm3802_vm4, 1.0, %v16541_v4  ;;  %v8437_v20 = vsel %vm3828_vm1, 1.0, %v16541_v4  ;;  %vm3829_vm4 = vcmp.eq.s32.totalorder %v11000_v60, %v9821_v11 }
 0x1c9   :  { %v6246_v56 = vadd.f32 %v8411_v62, %v6245_v54  ;;  %vm3830_vm1 = vcmp.eq.s32.totalorder %v11029_v59, %v9821_v11  ;;  %v8429_v59 = vsel %vm3820_vm15, 1.0, %v16541_v4  ;;  %vm3794_vm15 = vcmp.eq.s32.totalorder %v10856_v26, %v9821_v11 }
 0x1ca   :  { %v11038_v63 = vpop.permute.xlu0 %829  ;;  %v11041_v33 = vpop.permute.xlu1 %814  ;;  %1091 = vbcast.lane.b32.xlu1 %v9929_v42, 264  ;;  %v6230_v9 = vadd.f32 %v8400_v3, %v6229_v46 }
 0x1cb   :  { %1095 = vbcast.lane.b32.xlu0 %v9929_v42, 272  ;;  %vm3835_vm2 = vcmp.eq.s32.totalorder %v11038_v63, %v9821_v11  ;;  %v6257_v63 = vadd.f32 %v8417_v17, %v6256_v13  ;;  %v11183_v8 = vadd.f32 %v8412_v1, %v6246_v56 }
 0x1cc   :  { %v6231_v36 = vadd.f32 %v8401_v0, %v6230_v9  ;;  %v8444_v45 = vsel %vm3835_vm2, 1.0, %v16541_v4  ;;  %vm3804_vm2 = vcmp.eq.s32.totalorder %v10916_v48, %v9821_v11 }
 0x1cd   :  { %v6258_v3 = vadd.f32 %v8418_v32, %v6257_v63  ;;  %v11200_v60 = vsel %vm3804_vm2, 1.0, %v16541_v4 }
 0x1ce   :  { %v11054_v51 = vpop.permute.xlu0 %837  ;;  %v11057_v15 = vpop.permute.xlu1 %822  ;;  %1099 = vbcast.lane.b32.xlu1 %v9929_v42, 280  ;;  %v11170_v2 = vadd.f32 %v8402_v25, %v6231_v36 }
 0x1cf   :  { %1103 = vbcast.lane.b32.xlu0 %v9929_v42, 288  ;;  %vm3837_vm13 = vcmp.eq.s32.totalorder %v11054_v51, %v9821_v11  ;;  %v8436_v51 = vsel %vm3827_vm9, 1.0, %v16541_v4  ;;  %v6259_v0 = vadd.f32 %v8419_v23, %v6258_v3  ;;  %v16595_v23 = vld [vmem:[#allocation6_spill] sm:$0xff] }
 0x1d0   :  { %v8446_v34 = vsel %vm3837_vm13, 1.0, %v16541_v4  ;;  %v6286_v44 = vadd.f32 %v8436_v51, %v6285_v30 }
 0x1d1   :  { %v6260_v17 = vadd.f32 %v8420_v43, %v6259_v0 }
 0x1d2   :  { %v11070_v39 = vpop.permute.xlu0 %845  ;;  %v834_v5 = vpop.permute.xlu1 %833  ;;  %1107 = vbcast.lane.b32.xlu1 %v9929_v42, 296 }
 0x1d3   :  { %1111 = vbcast.lane.b32.xlu0 %v9929_v42, 304  ;;  %vm3836_vm3 = vcmp.eq.s32.totalorder %v834_v5, %v9821_v11 }
 0x1d4   :  { %v8445_v50 = vsel %vm3836_vm3, 1.0, %v16541_v4  ;;  %vm3819_vm3 = vcmp.eq.s32.totalorder %v10962_v57, %v9821_v11 }
 0x1d5   :  { %v6300_v46 = vadd.f32 %v8445_v50, %v8444_v45  ;;  %v8428_v13 = vsel %vm3819_vm3, 1.0, %v16541_v4  ;;  %v8439_v45 = vsel %vm3830_vm1, 1.0, %v16541_v4  ;;  %vm3813_vm1 = vcmp.eq.s32.totalorder %v10944_v61, %v9821_v11 }
 0x1d6   :  { %v11087_v53 = vpop.permute.xlu0 %853  ;;  %v842_v47 = vpop.permute.xlu1 %841  ;;  %1115 = vbcast.lane.b32.xlu1 %v9929_v42, 312 }
 0x1d7   :  { %1119 = vbcast.lane.b32.xlu0 %v9929_v42, 320  ;;  %vm3838_vm9 = vcmp.eq.s32.totalorder %v842_v47, %v9821_v11  ;;  %v6301_v5 = vadd.f32 %v8446_v34, %v6300_v46  ;;  %v6287_v47 = vadd.f32 %v8437_v20, %v6286_v44 }
 0x1d8   :  { %v8447_v7 = vsel %vm3838_vm9, 1.0, %v16541_v4  ;;  %vm3821_vm9 = vcmp.eq.s32.totalorder %v10968_v38, %v9821_v11 }
 0x1d9   :  { %v6302_v36 = vadd.f32 %v8447_v7, %v6301_v5  ;;  %v8430_v35 = vsel %vm3821_vm9, 1.0, %v16541_v4  ;;  %vm3832_vm9 = vcmp.eq.s32.totalorder %v11041_v33, %v9821_v11 }
 0x1da   :  { %v11116_v29 = vpop.permute.xlu0 %861  ;;  %v11122_v58 = vpop.permute.xlu1 %849  ;;  %1123 = vbcast.lane.b32.xlu1 %v9929_v42, 328  ;;  %v8426_v42 = vsel %vm3817_vm12, 1.0, %v16541_v4  ;;  %vm3839_vm12 = vcmp.eq.s32.totalorder %v11070_v39, %v9821_v11  ;;  %v8438_v39 = vsel %vm3829_vm4, 1.0, %v16541_v4  ;;  %vm3831_vm4 = vcmp.eq.s32.totalorder %v11013_v52, %v9821_v11 }
 0x1db   :  { %1130 = vbcast.lane.b32.xlu0 %v16594_v40, 256  ;;  %v6271_v37 = vadd.f32 %v8426_v42, %v6270_v10  ;;  %v8448_v12 = vsel %vm3839_vm12, 1.0, %v16541_v4  ;;  %vm3840_vm10 = vcmp.eq.s32.totalorder %v11122_v58, %v9821_v11  ;;  %v6288_v19 = vadd.f32 %v8438_v39, %v6287_v47 }
 0x1dc   :  { %v6303_v50 = vadd.f32 %v8448_v12, %v6302_v36  ;;  %v8421_v58 = vsel %vm3812_vm14, 1.0, %v16541_v4  ;;  %v8449_v32 = vsel %vm3840_vm10, 1.0, %v16541_v4  ;;  %vm3841_vm12 = vcmp.eq.s32.totalorder %v11087_v53, %v9821_v11 }
 0x1dd   :  { %v6272_v14 = vadd.f32 %v8427_v28, %v6271_v37  ;;  %vm3822_vm14 = vcmp.eq.s32.totalorder %v10982_v49, %v9821_v11  ;;  %v6289_v30 = vadd.f32 %v8439_v45, %v6288_v19  ;;  %v8440_v51 = vsel %vm3831_vm4, 1.0, %v16541_v4 }
 0x1de   :  { %v873_v22 = vpop.permute.xlu0 %872  ;;  %v11157_v16 = vpop.permute.xlu1 %857  ;;  %1134 = vbcast.lane.b32.xlu1 %v16594_v40, 264  ;;  %v6304_v46 = vadd.f32 %v8449_v32, %v6303_v50  ;;  %v6261_v3 = vadd.f32 %v8421_v58, %v6260_v17  ;;  %v8450_v34 = vsel %vm3841_vm12, 1.0, %v16541_v4  ;;  %v8431_v33 = vsel %vm3822_vm14, 1.0, %v16541_v4 }
 0x1df   :  { %1138 = vbcast.lane.b32.xlu0 %v16594_v40, 272  ;;  %vm3845_vm13 = vcmp.eq.s32.totalorder %v873_v22, %v9821_v11  ;;  %v6273_v54 = vadd.f32 %v8428_v13, %v6272_v14  ;;  %vm3842_vm10 = vcmp.eq.s32.totalorder %v11157_v16, %v9821_v11  ;;  %v6290_v44 = vadd.f32 %v8440_v51, %v6289_v30 }
 0x1e0   :  { %v8454_v31 = vsel %vm3845_vm13, 1.0, %v16541_v4  ;;  %v6305_v16 = vadd.f32 %v8450_v34, %v6304_v46  ;;  %v8422_v49 = vsel %vm3813_vm1, 1.0, %v16541_v4  ;;  %vm3814_vm4 = vcmp.eq.s32.totalorder %v10958_v18, %v9821_v11 }
 0x1e1   :  { %v6274_v42 = vadd.f32 %v8429_v59, %v6273_v54  ;;  %vm3833_vm12 = vcmp.eq.s32.totalorder %v11026_v6, %v9821_v11  ;;  %v8451_v0 = vsel %vm3842_vm10, 1.0, %v16541_v4  ;;  %v6262_v47 = vadd.f32 %v8422_v49, %v6261_v3 }
 0x1e2   :  { %v881_v9 = vpop.permute.xlu0 %880  ;;  %v11188_v41 = vpop.permute.xlu1 %865  ;;  %1142 = vbcast.lane.b32.xlu1 %v16594_v40, 280  ;;  %vm3824_vm1 = vcmp.eq.s32.totalorder %v10992_v27, %v9821_v11  ;;  %v8442_v39 = vsel %vm3833_vm12, 1.0, %v16541_v4 }
 0x1e3   :  { %1146 = vbcast.lane.b32.xlu0 %v16594_v40, 288  ;;  %vm3847_vm11 = vcmp.eq.s32.totalorder %v881_v9, %v9821_v11  ;;  %v6275_v37 = vadd.f32 %v8430_v35, %v6274_v42  ;;  %vm3844_vm10 = vcmp.eq.s32.totalorder %v11188_v41, %v9821_v11  ;;  %v6248_v41 = vadd.f32 %v11200_v60, %v11183_v8 }
 0x1e4   :  { %v8456_v55 = vsel %vm3847_vm11, 1.0, %v16541_v4  ;;  %v8453_v26 = vsel %vm3844_vm10, 1.0, %v16541_v4 }
 0x1e5   :  { %v6276_v43 = vadd.f32 %v8431_v33, %v6275_v37  ;;  %v6249_v32 = vrot.slane %v6248_v41, 4 }
 0x1e6   :  { %v889_v48 = vpop.permute.xlu0 %888  ;;  %v877_v57 = vpop.permute.xlu1 %876  ;;  %1150 = vbcast.lane.b32.xlu1 %v16594_v40, 296 }
 0x1e7   :  { %1154 = vbcast.lane.b32.xlu0 %v16594_v40, 304  ;;  %vm3846_vm2 = vcmp.eq.s32.totalorder %v877_v57, %v9821_v11  ;;  %vm3849_vm3 = vcmp.eq.s32.totalorder %v889_v48, %v9821_v11  ;;  %v8423_v48 = vsel %vm3814_vm4, 1.0, %v16541_v4  ;;  %v8433_v57 = vsel %vm3824_vm1, 1.0, %v16541_v4 }
 0x1e8   :  { %v8455_v63 = vsel %vm3846_vm2, 1.0, %v16541_v4  ;;  %v8458_v52 = vsel %vm3849_vm3, 1.0, %v16541_v4  ;;  %vm3823_vm3 = vcmp.eq.s32.totalorder %v10974_v24, %v9821_v11  ;;  %v6250_v34 = vadd.f32 %v6249_v32, %v6248_v41 }
 0x1e9   :  { %v6315_v38 = vadd.f32 %v8455_v63, %v8454_v31  ;;  %v8432_v14 = vsel %vm3823_vm3, 1.0, %v16541_v4  ;;  %v6263_v63 = vadd.f32 %v8423_v48, %v6262_v47 }
 0x1ea   :  { %v897_v62 = vpop.permute.xlu0 %896  ;;  %v885_v10 = vpop.permute.xlu1 %884  ;;  %1158 = vbcast.lane.b32.xlu1 %v16594_v40, 312  ;;  %v6277_v31 = vadd.f32 %v8432_v14, %v6276_v43 }
 0x1eb   :  { %1162 = vbcast.lane.b32.xlu0 %v16594_v40, 320  ;;  %vm3848_vm13 = vcmp.eq.s32.totalorder %v885_v10, %v9821_v11  ;;  %v6316_v21 = vadd.f32 %v8456_v55, %v6315_v38  ;;  %vm3851_vm11 = vcmp.eq.s32.totalorder %v897_v62, %v9821_v11  ;;  %v6264_v30 = vrot.slane %v6263_v63, 4 }
 0x1ec   :  { %v8457_v25 = vsel %vm3848_vm13, 1.0, %v16541_v4  ;;  %v8460_v53 = vsel %vm3851_vm11, 1.0, %v16541_v4  ;;  %vm3843_vm13 = vcmp.eq.s32.totalorder %v11116_v29, %v9821_v11  ;;  %v6306_v29 = vadd.f32 %v8451_v0, %v6305_v16 }
 0x1ed   :  { %v6317_v22 = vadd.f32 %v8457_v25, %v6316_v21  ;;  %v8452_v24 = vsel %vm3843_vm13, 1.0, %v16541_v4  ;;  %v6278_v8 = vadd.f32 %v8433_v57, %v6277_v31  ;;  %v6265_v33 = vadd.f32 %v6264_v30, %v6263_v63 }
 0x1ee   :  { %v905_v56 = vpop.permute.xlu0 %904  ;;  %v893_v1 = vpop.permute.xlu1 %892  ;;  %1166 = vbcast.lane.b32.xlu1 %v16594_v40, 328  ;;  %v8441_v40 = vsel %vm3832_vm9, 1.0, %v16541_v4  ;;  %vm3834_vm9 = vcmp.eq.s32.totalorder %v11057_v15, %v9821_v11  ;;  %v8403_v15 = vsel %vm3794_vm15, 1.0, %v16541_v4  ;;  %v6307_v19 = vadd.f32 %v8452_v24, %v6306_v29 }
 0x1ef   :  { %1173 = vbcast.lane.b32.xlu0 %v16595_v23, 256  ;;  %vm3850_vm2 = vcmp.eq.s32.totalorder %v893_v1, %v9821_v11  ;;  %v6318_v28 = vadd.f32 %v8458_v52, %v6317_v22  ;;  %v6291_v6 = vadd.f32 %v8441_v40, %v6290_v44  ;;  %vm3853_vm11 = vcmp.eq.s32.totalorder %v905_v56, %v9821_v11 }
 0x1f0   :  { %v8459_v20 = vsel %vm3850_vm2, 1.0, %v16541_v4  ;;  %v8462_v18 = vsel %vm3853_vm11, 1.0, %v16541_v4  ;;  %v8443_v59 = vsel %vm3834_vm9, 1.0, %v16541_v4  ;;  %v6233_v38 = vadd.f32 %v8403_v15, %v11170_v2 }
 0x1f1   :  { %v6319_v5 = vadd.f32 %v8459_v20, %v6318_v28  ;;  %v6292_v54 = vadd.f32 %v8442_v39, %v6291_v6  ;;  %v6308_v10 = vadd.f32 %v8453_v26, %v6307_v19  ;;  %v6279_v51 = vrot.slane %v6278_v8, 4  ;;  %v16596_v20 = vld [vmem:[#allocation7_spill] sm:$0xff] }
 0x1f2   :  { %v916_v9 = vpop.permute.xlu0 %915  ;;  %v901_v7 = vpop.permute.xlu1 %900  ;;  %1177 = vbcast.lane.b32.xlu1 %v16595_v23, 264  ;;  %v6234_v2 = vrot.slane %v6233_v38, 4  ;;  %v6266_v6 = vrot.slane %v6265_v33, 2 }
 0x1f3   :  { %1181 = vbcast.lane.b32.xlu0 %v16595_v23, 272  ;;  %vm3852_vm14 = vcmp.eq.s32.totalorder %v901_v7, %v9821_v11  ;;  %v6320_v61 = vadd.f32 %v8460_v53, %v6319_v5  ;;  %vm3855_vm2 = vcmp.eq.s32.totalorder %v916_v9, %v9821_v11  ;;  %v6293_v62 = vadd.f32 %v8443_v59, %v6292_v54 }
 0x1f4   :  { %v8461_v13 = vsel %vm3852_vm14, 1.0, %v16541_v4  ;;  %v8464_v45 = vsel %vm3855_vm2, 1.0, %v16541_v4  ;;  %v6309_v1 = vrot.slane %v6308_v10, 4  ;;  %v6235_v40 = vadd.f32 %v6234_v2, %v6233_v38 }
 0x1f5   :  { %v6321_v17 = vadd.f32 %v8461_v13, %v6320_v61  ;;  %v6294_v22 = vrot.slane %v6293_v62, 4  ;;  %v6280_v16 = vadd.f32 %v6279_v51, %v6278_v8  ;;  %v6251_v7 = vrot.slane %v6250_v34, 2 }
 0x1f6   :  { %v924_v36 = vpop.permute.xlu0 %923  ;;  %v909_v12 = vpop.permute.xlu1 %908  ;;  %1185 = vbcast.lane.b32.xlu1 %v16595_v23, 280  ;;  %v6310_v43 = vadd.f32 %v6309_v1, %v6308_v10  ;;  %v6236_v47 = vrot.slane %v6235_v40, 2  ;;  %v6267_v15 = vadd.f32 %v6266_v6, %v6265_v33  ;;  %v16597_v33 = vld [vmem:[#allocation8_spill] sm:$0xff]  ;;  %vm16598_vm2 = vcmask 1046534  }
 0x1f7   :  { %1189 = vbcast.lane.b32.xlu0 %v16595_v23, 288  ;;  %vm3854_vm3 = vcmp.eq.s32.totalorder %v909_v12, %v9821_v11  ;;  %vm3857_vm4 = vcmp.eq.s32.totalorder %v924_v36, %v9821_v11  ;;  %v6322_v50 = vadd.f32 %v8462_v18, %v6321_v17  ;;  %v6295_v9 = vadd.f32 %v6294_v22, %v6293_v62 }
 0x1f8   :  { %v8463_v60 = vsel %vm3854_vm3, 1.0, %v16541_v4  ;;  %v8466_v58 = vsel %vm3857_vm4, 1.0, %v16541_v4  ;;  %v6281_v39 = vrot.slane %v6280_v16, 2  ;;  %v6252_v17 = vadd.f32 %v6251_v7, %v6250_v34 }
 0x1f9   :  { %v6323_v52 = vadd.f32 %v8463_v60, %v6322_v50  ;;  %v6296_v36 = vrot.slane %v6295_v9, 2  ;;  %v6311_v12 = vrot.slane %v6310_v43, 2  ;;  %v6237_v41 = vadd.f32 %v6236_v47, %v6235_v40 }
 0x1fa   :  { %v932_v55 = vpop.permute.xlu0 %931  ;;  %v920_v27 = vpop.permute.xlu1 %919  ;;  %1193 = vbcast.lane.b32.xlu1 %v16595_v23, 296  ;;  %v6282_v59 = vadd.f32 %v6281_v39, %v6280_v16  ;;  %v6253_v26 = vrot.slane %v6252_v17, 1  ;;  %v6268_v38 = vrot.slane %v6267_v15, 1  ;;  %vm16599_vm3 = vcmask 1047559  }
 0x1fb   :  { %1197 = vbcast.lane.b32.xlu0 %v16595_v23, 304  ;;  %vm3856_vm15 = vcmp.eq.s32.totalorder %v920_v27, %v9821_v11  ;;  %vm3859_vm12 = vcmp.eq.s32.totalorder %v932_v55, %v9821_v11  ;;  %v6324_v44 = vrot.slane %v6323_v52, 4  ;;  %v6297_v55 = vadd.f32 %v6296_v36, %v6295_v9 }
 0x1fc   :  { %v8465_v35 = vsel %vm3856_vm15, 1.0, %v16541_v4  ;;  %v8468_v56 = vsel %vm3859_vm12, 1.0, %v16541_v4  ;;  %v6238_v62 = vrot.slane %v6237_v41, 1  ;;  %v6254_v10 = vadd.f32 %v6253_v26, %v6252_v17 }
 0x1fd   :  { %v6330_v42 = vadd.f32 %v8465_v35, %v8464_v45  ;;  %v6325_v13 = vadd.f32 %v6324_v44, %v6323_v52  ;;  %v6312_v45 = vadd.f32 %v6311_v12, %v6310_v43  ;;  %v6298_v32 = vrot.slane %v6297_v55, 1 }
 0x1fe   :  { %v940_v21 = vpop.permute.xlu0 %939  ;;  %v928_v25 = vpop.permute.xlu1 %927  ;;  %1201 = vbcast.lane.b32.xlu1 %v16595_v23, 312  ;;  %v6269_v52 = vadd.f32 %v6268_v38, %v6267_v15  ;;  %v6239_v51 = vadd.f32 %v6238_v62, %v6237_v41 }
 0x1ff   :  { %1205 = vbcast.lane.b32.xlu0 %v16595_v23, 320  ;;  %vm3858_vm13 = vcmp.eq.s32.totalorder %v928_v25, %v9821_v11  ;;  %v6331_v46 = vadd.f32 %v8466_v58, %v6330_v42  ;;  %vm3861_vm14 = vcmp.eq.s32.totalorder %v940_v21, %v9821_v11  ;;  %v6326_v57 = vrot.slane %v6325_v13, 2 }
 0x200   :  { %v8467_v3 = vsel %vm3858_vm13, 1.0, %v16541_v4  ;;  %v8470_v49 = vsel %vm3861_vm14, 1.0, %v16541_v4  ;;  %v6283_v58 = vrot.slane %v6282_v59, 1  ;;  %v6313_v42 = vrot.slane %v6312_v45, 1 }
 0x201   :  { %v6332_v37 = vadd.f32 %v8467_v3, %v6331_v46  ;;  %v6327_v8 = vadd.f32 %v6326_v57, %v6325_v13  ;;  %v7415_v3 = vsel %vm7401_vm0, %v6254_v10, %v6239_v51  ;;  %v16602_v10 = vld [vmem:[#allocation11_spill] sm:$0xff] }
 0x202   :  { %v948_v28 = vpop.permute.xlu0 %947  ;;  %v936_v53 = vpop.permute.xlu1 %935  ;;  %1209 = vbcast.lane.b32.xlu1 %v16595_v23, 328  ;;  %v6284_v46 = vadd.f32 %v6283_v58, %v6282_v59  ;;  %v6314_v34 = vadd.f32 %v6313_v42, %v6312_v45 }
 0x203   :  { %1216 = vbcast.lane.b32.xlu0 %v16596_v20, 256  ;;  %vm3860_vm11 = vcmp.eq.s32.totalorder %v936_v53, %v9821_v11  ;;  %v6333_v5 = vadd.f32 %v8468_v56, %v6332_v37  ;;  %vm3863_vm1 = vcmp.eq.s32.totalorder %v948_v28, %v9821_v11  ;;  %v6328_v25 = vrot.slane %v6327_v8, 1 }
 0x204   :  { %v8469_v0 = vsel %vm3860_vm11, 1.0, %v16541_v4  ;;  %v8472_v48 = vsel %vm3863_vm1, 1.0, %v16541_v4  ;;  %v6299_v56 = vadd.f32 %v6298_v32, %v6297_v55  ;;  %v7416_v53 = vsel %vm7403_vm5, %v6269_v52, %v7415_v3  ;;  %v16601_v55 = vld [vmem:[#allocation10_spill] sm:$0xff] }
 0x205   :  { %v6334_v61 = vadd.f32 %v8469_v0, %v6333_v5  ;;  %v6329_v44 = vadd.f32 %v6328_v25, %v6327_v8  ;;  %v7417_v16 = vsel %vm7405_vm6, %v6284_v46, %v7416_v53 }
 0x206   :  { %v11351_v14 = vpop.permute.xlu0 %958  ;;  %v944_v23 = vpop.permute.xlu1 %943  ;;  %1220 = vbcast.lane.b32.xlu1 %v16596_v20, 264  ;;  %v7418_v5 = vsel %vm7407_vm7, %v6299_v56, %v7417_v16 }
 0x207   :  { %1224 = vbcast.lane.b32.xlu0 %v16596_v20, 272  ;;  %vm3862_vm9 = vcmp.eq.s32.totalorder %v944_v23, %v9821_v11  ;;  %v6335_v29 = vadd.f32 %v8470_v49, %v6334_v61  ;;  %v7419_v0 = vsel %vm16475_vm8, %v6314_v34, %v7418_v5  ;;  %vm3865_vm4 = vcmp.eq.s32.totalorder %v11351_v14, %v9821_v11  ;;  %v16603_v5 = vld [vmem:[#allocation12_spill] sm:$0xff] }
 0x208   :  { %v8471_v24 = vsel %vm3862_vm9, 1.0, %v16541_v4  ;;  %v7420_v43 = vsel %vm16598_vm2, %v6329_v44, %v7419_v0  ;;  %v8474_v51 = vsel %vm3865_vm4, 1.0, %v16541_v4 }
 0x209   :  { %v6336_v31 = vadd.f32 %v8471_v24, %v6335_v29 }
 0x20a   :  { %v11358_v18 = vpop.permute.xlu0 %966  ;;  %v952_v54 = vpop.permute.xlu1 %951  ;;  %1228 = vbcast.lane.b32.xlu1 %v16596_v20, 280 }
 0x20b   :  { %1232 = vbcast.lane.b32.xlu0 %v16596_v20, 288  ;;  %vm3864_vm10 = vcmp.eq.s32.totalorder %v952_v54, %v9821_v11  ;;  %v6337_v19 = vadd.f32 %v8472_v48, %v6336_v31  ;;  %v16600_v48 = vld [vmem:[#allocation9_spill] sm:$0xff]  ;;  %vm3867_vm12 = vcmp.eq.s32.totalorder %v11358_v18, %v9821_v11 }
 0x20c   :  { %v8473_v63 = vsel %vm3864_vm10, 1.0, %v16541_v4  ;;  %v8476_v56 = vsel %vm3867_vm12, 1.0, %v16541_v4 }
 0x20d   :  { %v6338_v50 = vadd.f32 %v8473_v63, %v6337_v19 }
 0x20e   :  { %v11364_v27 = vpop.permute.xlu0 %974  ;;  %v11366_v60 = vpop.permute.xlu1 %962  ;;  %1236 = vbcast.lane.b32.xlu1 %v16596_v20, 296 }
 0x20f   :  { %1240 = vbcast.lane.b32.xlu0 %v16596_v20, 304  ;;  %v6339_v35 = vrot.slane %v6338_v50, 4  ;;  %vm3866_vm15 = vcmp.eq.s32.totalorder %v11366_v60, %v9821_v11  ;;  %vm3869_vm9 = vcmp.eq.s32.totalorder %v11364_v27, %v9821_v11 }
 0x210   :  { %v8475_v46 = vsel %vm3866_vm15, 1.0, %v16541_v4 }
 0x211   :  { %v6340_v21 = vadd.f32 %v6339_v35, %v6338_v50  ;;  %v6345_v60 = vadd.f32 %v8475_v46, %v8474_v51 }
 0x212   :  { %v11370_v30 = vpop.permute.xlu0 %982  ;;  %v11372_v2 = vpop.permute.xlu1 %970  ;;  %1244 = vbcast.lane.b32.xlu1 %v16596_v20, 312 }
 0x213   :  { %1248 = vbcast.lane.b32.xlu0 %v16596_v20, 320  ;;  %v6341_v22 = vrot.slane %v6340_v21, 2  ;;  %vm3868_vm11 = vcmp.eq.s32.totalorder %v11372_v2, %v9821_v11  ;;  %vm3871_vm12 = vcmp.eq.s32.totalorder %v11370_v30, %v9821_v11 }
 0x214   :  { %v8477_v44 = vsel %vm3868_vm11, 1.0, %v16541_v4  ;;  %v8480_v30 = vsel %vm3871_vm12, 1.0, %v16541_v4 }
 0x215   :  { %v6342_v1 = vadd.f32 %v6341_v22, %v6340_v21 }
 0x216   :  { %v11377_v37 = vpop.permute.xlu0 %990  ;;  %v11379_v28 = vpop.permute.xlu1 %978  ;;  %1252 = vbcast.lane.b32.xlu1 %v16596_v20, 328 }
 0x217   :  { %1259 = vbcast.lane.b32.xlu0 %v16597_v33, 256  ;;  %v6343_v40 = vrot.slane %v6342_v1, 1  ;;  %vm3870_vm2 = vcmp.eq.s32.totalorder %v11379_v28, %v9821_v11 }
 0x219   :  { %v6344_v49 = vadd.f32 %v6343_v40, %v6342_v1 }
 0x21a   :  { %v11386_v9 = vpop.permute.xlu0 %1001  ;;  %v11389_v7 = vpop.permute.xlu1 %986  ;;  %1263 = vbcast.lane.b32.xlu1 %v16597_v33, 264 }
 0x21b   :  { %1267 = vbcast.lane.b32.xlu0 %v16597_v33, 272  ;;  %v7421_v20 = vsel %vm16599_vm3, %v6344_v49, %v7420_v43  ;;  %vm3875_vm13 = vcmp.eq.s32.totalorder %v11386_v9, %v9821_v11  ;;  %v8478_v49 = vsel %vm3869_vm9, 1.0, %v16541_v4  ;;  %vm3872_vm11 = vcmp.eq.s32.totalorder %v11389_v7, %v9821_v11 }
 0x21c   :  { %9350 = vmatmul.mubr.f32.vlgmr.msra.gmra.mrb[0].mxu0 %v7421_v20  ;;  %v8484_v3 = vsel %vm3875_vm13, 1.0, %v16541_v4 }
 0x21e   :  { %v11395_v61 = vpop.permute.xlu0 %1009  ;;  %v11397_v6 = vpop.permute.xlu1 %994  ;;  %1271 = vbcast.lane.b32.xlu1 %v16597_v33, 280 }
 0x21f   :  { %1275 = vbcast.lane.b32.xlu0 %v16597_v33, 288  ;;  %vm3877_vm1 = vcmp.eq.s32.totalorder %v11395_v61, %v9821_v11 }
 0x220   :  { %v8486_v40 = vsel %vm3877_vm1, 1.0, %v16541_v4 }
 0x222   :  { %v11401_v13 = vpop.permute.xlu0 %1017  ;;  %v11403_v23 = vpop.permute.xlu1 %1005  ;;  %1279 = vbcast.lane.b32.xlu1 %v16597_v33, 296 }
 0x223   :  { %1283 = vbcast.lane.b32.xlu0 %v16597_v33, 304  ;;  %vm3876_vm14 = vcmp.eq.s32.totalorder %v11403_v23, %v9821_v11  ;;  %vm3879_vm3 = vcmp.eq.s32.totalorder %v11401_v13, %v9821_v11  ;;  %v8479_v23 = vsel %vm3870_vm2, 1.0, %v16541_v4 }
 0x224   :  { %v8485_v34 = vsel %vm3876_vm14, 1.0, %v16541_v4 }
 0x225   :  { %v6360_v2 = vadd.f32 %v8485_v34, %v8484_v3  ;;  %v8481_v3 = vsel %vm3872_vm11, 1.0, %v16541_v4 }
 0x226   :  { %v11407_v47 = vpop.permute.xlu0 %1025  ;;  %v11409_v39 = vpop.permute.xlu1 %1013  ;;  %1287 = vbcast.lane.b32.xlu1 %v16597_v33, 312 }
 0x227   :  { %1291 = vbcast.lane.b32.xlu0 %v16597_v33, 320  ;;  %vm3878_vm10 = vcmp.eq.s32.totalorder %v11409_v39, %v9821_v11  ;;  %v6361_v27 = vadd.f32 %v8486_v40, %v6360_v2  ;;  %vm3881_vm1 = vcmp.eq.s32.totalorder %v11407_v47, %v9821_v11 }
 0x228   :  { %v8487_v43 = vsel %vm3878_vm10, 1.0, %v16541_v4  ;;  %vm3873_vm10 = vcmp.eq.s32.totalorder %v11377_v37, %v9821_v11  ;;  %v8490_v47 = vsel %vm3881_vm1, 1.0, %v16541_v4 }
 0x229   :  { %v6362_v28 = vadd.f32 %v8487_v43, %v6361_v27 }
 0x22a   :  { %v11413_v29 = vpop.permute.xlu0 %1033  ;;  %v11415_v36 = vpop.permute.xlu1 %1021  ;;  %1295 = vbcast.lane.b32.xlu1 %v16597_v33, 328  ;;  %v6346_v33 = vadd.f32 %v8476_v56, %v6345_v60 }
 0x22b   :  { %1302 = vbcast.lane.b32.xlu0 %v16600_v48, 256  ;;  %vm3880_vm13 = vcmp.eq.s32.totalorder %v11415_v36, %v9821_v11 }
 0x22c   :  { %v6347_v9 = vadd.f32 %v8477_v44, %v6346_v33  ;;  %v8489_v46 = vsel %vm3880_vm13, 1.0, %v16541_v4 }
 0x22e   :  { %v11419_v24 = vpop.permute.xlu0 %1044  ;;  %v11421_v17 = vpop.permute.xlu1 %1029  ;;  %1306 = vbcast.lane.b32.xlu1 %v16600_v48, 264  ;;  %v6348_v61 = vadd.f32 %v8478_v49, %v6347_v9 }
 0x22f   :  { %1310 = vbcast.lane.b32.xlu0 %v16600_v48, 272  ;;  %vm3885_vm4 = vcmp.eq.s32.totalorder %v11419_v24, %v9821_v11 }
 0x230   :  { %v6349_v13 = vadd.f32 %v8479_v23, %v6348_v61  ;;  %v8494_v24 = vsel %vm3885_vm4, 1.0, %v16541_v4  ;;  %v16604_v61 = vld [vmem:[#allocation13_spill] sm:$0xff] }
 0x232   :  { %v11425_v12 = vpop.permute.xlu0 %1052  ;;  %v11427_v31 = vpop.permute.xlu1 %1037  ;;  %1314 = vbcast.lane.b32.xlu1 %v16600_v48, 280  ;;  %v6350_v36 = vadd.f32 %v8480_v30, %v6349_v13 }
 0x233   :  { %1318 = vbcast.lane.b32.xlu0 %v16600_v48, 288  ;;  %vm3887_vm14 = vcmp.eq.s32.totalorder %v11425_v12, %v9821_v11 }
 0x234   :  { %v8496_v12 = vsel %vm3887_vm14, 1.0, %v16541_v4  ;;  %v6351_v44 = vadd.f32 %v8481_v3, %v6350_v36  ;;  %vm3882_vm14 = vcmp.eq.s32.totalorder %v11421_v17, %v9821_v11 }
 0x235   :  { %v8491_v23 = vsel %vm3882_vm14, 1.0, %v16541_v4  ;;  %vm3884_vm14 = vcmp.eq.s32.totalorder %v11427_v31, %v9821_v11 }
 0x236   :  { %v11431_v15 = vpop.permute.xlu0 %1060  ;;  %v11433_v57 = vpop.permute.xlu1 %1048  ;;  %1322 = vbcast.lane.b32.xlu1 %v16600_v48, 296 }
 0x237   :  { %1326 = vbcast.lane.b32.xlu0 %v16600_v48, 304  ;;  %vm3886_vm15 = vcmp.eq.s32.totalorder %v11433_v57, %v9821_v11  ;;  %vm3889_vm11 = vcmp.eq.s32.totalorder %v11431_v15, %v9821_v11  ;;  %v8482_v15 = vsel %vm3873_vm10, 1.0, %v16541_v4 }
 0x238   :  { %v8495_v57 = vsel %vm3886_vm15, 1.0, %v16541_v4 }
 0x239   :  { %v6375_v60 = vadd.f32 %v8495_v57, %v8494_v24 }
 0x23a   :  { %v11437_v54 = vpop.permute.xlu0 %1068  ;;  %v11439_v41 = vpop.permute.xlu1 %1056  ;;  %1330 = vbcast.lane.b32.xlu1 %v16600_v48, 312 }
 0x23b   :  { %1334 = vbcast.lane.b32.xlu0 %v16600_v48, 320  ;;  %vm3888_vm9 = vcmp.eq.s32.totalorder %v11439_v41, %v9821_v11  ;;  %v6376_v33 = vadd.f32 %v8496_v12, %v6375_v60 }
 0x23c   :  { %v8497_v2 = vsel %vm3888_vm9, 1.0, %v16541_v4 }
 0x23e   :  { %v11443_v59 = vpop.permute.xlu0 %1076  ;;  %v11445_v19 = vpop.permute.xlu1 %1064  ;;  %1338 = vbcast.lane.b32.xlu1 %v16600_v48, 328  ;;  %v8488_v48 = vsel %vm3879_vm3, 1.0, %v16541_v4 }
 0x23f   :  { %1345 = vbcast.lane.b32.xlu0 %v16601_v55, 256 }
 0x242   :  { %v11449_v63 = vpop.permute.xlu0 %1087  ;;  %v11451_v26 = vpop.permute.xlu1 %1072  ;;  %1349 = vbcast.lane.b32.xlu1 %v16601_v55, 264 }
 0x243   :  { %1353 = vbcast.lane.b32.xlu0 %v16601_v55, 272  ;;  %vm3895_vm2 = vcmp.eq.s32.totalorder %v11449_v63, %v9821_v11 }
 0x246   :  { %v11455_v45 = vpop.permute.xlu0 %1095  ;;  %v11457_v50 = vpop.permute.xlu1 %1080  ;;  %1357 = vbcast.lane.b32.xlu1 %v16601_v55, 280 }
 0x247   :  { %1361 = vbcast.lane.b32.xlu0 %v16601_v55, 288  ;;  %vm3897_vm1 = vcmp.eq.s32.totalorder %v11455_v45, %v9821_v11 }
 0x248   :  { %v8506_v17 = vsel %vm3897_vm1, 1.0, %v16541_v4 }
 0x24a   :  { %v11461_v38 = vpop.permute.xlu0 %1103  ;;  %v11463_v8 = vpop.permute.xlu1 %1091  ;;  %1365 = vbcast.lane.b32.xlu1 %v16601_v55, 296 }
 0x24b   :  { %1369 = vbcast.lane.b32.xlu0 %v16601_v55, 304  ;;  %vm3896_vm3 = vcmp.eq.s32.totalorder %v11463_v8, %v9821_v11 }
 0x24e   :  { %v11467_v62 = vpop.permute.xlu0 %1111  ;;  %v11469_v58 = vpop.permute.xlu1 %1099  ;;  %1373 = vbcast.lane.b32.xlu1 %v16601_v55, 312 }
 0x24f   :  { %1377 = vbcast.lane.b32.xlu0 %v16601_v55, 320 }
 0x252   :  { %v11473_v35 = vpop.permute.xlu0 %1119  ;;  %v11475_v32 = vpop.permute.xlu1 %1107  ;;  %1381 = vbcast.lane.b32.xlu1 %v16601_v55, 328 }
 0x253   :  { %1388 = vbcast.lane.b32.xlu0 %v16602_v10, 256 }
 0x256   :  { %v11479_v42 = vpop.permute.xlu0 %1130  ;;  %v11481_v21 = vpop.permute.xlu1 %1115  ;;  %1392 = vbcast.lane.b32.xlu1 %v16602_v10, 264 }
 0x257   :  { %1396 = vbcast.lane.b32.xlu0 %v16602_v10, 272  ;;  %vm3905_vm4 = vcmp.eq.s32.totalorder %v11479_v42, %v9821_v11  ;;  %v8504_v42 = vsel %vm3895_vm2, 1.0, %v16541_v4 }
 0x258   :  { %v8514_v9 = vsel %vm3905_vm4, 1.0, %v16541_v4  ;;  %vm3890_vm4 = vcmp.eq.s32.totalorder %v11445_v19, %v9821_v11 }
 0x25a   :  { %v11489_v52 = vpop.permute.xlu0 %1138  ;;  %v11491_v25 = vpop.permute.xlu1 %1123  ;;  %1400 = vbcast.lane.b32.xlu1 %v16602_v10, 280 }
 0x25b   :  { %1404 = vbcast.lane.b32.xlu0 %v16602_v10, 288  ;;  %vm3907_vm9 = vcmp.eq.s32.totalorder %v11489_v52, %v9821_v11  ;;  %v8499_v52 = vsel %vm3890_vm4, 1.0, %v16541_v4  ;;  %vm3900_vm4 = vcmp.eq.s32.totalorder %v11475_v32, %v9821_v11 }
 0x25e   :  { %v11499_v22 = vpop.permute.xlu0 %1146  ;;  %v11501_v14 = vpop.permute.xlu1 %1134  ;;  %1408 = vbcast.lane.b32.xlu1 %v16602_v10, 296 }
 0x25f   :  { %1412 = vbcast.lane.b32.xlu0 %v16602_v10, 304  ;;  %vm3906_vm15 = vcmp.eq.s32.totalorder %v11501_v14, %v9821_v11  ;;  %v8505_v14 = vsel %vm3896_vm3, 1.0, %v16541_v4  ;;  %vm3883_vm3 = vcmp.eq.s32.totalorder %v11413_v29, %v9821_v11  ;;  %vm3909_vm1 = vcmp.eq.s32.totalorder %v11499_v22, %v9821_v11 }
 0x260   :  { %v8515_v49 = vsel %vm3906_vm15, 1.0, %v16541_v4  ;;  %vm3898_vm15 = vcmp.eq.s32.totalorder %v11469_v58, %v9821_v11  ;;  %v8492_v37 = vsel %vm3883_vm3, 1.0, %v16541_v4  ;;  %v11699_v22 = vsel %vm3884_vm14, 1.0, %v16541_v4 }
 0x261   :  { %v8507_v60 = vsel %vm3898_vm15, 1.0, %v16541_v4  ;;  %vm3892_vm3 = vcmp.eq.s32.totalorder %v11451_v26, %v9821_v11 }
 0x262   :  { %v11512_v18 = vpop.permute.xlu0 %1154  ;;  %v11516_v1 = vpop.permute.xlu1 %1142  ;;  %1416 = vbcast.lane.b32.xlu1 %v16602_v10, 312 }
 0x263   :  { %1420 = vbcast.lane.b32.xlu0 %v16602_v10, 320 }
 0x266   :  { %v11525_v53 = vpop.permute.xlu0 %1162  ;;  %v11528_v16 = vpop.permute.xlu1 %1150  ;;  %1424 = vbcast.lane.b32.xlu1 %v16602_v10, 328  ;;  %v6363_v10 = vadd.f32 %v8488_v48, %v6362_v28  ;;  %v8498_v28 = vsel %vm3889_vm11, 1.0, %v16541_v4  ;;  %v6390_v48 = vadd.f32 %v8505_v14, %v8504_v42  ;;  %vm3899_vm11 = vcmp.eq.s32.totalorder %v11461_v38, %v9821_v11 }
 0x267   :  { %1431 = vbcast.lane.b32.xlu0 %v16603_v5, 256 }
 0x268   :  { %v6364_v7 = vadd.f32 %v8489_v46, %v6363_v10  ;;  %v6391_v46 = vadd.f32 %v8506_v17, %v6390_v48 }
 0x26a   :  { %v11537_v0 = vpop.permute.xlu0 %1173  ;;  %v11540_v20 = vpop.permute.xlu1 %1158  ;;  %1435 = vbcast.lane.b32.xlu1 %v16603_v5, 264  ;;  %v6365_v40 = vadd.f32 %v8490_v47, %v6364_v7  ;;  %v6392_v47 = vadd.f32 %v8507_v60, %v6391_v46 }
 0x26b   :  { %1439 = vbcast.lane.b32.xlu0 %v16603_v5, 272  ;;  %vm3915_vm12 = vcmp.eq.s32.totalorder %v11537_v0, %v9821_v11  ;;  %v6377_v0 = vadd.f32 %v8497_v2, %v6376_v33  ;;  %v8508_v33 = vsel %vm3899_vm11, 1.0, %v16541_v4 }
 0x26c   :  { %v8524_v63 = vsel %vm3915_vm12, 1.0, %v16541_v4  ;;  %v6366_v57 = vadd.f32 %v8491_v23, %v6365_v40  ;;  %vm3908_vm12 = vcmp.eq.s32.totalorder %v11516_v1, %v9821_v11  ;;  %v11669_v1 = vadd.f32 %v8482_v15, %v6351_v44 }
 0x26d   :  { %v6378_v30 = vadd.f32 %v8498_v28, %v6377_v0  ;;  %v8517_v19 = vsel %vm3908_vm12, 1.0, %v16541_v4  ;;  %vm3910_vm12 = vcmp.eq.s32.totalorder %v11528_v16, %v9821_v11  ;;  %v6393_v40 = vadd.f32 %v8508_v33, %v6392_v47 }
 0x26e   :  { %v11553_v39 = vpop.permute.xlu0 %1181  ;;  %v11556_v55 = vpop.permute.xlu1 %1166  ;;  %1443 = vbcast.lane.b32.xlu1 %v16603_v5, 280  ;;  %v11682_v12 = vadd.f32 %v8492_v37, %v6366_v57  ;;  %v8509_v16 = vsel %vm3900_vm4, 1.0, %v16541_v4  ;;  %vm3874_vm4 = vcmp.eq.s32.totalorder %v11397_v6, %v9821_v11 }
 0x26f   :  { %1447 = vbcast.lane.b32.xlu0 %v16603_v5, 288  ;;  %vm3917_vm2 = vcmp.eq.s32.totalorder %v11553_v39, %v9821_v11  ;;  %v8516_v39 = vsel %vm3907_vm9, 1.0, %v16541_v4  ;;  %v6379_v3 = vadd.f32 %v8499_v52, %v6378_v30  ;;  %v6394_v17 = vadd.f32 %v8509_v16, %v6393_v40  ;;  %v16605_v52 = vld [vmem:[#allocation14_spill] sm:$0xff] }
 0x270   :  { %v8526_v45 = vsel %vm3917_vm2, 1.0, %v16541_v4 }
 0x272   :  { %v11569_v51 = vpop.permute.xlu0 %1189  ;;  %v1178_v56 = vpop.permute.xlu1 %1177  ;;  %1451 = vbcast.lane.b32.xlu1 %v16603_v5, 296 }
 0x273   :  { %1455 = vbcast.lane.b32.xlu0 %v16603_v5, 304  ;;  %vm3916_vm13 = vcmp.eq.s32.totalorder %v1178_v56, %v9821_v11  ;;  %vm3919_vm9 = vcmp.eq.s32.totalorder %v11569_v51, %v9821_v11  ;;  %v8518_v51 = vsel %vm3909_vm1, 1.0, %v16541_v4  ;;  %vm3911_vm1 = vcmp.eq.s32.totalorder %v11512_v18, %v9821_v11 }
 0x274   :  { %v8525_v43 = vsel %vm3916_vm13, 1.0, %v16541_v4  ;;  %vm3891_vm13 = vcmp.eq.s32.totalorder %v11437_v54, %v9821_v11  ;;  %v8528_v42 = vsel %vm3919_vm9, 1.0, %v16541_v4 }
 0x275   :  { %v6420_v13 = vadd.f32 %v8525_v43, %v8524_v63  ;;  %v8500_v7 = vsel %vm3891_vm13, 1.0, %v16541_v4  ;;  %v8519_v63 = vsel %vm3910_vm12, 1.0, %v16541_v4  ;;  %vm3893_vm12 = vcmp.eq.s32.totalorder %v11443_v59, %v9821_v11 }
 0x276   :  { %v11586_v34 = vpop.permute.xlu0 %1197  ;;  %v1186_v41 = vpop.permute.xlu1 %1185  ;;  %1459 = vbcast.lane.b32.xlu1 %v16603_v5, 312  ;;  %v6380_v2 = vadd.f32 %v8500_v7, %v6379_v3 }
 0x277   :  { %1463 = vbcast.lane.b32.xlu0 %v16603_v5, 320  ;;  %vm3918_vm10 = vcmp.eq.s32.totalorder %v1186_v41, %v9821_v11  ;;  %v6421_v56 = vadd.f32 %v8526_v45, %v6420_v13  ;;  %vm3921_vm9 = vcmp.eq.s32.totalorder %v11586_v34, %v9821_v11 }
 0x278   :  { %v8527_v54 = vsel %vm3918_vm10, 1.0, %v16541_v4  ;;  %vm3901_vm10 = vcmp.eq.s32.totalorder %v11467_v62, %v9821_v11  ;;  %v8530_v45 = vsel %vm3921_vm9, 1.0, %v16541_v4  ;;  %vm3913_vm9 = vcmp.eq.s32.totalorder %v11525_v53, %v9821_v11 }
 0x279   :  { %v6422_v44 = vadd.f32 %v8527_v54, %v6421_v56  ;;  %v8510_v32 = vsel %vm3901_vm10, 1.0, %v16541_v4  ;;  %vm3912_vm10 = vcmp.eq.s32.totalorder %v11540_v20, %v9821_v11 }
 0x27a   :  { %v11615_v27 = vpop.permute.xlu0 %1205  ;;  %v11621_v8 = vpop.permute.xlu1 %1193  ;;  %1467 = vbcast.lane.b32.xlu1 %v16603_v5, 328  ;;  %v6405_v5 = vadd.f32 %v8515_v49, %v8514_v9  ;;  %v6395_v46 = vadd.f32 %v8510_v32, %v6394_v17 }
 0x27b   :  { %1474 = vbcast.lane.b32.xlu0 %v16604_v61, 256  ;;  %vm3920_vm13 = vcmp.eq.s32.totalorder %v11621_v8, %v9821_v11  ;;  %v6423_v43 = vadd.f32 %v8528_v42, %v6422_v44  ;;  %v8501_v8 = vsel %vm3892_vm3, 1.0, %v16541_v4  ;;  %vm3902_vm3 = vcmp.eq.s32.totalorder %v11481_v21, %v9821_v11 }
 0x27c   :  { %v6406_v29 = vadd.f32 %v8516_v39, %v6405_v5  ;;  %v8529_v28 = vsel %vm3920_vm13, 1.0, %v16541_v4  ;;  %v8520_v39 = vsel %vm3911_vm1, 1.0, %v16541_v4  ;;  %v6381_v30 = vadd.f32 %v8501_v8, %v6380_v2 }
 0x27d   :  { %v6424_v13 = vadd.f32 %v8529_v28, %v6423_v43  ;;  %v8511_v20 = vsel %vm3902_vm3, 1.0, %v16541_v4  ;;  %v8502_v21 = vsel %vm3893_vm12, 1.0, %v16541_v4  ;;  %vm3894_vm1 = vcmp.eq.s32.totalorder %v11457_v50, %v9821_v11 }
 0x27e   :  { %v1217_v24 = vpop.permute.xlu0 %1216  ;;  %v11656_v10 = vpop.permute.xlu1 %1201  ;;  %1478 = vbcast.lane.b32.xlu1 %v16604_v61, 264  ;;  %v6407_v41 = vadd.f32 %v8517_v19, %v6406_v29  ;;  %v6396_v7 = vadd.f32 %v8511_v20, %v6395_v46  ;;  %vm3904_vm12 = vcmp.eq.s32.totalorder %v11491_v25, %v9821_v11 }
 0x27f   :  { %1482 = vbcast.lane.b32.xlu0 %v16604_v61, 272  ;;  %vm3925_vm2 = vcmp.eq.s32.totalorder %v1217_v24, %v9821_v11  ;;  %vm3922_vm13 = vcmp.eq.s32.totalorder %v11656_v10, %v9821_v11  ;;  %v6425_v10 = vadd.f32 %v8530_v45, %v6424_v13 }
 0x280   :  { %v8534_v14 = vsel %vm3925_vm2, 1.0, %v16541_v4  ;;  %v6408_v9 = vadd.f32 %v8518_v51, %v6407_v41  ;;  %v8531_v3 = vsel %vm3922_vm13, 1.0, %v16541_v4  ;;  %v6382_v41 = vadd.f32 %v8502_v21, %v6381_v30 }
 0x281   :  { %v8522_v51 = vsel %vm3913_vm9, 1.0, %v16541_v4 }
 0x282   :  { %v1225_v36 = vpop.permute.xlu0 %1224  ;;  %v11687_v58 = vpop.permute.xlu1 %1209  ;;  %1486 = vbcast.lane.b32.xlu1 %v16604_v61, 280  ;;  %v6409_v5 = vadd.f32 %v8519_v63, %v6408_v9 }
 0x283   :  { %1490 = vbcast.lane.b32.xlu0 %v16604_v61, 288  ;;  %vm3927_vm15 = vcmp.eq.s32.totalorder %v1225_v36, %v9821_v11  ;;  %vm3924_vm13 = vcmp.eq.s32.totalorder %v11687_v58, %v9821_v11  ;;  %v6368_v58 = vadd.f32 %v11699_v22, %v11682_v12 }
 0x284   :  { %v8536_v49 = vsel %vm3927_vm15, 1.0, %v16541_v4  ;;  %v6410_v29 = vadd.f32 %v8520_v39, %v6409_v5  ;;  %v8533_v6 = vsel %vm3924_vm13, 1.0, %v16541_v4 }
 0x285   :  { %v6369_v28 = vrot.slane %v6368_v58, 4 }
 0x286   :  { %v1233_v31 = vpop.permute.xlu0 %1232  ;;  %v1221_v38 = vpop.permute.xlu1 %1220  ;;  %1494 = vbcast.lane.b32.xlu1 %v16604_v61, 296 }
 0x287   :  { %1498 = vbcast.lane.b32.xlu0 %v16604_v61, 304  ;;  %vm3926_vm14 = vcmp.eq.s32.totalorder %v1221_v38, %v9821_v11  ;;  %vm3929_vm11 = vcmp.eq.s32.totalorder %v1233_v31, %v9821_v11  ;;  %v8503_v31 = vsel %vm3894_vm1, 1.0, %v16541_v4  ;;  %v8513_v38 = vsel %vm3904_vm12, 1.0, %v16541_v4 }
 0x288   :  { %v8535_v0 = vsel %vm3926_vm14, 1.0, %v16541_v4  ;;  %v8538_v18 = vsel %vm3929_vm11, 1.0, %v16541_v4  ;;  %vm3903_vm11 = vcmp.eq.s32.totalorder %v11473_v35, %v9821_v11  ;;  %v6370_v45 = vadd.f32 %v6369_v28, %v6368_v58 }
 0x289   :  { %v6435_v62 = vadd.f32 %v8535_v0, %v8534_v14  ;;  %v8512_v47 = vsel %vm3903_vm11, 1.0, %v16541_v4  ;;  %v6383_v0 = vadd.f32 %v8503_v31, %v6382_v41 }
 0x28a   :  { %v1241_v23 = vpop.permute.xlu0 %1240  ;;  %v1229_v48 = vpop.permute.xlu1 %1228  ;;  %1502 = vbcast.lane.b32.xlu1 %v16604_v61, 312  ;;  %v6397_v14 = vadd.f32 %v8512_v47, %v6396_v7 }
 0x28b   :  { %1506 = vbcast.lane.b32.xlu0 %v16604_v61, 320  ;;  %vm3928_vm2 = vcmp.eq.s32.totalorder %v1229_v48, %v9821_v11  ;;  %v6436_v26 = vadd.f32 %v8536_v49, %v6435_v62  ;;  %vm3931_vm15 = vcmp.eq.s32.totalorder %v1241_v23, %v9821_v11  ;;  %v6384_v5 = vrot.slane %v6383_v0, 4 }
 0x28c   :  { %v8537_v15 = vsel %vm3928_vm2, 1.0, %v16541_v4  ;;  %v8540_v34 = vsel %vm3931_vm15, 1.0, %v16541_v4  ;;  %vm3923_vm2 = vcmp.eq.s32.totalorder %v11615_v27, %v9821_v11  ;;  %v6426_v27 = vadd.f32 %v8531_v3, %v6425_v10 }
 0x28d   :  { %v6437_v24 = vadd.f32 %v8537_v15, %v6436_v26  ;;  %v8532_v35 = vsel %vm3923_vm2, 1.0, %v16541_v4  ;;  %v6398_v12 = vadd.f32 %v8513_v38, %v6397_v14  ;;  %v6385_v20 = vadd.f32 %v6384_v5, %v6383_v0 }
 0x28e   :  { %v1249_v57 = vpop.permute.xlu0 %1248  ;;  %v1237_v37 = vpop.permute.xlu1 %1236  ;;  %1510 = vbcast.lane.b32.xlu1 %v16604_v61, 328  ;;  %v8521_v61 = vsel %vm3912_vm10, 1.0, %v16541_v4  ;;  %vm3914_vm10 = vcmp.eq.s32.totalorder %v11556_v55, %v9821_v11  ;;  %v8483_v55 = vsel %vm3874_vm4, 1.0, %v16541_v4  ;;  %v6427_v9 = vadd.f32 %v8532_v35, %v6426_v27 }
 0x28f   :  { %1517 = vbcast.lane.b32.xlu0 %v16605_v52, 256  ;;  %vm3930_vm14 = vcmp.eq.s32.totalorder %v1237_v37, %v9821_v11  ;;  %v6438_v60 = vadd.f32 %v8538_v18, %v6437_v24  ;;  %v6411_v53 = vadd.f32 %v8521_v61, %v6410_v29  ;;  %vm3933_vm15 = vcmp.eq.s32.totalorder %v1249_v57, %v9821_v11 }
 0x290   :  { %v8539_v19 = vsel %vm3930_vm14, 1.0, %v16541_v4  ;;  %v8542_v50 = vsel %vm3933_vm15, 1.0, %v16541_v4  ;;  %v8523_v16 = vsel %vm3914_vm10, 1.0, %v16541_v4  ;;  %v6353_v62 = vadd.f32 %v8483_v55, %v11669_v1 }
 0x291   :  { %v6439_v56 = vadd.f32 %v8539_v19, %v6438_v60  ;;  %v6412_v40 = vadd.f32 %v8522_v51, %v6411_v53  ;;  %v6428_v48 = vadd.f32 %v8533_v6, %v6427_v9  ;;  %v6399_v39 = vrot.slane %v6398_v12, 4  ;;  %v16606_v19 = vld [vmem:[#allocation15_spill] sm:$0xff] }
 0x292   :  { %v1260_v36 = vpop.permute.xlu0 %1259  ;;  %v1245_v54 = vpop.permute.xlu1 %1244  ;;  %1521 = vbcast.lane.b32.xlu1 %v16605_v52, 264  ;;  %v6354_v1 = vrot.slane %v6353_v62, 4  ;;  %v6386_v53 = vrot.slane %v6385_v20, 2 }
 0x293   :  { %1525 = vbcast.lane.b32.xlu0 %v16605_v52, 272  ;;  %vm3932_vm3 = vcmp.eq.s32.totalorder %v1245_v54, %v9821_v11  ;;  %v6440_v59 = vadd.f32 %v8540_v34, %v6439_v56  ;;  %vm3935_vm14 = vcmp.eq.s32.totalorder %v1260_v36, %v9821_v11  ;;  %v6413_v23 = vadd.f32 %v8523_v16, %v6412_v40 }
 0x294   :  { %v8541_v33 = vsel %vm3932_vm3, 1.0, %v16541_v4  ;;  %v8544_v63 = vsel %vm3935_vm14, 1.0, %v16541_v4  ;;  %v6429_v37 = vrot.slane %v6428_v48, 4  ;;  %v6355_v61 = vadd.f32 %v6354_v1, %v6353_v62 }
 0x295   :  { %v6441_v2 = vadd.f32 %v8541_v33, %v6440_v59  ;;  %v6414_v24 = vrot.slane %v6413_v23, 4  ;;  %v6400_v10 = vadd.f32 %v6399_v39, %v6398_v12  ;;  %v6371_v54 = vrot.slane %v6370_v45, 2 }
 0x296   :  { %v1268_v44 = vpop.permute.xlu0 %1267  ;;  %v1253_v42 = vpop.permute.xlu1 %1252  ;;  %1529 = vbcast.lane.b32.xlu1 %v16605_v52, 280  ;;  %v6430_v7 = vadd.f32 %v6429_v37, %v6428_v48  ;;  %v6356_v41 = vrot.slane %v6355_v61, 2  ;;  %v6387_v55 = vadd.f32 %v6386_v53, %v6385_v20  ;;  %v16607_v20 = vld [vmem:[#allocation16_spill] sm:$0xff]  ;;  %vm16608_vm14 = vcmask 1046534  }
 0x297   :  { %1533 = vbcast.lane.b32.xlu0 %v16605_v52, 288  ;;  %vm3934_vm11 = vcmp.eq.s32.totalorder %v1253_v42, %v9821_v11  ;;  %vm3937_vm1 = vcmp.eq.s32.totalorder %v1268_v44, %v9821_v11  ;;  %v6442_v43 = vadd.f32 %v8542_v50, %v6441_v2  ;;  %v6415_v36 = vadd.f32 %v6414_v24, %v6413_v23 }
 0x298   :  { %v8543_v22 = vsel %vm3934_vm11, 1.0, %v16541_v4  ;;  %v8546_v8 = vsel %vm3937_vm1, 1.0, %v16541_v4  ;;  %v6401_v51 = vrot.slane %v6400_v10, 2  ;;  %v6372_v2 = vadd.f32 %v6371_v54, %v6370_v45 }
 0x299   :  { %v6443_v18 = vadd.f32 %v8543_v22, %v6442_v43  ;;  %v6416_v44 = vrot.slane %v6415_v36, 2  ;;  %v6431_v42 = vrot.slane %v6430_v7, 2  ;;  %v6357_v58 = vadd.f32 %v6356_v41, %v6355_v61 }
 0x29a   :  { %v1276_v49 = vpop.permute.xlu0 %1275  ;;  %v1264_v25 = vpop.permute.xlu1 %1263  ;;  %1537 = vbcast.lane.b32.xlu1 %v16605_v52, 296  ;;  %v6402_v16 = vadd.f32 %v6401_v51, %v6400_v10  ;;  %v6373_v6 = vrot.slane %v6372_v2, 1  ;;  %v6388_v62 = vrot.slane %v6387_v55, 1  ;;  %vm16609_vm11 = vcmask 1047559  }
 0x29b   :  { %1541 = vbcast.lane.b32.xlu0 %v16605_v52, 304  ;;  %vm3936_vm4 = vcmp.eq.s32.totalorder %v1264_v25, %v9821_v11  ;;  %vm3939_vm9 = vcmp.eq.s32.totalorder %v1276_v49, %v9821_v11  ;;  %v6444_v29 = vrot.slane %v6443_v18, 4  ;;  %v6417_v49 = vadd.f32 %v6416_v44, %v6415_v36 }
 0x29c   :  { %v8545_v32 = vsel %vm3936_vm4, 1.0, %v16541_v4  ;;  %v8548_v57 = vsel %vm3939_vm9, 1.0, %v16541_v4  ;;  %v6358_v23 = vrot.slane %v6357_v58, 1  ;;  %v6374_v48 = vadd.f32 %v6373_v6, %v6372_v2 }
 0x29d   :  { %v6450_v17 = vadd.f32 %v8545_v32, %v8544_v63  ;;  %v6445_v33 = vadd.f32 %v6444_v29, %v6443_v18  ;;  %v6432_v63 = vadd.f32 %v6431_v42, %v6430_v7  ;;  %v6418_v28 = vrot.slane %v6417_v49, 1 }
 0x29e   :  { %v1284_v26 = vpop.permute.xlu0 %1283  ;;  %v1272_v15 = vpop.permute.xlu1 %1271  ;;  %1545 = vbcast.lane.b32.xlu1 %v16605_v52, 312  ;;  %v6389_v18 = vadd.f32 %v6388_v62, %v6387_v55  ;;  %v6359_v39 = vadd.f32 %v6358_v23, %v6357_v58 }
 0x29f   :  { %1549 = vbcast.lane.b32.xlu0 %v16605_v52, 320  ;;  %vm3938_vm2 = vcmp.eq.s32.totalorder %v1272_v15, %v9821_v11  ;;  %v6451_v13 = vadd.f32 %v8546_v8, %v6450_v17  ;;  %vm3941_vm3 = vcmp.eq.s32.totalorder %v1284_v26, %v9821_v11  ;;  %v6446_v38 = vrot.slane %v6445_v33, 2 }
 0x2a0   :  { %v8547_v30 = vsel %vm3938_vm2, 1.0, %v16541_v4  ;;  %v8550_v21 = vsel %vm3941_vm3, 1.0, %v16541_v4  ;;  %v6403_v8 = vrot.slane %v6402_v16, 1  ;;  %v6433_v17 = vrot.slane %v6432_v63, 1 }
 0x2a1   :  { %v6452_v46 = vadd.f32 %v8547_v30, %v6451_v13  ;;  %v6447_v12 = vadd.f32 %v6446_v38, %v6445_v33  ;;  %v7422_v30 = vsel %vm7401_vm0, %v6374_v48, %v6359_v39 }
 0x2a2   :  { %v1292_v60 = vpop.permute.xlu0 %1291  ;;  %v1280_v34 = vpop.permute.xlu1 %1279  ;;  %1553 = vbcast.lane.b32.xlu1 %v16605_v52, 328  ;;  %v6404_v13 = vadd.f32 %v6403_v8, %v6402_v16  ;;  %v6434_v45 = vadd.f32 %v6433_v17, %v6432_v63 }
 0x2a3   :  { %1560 = vbcast.lane.b32.xlu0 %v16606_v19, 256  ;;  %vm3940_vm15 = vcmp.eq.s32.totalorder %v1280_v34, %v9821_v11  ;;  %v6453_v56 = vadd.f32 %v8548_v57, %v6452_v46  ;;  %vm3943_vm12 = vcmp.eq.s32.totalorder %v1292_v60, %v9821_v11  ;;  %v6448_v15 = vrot.slane %v6447_v12, 1 }
 0x2a4   :  { %v8549_v3 = vsel %vm3940_vm15, 1.0, %v16541_v4  ;;  %v8552_v31 = vsel %vm3943_vm12, 1.0, %v16541_v4  ;;  %v6419_v57 = vadd.f32 %v6418_v28, %v6417_v49  ;;  %v7423_v34 = vsel %vm7403_vm5, %v6389_v18, %v7422_v30  ;;  %v16611_v49 = vld [vmem:[#allocation18_spill] sm:$0xff] }
 0x2a5   :  { %v6454_v59 = vadd.f32 %v8549_v3, %v6453_v56  ;;  %v6449_v29 = vadd.f32 %v6448_v15, %v6447_v12  ;;  %v7424_v10 = vsel %vm7405_vm6, %v6404_v13, %v7423_v34 }
 0x2a6   :  { %v11850_v47 = vpop.permute.xlu0 %1302  ;;  %v1288_v52 = vpop.permute.xlu1 %1287  ;;  %1564 = vbcast.lane.b32.xlu1 %v16606_v19, 264  ;;  %v7425_v56 = vsel %vm7407_vm7, %v6419_v57, %v7424_v10 }
 0x2a7   :  { %1568 = vbcast.lane.b32.xlu0 %v16606_v19, 272  ;;  %vm3942_vm10 = vcmp.eq.s32.totalorder %v1288_v52, %v9821_v11  ;;  %v6455_v27 = vadd.f32 %v8550_v21, %v6454_v59  ;;  %v7426_v3 = vsel %vm16475_vm8, %v6434_v45, %v7425_v56  ;;  %vm3945_vm1 = vcmp.eq.s32.totalorder %v11850_v47, %v9821_v11 }
 0x2a8   :  { %v8551_v35 = vsel %vm3942_vm10, 1.0, %v16541_v4  ;;  %v7427_v7 = vsel %vm16608_vm14, %v6449_v29, %v7426_v3 }
 0x2a9   :  { %v6456_v14 = vadd.f32 %v8551_v35, %v6455_v27 }
 0x2aa   :  { %v11857_v50 = vpop.permute.xlu0 %1310  ;;  %v1296_v40 = vpop.permute.xlu1 %1295  ;;  %1572 = vbcast.lane.b32.xlu1 %v16606_v19, 280 }
 0x2ab   :  { %1576 = vbcast.lane.b32.xlu0 %v16606_v19, 288  ;;  %vm3944_vm13 = vcmp.eq.s32.totalorder %v1296_v40, %v9821_v11  ;;  %v6457_v9 = vadd.f32 %v8552_v31, %v6456_v14  ;;  %v16610_v31 = vld [vmem:[#allocation17_spill] sm:$0xff]  ;;  %vm3947_vm9 = vcmp.eq.s32.totalorder %v11857_v50, %v9821_v11 }
 0x2ac   :  { %v8553_v0 = vsel %vm3944_vm13, 1.0, %v16541_v4  ;;  %v8556_v45 = vsel %vm3947_vm9, 1.0, %v16541_v4 }
 0x2ad   :  { %v6458_v43 = vadd.f32 %v8553_v0, %v6457_v9 }
 0x2ae   :  { %v11863_v25 = vpop.permute.xlu0 %1318  ;;  %v11865_v22 = vpop.permute.xlu1 %1306  ;;  %1580 = vbcast.lane.b32.xlu1 %v16606_v19, 296 }
 0x2af   :  { %1584 = vbcast.lane.b32.xlu0 %v16606_v19, 304  ;;  %v6459_v32 = vrot.slane %v6458_v43, 4  ;;  %vm3946_vm4 = vcmp.eq.s32.totalorder %v11865_v22, %v9821_v11  ;;  %vm3949_vm10 = vcmp.eq.s32.totalorder %v11863_v25, %v9821_v11 }
 0x2b0   :  { %v8555_v57 = vsel %vm3946_vm4, 1.0, %v16541_v4 }
 0x2b1   :  { %v6460_v26 = vadd.f32 %v6459_v32, %v6458_v43 }
 0x2b2   :  { %v11869_v5 = vpop.permute.xlu0 %1326  ;;  %v11871_v1 = vpop.permute.xlu1 %1314  ;;  %1588 = vbcast.lane.b32.xlu1 %v16606_v19, 312 }
 0x2b3   :  { %1592 = vbcast.lane.b32.xlu0 %v16606_v19, 320  ;;  %v6461_v24 = vrot.slane %v6460_v26, 2  ;;  %vm3948_vm15 = vcmp.eq.s32.totalorder %v11871_v1, %v9821_v11  ;;  %vm3951_vm9 = vcmp.eq.s32.totalorder %v11869_v5, %v9821_v11 }
 0x2b4   :  { %v8560_v5 = vsel %vm3951_vm9, 1.0, %v16541_v4 }
 0x2b5   :  { %v6462_v37 = vadd.f32 %v6461_v24, %v6460_v26  ;;  %v16614_v26 = vld [vmem:[#allocation19_spill] sm:$0xff]  ;;  %v8554_v24 = vsel %vm3945_vm1, 1.0, %v16541_v4 }
 0x2b6   :  { %v11876_v46 = vpop.permute.xlu0 %1334  ;;  %v11878_v60 = vpop.permute.xlu1 %1322  ;;  %1596 = vbcast.lane.b32.xlu1 %v16606_v19, 328  ;;  %v6465_v22 = vadd.f32 %v8555_v57, %v8554_v24 }
 0x2b7   :  { %1603 = vbcast.lane.b32.xlu0 %v16607_v20, 256  ;;  %v6463_v61 = vrot.slane %v6462_v37, 1  ;;  %vm3950_vm14 = vcmp.eq.s32.totalorder %v11878_v60, %v9821_v11 }
 0x2b8   :  { %v6466_v34 = vadd.f32 %v8556_v45, %v6465_v22 }
 0x2b9   :  { %v6464_v21 = vadd.f32 %v6463_v61, %v6462_v37  ;;  %v8557_v61 = vsel %vm3948_vm15, 1.0, %v16541_v4 }
 0x2ba   :  { %v11885_v36 = vpop.permute.xlu0 %1345  ;;  %v11888_v54 = vpop.permute.xlu1 %1330  ;;  %1607 = vbcast.lane.b32.xlu1 %v16607_v20, 264  ;;  %v6467_v3 = vadd.f32 %v8557_v61, %v6466_v34 }
 0x2bb   :  { %1611 = vbcast.lane.b32.xlu0 %v16607_v20, 272  ;;  %v7428_v19 = vsel %vm16609_vm11, %v6464_v21, %v7427_v7  ;;  %vm3955_vm2 = vcmp.eq.s32.totalorder %v11885_v36, %v9821_v11  ;;  %v16615_v21 = vld [vmem:[#allocation20_spill] sm:$0xff]  ;;  %v8558_v7 = vsel %vm3949_vm10, 1.0, %v16541_v4  ;;  %vm3952_vm15 = vcmp.eq.s32.totalorder %v11888_v54, %v9821_v11 }
 0x2bc   :  { %9352 = vmatprep.mubr.f32.mxu0 %v7428_v19  ;;  %v8564_v37 = vsel %vm3955_vm2, 1.0, %v16541_v4  ;;  %v8561_v34 = vsel %vm3952_vm15, 1.0, %v16541_v4 }
 0x2be   :  { %v11894_v59 = vpop.permute.xlu0 %1353  ;;  %v11896_v53 = vpop.permute.xlu1 %1338  ;;  %1615 = vbcast.lane.b32.xlu1 %v16607_v20, 280 }
 0x2bf   :  { %1619 = vbcast.lane.b32.xlu0 %v16607_v20, 288  ;;  %vm3957_vm12 = vcmp.eq.s32.totalorder %v11894_v59, %v9821_v11 }
 0x2c0   :  { %v8566_v56 = vsel %vm3957_vm12, 1.0, %v16541_v4 }
 0x2c2   :  { %v11900_v33 = vpop.permute.xlu0 %1361  ;;  %v11902_v52 = vpop.permute.xlu1 %1349  ;;  %1623 = vbcast.lane.b32.xlu1 %v16607_v20, 296 }
 0x2c3   :  { %1627 = vbcast.lane.b32.xlu0 %v16607_v20, 304  ;;  %vm3956_vm3 = vcmp.eq.s32.totalorder %v11902_v52, %v9821_v11  ;;  %vm3959_vm11 = vcmp.eq.s32.totalorder %v11900_v33, %v9821_v11 }
 0x2c6   :  { %v11906_v41 = vpop.permute.xlu0 %1369  ;;  %v11908_v51 = vpop.permute.xlu1 %1357  ;;  %1631 = vbcast.lane.b32.xlu1 %v16607_v20, 312 }
 0x2c7   :  { %1635 = vbcast.lane.b32.xlu0 %v16607_v20, 320  ;;  %vm3958_vm13 = vcmp.eq.s32.totalorder %v11908_v51, %v9821_v11  ;;  %v8559_v51 = vsel %vm3950_vm14, 1.0, %v16541_v4  ;;  %vm3961_vm12 = vcmp.eq.s32.totalorder %v11906_v41, %v9821_v11 }
 0x2c8   :  { %v8567_v59 = vsel %vm3958_vm13, 1.0, %v16541_v4  ;;  %vm3953_vm13 = vcmp.eq.s32.totalorder %v11876_v46, %v9821_v11  ;;  %v8570_v41 = vsel %vm3961_vm12, 1.0, %v16541_v4 }
 0x2ca   :  { %v11912_v27 = vpop.permute.xlu0 %1377  ;;  %v11914_v44 = vpop.permute.xlu1 %1365  ;;  %1639 = vbcast.lane.b32.xlu1 %v16607_v20, 328  ;;  %v8565_v20 = vsel %vm3956_vm3, 1.0, %v16541_v4 }
 0x2cb   :  { %1646 = vbcast.lane.b32.xlu0 %v16610_v31, 256  ;;  %v6480_v1 = vadd.f32 %v8565_v20, %v8564_v37  ;;  %vm3960_vm2 = vcmp.eq.s32.totalorder %v11914_v44, %v9821_v11 }
 0x2cc   :  { %v8569_v45 = vsel %vm3960_vm2, 1.0, %v16541_v4 }
 0x2cd   :  { %v6481_v25 = vadd.f32 %v8566_v56, %v6480_v1 }
 0x2ce   :  { %v11918_v35 = vpop.permute.xlu0 %1388  ;;  %v11920_v2 = vpop.permute.xlu1 %1373  ;;  %1650 = vbcast.lane.b32.xlu1 %v16610_v31, 264 }
 0x2cf   :  { %1654 = vbcast.lane.b32.xlu0 %v16610_v31, 272  ;;  %vm3965_vm1 = vcmp.eq.s32.totalorder %v11918_v35, %v9821_v11  ;;  %v6482_v60 = vadd.f32 %v8567_v59, %v6481_v25 }
 0x2d0   :  { %v8574_v35 = vsel %vm3965_vm1, 1.0, %v16541_v4 }
 0x2d2   :  { %v11924_v42 = vpop.permute.xlu0 %1396  ;;  %v11926_v14 = vpop.permute.xlu1 %1381  ;;  %1658 = vbcast.lane.b32.xlu1 %v16610_v31, 280 }
 0x2d3   :  { %1662 = vbcast.lane.b32.xlu0 %v16610_v31, 288  ;;  %vm3967_vm3 = vcmp.eq.s32.totalorder %v11924_v42, %v9821_v11 }
 0x2d4   :  { %v8576_v42 = vsel %vm3967_vm3, 1.0, %v16541_v4  ;;  %vm3962_vm3 = vcmp.eq.s32.totalorder %v11920_v2, %v9821_v11 }
 0x2d6   :  { %v11930_v55 = vpop.permute.xlu0 %1404  ;;  %v11932_v38 = vpop.permute.xlu1 %1392  ;;  %1666 = vbcast.lane.b32.xlu1 %v16610_v31, 296 }
 0x2d7   :  { %1670 = vbcast.lane.b32.xlu0 %v16610_v31, 304  ;;  %vm3966_vm4 = vcmp.eq.s32.totalorder %v11932_v38, %v9821_v11  ;;  %vm3969_vm15 = vcmp.eq.s32.totalorder %v11930_v55, %v9821_v11  ;;  %v8562_v55 = vsel %vm3953_vm13, 1.0, %v16541_v4 }
 0x2d8   :  { %v8575_v38 = vsel %vm3966_vm4, 1.0, %v16541_v4 }
 0x2d9   :  { %v6495_v37 = vadd.f32 %v8575_v38, %v8574_v35 }
 0x2da   :  { %v11936_v40 = vpop.permute.xlu0 %1412  ;;  %v11938_v58 = vpop.permute.xlu1 %1400  ;;  %1674 = vbcast.lane.b32.xlu1 %v16610_v31, 312 }
 0x2db   :  { %1678 = vbcast.lane.b32.xlu0 %v16610_v31, 320  ;;  %vm3968_vm10 = vcmp.eq.s32.totalorder %v11938_v58, %v9821_v11  ;;  %v6496_v1 = vadd.f32 %v8576_v42, %v6495_v37 }
 0x2de   :  { %v11942_v16 = vpop.permute.xlu0 %1420  ;;  %v11944_v9 = vpop.permute.xlu1 %1408  ;;  %1682 = vbcast.lane.b32.xlu1 %v16610_v31, 328  ;;  %v6468_v31 = vadd.f32 %v8558_v7, %v6467_v3  ;;  %v8577_v3 = vsel %vm3968_vm10, 1.0, %v16541_v4 }
 0x2df   :  { %1689 = vbcast.lane.b32.xlu0 %v16611_v49, 256 }
 0x2e0   :  { %v6469_v33 = vadd.f32 %v8559_v51, %v6468_v31  ;;  %v6497_v31 = vadd.f32 %v8577_v3, %v6496_v1 }
 0x2e2   :  { %v11948_v0 = vpop.permute.xlu0 %1431  ;;  %v11950_v6 = vpop.permute.xlu1 %1416  ;;  %1693 = vbcast.lane.b32.xlu1 %v16611_v49, 264  ;;  %v6470_v44 = vadd.f32 %v8560_v5, %v6469_v33  ;;  %v8578_v33 = vsel %vm3969_vm15, 1.0, %v16541_v4 }
 0x2e3   :  { %1697 = vbcast.lane.b32.xlu0 %v16611_v49, 272  ;;  %vm3975_vm14 = vcmp.eq.s32.totalorder %v11948_v0, %v9821_v11 }
 0x2e4   :  { %v6471_v56 = vadd.f32 %v8561_v34, %v6470_v44 }
 0x2e6   :  { %v11954_v63 = vpop.permute.xlu0 %1439  ;;  %v11956_v43 = vpop.permute.xlu1 %1424  ;;  %1701 = vbcast.lane.b32.xlu1 %v16611_v49, 280 }
 0x2e7   :  { %1705 = vbcast.lane.b32.xlu0 %v16611_v49, 288  ;;  %vm3977_vm12 = vcmp.eq.s32.totalorder %v11954_v63, %v9821_v11 }
 0x2e8   :  { %v8586_v2 = vsel %vm3977_vm12, 1.0, %v16541_v4 }
 0x2ea   :  { %v11960_v62 = vpop.permute.xlu0 %1447  ;;  %v11962_v12 = vpop.permute.xlu1 %1435  ;;  %1709 = vbcast.lane.b32.xlu1 %v16611_v49, 296 }
 0x2eb   :  { %1713 = vbcast.lane.b32.xlu0 %v16611_v49, 304  ;;  %vm3979_vm15 = vcmp.eq.s32.totalorder %v11960_v62, %v9821_v11 }
 0x2ee   :  { %v11966_v23 = vpop.permute.xlu0 %1455  ;;  %v11968_v8 = vpop.permute.xlu1 %1443  ;;  %1717 = vbcast.lane.b32.xlu1 %v16611_v49, 312 }
 0x2ef   :  { %1721 = vbcast.lane.b32.xlu0 %v16611_v49, 320  ;;  %v11972_v32 = vpop.f32.mrb[0].mxu0 }
 0x2f0   :  { %16612 = vst [vmem:[#allocation5_spill] sm:$0xff] %v11972_v32  ;;  %v11974_v28 = vpop.f32.mrb[1].mxu0 }
 0x2f1   :  { %16613 = vst [vmem:[#allocation6_spill] sm:$0xff] %v11974_v28 }
 0x2f2   :  { %v11976_v48 = vpop.permute.xlu0 %1463  ;;  %v11978_v17 = vpop.permute.xlu1 %1451  ;;  %1725 = vbcast.lane.b32.xlu1 %v16611_v49, 328 }
 0x2f3   :  { %1732 = vbcast.lane.b32.xlu0 %v16614_v26, 256 }
 0x2f6   :  { %v11982_v18 = vpop.permute.xlu0 %1474  ;;  %v11984_v15 = vpop.permute.xlu1 %1459  ;;  %1736 = vbcast.lane.b32.xlu1 %v16614_v26, 264 }
 0x2f7   :  { %1740 = vbcast.lane.b32.xlu0 %v16614_v26, 272  ;;  %vm3985_vm1 = vcmp.eq.s32.totalorder %v11982_v18, %v9821_v11  ;;  %v8584_v18 = vsel %vm3975_vm14, 1.0, %v16541_v4 }
 0x2f8   :  { %v8594_v25 = vsel %vm3985_vm1, 1.0, %v16541_v4  ;;  %vm3970_vm1 = vcmp.eq.s32.totalorder %v11944_v9, %v9821_v11 }
 0x2fa   :  { %v11992_v39 = vpop.permute.xlu0 %1482  ;;  %v11994_v13 = vpop.permute.xlu1 %1467  ;;  %1744 = vbcast.lane.b32.xlu1 %v16614_v26, 280 }
 0x2fb   :  { %1748 = vbcast.lane.b32.xlu0 %v16614_v26, 288  ;;  %vm3987_vm10 = vcmp.eq.s32.totalorder %v11992_v39, %v9821_v11  ;;  %v8579_v39 = vsel %vm3970_vm1, 1.0, %v16541_v4  ;;  %vm3980_vm1 = vcmp.eq.s32.totalorder %v11978_v17, %v9821_v11 }
 0x2fe   :  { %v12002_v30 = vpop.permute.xlu0 %1490  ;;  %v12004_v47 = vpop.permute.xlu1 %1478  ;;  %1752 = vbcast.lane.b32.xlu1 %v16614_v26, 296 }
 0x2ff   :  { %1756 = vbcast.lane.b32.xlu0 %v16614_v26, 304  ;;  %vm3986_vm4 = vcmp.eq.s32.totalorder %v12004_v47, %v9821_v11  ;;  %vm3989_vm12 = vcmp.eq.s32.totalorder %v12002_v30, %v9821_v11 }
 0x302   :  { %v12015_v50 = vpop.permute.xlu0 %1498  ;;  %v12019_v29 = vpop.permute.xlu1 %1486  ;;  %1760 = vbcast.lane.b32.xlu1 %v16614_v26, 312 }
 0x303   :  { %1764 = vbcast.lane.b32.xlu0 %v16614_v26, 320 }
 0x306   :  { %v12028_v10 = vpop.permute.xlu0 %1506  ;;  %v12031_v36 = vpop.permute.xlu1 %1494  ;;  %1768 = vbcast.lane.b32.xlu1 %v16614_v26, 328  ;;  %v8568_v26 = vsel %vm3959_vm11, 1.0, %v16541_v4  ;;  %vm3976_vm11 = vcmp.eq.s32.totalorder %v11962_v12, %v9821_v11 }
 0x307   :  { %1775 = vbcast.lane.b32.xlu0 %v16615_v21, 256  ;;  %v6483_v57 = vadd.f32 %v8568_v26, %v6482_v60  ;;  %v8585_v47 = vsel %vm3976_vm11, 1.0, %v16541_v4  ;;  %v16616_v60 = vld [vmem:[#allocation21_spill] sm:$0xff]  ;;  %v8571_v26 = vsel %vm3962_vm3, 1.0, %v16541_v4  ;;  %vm3963_vm11 = vcmp.eq.s32.totalorder %v11912_v27, %v9821_v11 }
 0x308   :  { %v6510_v35 = vadd.f32 %v8585_v47, %v8584_v18  ;;  %v8572_v46 = vsel %vm3963_vm11, 1.0, %v16541_v4  ;;  %vm3964_vm3 = vcmp.eq.s32.totalorder %v11926_v14, %v9821_v11  ;;  %vm3972_vm11 = vcmp.eq.s32.totalorder %v11950_v6, %v9821_v11 }
 0x309   :  { %v6484_v54 = vadd.f32 %v8569_v45, %v6483_v57  ;;  %v6498_v45 = vadd.f32 %v8578_v33, %v6497_v31  ;;  %v12202_v30 = vsel %vm3964_vm3, 1.0, %v16541_v4 }
 0x30a   :  { %v12040_v19 = vpop.permute.xlu0 %1517  ;;  %v12043_v52 = vpop.permute.xlu1 %1502  ;;  %1779 = vbcast.lane.b32.xlu1 %v16615_v21, 264 }
 0x30b   :  { %1783 = vbcast.lane.b32.xlu0 %v16615_v21, 272  ;;  %vm3995_vm9 = vcmp.eq.s32.totalorder %v12040_v19, %v9821_v11  ;;  %v6485_v7 = vadd.f32 %v8570_v41, %v6484_v54  ;;  %v8595_v19 = vsel %vm3986_vm4, 1.0, %v16541_v4  ;;  %vm3978_vm4 = vcmp.eq.s32.totalorder %v11968_v8, %v9821_v11 }
 0x30c   :  { %v8604_v0 = vsel %vm3995_vm9, 1.0, %v16541_v4  ;;  %vm3988_vm9 = vcmp.eq.s32.totalorder %v12019_v29, %v9821_v11  ;;  %v12172_v29 = vadd.f32 %v8562_v55, %v6471_v56  ;;  %v8587_v44 = vsel %vm3978_vm4, 1.0, %v16541_v4 }
 0x30d   :  { %v6486_v57 = vadd.f32 %v8571_v26, %v6485_v7  ;;  %v8597_v9 = vsel %vm3988_vm9, 1.0, %v16541_v4  ;;  %v6499_v41 = vadd.f32 %v8579_v39, %v6498_v45  ;;  %v8588_v56 = vsel %vm3979_vm15, 1.0, %v16541_v4 }
 0x30e   :  { %v12056_v49 = vpop.permute.xlu0 %1525  ;;  %v12059_v24 = vpop.permute.xlu1 %1510  ;;  %1787 = vbcast.lane.b32.xlu1 %v16615_v21, 280  ;;  %vm3990_vm9 = vcmp.eq.s32.totalorder %v12031_v36, %v9821_v11  ;;  %v8589_v36 = vsel %vm3980_vm1, 1.0, %v16541_v4  ;;  %vm3954_vm1 = vcmp.eq.s32.totalorder %v11896_v53, %v9821_v11 }
 0x30f   :  { %1791 = vbcast.lane.b32.xlu0 %v16615_v21, 288  ;;  %vm3997_vm14 = vcmp.eq.s32.totalorder %v12056_v49, %v9821_v11  ;;  %v8596_v49 = vsel %vm3987_vm10, 1.0, %v16541_v4  ;;  %v12185_v54 = vadd.f32 %v8572_v46, %v6486_v57  ;;  %v8599_v26 = vsel %vm3990_vm9, 1.0, %v16541_v4 }
 0x310   :  { %v8606_v63 = vsel %vm3997_vm14, 1.0, %v16541_v4  ;;  %vm3973_vm9 = vcmp.eq.s32.totalorder %v11942_v16, %v9821_v11 }
 0x312   :  { %v12072_v22 = vpop.permute.xlu0 %1533  ;;  %v1522_v20 = vpop.permute.xlu1 %1521  ;;  %1795 = vbcast.lane.b32.xlu1 %v16615_v21, 296 }
 0x313   :  { %1799 = vbcast.lane.b32.xlu0 %v16615_v21, 304  ;;  %vm3996_vm2 = vcmp.eq.s32.totalorder %v1522_v20, %v9821_v11  ;;  %v6511_v20 = vadd.f32 %v8586_v2, %v6510_v35  ;;  %vm3999_vm10 = vcmp.eq.s32.totalorder %v12072_v22, %v9821_v11  ;;  %v8598_v22 = vsel %vm3989_vm12, 1.0, %v16541_v4 }
 0x314   :  { %v8605_v51 = vsel %vm3996_vm2, 1.0, %v16541_v4  ;;  %vm3971_vm2 = vcmp.eq.s32.totalorder %v11936_v40, %v9821_v11  ;;  %v8608_v7 = vsel %vm3999_vm10, 1.0, %v16541_v4  ;;  %vm3991_vm12 = vcmp.eq.s32.totalorder %v12015_v50, %v9821_v11 }
 0x315   :  { %v6540_v38 = vadd.f32 %v8605_v51, %v8604_v0  ;;  %v8580_v1 = vsel %vm3971_vm2, 1.0, %v16541_v4 }
 0x316   :  { %v12089_v61 = vpop.permute.xlu0 %1541  ;;  %v1530_v58 = vpop.permute.xlu1 %1529  ;;  %1803 = vbcast.lane.b32.xlu1 %v16615_v21, 312  ;;  %v6500_v47 = vadd.f32 %v8580_v1, %v6499_v41 }
 0x317   :  { %1807 = vbcast.lane.b32.xlu0 %v16615_v21, 320  ;;  %vm3998_vm13 = vcmp.eq.s32.totalorder %v1530_v58, %v9821_v11  ;;  %v6541_v42 = vadd.f32 %v8606_v63, %v6540_v38  ;;  %v6512_v58 = vadd.f32 %v8587_v44, %v6511_v20  ;;  %vm4001_vm10 = vcmp.eq.s32.totalorder %v12089_v61, %v9821_v11  ;;  %v16617_v44 = vld [vmem:[#allocation22_spill] sm:$0xff] }
 0x318   :  { %v8607_v40 = vsel %vm3998_vm13, 1.0, %v16541_v4  ;;  %vm3981_vm13 = vcmp.eq.s32.totalorder %v11966_v23, %v9821_v11  ;;  %v8610_v39 = vsel %vm4001_vm10, 1.0, %v16541_v4  ;;  %vm3993_vm10 = vcmp.eq.s32.totalorder %v12028_v10, %v9821_v11 }
 0x319   :  { %v6542_v18 = vadd.f32 %v8607_v40, %v6541_v42  ;;  %v8590_v17 = vsel %vm3981_vm13, 1.0, %v16541_v4  ;;  %vm3992_vm13 = vcmp.eq.s32.totalorder %v12043_v52, %v9821_v11 }
 0x31a   :  { %v12118_v59 = vpop.permute.xlu0 %1549  ;;  %v12124_v12 = vpop.permute.xlu1 %1537  ;;  %1811 = vbcast.lane.b32.xlu1 %v16615_v21, 328  ;;  %v6525_v21 = vadd.f32 %v8595_v19, %v8594_v25  ;;  %v6513_v19 = vadd.f32 %v8588_v56, %v6512_v58 }
 0x31b   :  { %1818 = vbcast.lane.b32.xlu0 %v16616_v60, 256  ;;  %vm4000_vm2 = vcmp.eq.s32.totalorder %v12124_v12, %v9821_v11  ;;  %v6543_v33 = vadd.f32 %v8608_v7, %v6542_v18  ;;  %v8581_v12 = vsel %vm3972_vm11, 1.0, %v16541_v4  ;;  %vm3982_vm11 = vcmp.eq.s32.totalorder %v11984_v15, %v9821_v11 }
 0x31c   :  { %v6526_v27 = vadd.f32 %v8596_v49, %v6525_v21  ;;  %v8609_v2 = vsel %vm4000_vm2, 1.0, %v16541_v4  ;;  %v6514_v55 = vadd.f32 %v8589_v36, %v6513_v19  ;;  %v6501_v46 = vadd.f32 %v8581_v12, %v6500_v47  ;;  %v16618_v12 = vld [vmem:[#allocation25_spill] sm:$0xff] }
 0x31d   :  { %v6544_v57 = vadd.f32 %v8609_v2, %v6543_v33  ;;  %v8591_v52 = vsel %vm3982_vm11, 1.0, %v16541_v4  ;;  %v8582_v15 = vsel %vm3973_vm9, 1.0, %v16541_v4  ;;  %vm3984_vm9 = vcmp.eq.s32.totalorder %v11994_v13, %v9821_v11 }
 0x31e   :  { %v1561_v5 = vpop.permute.xlu0 %1560  ;;  %v12159_v37 = vpop.permute.xlu1 %1545  ;;  %1822 = vbcast.lane.b32.xlu1 %v16616_v60, 264  ;;  %v6527_v3 = vadd.f32 %v8597_v9, %v6526_v27  ;;  %v6515_v27 = vadd.f32 %v8590_v17, %v6514_v55  ;;  %v6502_v18 = vadd.f32 %v8582_v15, %v6501_v46  ;;  %v8593_v36 = vsel %vm3984_vm9, 1.0, %v16541_v4 }
 0x31f   :  { %1826 = vbcast.lane.b32.xlu0 %v16616_v60, 272  ;;  %vm4005_vm14 = vcmp.eq.s32.totalorder %v1561_v5, %v9821_v11  ;;  %v8600_v5 = vsel %vm3991_vm12, 1.0, %v16541_v4  ;;  %vm4002_vm2 = vcmp.eq.s32.totalorder %v12159_v37, %v9821_v11  ;;  %v6545_v37 = vadd.f32 %v8610_v39, %v6544_v57 }
 0x320   :  { %v8614_v25 = vsel %vm4005_vm14, 1.0, %v16541_v4  ;;  %v6528_v31 = vadd.f32 %v8598_v22, %v6527_v3  ;;  %vm3974_vm12 = vcmp.eq.s32.totalorder %v11956_v43, %v9821_v11  ;;  %v8611_v1 = vsel %vm4002_vm2, 1.0, %v16541_v4 }
 0x321   :  { %v6516_v56 = vadd.f32 %v8591_v52, %v6515_v27  ;;  %v8583_v7 = vsel %vm3974_vm12, 1.0, %v16541_v4 }
 0x322   :  { %v1569_v34 = vpop.permute.xlu0 %1568  ;;  %v12190_v8 = vpop.permute.xlu1 %1553  ;;  %1830 = vbcast.lane.b32.xlu1 %v16616_v60, 280  ;;  %v6529_v49 = vadd.f32 %v8599_v26, %v6528_v31  ;;  %v6503_v33 = vadd.f32 %v8583_v7, %v6502_v18 }
 0x323   :  { %1834 = vbcast.lane.b32.xlu0 %v16616_v60, 288  ;;  %vm4007_vm4 = vcmp.eq.s32.totalorder %v1569_v34, %v9821_v11  ;;  %vm4004_vm2 = vcmp.eq.s32.totalorder %v12190_v8, %v9821_v11  ;;  %v6488_v8 = vadd.f32 %v12202_v30, %v12185_v54 }
 0x324   :  { %v8616_v0 = vsel %vm4007_vm4, 1.0, %v16541_v4  ;;  %v6530_v42 = vadd.f32 %v8600_v5, %v6529_v49  ;;  %v8613_v53 = vsel %vm4004_vm2, 1.0, %v16541_v4  ;;  %v6504_v5 = vrot.slane %v6503_v33, 4 }
 0x326   :  { %v1577_v14 = vpop.permute.xlu0 %1576  ;;  %v1565_v62 = vpop.permute.xlu1 %1564  ;;  %1838 = vbcast.lane.b32.xlu1 %v16616_v60, 296 }
 0x327   :  { %1842 = vbcast.lane.b32.xlu0 %v16616_v60, 304  ;;  %vm4006_vm3 = vcmp.eq.s32.totalorder %v1565_v62, %v9821_v11  ;;  %vm4009_vm15 = vcmp.eq.s32.totalorder %v1577_v14, %v9821_v11  ;;  %v8602_v14 = vsel %vm3993_vm10, 1.0, %v16541_v4 }
 0x328   :  { %v8615_v51 = vsel %vm4006_vm3, 1.0, %v16541_v4  ;;  %v8618_v50 = vsel %vm4009_vm15, 1.0, %v16541_v4  ;;  %vm3983_vm15 = vcmp.eq.s32.totalorder %v11976_v48, %v9821_v11 }
 0x329   :  { %v6555_v23 = vadd.f32 %v8615_v51, %v8614_v25  ;;  %v8592_v3 = vsel %vm3983_vm15, 1.0, %v16541_v4 }
 0x32a   :  { %v1585_v35 = vpop.permute.xlu0 %1584  ;;  %v1573_v21 = vpop.permute.xlu1 %1572  ;;  %1846 = vbcast.lane.b32.xlu1 %v16616_v60, 312  ;;  %v6517_v19 = vadd.f32 %v8592_v3, %v6516_v56 }
 0x32b   :  { %1850 = vbcast.lane.b32.xlu0 %v16616_v60, 320  ;;  %vm4008_vm14 = vcmp.eq.s32.totalorder %v1573_v21, %v9821_v11  ;;  %v6556_v6 = vadd.f32 %v8616_v0, %v6555_v23  ;;  %vm4011_vm4 = vcmp.eq.s32.totalorder %v1585_v35, %v9821_v11 }
 0x32c   :  { %v8617_v38 = vsel %vm4008_vm14, 1.0, %v16541_v4  ;;  %v8620_v61 = vsel %vm4011_vm4, 1.0, %v16541_v4  ;;  %vm4003_vm14 = vcmp.eq.s32.totalorder %v12118_v59, %v9821_v11  ;;  %v6546_v59 = vadd.f32 %v8611_v1, %v6545_v37 }
 0x32d   :  { %v6557_v45 = vadd.f32 %v8617_v38, %v6556_v6  ;;  %v8612_v48 = vsel %vm4003_vm14, 1.0, %v16541_v4  ;;  %v6518_v54 = vadd.f32 %v8593_v36, %v6517_v19  ;;  %v6489_v6 = vrot.slane %v6488_v8, 4 }
 0x32e   :  { %v1593_v63 = vpop.permute.xlu0 %1592  ;;  %v1581_v20 = vpop.permute.xlu1 %1580  ;;  %1854 = vbcast.lane.b32.xlu1 %v16616_v60, 328  ;;  %v8601_v60 = vsel %vm3992_vm13, 1.0, %v16541_v4  ;;  %vm3994_vm13 = vcmp.eq.s32.totalorder %v12059_v24, %v9821_v11  ;;  %v8563_v24 = vsel %vm3954_vm1, 1.0, %v16541_v4  ;;  %v6547_v51 = vadd.f32 %v8612_v48, %v6546_v59 }
 0x32f   :  { %1861 = vbcast.lane.b32.xlu0 %v16617_v44, 256  ;;  %vm4010_vm3 = vcmp.eq.s32.totalorder %v1581_v20, %v9821_v11  ;;  %v6558_v9 = vadd.f32 %v8618_v50, %v6557_v45  ;;  %v6531_v10 = vadd.f32 %v8601_v60, %v6530_v42  ;;  %vm4013_vm4 = vcmp.eq.s32.totalorder %v1593_v63, %v9821_v11 }
 0x330   :  { %v8619_v34 = vsel %vm4010_vm3, 1.0, %v16541_v4  ;;  %v8622_v43 = vsel %vm4013_vm4, 1.0, %v16541_v4  ;;  %v8603_v0 = vsel %vm3994_vm13, 1.0, %v16541_v4  ;;  %v6473_v17 = vadd.f32 %v8563_v24, %v12172_v29  ;;  %v16619_v29 = vld [vmem:[#allocation26_spill] sm:$0xff] }
 0x331   :  { %v6559_v41 = vadd.f32 %v8619_v34, %v6558_v9  ;;  %v6532_v31 = vadd.f32 %v8602_v14, %v6531_v10  ;;  %v6548_v49 = vadd.f32 %v8613_v53, %v6547_v51  ;;  %v6519_v46 = vrot.slane %v6518_v54, 4  ;;  %v16621_v53 = vld [vmem:[#allocation28_spill] sm:$0xff] }
 0x332   :  { %v1604_v40 = vpop.permute.xlu0 %1603  ;;  %v1589_v58 = vpop.permute.xlu1 %1588  ;;  %1865 = vbcast.lane.b32.xlu1 %v16617_v44, 264  ;;  %v6474_v63 = vrot.slane %v6473_v17, 4  ;;  %v6490_v52 = vadd.f32 %v6489_v6, %v6488_v8  ;;  %v6505_v60 = vadd.f32 %v6504_v5, %v6503_v33 }
 0x333   :  { %1869 = vbcast.lane.b32.xlu0 %v16617_v44, 272  ;;  %vm4012_vm11 = vcmp.eq.s32.totalorder %v1589_v58, %v9821_v11  ;;  %v6560_v16 = vadd.f32 %v8620_v61, %v6559_v41  ;;  %vm4015_vm3 = vcmp.eq.s32.totalorder %v1604_v40, %v9821_v11  ;;  %v6533_v2 = vadd.f32 %v8603_v0, %v6532_v31  ;;  %v16620_v40 = vld [vmem:[#allocation27_spill] sm:$0xff] }
 0x334   :  { %v8621_v22 = vsel %vm4012_vm11, 1.0, %v16541_v4  ;;  %v8624_v23 = vsel %vm4015_vm3, 1.0, %v16541_v4  ;;  %v6549_v42 = vrot.slane %v6548_v49, 4  ;;  %v6475_v15 = vadd.f32 %v6474_v63, %v6473_v17 }
 0x335   :  { %v6561_v25 = vadd.f32 %v8621_v22, %v6560_v16  ;;  %v6534_v20 = vrot.slane %v6533_v2, 4  ;;  %v6520_v1 = vadd.f32 %v6519_v46, %v6518_v54  ;;  %v6491_v10 = vrot.slane %v6490_v52, 2 }
 0x336   :  { %v1612_v47 = vpop.permute.xlu0 %1611  ;;  %v1597_v62 = vpop.permute.xlu1 %1596  ;;  %1873 = vbcast.lane.b32.xlu1 %v16617_v44, 280  ;;  %v6550_v22 = vadd.f32 %v6549_v42, %v6548_v49  ;;  %v6506_v59 = vrot.slane %v6505_v60, 2  ;;  %v6476_v48 = vrot.slane %v6475_v15, 2  ;;  %vm16624_vm3 = vcmask 1046534  }
 0x337   :  { %1877 = vbcast.lane.b32.xlu0 %v16617_v44, 288  ;;  %vm4014_vm15 = vcmp.eq.s32.totalorder %v1597_v62, %v9821_v11  ;;  %vm4017_vm12 = vcmp.eq.s32.totalorder %v1612_v47, %v9821_v11  ;;  %v6562_v35 = vadd.f32 %v8622_v43, %v6561_v25  ;;  %v6535_v56 = vadd.f32 %v6534_v20, %v6533_v2 }
 0x338   :  { %v8623_v30 = vsel %vm4014_vm15, 1.0, %v16541_v4  ;;  %v8626_v21 = vsel %vm4017_vm12, 1.0, %v16541_v4  ;;  %v6521_v25 = vrot.slane %v6520_v1, 2  ;;  %v6492_v36 = vadd.f32 %v6491_v10, %v6490_v52 }
 0x339   :  { %v6563_v57 = vadd.f32 %v8623_v30, %v6562_v35  ;;  %v6536_v19 = vrot.slane %v6535_v56, 2  ;;  %v6551_v31 = vrot.slane %v6550_v22, 2  ;;  %v6507_v51 = vadd.f32 %v6506_v59, %v6505_v60 }
 0x33a   :  { %v1620_v26 = vpop.permute.xlu0 %1619  ;;  %v1608_v13 = vpop.permute.xlu1 %1607  ;;  %1990 = vbcast.lane.b32.xlu1 %v16618_v12, 256  ;;  %v6522_v35 = vadd.f32 %v6521_v25, %v6520_v1  ;;  %v6493_v30 = vrot.slane %v6492_v36, 1  ;;  %vm16625_vm15 = vcmask 1047559  }
 0x33b   :  { %1994 = vbcast.lane.b32.xlu0 %v16618_v12, 264  ;;  %vm4016_vm1 = vcmp.eq.s32.totalorder %v1608_v13, %v9821_v11  ;;  %vm4019_vm10 = vcmp.eq.s32.totalorder %v1620_v26, %v9821_v11  ;;  %v6564_v37 = vrot.slane %v6563_v57, 4  ;;  %v6537_v17 = vadd.f32 %v6536_v19, %v6535_v56 }
 0x33c   :  { %v8625_v55 = vsel %vm4016_vm1, 1.0, %v16541_v4  ;;  %v8628_v27 = vsel %vm4019_vm10, 1.0, %v16541_v4  ;;  %v6552_v2 = vadd.f32 %v6551_v31, %v6550_v22  ;;  %v6508_v6 = vrot.slane %v6507_v51, 1 }
 0x33d   :  { %v6570_v50 = vadd.f32 %v8625_v55, %v8624_v23  ;;  %v6565_v47 = vadd.f32 %v6564_v37, %v6563_v57  ;;  %v6477_v23 = vadd.f32 %v6476_v48, %v6475_v15  ;;  %v6523_v57 = vrot.slane %v6522_v35, 1 }
 0x33e   :  { %v1628_v38 = vpop.permute.xlu0 %1627  ;;  %v1616_v45 = vpop.permute.xlu1 %1615  ;;  %2033 = vbcast.lane.b32.xlu1 %v16619_v29, 256  ;;  %v6538_v63 = vrot.slane %v6537_v17, 1  ;;  %v6494_v46 = vadd.f32 %v6493_v30, %v6492_v36  ;;  %v16626_v36 = vld [vmem:[#allocation30_spill] sm:$0xff] }
 0x33f   :  { %2037 = vbcast.lane.b32.xlu0 %v16619_v29, 264  ;;  %vm4018_vm14 = vcmp.eq.s32.totalorder %v1616_v45, %v9821_v11  ;;  %v6571_v39 = vadd.f32 %v8626_v21, %v6570_v50  ;;  %vm4021_vm11 = vcmp.eq.s32.totalorder %v1628_v38, %v9821_v11  ;;  %v6566_v26 = vrot.slane %v6565_v47, 2  ;;  %v16622_v38 = vld [vmem:[#allocation29_spill] sm:$0xff] }
 0x340   :  { %v8627_v9 = vsel %vm4018_vm14, 1.0, %v16541_v4  ;;  %v8630_v16 = vsel %vm4021_vm11, 1.0, %v16541_v4  ;;  %v6478_v5 = vrot.slane %v6477_v23, 1  ;;  %v6524_v60 = vadd.f32 %v6523_v57, %v6522_v35 }
 0x341   :  { %v6572_v61 = vadd.f32 %v8627_v9, %v6571_v39  ;;  %v6567_v49 = vadd.f32 %v6566_v26, %v6565_v47  ;;  %v6553_v39 = vrot.slane %v6552_v2, 1  ;;  %v6509_v9 = vadd.f32 %v6508_v6, %v6507_v51  ;;  %v16627_v51 = vld [vmem:[#allocation24_spill] sm:$0xff] }
 0x342   :  { %v1636_v34 = vpop.permute.xlu0 %1635  ;;  %v1624_v41 = vpop.permute.xlu1 %1623  ;;  %2076 = vbcast.lane.b32.xlu1 %v16620_v40, 256 }
 0x343   :  { %2080 = vbcast.lane.b32.xlu0 %v16620_v40, 264  ;;  %vm4020_vm4 = vcmp.eq.s32.totalorder %v1624_v41, %v9821_v11  ;;  %v6573_v58 = vadd.f32 %v8628_v27, %v6572_v61  ;;  %vm4023_vm9 = vcmp.eq.s32.totalorder %v1636_v34, %v9821_v11  ;;  %v6568_v52 = vrot.slane %v6567_v49, 1  ;;  %v16623_v61 = vld [vmem:[#allocation23_spill] sm:$0xff] }
 0x344   :  { %v8629_v3 = vsel %vm4020_vm4, 1.0, %v16541_v4  ;;  %v8632_v43 = vsel %vm4023_vm9, 1.0, %v16541_v4  ;;  %v6479_v34 = vadd.f32 %v6478_v5, %v6477_v23  ;;  %v6539_v41 = vadd.f32 %v6538_v63, %v6537_v17 }
 0x345   :  { %v6574_v18 = vadd.f32 %v8629_v3, %v6573_v58  ;;  %v6554_v1 = vadd.f32 %v6553_v39, %v6552_v2  ;;  %v6569_v3 = vadd.f32 %v6568_v52, %v6567_v49  ;;  %v16629_v49 = vld [vmem:[#allocation32_spill] sm:$0xff] }
 0x346   :  { %v12353_v14 = vpop.permute.xlu0 %1646  ;;  %v1632_v7 = vpop.permute.xlu1 %1631  ;;  %1998 = vbcast.lane.b32.xlu1 %v16618_v12, 272  ;;  %v7429_v15 = vsel %vm7401_vm0, %v6494_v46, %v6479_v34 }
 0x347   :  { %2041 = vbcast.lane.b32.xlu0 %v16619_v29, 272  ;;  %vm4022_vm13 = vcmp.eq.s32.totalorder %v1632_v7, %v9821_v11  ;;  %v6575_v62 = vadd.f32 %v8630_v16, %v6574_v18  ;;  %v7430_v10 = vsel %vm7403_vm5, %v6509_v9, %v7429_v15  ;;  %vm4025_vm11 = vcmp.eq.s32.totalorder %v12353_v14, %v9821_v11 }
 0x348   :  { %v8631_v24 = vsel %vm4022_vm13, 1.0, %v16541_v4  ;;  %v7431_v18 = vsel %vm7405_vm6, %v6524_v60, %v7430_v10 }
 0x349   :  { %v6576_v8 = vadd.f32 %v8631_v24, %v6575_v62  ;;  %v7432_v59 = vsel %vm7407_vm7, %v6539_v41, %v7431_v18 }
 0x34a   :  { %v12360_v0 = vpop.permute.xlu0 %1654  ;;  %v1640_v33 = vpop.permute.xlu1 %1639  ;;  %2119 = vbcast.lane.b32.xlu1 %v16621_v53, 256  ;;  %v7433_v48 = vsel %vm16475_vm8, %v6554_v1, %v7432_v59 }
 0x34b   :  { %2123 = vbcast.lane.b32.xlu0 %v16621_v53, 264  ;;  %vm4024_vm2 = vcmp.eq.s32.totalorder %v1640_v33, %v9821_v11  ;;  %v6577_v13 = vadd.f32 %v8632_v43, %v6576_v8  ;;  %v7434_v62 = vsel %vm16624_vm3, %v6569_v3, %v7433_v48  ;;  %vm4027_vm13 = vcmp.eq.s32.totalorder %v12360_v0, %v9821_v11 }
 0x34c   :  { %v8633_v54 = vsel %vm4024_vm2, 1.0, %v16541_v4 }
 0x34d   :  { %v6578_v21 = vadd.f32 %v8633_v54, %v6577_v13  ;;  %v16628_v13 = vld [vmem:[#allocation31_spill] sm:$0xff] }
 0x34e   :  { %v12366_v55 = vpop.permute.xlu0 %1662  ;;  %v12368_v50 = vpop.permute.xlu1 %1650  ;;  %2084 = vbcast.lane.b32.xlu1 %v16620_v40, 272 }
 0x34f   :  { %2162 = vbcast.lane.b32.xlu0 %v16622_v38, 256  ;;  %v6579_v45 = vrot.slane %v6578_v21, 4  ;;  %vm4026_vm4 = vcmp.eq.s32.totalorder %v12368_v50, %v9821_v11 }
 0x350   :  { %v8635_v50 = vsel %vm4026_vm4, 1.0, %v16541_v4 }
 0x351   :  { %v6580_v20 = vadd.f32 %v6579_v45, %v6578_v21 }
 0x352   :  { %v12372_v27 = vpop.permute.xlu0 %1670  ;;  %v12374_v42 = vpop.permute.xlu1 %1658  ;;  %2166 = vbcast.lane.b32.xlu1 %v16622_v38, 264 }
 0x353   :  { %1904 = vbcast.lane.b32.xlu0 %v16623_v61, 256  ;;  %v6581_v37 = vrot.slane %v6580_v20, 2 }
 0x355   :  { %v6582_v58 = vadd.f32 %v6581_v37, %v6580_v20 }
 0x356   :  { %v12379_v56 = vpop.permute.xlu0 %1678  ;;  %v12381_v16 = vpop.permute.xlu1 %1666  ;;  %1908 = vbcast.lane.b32.xlu1 %v16623_v61, 264 }
 0x357   :  { %2002 = vbcast.lane.b32.xlu0 %v16618_v12, 280  ;;  %v6583_v22 = vrot.slane %v6582_v58, 1 }
 0x359   :  { %v6584_v7 = vadd.f32 %v6583_v22, %v6582_v58 }
 0x35a   :  { %v12388_v47 = vpop.permute.xlu0 %1689  ;;  %v12391_v25 = vpop.permute.xlu1 %1674  ;;  %2045 = vbcast.lane.b32.xlu1 %v16619_v29, 280 }
 0x35b   :  { %2127 = vbcast.lane.b32.xlu0 %v16621_v53, 272  ;;  %v7435_v19 = vsel %vm16625_vm15, %v6584_v7, %v7434_v62  ;;  %vm4035_vm12 = vcmp.eq.s32.totalorder %v12388_v47, %v9821_v11 }
 0x35c   :  { %9353 = vmatmul.mubr.f32.gmra.mrb[2].mxu0 %v7435_v19  ;;  %v8644_v47 = vsel %vm4035_vm12, 1.0, %v16541_v4 }
 0x35e   :  { %v12397_v43 = vpop.permute.xlu0 %1697  ;;  %v12399_v24 = vpop.permute.xlu1 %1682  ;;  %2205 = vbcast.lane.b32.xlu1 %v16626_v36, 256 }
 0x35f   :  { %2209 = vbcast.lane.b32.xlu0 %v16626_v36, 264  ;;  %vm4037_vm9 = vcmp.eq.s32.totalorder %v12397_v43, %v9821_v11 }
 0x360   :  { %v8646_v0 = vsel %vm4037_vm9, 1.0, %v16541_v4  ;;  %vm4029_vm9 = vcmp.eq.s32.totalorder %v12366_v55, %v9821_v11 }
 0x362   :  { %v12403_v31 = vpop.permute.xlu0 %1705  ;;  %v12405_v8 = vpop.permute.xlu1 %1693  ;;  %1947 = vbcast.lane.b32.xlu1 %v16627_v51, 256 }
 0x363   :  { %1951 = vbcast.lane.b32.xlu0 %v16627_v51, 264  ;;  %vm4036_vm1 = vcmp.eq.s32.totalorder %v12405_v8, %v9821_v11 }
 0x364   :  { %v8645_v8 = vsel %vm4036_vm1, 1.0, %v16541_v4 }
 0x366   :  { %v12409_v26 = vpop.permute.xlu0 %1713  ;;  %v12411_v33 = vpop.permute.xlu1 %1701  ;;  %2088 = vbcast.lane.b32.xlu1 %v16620_v40, 280 }
 0x367   :  { %2170 = vbcast.lane.b32.xlu0 %v16622_v38, 272  ;;  %vm4038_vm12 = vcmp.eq.s32.totalorder %v12411_v33, %v9821_v11 }
 0x36a   :  { %v12415_v23 = vpop.permute.xlu0 %1721  ;;  %v12417_v35 = vpop.permute.xlu1 %1709  ;;  %2248 = vbcast.lane.b32.xlu1 %v16628_v13, 256 }
 0x36b   :  { %2252 = vbcast.lane.b32.xlu0 %v16628_v13, 264 }
 0x36e   :  { %v12421_v17 = vpop.permute.xlu0 %1732  ;;  %v12423_v54 = vpop.permute.xlu1 %1717  ;;  %1912 = vbcast.lane.b32.xlu1 %v16623_v61, 272 }
 0x36f   :  { %2006 = vbcast.lane.b32.xlu0 %v16618_v12, 288  ;;  %vm4045_vm10 = vcmp.eq.s32.totalorder %v12421_v17, %v9821_v11 }
 0x370   :  { %v8654_v17 = vsel %vm4045_vm10, 1.0, %v16541_v4  ;;  %vm4028_vm10 = vcmp.eq.s32.totalorder %v12374_v42, %v9821_v11 }
 0x372   :  { %v12427_v30 = vpop.permute.xlu0 %1740  ;;  %v12429_v2 = vpop.permute.xlu1 %1725  ;;  %2049 = vbcast.lane.b32.xlu1 %v16619_v29, 288 }
 0x373   :  { %2131 = vbcast.lane.b32.xlu0 %v16621_v53, 280  ;;  %vm4047_vm2 = vcmp.eq.s32.totalorder %v12427_v30, %v9821_v11 }
 0x374   :  { %v8656_v30 = vsel %vm4047_vm2, 1.0, %v16541_v4  ;;  %vm4040_vm2 = vcmp.eq.s32.totalorder %v12417_v35, %v9821_v11 }
 0x376   :  { %v12433_v21 = vpop.permute.xlu0 %1748  ;;  %v12435_v6 = vpop.permute.xlu1 %1736  ;;  %2213 = vbcast.lane.b32.xlu1 %v16626_v36, 272 }
 0x377   :  { %2291 = vbcast.lane.b32.xlu0 %v16629_v49, 256  ;;  %vm4046_vm14 = vcmp.eq.s32.totalorder %v12435_v6, %v9821_v11  ;;  %v8634_v6 = vsel %vm4025_vm11, 1.0, %v16541_v4  ;;  %vm4039_vm11 = vcmp.eq.s32.totalorder %v12403_v31, %v9821_v11  ;;  %vm4049_vm4 = vcmp.eq.s32.totalorder %v12433_v21, %v9821_v11 }
 0x378   :  { %v8655_v14 = vsel %vm4046_vm14, 1.0, %v16541_v4 }
 0x37a   :  { %v12439_v5 = vpop.permute.xlu0 %1756  ;;  %v12441_v57 = vpop.permute.xlu1 %1744  ;;  %2295 = vbcast.lane.b32.xlu1 %v16629_v49, 264 }
 0x37b   :  { %1955 = vbcast.lane.b32.xlu0 %v16627_v51, 272  ;;  %vm4048_vm1 = vcmp.eq.s32.totalorder %v12441_v57, %v9821_v11  ;;  %v8647_v57 = vsel %vm4038_vm12, 1.0, %v16541_v4 }
 0x37e   :  { %v12445_v45 = vpop.permute.xlu0 %1764  ;;  %v12447_v63 = vpop.permute.xlu1 %1752  ;;  %2092 = vbcast.lane.b32.xlu1 %v16620_v40, 288 }
 0x37f   :  { %2174 = vbcast.lane.b32.xlu0 %v16622_v38, 280 }
 0x382   :  { %v12451_v46 = vpop.permute.xlu0 %1775  ;;  %v12453_v39 = vpop.permute.xlu1 %1760  ;;  %2256 = vbcast.lane.b32.xlu1 %v16628_v13, 272 }
 0x383   :  { %1916 = vbcast.lane.b32.xlu0 %v16623_v61, 280  ;;  %vm4055_vm3 = vcmp.eq.s32.totalorder %v12451_v46, %v9821_v11  ;;  %v8636_v46 = vsel %vm4027_vm13, 1.0, %v16541_v4 }
 0x386   :  { %v12457_v20 = vpop.permute.xlu0 %1783  ;;  %v12459_v9 = vpop.permute.xlu1 %1768  ;;  %2010 = vbcast.lane.b32.xlu1 %v16618_v12, 296 }
 0x387   :  { %2053 = vbcast.lane.b32.xlu0 %v16619_v29, 296  ;;  %vm4057_vm14 = vcmp.eq.s32.totalorder %v12457_v20, %v9821_v11 }
 0x388   :  { %v8666_v20 = vsel %vm4057_vm14, 1.0, %v16541_v4  ;;  %vm4041_vm14 = vcmp.eq.s32.totalorder %v12409_v26, %v9821_v11 }
 0x38a   :  { %v12463_v52 = vpop.permute.xlu0 %1791  ;;  %v12465_v34 = vpop.permute.xlu1 %1779  ;;  %2135 = vbcast.lane.b32.xlu1 %v16621_v53, 288 }
 0x38b   :  { %2217 = vbcast.lane.b32.xlu0 %v16626_v36, 280  ;;  %vm4056_vm15 = vcmp.eq.s32.totalorder %v12465_v34, %v9821_v11  ;;  %v8664_v34 = vsel %vm4055_vm3, 1.0, %v16541_v4  ;;  %vm4050_vm3 = vcmp.eq.s32.totalorder %v12447_v63, %v9821_v11  ;;  %vm4059_vm12 = vcmp.eq.s32.totalorder %v12463_v52, %v9821_v11 }
 0x38c   :  { %v8659_v52 = vsel %vm4050_vm3, 1.0, %v16541_v4  ;;  %vm4052_vm3 = vcmp.eq.s32.totalorder %v12453_v39, %v9821_v11 }
 0x38e   :  { %v12469_v60 = vpop.permute.xlu0 %1799  ;;  %v12471_v37 = vpop.permute.xlu1 %1787  ;;  %2299 = vbcast.lane.b32.xlu1 %v16629_v49, 272 }
 0x38f   :  { %1959 = vbcast.lane.b32.xlu0 %v16627_v51, 280  ;;  %vm4058_vm13 = vcmp.eq.s32.totalorder %v12471_v37, %v9821_v11 }
 0x390   :  { %v8667_v37 = vsel %vm4058_vm13, 1.0, %v16541_v4 }
 0x392   :  { %v12475_v41 = vpop.permute.xlu0 %1807  ;;  %v12477_v15 = vpop.permute.xlu1 %1795  ;;  %2096 = vbcast.lane.b32.xlu1 %v16620_v40, 296 }
 0x393   :  { %2178 = vbcast.lane.b32.xlu0 %v16622_v38, 288 }
 0x396   :  { %v12481_v1 = vpop.permute.xlu0 %1818  ;;  %v12483_v58 = vpop.permute.xlu1 %1803  ;;  %2260 = vbcast.lane.b32.xlu1 %v16628_v13, 280 }
 0x397   :  { %1920 = vbcast.lane.b32.xlu0 %v16623_v61, 288 }
 0x39a   :  { %v12487_v3 = vpop.permute.xlu0 %1826  ;;  %v12489_v10 = vpop.permute.xlu1 %1811  ;;  %2014 = vbcast.lane.b32.xlu1 %v16618_v12, 304 }
 0x39b   :  { %16630 = vst [vmem:[#allocation7_spill] sm:$0xff] %v12489_v10  ;;  %2057 = vbcast.lane.b32.xlu0 %v16619_v29, 304  ;;  %vm4067_vm13 = vcmp.eq.s32.totalorder %v12487_v3, %v9821_v11 }
 0x39c   :  { %v8676_v3 = vsel %vm4067_vm13, 1.0, %v16541_v4  ;;  %vm4044_vm13 = vcmp.eq.s32.totalorder %v12429_v2, %v9821_v11 }
 0x39e   :  { %v12493_v22 = vpop.permute.xlu0 %1834  ;;  %v12495_v18 = vpop.permute.xlu1 %1822  ;;  %2139 = vbcast.lane.b32.xlu1 %v16621_v53, 296 }
 0x39f   :  { %2221 = vbcast.lane.b32.xlu0 %v16626_v36, 288 }
 0x3a2   :  { %v12499_v59 = vpop.permute.xlu0 %1842  ;;  %v12501_v7 = vpop.permute.xlu1 %1830  ;;  %2303 = vbcast.lane.b32.xlu1 %v16629_v49, 280 }
 0x3a3   :  { %16631 = vst [vmem:[#allocation8_spill] sm:$0xff] %v12499_v59  ;;  %1881 = vbcast.lane.b32.xlu0 %v16617_v44, 296 }
 0x3a6   :  { %v12505_v48 = vpop.permute.xlu0 %1850  ;;  %v12507_v62 = vpop.permute.xlu1 %1838  ;;  %1963 = vbcast.lane.b32.xlu1 %v16627_v51, 288 }
 0x3a7   :  { %16632 = vst [vmem:[#allocation9_spill] sm:$0xff] %v12505_v48  ;;  %2100 = vbcast.lane.b32.xlu0 %v16620_v40, 304 }
 0x3aa   :  { %v12511_v19 = vpop.permute.xlu0 %1861  ;;  %v12513_v28 = vpop.permute.xlu1 %1846  ;;  %2182 = vbcast.lane.b32.xlu1 %v16622_v38, 296 }
 0x3ab   :  { %16633 = vst [vmem:[#allocation10_spill] sm:$0xff] %v12511_v19  ;;  %16634 = vst [vmem:[#allocation11_spill] sm:$0xff] %v12513_v28  ;;  %2264 = vbcast.lane.b32.xlu0 %v16628_v13, 288 }
 0x3ae   :  { %v12517_v32 = vpop.permute.xlu0 %1869  ;;  %v12519_v59 = vpop.permute.xlu1 %1854  ;;  %1924 = vbcast.lane.b32.xlu1 %v16623_v61, 296 }
 0x3af   :  { %16635 = vst [vmem:[#allocation12_spill] sm:$0xff] %v12517_v32  ;;  %16636 = vst [vmem:[#allocation13_spill] sm:$0xff] %v12519_v59  ;;  %2018 = vbcast.lane.b32.xlu0 %v16618_v12, 312 }
 0x3b2   :  { %v12523_v48 = vpop.permute.xlu0 %1877  ;;  %v12525_v10 = vpop.permute.xlu1 %1865  ;;  %2061 = vbcast.lane.b32.xlu1 %v16619_v29, 312 }
 0x3b3   :  { %16637 = vst [vmem:[#allocation14_spill] sm:$0xff] %v12523_v48  ;;  %16638 = vst [vmem:[#allocation15_spill] sm:$0xff] %v12525_v10  ;;  %2143 = vbcast.lane.b32.xlu0 %v16621_v53, 304 }
 0x3b6   :  { %v12529_v19 = vpop.permute.xlu0 %1994  ;;  %v12531_v28 = vpop.permute.xlu1 %1873  ;;  %2225 = vbcast.lane.b32.xlu1 %v16626_v36, 296 }
 0x3b7   :  { %16639 = vst [vmem:[#allocation16_spill] sm:$0xff] %v12529_v19  ;;  %16640 = vst [vmem:[#allocation17_spill] sm:$0xff] %v12531_v28  ;;  %2307 = vbcast.lane.b32.xlu0 %v16629_v49, 288 }
 0x3ba   :  { %v12535_v32 = vpop.permute.xlu0 %2037  ;;  %v12537_v59 = vpop.permute.xlu1 %1990  ;;  %1885 = vbcast.lane.b32.xlu1 %v16617_v44, 304 }
 0x3bb   :  { %16641 = vst [vmem:[#allocation18_spill] sm:$0xff] %v12535_v32  ;;  %16642 = vst [vmem:[#allocation19_spill] sm:$0xff] %v12537_v59  ;;  %1967 = vbcast.lane.b32.xlu0 %v16627_v51, 296 }
 0x3be   :  { %v12541_v48 = vpop.permute.xlu0 %2080  ;;  %v12543_v10 = vpop.permute.xlu1 %2033  ;;  %2104 = vbcast.lane.b32.xlu1 %v16620_v40, 312 }
 0x3bf   :  { %16643 = vst [vmem:[#allocation20_spill] sm:$0xff] %v12541_v48  ;;  %16644 = vst [vmem:[#allocation21_spill] sm:$0xff] %v12543_v10  ;;  %2186 = vbcast.lane.b32.xlu0 %v16622_v38, 304 }
 0x3c2   :  { %v12547_v19 = vpop.permute.xlu0 %2041  ;;  %v12549_v28 = vpop.permute.xlu1 %2076  ;;  %2268 = vbcast.lane.b32.xlu1 %v16628_v13, 296 }
 0x3c3   :  { %16645 = vst [vmem:[#allocation22_spill] sm:$0xff] %v12547_v19  ;;  %16646 = vst [vmem:[#allocation25_spill] sm:$0xff] %v12549_v28  ;;  %1928 = vbcast.lane.b32.xlu0 %v16623_v61, 304 }
 0x3c6   :  { %v12553_v59 = vpop.permute.xlu0 %2123  ;;  %v12555_v32 = vpop.permute.xlu1 %1998  ;;  %2022 = vbcast.lane.b32.xlu1 %v16618_v12, 320 }
 0x3c7   :  { %16647 = vst [vmem:[#allocation26_spill] sm:$0xff] %v12553_v59  ;;  %16648 = vst [vmem:[#allocation27_spill] sm:$0xff] %v12555_v32  ;;  %2065 = vbcast.lane.b32.xlu0 %v16619_v29, 320 }
 0x3ca   :  { %v12559_v48 = vpop.permute.xlu0 %2162  ;;  %v12561_v10 = vpop.permute.xlu1 %2119  ;;  %2147 = vbcast.lane.b32.xlu1 %v16621_v53, 312 }
 0x3cb   :  { %16649 = vst [vmem:[#allocation28_spill] sm:$0xff] %v12559_v48  ;;  %16650 = vst [vmem:[#allocation29_spill] sm:$0xff] %v12561_v10  ;;  %2229 = vbcast.lane.b32.xlu0 %v16626_v36, 304 }
 0x3ce   :  { %v12565_v28 = vpop.permute.xlu0 %1904  ;;  %v12567_v19 = vpop.permute.xlu1 %2084  ;;  %2311 = vbcast.lane.b32.xlu1 %v16629_v49, 296 }
 0x3cf   :  { %16651 = vst [vmem:[#allocation23_spill] sm:$0xff] %v12565_v28  ;;  %16652 = vst [vmem:[#allocation30_spill] sm:$0xff] %v12567_v19  ;;  %1889 = vbcast.lane.b32.xlu0 %v16617_v44, 312 }
 0x3d2   :  { %v12571_v32 = vpop.permute.xlu0 %2002  ;;  %v12573_v59 = vpop.permute.xlu1 %2166  ;;  %1971 = vbcast.lane.b32.xlu1 %v16627_v51, 304 }
 0x3d3   :  { %16653 = vst [vmem:[#allocation24_spill] sm:$0xff] %v12571_v32  ;;  %16654 = vst [vmem:[#allocation31_spill] sm:$0xff] %v12573_v59  ;;  %2108 = vbcast.lane.b32.xlu0 %v16620_v40, 320 }
 0x3d6   :  { %v12577_v48 = vpop.permute.xlu0 %2127  ;;  %v12579_v10 = vpop.permute.xlu1 %1908  ;;  %2190 = vbcast.lane.b32.xlu1 %v16622_v38, 312 }
 0x3d7   :  { %16655 = vst [vmem:[#allocation32_spill] sm:$0xff] %v12577_v48  ;;  %16656 = vst [vmem:[#allocation83_spill] sm:$0xff] %v12579_v10  ;;  %2272 = vbcast.lane.b32.xlu0 %v16628_v13, 304 }
 0x3da   :  { %v12583_v28 = vpop.permute.xlu0 %2209  ;;  %v12585_v19 = vpop.permute.xlu1 %2045  ;;  %1932 = vbcast.lane.b32.xlu1 %v16623_v61, 312 }
 0x3db   :  { %16657 = vst [vmem:[#allocation84_spill] sm:$0xff] %v12585_v19  ;;  %2026 = vbcast.lane.b32.xlu0 %v16618_v12, 328 }
 0x3de   :  { %v12589_v59 = vpop.permute.xlu0 %1951  ;;  %v12591_v32 = vpop.permute.xlu1 %2205  ;;  %2069 = vbcast.lane.b32.xlu1 %v16619_v29, 328 }
 0x3df   :  { %16658 = vst [vmem:[#allocation85_spill] sm:$0xff] %v12589_v59  ;;  %16659 = vst [vmem:[#allocation86_spill] sm:$0xff] %v12591_v32  ;;  %2151 = vbcast.lane.b32.xlu0 %v16621_v53, 320 }
 0x3e2   :  { %v12595_v10 = vpop.permute.xlu0 %2170  ;;  %v12597_v48 = vpop.permute.xlu1 %1947  ;;  %2233 = vbcast.lane.b32.xlu1 %v16626_v36, 312 }
 0x3e3   :  { %16660 = vst [vmem:[#allocation87_spill] sm:$0xff] %v12597_v48  ;;  %2315 = vbcast.lane.b32.xlu0 %v16629_v49, 304 }
 0x3e6   :  { %v12601_v19 = vpop.permute.xlu0 %2252  ;;  %v12603_v12 = vpop.permute.xlu1 %2088  ;;  %1893 = vbcast.lane.b32.xlu1 %v16617_v44, 320 }
 0x3e7   :  { %1975 = vbcast.lane.b32.xlu0 %v16627_v51, 312 }
 0x3ea   :  { %v12607_v32 = vpop.permute.xlu0 %2006  ;;  %v12609_v59 = vpop.permute.xlu1 %2248  ;;  %2112 = vbcast.lane.b32.xlu1 %v16620_v40, 328 }
 0x3eb   :  { %2194 = vbcast.lane.b32.xlu0 %v16622_v38, 320 }
 0x3ee   :  { %v12613_v29 = vpop.permute.xlu0 %2131  ;;  %v12615_v48 = vpop.permute.xlu1 %1912  ;;  %2276 = vbcast.lane.b32.xlu1 %v16628_v13, 312 }
 0x3ef   :  { %16661 = vst [vmem:[#allocation88_spill] sm:$0xff] %v12613_v29  ;;  %16662 = vst [vmem:[#allocation89_spill] sm:$0xff] %v12615_v48  ;;  %1936 = vbcast.lane.b32.xlu0 %v16623_v61, 320  ;;  %v6585_v29 = vadd.f32 %v8635_v50, %v8634_v6  ;;  %v8657_v6 = vsel %vm4048_vm1, 1.0, %v16541_v4  ;;  %vm4065_vm1 = vcmp.eq.s32.totalorder %v12481_v1, %v9821_v11  ;;  %v8668_v1 = vsel %vm4059_vm12, 1.0, %v16541_v4 }
 0x3f0   :  { %v8674_v26 = vsel %vm4065_vm1, 1.0, %v16541_v4  ;;  %vm4061_vm12 = vcmp.eq.s32.totalorder %v12469_v60, %v9821_v11  ;;  %vm4068_vm1 = vcmp.eq.s32.totalorder %v12501_v7, %v9821_v11 }
 0x3f1   :  { %v8677_v39 = vsel %vm4068_vm1, 1.0, %v16541_v4 }
 0x3f2   :  { %v12627_v40 = vpop.permute.xlu0 %2291  ;;  %v12633_v48 = vpop.permute.xlu1 %2049  ;;  %2155 = vbcast.lane.b32.xlu1 %v16621_v53, 328 }
 0x3f3   :  { %16663 = vst [vmem:[#allocation90_spill] sm:$0xff] %v12627_v40  ;;  %16664 = vst [vmem:[#allocation91_spill] sm:$0xff] %v12633_v48  ;;  %2237 = vbcast.lane.b32.xlu0 %v16626_v36, 320  ;;  %v6600_v40 = vadd.f32 %v8645_v8, %v8644_v47  ;;  %v6615_v48 = vadd.f32 %v8655_v14, %v8654_v17  ;;  %v6586_v14 = vadd.f32 %v8636_v46, %v6585_v29 }
 0x3f4   :  { %v8648_v29 = vsel %vm4039_vm11, 1.0, %v16541_v4  ;;  %vm4031_vm11 = vcmp.eq.s32.totalorder %v12372_v27, %v9821_v11  ;;  %v16665_v27 = vld [vmem:[#allocation33_spill] sm:$0xff] }
 0x3f5   :  { %v6601_v8 = vadd.f32 %v8646_v0, %v6600_v40  ;;  %v6616_v17 = vadd.f32 %v8656_v30, %v6615_v48  ;;  %v8637_v40 = vsel %vm4028_vm10, 1.0, %v16541_v4  ;;  %v8658_v0 = vsel %vm4049_vm4, 1.0, %v16541_v4 }
 0x3f6   :  { %v12649_v53 = vpop.permute.xlu0 %1955  ;;  %v12655_v43 = vpop.permute.xlu1 %2213  ;;  %2319 = vbcast.lane.b32.xlu1 %v16629_v49, 312  ;;  %v6587_v50 = vadd.f32 %v8637_v40, %v6586_v14  ;;  %v8638_v30 = vsel %vm4029_vm9, 1.0, %v16541_v4  ;;  %vm4066_vm10 = vcmp.eq.s32.totalorder %v12495_v18, %v9821_v11  ;;  %vm4051_vm4 = vcmp.eq.s32.totalorder %v12439_v5, %v9821_v11 }
 0x3f7   :  { %1897 = vbcast.lane.b32.xlu0 %v16617_v44, 328  ;;  %v8665_v44 = vsel %vm4056_vm15, 1.0, %v16541_v4  ;;  %v6602_v48 = vadd.f32 %v8647_v57, %v6601_v8  ;;  %v6617_v21 = vadd.f32 %v8657_v6, %v6616_v17  ;;  %vm4030_vm15 = vcmp.eq.s32.totalorder %v12381_v16, %v9821_v11 }
 0x3f8   :  { %v6630_v42 = vadd.f32 %v8665_v44, %v8664_v34  ;;  %v8649_v34 = vsel %vm4040_vm2, 1.0, %v16541_v4  ;;  %v6588_v16 = vadd.f32 %v8638_v30, %v6587_v50  ;;  %vm4060_vm9 = vcmp.eq.s32.totalorder %v12477_v15, %v9821_v11 }
 0x3f9   :  { %v6603_v46 = vadd.f32 %v8648_v29, %v6602_v48  ;;  %v6618_v63 = vadd.f32 %v8658_v0, %v6617_v21  ;;  %v8675_v57 = vsel %vm4066_vm10, 1.0, %v16541_v4  ;;  %v8650_v5 = vsel %vm4041_vm14, 1.0, %v16541_v4 }
 0x3fa   :  { %v12668_v47 = vpop.permute.xlu0 %2174  ;;  %v12674_v33 = vpop.permute.xlu1 %2295  ;;  %1979 = vbcast.lane.b32.xlu1 %v16627_v51, 320  ;;  %v6631_v55 = vadd.f32 %v8666_v20, %v6630_v42  ;;  %vm4042_vm2 = vcmp.eq.s32.totalorder %v12423_v54, %v9821_v11  ;;  %v8660_v15 = vsel %vm4051_vm4, 1.0, %v16541_v4  ;;  %v6645_v40 = vadd.f32 %v8675_v57, %v8674_v26 }
 0x3fb   :  { %2198 = vbcast.lane.b32.xlu0 %v16622_v38, 328  ;;  %v6604_v18 = vadd.f32 %v8649_v34, %v6603_v46  ;;  %v6619_v14 = vadd.f32 %v8659_v52, %v6618_v63  ;;  %v8651_v29 = vsel %vm4042_vm2, 1.0, %v16541_v4  ;;  %vm4043_vm10 = vcmp.eq.s32.totalorder %v12415_v23, %v9821_v11 }
 0x3fc   :  { %v6632_v44 = vadd.f32 %v8667_v37, %v6631_v55  ;;  %vm4053_vm14 = vcmp.eq.s32.totalorder %v12445_v45, %v9821_v11  ;;  %v6646_v55 = vadd.f32 %v8676_v3, %v6645_v40  ;;  %vm4062_vm4 = vcmp.eq.s32.totalorder %v12483_v58, %v9821_v11  ;;  %v16666_v37 = vld [vmem:[#allocation34_spill] sm:$0xff]  ;;  %v16671_v3 = vld [vmem:[#allocation67_spill] sm:$0xff] }
 0x3fd   :  { %v6605_v54 = vadd.f32 %v8650_v5, %v6604_v18  ;;  %v6620_v21 = vadd.f32 %v8660_v15, %v6619_v14  ;;  %v8652_v46 = vsel %vm4043_vm10, 1.0, %v16541_v4  ;;  %vm4054_vm2 = vcmp.eq.s32.totalorder %v12459_v9, %v9821_v11 }
 0x3fe   :  { %v12686_v38 = vpop.permute.xlu0 %1916  ;;  %v12692_v31 = vpop.permute.xlu1 %2092  ;;  %2280 = vbcast.lane.b32.xlu1 %v16628_v13, 320  ;;  %v6633_v42 = vadd.f32 %v8668_v1, %v6632_v44  ;;  %v8671_v52 = vsel %vm4062_vm4, 1.0, %v16541_v4  ;;  %v6647_v44 = vadd.f32 %v8677_v39, %v6646_v55  ;;  %v16667_v1 = vld [vmem:[#allocation35_spill] sm:$0xff]  ;;  %v8653_v9 = vsel %vm4044_vm13, 1.0, %v16541_v4  ;;  %v16673_v39 = vld [vmem:[#allocation42_spill] sm:$0xff] }
 0x3ff   :  { %1940 = vbcast.lane.b32.xlu0 %v16623_v61, 328  ;;  %v6606_v23 = vadd.f32 %v8651_v29, %v6605_v54  ;;  %v16670_v54 = vld [vmem:[#allocation8_spill] sm:$0xff]  ;;  %v172_v29 = vmax.f32 %v16671_v3, 1.0 }
 0x400   :  { %vm4071_vm10 = vcmp.eq.s32.totalorder %v16670_v54, %v9821_v11  ;;  %v16682_v3 = vld [vmem:[#allocation36_spill] sm:$0xff] }
 0x401   :  { %v6607_v2 = vadd.f32 %v8652_v46, %v6606_v23  ;;  %v8680_v55 = vsel %vm4071_vm10, 1.0, %v16541_v4  ;;  %9680 = vrcp.f32 %v172_v29  ;;  %v16683_v29 = vld [vmem:[#allocation13_spill] sm:$0xff] }
 0x402   :  { %v12704_v61 = vpop.permute.xlu0 %2053  ;;  %v12710_v35 = vpop.permute.xlu1 %2256  ;;  %2241 = vbcast.lane.b32.xlu1 %v16626_v36, 328  ;;  %v8639_v36 = vsel %vm4030_vm15, 1.0, %v16541_v4  ;;  %vm4032_vm15 = vcmp.eq.s32.totalorder %v12391_v25, %v9821_v11  ;;  %v8661_v25 = vsel %vm4052_vm3, 1.0, %v16541_v4  ;;  %vm4034_vm3 = vcmp.eq.s32.totalorder %v12399_v24, %v9821_v11 }
 0x403   :  { %2323 = vbcast.lane.b32.xlu0 %v16629_v49, 320  ;;  %v6589_v6 = vadd.f32 %v8639_v36, %v6588_v16  ;;  %v8641_v0 = vsel %vm4032_vm15, 1.0, %v16541_v4  ;;  %v6621_v34 = vadd.f32 %v8661_v25, %v6620_v21  ;;  %vm4063_vm15 = vcmp.eq.s32.totalorder %v12475_v41, %v9821_v11 }
 0x404   :  { %v8663_v24 = vsel %vm4054_vm2, 1.0, %v16541_v4  ;;  %v8643_v41 = vsel %vm4034_vm3, 1.0, %v16541_v4  ;;  %v8672_v5 = vsel %vm4063_vm15, 1.0, %v16541_v4  ;;  %v6608_v15 = vadd.f32 %v8653_v9, %v6607_v2  ;;  %v16677_v9 = vld [vmem:[#allocation9_spill] sm:$0xff] }
 0x405   :  { %vm4074_vm4 = vcmp.eq.s32.totalorder %v16683_v29, %v9821_v11 }
 0x406   :  { %v12728_v8 = vpop.permute.xlu0 %2217  ;;  %v12734_v17 = vpop.permute.xlu1 %2010  ;;  %1983 = vbcast.lane.b32.xlu1 %v16627_v51, 328  ;;  %v8669_v51 = vsel %vm4060_vm9, 1.0, %v16541_v4  ;;  %vm4069_vm9 = vcmp.eq.s32.totalorder %v12493_v22, %v9821_v11 }
 0x407   :  { %2284 = vbcast.lane.b32.xlu0 %v16628_v13, 328  ;;  %v8640_v13 = vsel %vm4031_vm11, 1.0, %v16541_v4  ;;  %v6634_v60 = vadd.f32 %v8669_v51, %v6633_v42  ;;  %vm4033_vm11 = vcmp.eq.s32.totalorder %v12379_v56, %v9821_v11  ;;  %v8662_v56 = vsel %vm4053_vm14, 1.0, %v16541_v4  ;;  %v16668_v42 = vld [vmem:[#allocation7_spill] sm:$0xff] }
 0x408   :  { %v6590_v50 = vadd.f32 %v8640_v13, %v6589_v6  ;;  %v8642_v16 = vsel %vm4033_vm11, 1.0, %v16541_v4  ;;  %v8678_v45 = vsel %vm4069_vm9, 1.0, %v16541_v4  ;;  %v6622_v18 = vadd.f32 %v8662_v56, %v6621_v34  ;;  %v16674_v34 = vld [vmem:[#allocation11_spill] sm:$0xff] }
 0x409   :  { %v6648_v14 = vadd.f32 %v8678_v45, %v6647_v44  ;;  %vm4064_vm1 = vcmp.eq.s32.totalorder %v16668_v42, %v9821_v11  ;;  %vm4072_vm14 = vcmp.eq.s32.totalorder %v16674_v34, %v9821_v11  ;;  %vm4073_vm11 = vcmp.eq.s32.totalorder %v16677_v9, %v9821_v11 }
 0x40a   :  { %v12751_v20 = vpop.permute.xlu0 %1959  ;;  %v12758_v48 = vpop.permute.xlu1 %2135  ;;  %2327 = vbcast.lane.b32.xlu1 %v16629_v49, 328  ;;  %v8670_v49 = vsel %vm4061_vm12, 1.0, %v16541_v4  ;;  %v6591_v63 = vadd.f32 %v8641_v0, %v6590_v50  ;;  %vm4070_vm12 = vcmp.eq.s32.totalorder %v12507_v62, %v9821_v11  ;;  %v16669_v62 = vld [vmem:[#allocation41_spill] sm:$0xff]  ;;  %v6623_v40 = vadd.f32 %v8663_v24, %v6622_v18  ;;  %v16678_v24 = vld [vmem:[#allocation68_spill] sm:$0xff] }
 0x40b   :  { %2334 = vbcast.lane.b32.xlu0 %v16665_v27, 256  ;;  %v6635_v58 = vadd.f32 %v8670_v49, %v6634_v60  ;;  %v8679_v13 = vsel %vm4070_vm12, 1.0, %v16541_v4  ;;  %v8673_v25 = vsel %vm4064_vm1, 1.0, %v16541_v4  ;;  %v6609_v49 = vrot.slane %v6608_v15, 4 }
 0x40c   :  { %v6592_v26 = vadd.f32 %v8642_v16, %v6591_v63  ;;  %v6649_v60 = vadd.f32 %v8679_v13, %v6648_v14  ;;  %v6624_v46 = vrot.slane %v6623_v40, 4  ;;  %v8681_v44 = vsel %vm4072_vm14, 1.0, %v16541_v4  ;;  %v16680_v14 = vld [vmem:[#allocation66_spill] sm:$0xff] }
 0x40d   :  { %v6636_v57 = vadd.f32 %v8671_v52, %v6635_v58  ;;  %v6610_v52 = vadd.f32 %v6609_v49, %v6608_v15  ;;  %v173_v15 = vmax.f32 %v16680_v14, 1.0  ;;  %v8682_v13 = vsel %vm4073_vm11, 1.0, %v16541_v4  ;;  %v9681_v49 = vpop.eup %9680  ;;  %v16689_v14 = vld [vmem:[#allocation10_spill] sm:$0xff] }
 0x40e   :  { %v12775_v30 = vpop.permute.xlu0 %2178  ;;  %v12782_v7 = vpop.permute.xlu1 %2299  ;;  %2338 = vbcast.lane.b32.xlu1 %v16665_v27, 264  ;;  %v6593_v21 = vadd.f32 %v8643_v41, %v6592_v26  ;;  %v6650_v58 = vadd.f32 %v8680_v55, %v6649_v60  ;;  %v6625_v45 = vadd.f32 %v6624_v46, %v6623_v40  ;;  %v8683_v46 = vsel %vm4074_vm4, 1.0, %v16541_v4 }
 0x40f   :  { %2377 = vbcast.lane.b32.xlu0 %v16666_v37, 256  ;;  %v6637_v50 = vadd.f32 %v8672_v5, %v6636_v57  ;;  %v174_v57 = vmax.f32 %v16678_v24, 1.0  ;;  %v6611_v42 = vrot.slane %v6610_v52, 2  ;;  %vm4075_vm9 = vcmp.eq.s32.totalorder %v16689_v14, %v9821_v11 }
 0x410   :  { %v6594_v63 = vrot.slane %v6593_v21, 4  ;;  %v6651_v41 = vadd.f32 %v8681_v44, %v6650_v58  ;;  %v6626_v40 = vrot.slane %v6625_v45, 2  ;;  %v16687_v58 = vld [vmem:[#allocation5_spill] sm:$0xff] }
 0x411   :  { %v6638_v56 = vadd.f32 %v8673_v25, %v6637_v50  ;;  %9682 = vrcp.f32 %v174_v57  ;;  %v6612_v55 = vadd.f32 %v6611_v42, %v6610_v52  ;;  %v7604_v44 = vmul.f32 %v9681_v49, %v16687_v58 }
 0x412   :  { %v12799_v36 = vpop.permute.xlu0 %1920  ;;  %v12806_v22 = vpop.permute.xlu1 %2096  ;;  %2381 = vbcast.lane.b32.xlu1 %v16666_v37, 264  ;;  %v6595_v18 = vadd.f32 %v6594_v63, %v6593_v21  ;;  %v6652_v25 = vadd.f32 %v8682_v13, %v6651_v41  ;;  %9684 = vrcp.f32 %v173_v15  ;;  %v16686_v63 = vld [vmem:[#allocation43_spill] sm:$0xff]  ;;  %v6627_v9 = vadd.f32 %v6626_v40, %v6625_v45  ;;  %v16693_v40 = vld [vmem:[#allocation76_spill] sm:$0xff] }
 0x413   :  { %2420 = vbcast.lane.b32.xlu0 %v16667_v1, 256  ;;  %v6639_v26 = vrot.slane %v6638_v56, 4  ;;  %v6613_v52 = vrot.slane %v6612_v55, 1  ;;  %v16690_v15 = vld [vmem:[#allocation15_spill] sm:$0xff]  ;;  %vm232_vm3 = vcmp.gt.f32.partialorder %v16693_v40, 0.0  ;;  %v16700_v40 = vld [vmem:[#allocation77_spill] sm:$0xff] }
 0x414   :  { %v6596_v21 = vrot.slane %v6595_v18, 2  ;;  %v6653_v57 = vadd.f32 %v8683_v46, %v6652_v25  ;;  %vm4076_vm13 = vcmp.eq.s32.totalorder %v16690_v15, %v9821_v11  ;;  %v16692_v45 = vld [vmem:[#allocation75_spill] sm:$0xff]  ;;  %v6628_v13 = vrot.slane %v6627_v9, 1 }
 0x415   :  { %v6640_v50 = vadd.f32 %v6639_v26, %v6638_v56  ;;  %v9114_v56 = vld [vmem:[%s16359_s3] ss:$0 sm:$0xff]  ;;  %vm231_vm2 = vcmp.gt.f32.partialorder %v16692_v45, 0.0  ;;  %v8684_v25 = vsel %vm4075_vm9, 1.0, %v16541_v4  ;;  %v8685_v46 = vsel %vm4076_vm13, 1.0, %v16541_v4  ;;  %v16698_v45 = vld [vmem:[#allocation37_spill] sm:$0xff] }
 0x416   :  { %v12816_v6 = vpop.permute.xlu0 %2057  ;;  %v12821_v51 = vpop.permute.xlu1 %2260  ;;  %2424 = vbcast.lane.b32.xlu1 %v16667_v1, 264  ;;  %v6597_v26 = vadd.f32 %v6596_v21, %v6595_v18  ;;  %v7621_v18 = vadd.f32 %v9114_v56, %v7604_v44  ;;  %v6654_v49 = vrot.slane %v6653_v57, 4  ;;  %v12886_v14 = vsel %vm231_vm2, 1.0, %v16541_v4 }
 0x417   :  { %2678 = vbcast.lane.b32.xlu0 %v16669_v62, 256  ;;  %v6641_v24 = vrot.slane %v6640_v50, 2  ;;  %16695 = vst [vmem:[#allocation13_spill] sm:$0xff] %v12886_v14  ;;  %v6614_v15 = vadd.f32 %v6613_v52, %v6612_v55  ;;  %vm233_vm12 = vcmp.gt.f32.partialorder %v16700_v40, 0.0 }
 0x418   :  { %v6598_v29 = vrot.slane %v6597_v26, 1 }
 0x419   :  { %v6642_v21 = vadd.f32 %v6641_v24, %v6640_v50  ;;  %v12895_v24 = vsel %vm232_vm3, 1.0, %v16541_v4 }
 0x41a   :  { %v12829_v0 = vpop.permute.xlu0 %2221  ;;  %v12832_v23 = vpop.permute.xlu1 %2014  ;;  %2682 = vbcast.lane.b32.xlu1 %v16669_v62, 264  ;;  %16699 = vst [vmem:[#allocation10_spill] sm:$0xff] %v12895_v24  ;;  %v6599_v52 = vadd.f32 %v6598_v29, %v6597_v26 }
 0x41b   :  { %16672 = vst [vmem:[#allocation35_spill] sm:$0xff] %v12832_v23  ;;  %2721 = vbcast.lane.b32.xlu0 %v16673_v39, 256  ;;  %v9683_v50 = vpop.eup %9682  ;;  %v16701_v23 = vld [vmem:[#allocation14_spill] sm:$0xff] }
 0x41c   :  { %v9685_v55 = vpop.eup %9684  ;;  %vm4079_vm1 = vcmp.eq.s32.totalorder %v16701_v23, %v9821_v11  ;;  %v7436_v26 = vsel %vm7401_vm0, %v6614_v15, %v6599_v52  ;;  %v16705_v23 = vld [vmem:[#allocation21_spill] sm:$0xff]  ;;  %v16708_v15 = vld [vmem:[#allocation16_spill] sm:$0xff] }
 0x41d   :  { %vm4115_vm11 = vcmp.eq.s32.totalorder %v16705_v23, %v9821_v11  ;;  %vm4106_vm4 = vcmp.eq.s32.totalorder %v16708_v15, %v9821_v11 }
 0x41e   :  { %v12838_v16 = vpop.permute.xlu0 %1881  ;;  %v12841_v2 = vpop.permute.xlu1 %2139  ;;  %2725 = vbcast.lane.b32.xlu1 %v16673_v39, 264 }
 0x41f   :  { %16675 = vst [vmem:[#allocation7_spill] sm:$0xff] %v12838_v16  ;;  %16676 = vst [vmem:[#allocation41_spill] sm:$0xff] %v12841_v2  ;;  %2342 = vbcast.lane.b32.xlu0 %v16665_v27, 272  ;;  %v6655_v16 = vadd.f32 %v6654_v49, %v6653_v57 }
 0x422   :  { %v12848_v5 = vpop.permute.xlu0 %2100  ;;  %v12852_v54 = vpop.permute.xlu1 %2303  ;;  %2385 = vbcast.lane.b32.xlu1 %v16666_v37, 272 }
 0x423   :  { %16679 = vst [vmem:[#allocation8_spill] sm:$0xff] %v12848_v5  ;;  %16681 = vst [vmem:[#allocation67_spill] sm:$0xff] %v12852_v54  ;;  %2463 = vbcast.lane.b32.xlu0 %v16682_v3, 256  ;;  %v6660_v54 = vadd.f32 %v8685_v46, %v8684_v25  ;;  %v8688_v46 = vsel %vm4079_vm1, 1.0, %v16541_v4 }
 0x426   :  { %v12858_v60 = vpop.permute.xlu0 %2264  ;;  %v12861_v34 = vpop.permute.xlu1 %1963  ;;  %2467 = vbcast.lane.b32.xlu1 %v16682_v3, 264 }
 0x427   :  { %16684 = vst [vmem:[#allocation42_spill] sm:$0xff] %v12858_v60  ;;  %16685 = vst [vmem:[#allocation11_spill] sm:$0xff] %v12861_v34  ;;  %2764 = vbcast.lane.b32.xlu0 %v16686_v63, 256  ;;  %v6643_v60 = vrot.slane %v6642_v21, 1 }
 0x429   :  { %v12924_v49 = vadd.f32 %v6643_v60, %v6642_v21  ;;  %v16710_v60 = vld [vmem:[#allocation20_spill] sm:$0xff]  ;;  %v16711_v21 = vld [vmem:[#allocation22_spill] sm:$0xff] }
 0x42a   :  { %v12869_v41 = vpop.permute.xlu0 %2018  ;;  %v12875_v42 = vpop.permute.xlu1 %2182  ;;  %2768 = vbcast.lane.b32.xlu1 %v16686_v63, 264  ;;  %vm4126_vm13 = vcmp.eq.s32.totalorder %v16710_v60, %v9821_v11  ;;  %vm4117_vm2 = vcmp.eq.s32.totalorder %v16711_v21, %v9821_v11  ;;  %v16715_v60 = vld [vmem:[#allocation27_spill] sm:$0xff]  ;;  %v16720_v21 = vld [vmem:[#allocation24_spill] sm:$0xff] }
 0x42b   :  { %16688 = vst [vmem:[#allocation9_spill] sm:$0xff] %v12869_v41  ;;  %16691 = vst [vmem:[#allocation68_spill] sm:$0xff] %v12875_v42  ;;  %2428 = vbcast.lane.b32.xlu0 %v16667_v1, 272  ;;  %v16696_v42 = vld [vmem:[#allocation12_spill] sm:$0xff]  ;;  %v6629_v41 = vadd.f32 %v6628_v13, %v6627_v9  ;;  %v12908_v9 = vsel %vm233_vm12, 1.0, %v16541_v4  ;;  %v16704_v13 = vld [vmem:[#allocation18_spill] sm:$0xff]  ;;  %vm4107_vm12 = vcmp.eq.s32.totalorder %v16715_v60, %v9821_v11 }
 0x42c   :  { %vm4077_vm15 = vcmp.eq.s32.totalorder %v16696_v42, %v9821_v11  ;;  %16702 = vst [vmem:[#allocation15_spill] sm:$0xff] %v12908_v9  ;;  %vm4116_vm14 = vcmp.eq.s32.totalorder %v16704_v13, %v9821_v11  ;;  %16707 = vst [vmem:[#allocation76_spill] sm:$0xff] %v12924_v49  ;;  %v16722_v60 = vld [vmem:[#allocation23_spill] sm:$0xff] }
 0x42d   :  { %v8686_v2 = vsel %vm4077_vm15, 1.0, %v16541_v4  ;;  %v12922_v25 = vsel %vm7403_vm5, %v6629_v41, %v7436_v26  ;;  %v8725_v52 = vsel %vm4116_vm14, 1.0, %v16541_v4  ;;  %v8724_v41 = vsel %vm4115_vm11, 1.0, %v16541_v4  ;;  %v16714_v26 = vld [vmem:[#allocation26_spill] sm:$0xff] }
 0x42e   :  { %v12883_v58 = vpop.permute.xlu0 %2143  ;;  %v12890_v44 = vpop.permute.xlu1 %1924  ;;  %2506 = vbcast.lane.b32.xlu1 %v16698_v45, 256  ;;  %16706 = vst [vmem:[#allocation75_spill] sm:$0xff] %v12922_v25  ;;  %vm4136_vm15 = vcmp.eq.s32.totalorder %v16714_v26, %v9821_v11  ;;  %v6720_v26 = vadd.f32 %v8725_v52, %v8724_v41  ;;  %v8716_v52 = vsel %vm4107_vm12, 1.0, %v16541_v4  ;;  %vm4108_vm11 = vcmp.eq.s32.totalorder %v16720_v21, %v9821_v11 }
 0x42f   :  { %16694 = vst [vmem:[#allocation66_spill] sm:$0xff] %v12883_v58  ;;  %16697 = vst [vmem:[#allocation5_spill] sm:$0xff] %v12890_v44  ;;  %2510 = vbcast.lane.b32.xlu0 %v16698_v45, 264  ;;  %v7634_v58 = vmul.f32 %v12886_v14, %v7621_v18  ;;  %v9354_v34 = vpop.f32.mrb[2].mxu0  ;;  %v8735_v14 = vsel %vm4126_vm13, 1.0, %v16541_v4 }
 0x430   :  { %v7606_v5 = vmul.f32 %v9683_v50, %v9354_v34  ;;  %v7564_v44 = vpop.f32.mrb[3].mxu0  ;;  %v16703_v34 = vld [vmem:[#allocation17_spill] sm:$0xff]  ;;  %v6656_v50 = vrot.slane %v6655_v16, 2 }
 0x431   :  { %v7605_v18 = vmul.f32 %v9685_v55, %v7564_v44  ;;  %vm4078_vm10 = vcmp.eq.s32.totalorder %v16703_v34, %v9821_v11  ;;  %v6661_v44 = vadd.f32 %v8686_v2, %v6660_v54  ;;  %v16712_v54 = vld [vmem:[#allocation44_spill] sm:$0xff] }
 0x432   :  { %v12905_v40 = vpop.permute.xlu0 %2307  ;;  %v12915_v42 = vpop.permute.xlu1 %2061  ;;  %2686 = vbcast.lane.b32.xlu1 %v16669_v62, 272  ;;  %v7623_v57 = vadd.f32 %v9114_v56, %v7606_v5  ;;  %v8687_v55 = vsel %vm4078_vm10, 1.0, %v16541_v4 }
 0x433   :  { %2729 = vbcast.lane.b32.xlu0 %v16673_v39, 272  ;;  %v7622_v29 = vadd.f32 %v9114_v56, %v7605_v18  ;;  %v16709_v56 = vld [vmem:[#allocation19_spill] sm:$0xff]  ;;  %v16713_v18 = vld [vmem:[#allocation25_spill] sm:$0xff] }
 0x434   :  { %vm4105_vm9 = vcmp.eq.s32.totalorder %v16709_v56, %v9821_v11  ;;  %vm4125_vm3 = vcmp.eq.s32.totalorder %v16713_v18, %v9821_v11  ;;  %v7636_v13 = vmul.f32 %v12908_v9, %v7623_v57  ;;  %v6662_v56 = vadd.f32 %v8687_v55, %v6661_v44 }
 0x435   :  { %v7635_v34 = vmul.f32 %v12895_v24, %v7622_v29  ;;  %v8715_v29 = vsel %vm4106_vm4, 1.0, %v16541_v4  ;;  %v16716_v24 = vld [vmem:[#allocation29_spill] sm:$0xff]  ;;  %v8714_v18 = vsel %vm4105_vm9, 1.0, %v16541_v4  ;;  %v8726_v57 = vsel %vm4117_vm2, 1.0, %v16541_v4 }
 0x436   :  { %v12932_v5 = vpop.permute.xlu0 %1967  ;;  %v12941_v2 = vpop.permute.xlu1 %2225  ;;  %2807 = vbcast.lane.b32.xlu1 %v16712_v54, 256  ;;  %vm4135_vm1 = vcmp.eq.s32.totalorder %v16716_v24, %v9821_v11  ;;  %v8734_v15 = vsel %vm4125_vm3, 1.0, %v16541_v4  ;;  %v8745_v44 = vsel %vm4136_vm15, 1.0, %v16541_v4  ;;  %v16718_v24 = vld [vmem:[#allocation30_spill] sm:$0xff]  ;;  %vm4085_vm4 = vcmp.eq.s32.totalorder %v16722_v60, %v9821_v11 }
 0x437   :  { %2811 = vbcast.lane.b32.xlu0 %v16712_v54, 264  ;;  %v7638_v23 = vadd.f32 %v7635_v34, %v7634_v58  ;;  %vm4127_vm10 = vcmp.eq.s32.totalorder %v16718_v24, %v9821_v11  ;;  %v16719_v34 = vld [vmem:[#allocation28_spill] sm:$0xff]  ;;  %v8744_v41 = vsel %vm4135_vm1, 1.0, %v16541_v4  ;;  %v16723_v24 = vld [vmem:[#allocation31_spill] sm:$0xff]  ;;  %v6735_v9 = vadd.f32 %v8735_v14, %v8734_v15 }
 0x438   :  { %vm4145_vm14 = vcmp.eq.s32.totalorder %v16719_v34, %v9821_v11  ;;  %vm4146_vm9 = vcmp.eq.s32.totalorder %v16723_v24, %v9821_v11  ;;  %v8736_v25 = vsel %vm4127_vm10, 1.0, %v16541_v4  ;;  %v8694_v14 = vsel %vm4085_vm4, 1.0, %v16541_v4  ;;  %v16727_v15 = vld [vmem:[#allocation84_spill] sm:$0xff] }
 0x439   :  { %v12962_v58 = vadd.f32 %v7638_v23, %v7636_v13  ;;  %v12982_v13 = vadd.f32 %v6656_v50, %v6655_v16  ;;  %v6705_v23 = vadd.f32 %v8715_v29, %v8714_v18  ;;  %v8754_v21 = vsel %vm4145_vm14, 1.0, %v16541_v4  ;;  %v16724_v18 = vld [vmem:[#allocation38_spill] sm:$0xff] }
 0x43a   :  { %v12960_v49 = vpop.permute.xlu0 %2186  ;;  %v12972_v55 = vpop.permute.xlu1 %1885  ;;  %2346 = vbcast.lane.b32.xlu1 %v16665_v27, 280  ;;  %v6750_v16 = vadd.f32 %v8745_v44, %v8744_v41  ;;  %v8717_v50 = vsel %vm4108_vm11, 1.0, %v16541_v4  ;;  %vm4156_vm3 = vcmp.eq.s32.totalorder %v12583_v28, %v9821_v11  ;;  %vm4118_vm15 = vcmp.eq.s32.totalorder %v16727_v15, %v9821_v11  ;;  %v16728_v44 = vld [vmem:[#allocation85_spill] sm:$0xff]  ;;  %v16729_v41 = vld [vmem:[#allocation86_spill] sm:$0xff]  ;;  %v16731_v15 = vld [vmem:[#allocation88_spill] sm:$0xff] }
 0x43b   :  { %16717 = vst [vmem:[#allocation12_spill] sm:$0xff] %v12962_v58  ;;  %2389 = vbcast.lane.b32.xlu0 %v16666_v37, 280  ;;  %16721 = vst [vmem:[#allocation37_spill] sm:$0xff] %v12982_v13  ;;  %v6721_v58 = vadd.f32 %v8726_v57, %v6720_v26  ;;  %v12989_v37 = vadd.f32 %v8688_v46, %v6662_v56  ;;  %v6706_v27 = vadd.f32 %v8716_v52, %v6705_v23  ;;  %v16725_v46 = vld [vmem:[#allocation32_spill] sm:$0xff]  ;;  %v16726_v56 = vld [vmem:[#allocation83_spill] sm:$0xff] }
 0x43c   :  { %v8755_v26 = vsel %vm4146_vm9, 1.0, %v16541_v4  ;;  %vm4137_vm13 = vcmp.eq.s32.totalorder %v16725_v46, %v9821_v11  ;;  %vm4086_vm2 = vcmp.eq.s32.totalorder %v16726_v56, %v9821_v11  ;;  %v6736_v57 = vadd.f32 %v8736_v25, %v6735_v9  ;;  %v16730_v23 = vld [vmem:[#allocation87_spill] sm:$0xff]  ;;  %v16732_v13 = vld [vmem:[#allocation89_spill] sm:$0xff] }
 0x43d   :  { %vm4096_vm12 = vcmp.eq.s32.totalorder %v16728_v44, %v9821_v11  ;;  %v6707_v52 = vadd.f32 %v8717_v50, %v6706_v27  ;;  %vm4155_vm1 = vcmp.eq.s32.totalorder %v16729_v41, %v9821_v11  ;;  %vm4147_vm10 = vcmp.eq.s32.totalorder %v12595_v10, %v9821_v11 }
 0x43e   :  { %v12991_v34 = vpop.permute.xlu0 %1928  ;;  %v12995_v29 = vpop.permute.xlu1 %2104  ;;  %2471 = vbcast.lane.b32.xlu1 %v16682_v3, 272  ;;  %vm4095_vm14 = vcmp.eq.s32.totalorder %v16730_v23, %v9821_v11  ;;  %v6765_v25 = vadd.f32 %v8755_v26, %v8754_v21  ;;  %v8746_v28 = vsel %vm4137_vm13, 1.0, %v16541_v4  ;;  %v8695_v60 = vsel %vm4086_vm2, 1.0, %v16541_v4 }
 0x43f   :  { %2549 = vbcast.lane.b32.xlu0 %v16724_v18, 256  ;;  %vm4128_vm11 = vcmp.eq.s32.totalorder %v12603_v12, %v9821_v11  ;;  %v8765_v10 = vsel %vm4156_vm3, 1.0, %v16541_v4  ;;  %v8727_v24 = vsel %vm4118_vm15, 1.0, %v16541_v4  ;;  %v8705_v50 = vsel %vm4096_vm12, 1.0, %v16541_v4 }
 0x440   :  { %vm4109_vm4 = vcmp.eq.s32.totalorder %v12607_v32, %v9821_v11  ;;  %v8764_v21 = vsel %vm4155_vm1, 1.0, %v16541_v4  ;;  %v8756_v26 = vsel %vm4147_vm10, 1.0, %v16541_v4  ;;  %v8704_v12 = vsel %vm4095_vm14, 1.0, %v16541_v4 }
 0x441   :  { %vm4166_vm9 = vcmp.eq.s32.totalorder %v12601_v19, %v9821_v11  ;;  %v6751_v46 = vadd.f32 %v8746_v28, %v6750_v16  ;;  %v8737_v56 = vsel %vm4128_vm11, 1.0, %v16541_v4  ;;  %vm4165_vm13 = vcmp.eq.s32.totalorder %v12609_v59, %v9821_v11  ;;  %v16733_v16 = vld [vmem:[#allocation45_spill] sm:$0xff]  ;;  %v16735_v19 = vld [vmem:[#allocation90_spill] sm:$0xff] }
 0x442   :  { %v13017_v9 = vpop.permute.xlu0 %2065  ;;  %v13023_v27 = vpop.permute.xlu1 %2268  ;;  %2553 = vbcast.lane.b32.xlu1 %v16724_v18, 264  ;;  %vm4138_vm2 = vcmp.eq.s32.totalorder %v16731_v15, %v9821_v11  ;;  %v6675_v32 = vadd.f32 %v8695_v60, %v8694_v14  ;;  %v6722_v41 = vadd.f32 %v8727_v24, %v6721_v58  ;;  %v8718_v23 = vsel %vm4109_vm4, 1.0, %v16541_v4 }
 0x443   :  { %2772 = vbcast.lane.b32.xlu0 %v16686_v63, 272  ;;  %vm4087_vm3 = vcmp.eq.s32.totalorder %v16732_v13, %v9821_v11  ;;  %v6780_v28 = vadd.f32 %v8765_v10, %v8764_v21  ;;  %v6766_v59 = vadd.f32 %v8756_v26, %v6765_v25  ;;  %v6690_v18 = vadd.f32 %v8705_v50, %v8704_v12  ;;  %v16734_v13 = vld [vmem:[#allocation91_spill] sm:$0xff] }
 0x444   :  { %v8775_v14 = vsel %vm4166_vm9, 1.0, %v16541_v4  ;;  %v6737_v58 = vadd.f32 %v8737_v56, %v6736_v57  ;;  %v8774_v60 = vsel %vm4165_vm13, 1.0, %v16541_v4  ;;  %v8747_v24 = vsel %vm4138_vm2, 1.0, %v16541_v4  ;;  %v16737_v56 = vld [vmem:[#allocation51_spill] sm:$0xff] }
 0x445   :  { %vm4119_vm15 = vcmp.eq.s32.totalorder %v16734_v13, %v9821_v11  ;;  %v6708_v15 = vadd.f32 %v8718_v23, %v6707_v52  ;;  %v8696_v3 = vsel %vm4087_vm3, 1.0, %v16541_v4  ;;  %vm4097_vm12 = vcmp.eq.s32.totalorder %v12649_v53, %v9821_v11  ;;  %v16736_v52 = vld [vmem:[#allocation50_spill] sm:$0xff] }
 0x446   :  { %v13042_v44 = vpop.permute.xlu0 %2229  ;;  %v13047_v63 = vpop.permute.xlu1 %2022  ;;  %2850 = vbcast.lane.b32.xlu1 %v16733_v16, 256  ;;  %vm4157_vm1 = vcmp.eq.s32.totalorder %v12655_v43, %v9821_v11  ;;  %vm4175_vm10 = vcmp.eq.s32.totalorder %v16735_v19, %v9821_v11  ;;  %vm4148_vm14 = vcmp.eq.s32.totalorder %v12668_v47, %v9821_v11  ;;  %vm4176_vm11 = vcmp.eq.s32.totalorder %v12674_v33, %v9821_v11 }
 0x447   :  { %2854 = vbcast.lane.b32.xlu0 %v16733_v16, 264  ;;  %v6795_v53 = vadd.f32 %v8775_v14, %v8774_v60  ;;  %v6752_v10 = vadd.f32 %v8747_v24, %v6751_v46  ;;  %v8728_v43 = vsel %vm4119_vm15, 1.0, %v16541_v4  ;;  %vm4088_vm4 = vcmp.eq.s32.totalorder %v12686_v38, %v9821_v11 }
 0x448   :  { %v6676_v50 = vadd.f32 %v8696_v3, %v6675_v32  ;;  %v8706_v21 = vsel %vm4097_vm12, 1.0, %v16541_v4  ;;  %v8766_v47 = vsel %vm4157_vm1, 1.0, %v16541_v4  ;;  %vm4129_vm9 = vcmp.eq.s32.totalorder %v12692_v31, %v9821_v11 }
 0x449   :  { %v8784_v33 = vsel %vm4175_vm10, 1.0, %v16541_v4  ;;  %v8757_v26 = vsel %vm4148_vm14, 1.0, %v16541_v4  ;;  %v8785_v12 = vsel %vm4176_vm11, 1.0, %v16541_v4  ;;  %vm4120_vm13 = vcmp.eq.s32.totalorder %v12704_v61, %v9821_v11 }
 0x44a   :  { %v13064_v25 = vpop.permute.xlu0 %1889  ;;  %v13072_v57 = vpop.permute.xlu1 %2147  ;;  %3022 = vbcast.lane.b32.xlu1 %v16736_v52, 256  ;;  %v6723_v38 = vadd.f32 %v8728_v43, %v6722_v41  ;;  %v8697_v3 = vsel %vm4088_vm4, 1.0, %v16541_v4  ;;  %vm4167_vm2 = vcmp.eq.s32.totalorder %v12710_v35, %v9821_v11  ;;  %vm4158_vm3 = vcmp.eq.s32.totalorder %v12728_v8, %v9821_v11 }
 0x44b   :  { %3026 = vbcast.lane.b32.xlu0 %v16736_v52, 264  ;;  %v6691_v32 = vadd.f32 %v8706_v21, %v6690_v18  ;;  %v6781_v23 = vadd.f32 %v8766_v47, %v6780_v28  ;;  %v8738_v61 = vsel %vm4129_vm9, 1.0, %v16541_v4  ;;  %vm4110_vm15 = vcmp.eq.s32.totalorder %v12734_v17, %v9821_v11 }
 0x44c   :  { %v6767_v41 = vadd.f32 %v8757_v26, %v6766_v59  ;;  %v6810_v14 = vadd.f32 %v8785_v12, %v8784_v33  ;;  %v8729_v35 = vsel %vm4120_vm13, 1.0, %v16541_v4  ;;  %vm4098_vm12 = vcmp.eq.s32.totalorder %v12751_v20, %v9821_v11  ;;  %v16740_v33 = vld [vmem:[#allocation7_spill] sm:$0xff] }
 0x44d   :  { %v6677_v8 = vadd.f32 %v8697_v3, %v6676_v50  ;;  %v8776_v60 = vsel %vm4167_vm2, 1.0, %v16541_v4  ;;  %v8767_v24 = vsel %vm4158_vm3, 1.0, %v16541_v4  ;;  %vm4139_vm1 = vcmp.eq.s32.totalorder %v12758_v48, %v9821_v11 }
 0x44e   :  { %v13088_v46 = vpop.permute.xlu0 %2108  ;;  %v13095_v31 = vpop.permute.xlu1 %2311  ;;  %3065 = vbcast.lane.b32.xlu1 %v16737_v56, 256  ;;  %v6738_v28 = vadd.f32 %v8738_v61, %v6737_v58  ;;  %v8719_v17 = vsel %vm4110_vm15, 1.0, %v16541_v4  ;;  %vm4149_vm10 = vcmp.eq.s32.totalorder %v12775_v30, %v9821_v11  ;;  %vm4177_vm14 = vcmp.eq.s32.totalorder %v12782_v7, %v9821_v11 }
 0x44f   :  { %3069 = vbcast.lane.b32.xlu0 %v16737_v56, 264  ;;  %v6724_v59 = vadd.f32 %v8729_v35, %v6723_v38  ;;  %v8707_v48 = vsel %vm4098_vm12, 1.0, %v16541_v4  ;;  %vm4089_vm11 = vcmp.eq.s32.totalorder %v12799_v36, %v9821_v11  ;;  %vm4130_vm4 = vcmp.eq.s32.totalorder %v12806_v22, %v9821_v11 }
 0x450   :  { %v6796_v58 = vadd.f32 %v8776_v60, %v6795_v53  ;;  %v6782_v30 = vadd.f32 %v8767_v24, %v6781_v23  ;;  %v8748_v13 = vsel %vm4139_vm1, 1.0, %v16541_v4  ;;  %vm4121_vm9 = vcmp.eq.s32.totalorder %v12816_v6, %v9821_v11  ;;  %v16738_v6 = vld [vmem:[#allocation39_spill] sm:$0xff] }
 0x451   :  { %v6709_v7 = vadd.f32 %v8719_v17, %v6708_v15  ;;  %v8758_v19 = vsel %vm4149_vm10, 1.0, %v16541_v4  ;;  %v8786_v43 = vsel %vm4177_vm14, 1.0, %v16541_v4  ;;  %vm4168_vm13 = vcmp.eq.s32.totalorder %v12821_v51, %v9821_v11  ;;  %v16739_v51 = vld [vmem:[#allocation35_spill] sm:$0xff]  ;;  %v16744_v17 = vld [vmem:[#allocation42_spill] sm:$0xff] }
 0x452   :  { %v13109_v18 = vpop.permute.xlu0 %2272  ;;  %v13116_v20 = vpop.permute.xlu1 %1971  ;;  %2432 = vbcast.lane.b32.xlu1 %v16667_v1, 280  ;;  %v6692_v36 = vadd.f32 %v8707_v48, %v6691_v32  ;;  %v8698_v22 = vsel %vm4089_vm11, 1.0, %v16541_v4  ;;  %v8739_v53 = vsel %vm4130_vm4, 1.0, %v16541_v4  ;;  %vm4159_vm2 = vcmp.eq.s32.totalorder %v12829_v0, %v9821_v11  ;;  %v16741_v0 = vld [vmem:[#allocation41_spill] sm:$0xff] }
 0x453   :  { %2514 = vbcast.lane.b32.xlu0 %v16698_v45, 272  ;;  %v6753_v15 = vadd.f32 %v8748_v13, %v6752_v10  ;;  %v8730_v47 = vsel %vm4121_vm9, 1.0, %v16541_v4  ;;  %vm4111_vm3 = vcmp.eq.s32.totalorder %v16739_v51, %v9821_v11  ;;  %vm4080_vm15 = vcmp.eq.s32.totalorder %v16740_v33, %v9821_v11  ;;  %v16742_v10 = vld [vmem:[#allocation8_spill] sm:$0xff] }
 0x454   :  { %v6768_v26 = vadd.f32 %v8758_v19, %v6767_v41  ;;  %v6811_v12 = vadd.f32 %v8786_v43, %v6810_v14  ;;  %v8777_v38 = vsel %vm4168_vm13, 1.0, %v16541_v4  ;;  %vm4140_vm12 = vcmp.eq.s32.totalorder %v16741_v0, %v9821_v11  ;;  %v16743_v14 = vld [vmem:[#allocation67_spill] sm:$0xff]  ;;  %v16746_v19 = vld [vmem:[#allocation9_spill] sm:$0xff]  ;;  %v16747_v43 = vld [vmem:[#allocation68_spill] sm:$0xff] }
 0x455   :  { %v6678_v3 = vadd.f32 %v8698_v22, %v6677_v8  ;;  %v6739_v32 = vadd.f32 %v8739_v53, %v6738_v28  ;;  %v8768_v23 = vsel %vm4159_vm2, 1.0, %v16541_v4  ;;  %vm4131_vm1 = vcmp.eq.s32.totalorder %v16742_v10, %v9821_v11  ;;  %v16749_v0 = vld [vmem:[#allocation5_spill] sm:$0xff] }
 0x456   :  { %v13132_v50 = vpop.permute.xlu0 %2026  ;;  %v13138_v21 = vpop.permute.xlu1 %2190  ;;  %2592 = vbcast.lane.b32.xlu1 %v16738_v6, 256  ;;  %v6725_v35 = vadd.f32 %v8730_v47, %v6724_v59  ;;  %v8720_v60 = vsel %vm4111_vm3, 1.0, %v16541_v4  ;;  %v8689_v41 = vsel %vm4080_vm15, 1.0, %v16541_v4  ;;  %vm4178_vm10 = vcmp.eq.s32.totalorder %v16743_v14, %v9821_v11  ;;  %v16745_v59 = vld [vmem:[#allocation11_spill] sm:$0xff]  ;;  %v16748_v47 = vld [vmem:[#allocation66_spill] sm:$0xff] }
 0x457   :  { %2596 = vbcast.lane.b32.xlu0 %v16738_v6, 264  ;;  %v6797_v8 = vadd.f32 %v8777_v38, %v6796_v58  ;;  %v8749_v28 = vsel %vm4140_vm12, 1.0, %v16541_v4  ;;  %vm4169_vm14 = vcmp.eq.s32.totalorder %v16744_v17, %v9821_v11  ;;  %vm4099_vm11 = vcmp.eq.s32.totalorder %v16745_v59, %v9821_v11 }
 0x458   :  { %v6783_v48 = vadd.f32 %v8768_v23, %v6782_v30  ;;  %v8740_v13 = vsel %vm4131_vm1, 1.0, %v16541_v4  ;;  %vm4112_vm4 = vcmp.eq.s32.totalorder %v16746_v19, %v9821_v11  ;;  %vm4150_vm9 = vcmp.eq.s32.totalorder %v16747_v43, %v9821_v11 }
 0x459   :  { %v6710_v22 = vadd.f32 %v8720_v60, %v6709_v7  ;;  %v13174_v58 = vadd.f32 %v8689_v41, %v12989_v37  ;;  %v8787_v53 = vsel %vm4178_vm10, 1.0, %v16541_v4  ;;  %vm4141_vm13 = vcmp.eq.s32.totalorder %v16748_v47, %v9821_v11  ;;  %v16750_v7 = vld [vmem:[#allocation46_spill] sm:$0xff] }
 0x45a   :  { %v13153_v61 = vpop.permute.xlu0 %2151  ;;  %v13159_v24 = vpop.permute.xlu1 %1932  ;;  %2690 = vbcast.lane.b32.xlu1 %v16669_v62, 280  ;;  %v6754_v30 = vadd.f32 %v8749_v28, %v6753_v15  ;;  %v8778_v33 = vsel %vm4169_vm14, 1.0, %v16541_v4  ;;  %v8708_v38 = vsel %vm4099_vm11, 1.0, %v16541_v4  ;;  %vm4090_vm2 = vcmp.eq.s32.totalorder %v16749_v0, %v9821_v11 }
 0x45b   :  { %2733 = vbcast.lane.b32.xlu0 %v16673_v39, 280  ;;  %v6740_v37 = vadd.f32 %v8740_v13, %v6739_v32  ;;  %v8721_v10 = vsel %vm4112_vm4, 1.0, %v16541_v4  ;;  %v8759_v60 = vsel %vm4150_vm9, 1.0, %v16541_v4  ;;  %vm4179_vm3 = vcmp.eq.s32.totalorder %v12905_v40, %v9821_v11  ;;  %v16751_v13 = vld [vmem:[#allocation52_spill] sm:$0xff] }
 0x45c   :  { %v6812_v15 = vadd.f32 %v8787_v53, %v6811_v12  ;;  %v8750_v41 = vsel %vm4141_vm13, 1.0, %v16541_v4  ;;  %vm4122_vm15 = vcmp.eq.s32.totalorder %v12915_v42, %v9821_v11  ;;  %vm4100_vm12 = vcmp.eq.s32.totalorder %v12932_v5, %v9821_v11  ;;  %v16752_v53 = vld [vmem:[#allocation49_spill] sm:$0xff] }
 0x45d   :  { %v6798_v14 = vadd.f32 %v8778_v33, %v6797_v8  ;;  %v6693_v28 = vadd.f32 %v8708_v38, %v6692_v36  ;;  %v8699_v32 = vsel %vm4090_vm2, 1.0, %v16541_v4  ;;  %vm4160_vm1 = vcmp.eq.s32.totalorder %v12941_v2, %v9821_v11 }
 0x45e   :  { %v13179_v51 = vpop.permute.xlu0 %2315  ;;  %v13185_v23 = vpop.permute.xlu1 %2069  ;;  %2815 = vbcast.lane.b32.xlu1 %v16712_v54, 272  ;;  %v6711_v59 = vadd.f32 %v8721_v10, %v6710_v22  ;;  %v6769_v40 = vadd.f32 %v8759_v60, %v6768_v26  ;;  %v8788_v12 = vsel %vm4179_vm3, 1.0, %v16541_v4  ;;  %vm4113_vm10 = vcmp.eq.s32.totalorder %v13047_v63, %v9821_v11  ;;  %v16753_v10 = vld [vmem:[#allocation58_spill] sm:$0xff] }
 0x45f   :  { %2893 = vbcast.lane.b32.xlu0 %v16750_v7, 256  ;;  %v6755_v5 = vadd.f32 %v8750_v41, %v6754_v30  ;;  %v8731_v36 = vsel %vm4122_vm15, 1.0, %v16541_v4  ;;  %v8709_v2 = vsel %vm4100_vm12, 1.0, %v16541_v4  ;;  %vm4151_vm14 = vcmp.eq.s32.totalorder %v12960_v49, %v9821_v11 }
 0x460   :  { %v6679_v26 = vadd.f32 %v8699_v32, %v6678_v3  ;;  %v8769_v8 = vsel %vm4160_vm1, 1.0, %v16541_v4  ;;  %vm4081_vm11 = vcmp.eq.s32.totalorder %v12972_v55, %v9821_v11  ;;  %vm4114_vm4 = vcmp.eq.s32.totalorder %v13132_v50, %v9821_v11 }
 0x461   :  { %v6813_v63 = vadd.f32 %v8788_v12, %v6812_v15  ;;  %vm4091_vm9 = vcmp.eq.s32.totalorder %v12991_v34, %v9821_v11  ;;  %vm4132_vm13 = vcmp.eq.s32.totalorder %v12995_v29, %v9821_v11  ;;  %v8722_v19 = vsel %vm4113_vm10, 1.0, %v16541_v4 }
 0x462   :  { %v13201_v17 = vpop.permute.xlu0 %1975  ;;  %v13206_v42 = vpop.permute.xlu1 %2233  ;;  %2897 = vbcast.lane.b32.xlu1 %v16750_v7, 264  ;;  %v6726_v49 = vadd.f32 %v8731_v36, %v6725_v35  ;;  %v13226_v3 = vadd.f32 %v8709_v2, %v6693_v28  ;;  %v8760_v22 = vsel %vm4151_vm14, 1.0, %v16541_v4  ;;  %vm4123_vm2 = vcmp.eq.s32.totalorder %v13017_v9, %v9821_v11 }
 0x463   :  { %3108 = vbcast.lane.b32.xlu0 %v16751_v13, 256  ;;  %v6784_v34 = vadd.f32 %v8769_v8, %v6783_v48  ;;  %v8690_v29 = vsel %vm4081_vm11, 1.0, %v16541_v4  ;;  %vm4170_vm3 = vcmp.eq.s32.totalorder %v13023_v27, %v9821_v11  ;;  %v8723_v35 = vsel %vm4114_vm4, 1.0, %v16541_v4 }
 0x464   :  { %v8700_v47 = vsel %vm4091_vm9, 1.0, %v16541_v4  ;;  %v8741_v9 = vsel %vm4132_vm13, 1.0, %v16541_v4  ;;  %vm4161_vm15 = vcmp.eq.s32.totalorder %v13042_v44, %v9821_v11  ;;  %v6712_v30 = vadd.f32 %v8722_v19, %v6711_v59 }
 0x465   :  { %v6770_v33 = vadd.f32 %v8760_v22, %v6769_v40  ;;  %v8732_v48 = vsel %vm4123_vm2, 1.0, %v16541_v4  ;;  %vm4082_vm12 = vcmp.eq.s32.totalorder %v13064_v25, %v9821_v11  ;;  %vm4142_vm1 = vcmp.eq.s32.totalorder %v13072_v57, %v9821_v11  ;;  %v16756_v22 = vld [vmem:[#allocation34_spill] sm:$0xff] }
 0x466   :  { %v13224_v43 = vpop.permute.xlu0 %2194  ;;  %v13231_v55 = vpop.permute.xlu1 %1893  ;;  %3112 = vbcast.lane.b32.xlu1 %v16751_v13, 264  ;;  %v8779_v50 = vsel %vm4170_vm3, 1.0, %v16541_v4  ;;  %vm4133_vm10 = vcmp.eq.s32.totalorder %v13088_v46, %v9821_v11  ;;  %vm4180_vm14 = vcmp.eq.s32.totalorder %v13095_v31, %v9821_v11  ;;  %v6713_v38 = vadd.f32 %v8723_v35, %v6712_v30 }
 0x467   :  { %3366 = vbcast.lane.b32.xlu0 %v16752_v53, 256  ;;  %v6665_v25 = vadd.f32 %v8690_v29, %v13174_v58  ;;  %v13261_v60 = vadd.f32 %v8700_v47, %v6679_v26  ;;  %v6741_v57 = vadd.f32 %v8741_v9, %v6740_v37  ;;  %v8770_v15 = vsel %vm4161_vm15, 1.0, %v16541_v4 }
 0x468   :  { %v6727_v46 = vadd.f32 %v8732_v48, %v6726_v49  ;;  %v8691_v41 = vsel %vm4082_vm12, 1.0, %v16541_v4  ;;  %v8751_v31 = vsel %vm4142_vm1, 1.0, %v16541_v4  ;;  %vm4124_vm11 = vcmp.eq.s32.totalorder %v13185_v23, %v9821_v11 }
 0x469   :  { %v6799_v28 = vadd.f32 %v8779_v50, %v6798_v14  ;;  %v8742_v32 = vsel %vm4133_vm10, 1.0, %v16541_v4  ;;  %v8789_v58 = vsel %vm4180_vm14, 1.0, %v16541_v4  ;;  %vm4143_vm4 = vcmp.eq.s32.totalorder %v13153_v61, %v9821_v11  ;;  %v16754_v14 = vld [vmem:[#allocation33_spill] sm:$0xff] }
 0x46a   :  { %v13251_v27 = vpop.permute.xlu0 %1936  ;;  %v2113_v0 = vpop.permute.xlu1 %2112  ;;  %3370 = vbcast.lane.b32.xlu1 %v16752_v53, 264  ;;  %v13277_v44 = vadd.f32 %v8770_v15, %v6784_v34  ;;  %vm4171_vm9 = vcmp.eq.s32.totalorder %v13109_v18, %v9821_v11  ;;  %v6714_v59 = vrot.slane %v6713_v38, 4  ;;  %v6666_v12 = vadd.f32 %v8691_v41, %v6665_v25  ;;  %v16758_v41 = vld [vmem:[#allocation38_spill] sm:$0xff] }
 0x46b   :  { %3409 = vbcast.lane.b32.xlu0 %v16753_v10, 256  ;;  %vm4134_vm13 = vcmp.eq.s32.totalorder %v2113_v0, %v9821_v11  ;;  %v6756_v36 = vadd.f32 %v8751_v31, %v6755_v5  ;;  %vm4152_vm2 = vcmp.eq.s32.totalorder %v13138_v21, %v9821_v11  ;;  %v8733_v61 = vsel %vm4124_vm11, 1.0, %v16541_v4 }
 0x46c   :  { %v6742_v18 = vadd.f32 %v8742_v32, %v6741_v57  ;;  %v13292_v2 = vadd.f32 %v8789_v58, %v6813_v63  ;;  %v8752_v26 = vsel %vm4143_vm4, 1.0, %v16541_v4  ;;  %vm4153_vm3 = vcmp.eq.s32.totalorder %v13224_v43, %v9821_v11  ;;  %v16755_v43 = vld [vmem:[#allocation36_spill] sm:$0xff] }
 0x46d   :  { %v8780_v8 = vsel %vm4171_vm9, 1.0, %v16541_v4  ;;  %vm4101_vm15 = vcmp.eq.s32.totalorder %v13116_v20, %v9821_v11  ;;  %vm4083_vm12 = vcmp.eq.s32.totalorder %v13231_v55, %v9821_v11  ;;  %v8743_v21 = vsel %vm4134_vm13, 1.0, %v16541_v4 }
 0x46e   :  { %v13275_v37 = vpop.permute.xlu0 %2237  ;;  %v13282_v40 = vpop.permute.xlu1 %2276  ;;  %3413 = vbcast.lane.b32.xlu1 %v16753_v10, 264  ;;  %v6715_v5 = vadd.f32 %v6714_v59, %v6713_v38  ;;  %v8761_v63 = vsel %vm4152_vm2, 1.0, %v16541_v4  ;;  %vm4092_vm1 = vcmp.eq.s32.totalorder %v13159_v24, %v9821_v11  ;;  %v6728_v19 = vadd.f32 %v8733_v61, %v6727_v46  ;;  %v16757_v46 = vld [vmem:[#allocation40_spill] sm:$0xff] }
 0x46f   :  { %2350 = vbcast.lane.b32.xlu0 %v16754_v14, 288  ;;  %v6757_v34 = vadd.f32 %v8752_v26, %v6756_v36  ;;  %v8762_v29 = vsel %vm4153_vm3, 1.0, %v16541_v4  ;;  %v8692_v55 = vsel %vm4083_vm12, 1.0, %v16541_v4  ;;  %vm4093_vm11 = vcmp.eq.s32.totalorder %v13251_v27, %v9821_v11 }
 0x470   :  { %v6743_v35 = vadd.f32 %v8743_v21, %v6742_v18  ;;  %v6800_v9 = vadd.f32 %v8780_v8, %v6799_v28  ;;  %v8710_v30 = vsel %vm4101_vm15, 1.0, %v16541_v4  ;;  %v6771_v48 = vadd.f32 %v8761_v63, %v6770_v33  ;;  %v16759_v18 = vld [vmem:[#allocation43_spill] sm:$0xff] }
 0x471   :  { %v8701_v50 = vsel %vm4092_vm1, 1.0, %v16541_v4  ;;  %v6729_v0 = vrot.slane %v6728_v19, 4  ;;  %v6667_v33 = vadd.f32 %v8692_v55, %v6666_v12  ;;  %v8702_v24 = vsel %vm4093_vm11, 1.0, %v16541_v4 }
 0x472   :  { %v1898_v23 = vpop.permute.xlu0 %1897  ;;  %v2156_v49 = vpop.permute.xlu1 %2155  ;;  %2393 = vbcast.lane.b32.xlu1 %v16756_v22, 288  ;;  %v6772_v20 = vadd.f32 %v8762_v29, %v6771_v48  ;;  %v6716_v28 = vrot.slane %v6715_v5, 2  ;;  %v6681_v32 = vadd.f32 %v8701_v50, %v13261_v60  ;;  %vm4181_vm9 = vcmp.eq.s32.totalorder %v13179_v51, %v9821_v11  ;;  %v16760_v50 = vld [vmem:[#allocation47_spill] sm:$0xff] }
 0x473   :  { %2475 = vbcast.lane.b32.xlu0 %v16755_v43, 280  ;;  %vm4084_vm10 = vcmp.eq.s32.totalorder %v1898_v23, %v9821_v11  ;;  %vm4144_vm14 = vcmp.eq.s32.totalorder %v2156_v49, %v9821_v11  ;;  %v6744_v58 = vrot.slane %v6743_v35, 4  ;;  %vm4102_vm13 = vcmp.eq.s32.totalorder %v13201_v17, %v9821_v11 }
 0x474   :  { %v8753_v47 = vsel %vm4144_vm14, 1.0, %v16541_v4  ;;  %v8693_v25 = vsel %vm4084_vm10, 1.0, %v16541_v4  ;;  %vm4162_vm2 = vcmp.eq.s32.totalorder %v13206_v42, %v9821_v11  ;;  %v6682_v27 = vadd.f32 %v8702_v24, %v6681_v32 }
 0x475   :  { %v6758_v57 = vadd.f32 %v8753_v47, %v6757_v34  ;;  %v6668_v59 = vadd.f32 %v8693_v25, %v6667_v33  ;;  %vm4172_vm3 = vcmp.eq.s32.totalorder %v13282_v40, %v9821_v11  ;;  %v6695_v51 = vadd.f32 %v8710_v30, %v13226_v3 }
 0x476   :  { %v2199_v38 = vpop.permute.xlu0 %2198  ;;  %v13325_v15 = vpop.permute.xlu1 %2319  ;;  %2557 = vbcast.lane.b32.xlu1 %v16758_v41, 272  ;;  %v8790_v26 = vsel %vm4181_vm9, 1.0, %v16541_v4  ;;  %v6730_v8 = vadd.f32 %v6729_v0, %v6728_v19  ;;  %v8711_v40 = vsel %vm4102_vm13, 1.0, %v16541_v4  ;;  %v8771_v23 = vsel %vm4162_vm2, 1.0, %v16541_v4 }
 0x477   :  { %vm4154_vm4 = vcmp.eq.s32.totalorder %v2199_v38, %v9821_v11  ;;  %2635 = vbcast.lane.b32.xlu0 %v16757_v46, 256  ;;  %v6759_v61 = vrot.slane %v6758_v57, 4  ;;  %v6745_v63 = vadd.f32 %v6744_v58, %v6743_v35  ;;  %vm4163_vm12 = vcmp.eq.s32.totalorder %v13275_v37, %v9821_v11 }
 0x478   :  { %v8763_v31 = vsel %vm4154_vm4, 1.0, %v16541_v4  ;;  %v8781_v3 = vsel %vm4172_vm3, 1.0, %v16541_v4  ;;  %v6669_v19 = vrot.slane %v6668_v59, 4  ;;  %v13360_v55 = vadd.f32 %v6716_v28, %v6715_v5 }
 0x479   :  { %v6773_v12 = vadd.f32 %v8763_v31, %v6772_v20  ;;  %v6815_v17 = vadd.f32 %v8790_v26, %v13292_v2  ;;  %v6760_v47 = vadd.f32 %v6759_v61, %v6758_v57  ;;  %v6731_v42 = vrot.slane %v6730_v8, 2 }
 0x47a   :  { %v1941_v36 = vpop.permute.xlu0 %1940  ;;  %v1980_v60 = vpop.permute.xlu1 %1979  ;;  %2639 = vbcast.lane.b32.xlu1 %v16757_v46, 264  ;;  %v6696_v35 = vadd.f32 %v8711_v40, %v6695_v51  ;;  %v6786_v38 = vadd.f32 %v8771_v23, %v13277_v44  ;;  %v6746_v0 = vrot.slane %v6745_v63, 2  ;;  %v8772_v5 = vsel %vm4163_vm12, 1.0, %v16541_v4 }
 0x47b   :  { %vm4094_vm15 = vcmp.eq.s32.totalorder %v1941_v36, %v9821_v11  ;;  %2776 = vbcast.lane.b32.xlu0 %v16759_v18, 280  ;;  %v6774_v34 = vrot.slane %v6773_v12, 4  ;;  %v6801_v2 = vadd.f32 %v8781_v3, %v6800_v9  ;;  %vm4182_vm10 = vcmp.eq.s32.totalorder %v13325_v15, %v9821_v11 }
 0x47c   :  { %v8703_v21 = vsel %vm4094_vm15, 1.0, %v16541_v4  ;;  %v6670_v25 = vadd.f32 %v6669_v19, %v6668_v59  ;;  %vm4103_vm14 = vcmp.eq.s32.totalorder %v1980_v60, %v9821_v11  ;;  %v6761_v44 = vrot.slane %v6760_v47, 2 }
 0x47d   :  { %v6683_v49 = vadd.f32 %v8703_v21, %v6682_v27  ;;  %v6775_v57 = vadd.f32 %v6774_v34, %v6773_v12  ;;  %v6732_v37 = vadd.f32 %v6731_v42, %v6730_v8  ;;  %v6787_v9 = vadd.f32 %v8772_v5, %v6786_v38 }
 0x47e   :  { %v2324_v29 = vpop.permute.xlu0 %2323  ;;  %v2281_v48 = vpop.permute.xlu1 %2280  ;;  %2858 = vbcast.lane.b32.xlu1 %v16733_v16, 272  ;;  %v6747_v58 = vadd.f32 %v6746_v0, %v6745_v63  ;;  %v8712_v59 = vsel %vm4103_vm14, 1.0, %v16541_v4  ;;  %v6671_v27 = vrot.slane %v6670_v25, 2  ;;  %v8791_v61 = vsel %vm4182_vm10, 1.0, %v16541_v4  ;;  %v16761_v63 = vld [vmem:[#allocation53_spill] sm:$0xff] }
 0x47f   :  { %v6684_v30 = vrot.slane %v6683_v49, 4  ;;  %2936 = vbcast.lane.b32.xlu0 %v16760_v50, 256  ;;  %vm4173_vm1 = vcmp.eq.s32.totalorder %v2281_v48, %v9821_v11  ;;  %vm4183_vm9 = vcmp.eq.s32.totalorder %v2324_v29, %v9821_v11  ;;  %v6762_v26 = vadd.f32 %v6761_v44, %v6760_v47  ;;  %v16762_v44 = vld [vmem:[#allocation59_spill] sm:$0xff] }
 0x480   :  { %v8782_v20 = vsel %vm4173_vm1, 1.0, %v16541_v4  ;;  %v6776_v8 = vrot.slane %v6775_v57, 2  ;;  %v6697_v3 = vadd.f32 %v8712_v59, %v6696_v35  ;;  %v6733_v15 = vrot.slane %v6732_v37, 1 }
 0x481   :  { %v6685_v24 = vadd.f32 %v6684_v30, %v6683_v49  ;;  %v6802_v31 = vadd.f32 %v8782_v20, %v6801_v2  ;;  %v6718_v49 = vrot.slane %v13360_v55, 1  ;;  %v8792_v34 = vsel %vm4183_vm9, 1.0, %v16541_v4 }
 0x482   :  { %v2285_v33 = vpop.permute.xlu0 %2284  ;;  %v2242_v28 = vpop.permute.xlu1 %2241  ;;  %2940 = vbcast.lane.b32.xlu1 %v16760_v50, 264  ;;  %v6672_v30 = vadd.f32 %v6671_v27, %v6670_v25  ;;  %v6816_v48 = vadd.f32 %v8791_v61, %v6815_v17  ;;  %v6748_v5 = vrot.slane %v6747_v58, 1  ;;  %v6763_v2 = vrot.slane %v6762_v26, 1  ;;  %v16763_v25 = vld [vmem:[#allocation37_spill] sm:$0xff] }
 0x483   :  { %vm4174_vm11 = vcmp.eq.s32.totalorder %v2285_v33, %v9821_v11  ;;  %3030 = vbcast.lane.b32.xlu0 %v16736_v52, 272  ;;  %vm4164_vm4 = vcmp.eq.s32.totalorder %v2242_v28, %v9821_v11  ;;  %v6686_v21 = vrot.slane %v6685_v24, 2  ;;  %v6777_v20 = vadd.f32 %v6776_v8, %v6775_v57 }
 0x484   :  { %v8783_v32 = vsel %vm4174_vm11, 1.0, %v16541_v4  ;;  %v8773_v36 = vsel %vm4164_vm4, 1.0, %v16541_v4  ;;  %v6658_v17 = vrot.slane %v16763_v25, 1  ;;  %v6749_v8 = vadd.f32 %v6748_v5, %v6747_v58 }
 0x485   :  { %v6803_v12 = vadd.f32 %v8783_v32, %v6802_v31  ;;  %v6788_v60 = vadd.f32 %v8773_v36, %v6787_v9  ;;  %v6687_v33 = vadd.f32 %v6686_v21, %v6685_v24  ;;  %v6817_v31 = vadd.f32 %v8792_v34, %v6816_v48  ;;  %v16764_v48 = vld [vmem:[#allocation75_spill] sm:$0xff] }
 0x486   :  { %v13387_v51 = vpop.permute.xlu0 %2334  ;;  %v1984_v23 = vpop.permute.xlu1 %1983  ;;  %3073 = vbcast.lane.b32.xlu1 %v16737_v56, 272  ;;  %v6734_v32 = vadd.f32 %v6733_v15, %v6732_v37  ;;  %v6673_v36 = vrot.slane %v6672_v30, 1  ;;  %v6778_v21 = vrot.slane %v6777_v20, 1  ;;  %v6764_v37 = vadd.f32 %v6763_v2, %v6762_v26 }
 0x487   :  { %v6804_v40 = vrot.slane %v6803_v12, 4  ;;  %3151 = vbcast.lane.b32.xlu0 %v16761_v63, 256  ;;  %v6789_v19 = vrot.slane %v6788_v60, 4  ;;  %vm4104_vm13 = vcmp.eq.s32.totalorder %v1984_v23, %v9821_v11  ;;  %v6659_v34 = vadd.f32 %v6658_v17, %v16763_v25 }
 0x488   :  { %v8713_v47 = vsel %vm4104_vm13, 1.0, %v16541_v4  ;;  %vm16766_vm3 = vcmask 1046534   ;;  %vm16767_vm15 = vcmask 1047559   ;;  %vm16474_vm10 = vmmov 0  }
 0x489   :  { %v6805_v29 = vadd.f32 %v6804_v40, %v6803_v12  ;;  %v6790_v42 = vadd.f32 %v6789_v19, %v6788_v60  ;;  %v6698_v38 = vadd.f32 %v8713_v47, %v6697_v3  ;;  %v6719_v60 = vadd.f32 %v6718_v49, %v13360_v55  ;;  %vm16768_vm12 = vmmov %vm16766_vm3  ;;  %9396 = vmatprep.mubr.msk.f32.mxu1 %vm16474_vm10, %v16541_v4 }
 0x48a   :  { %v13395_v0 = vpop.permute.xlu0 %2377  ;;  %v2328_v35 = vpop.permute.xlu1 %2327  ;;  %3155 = vbcast.lane.b32.xlu1 %v16761_v63, 264  ;;  %v6688_v40 = vrot.slane %v6687_v33, 1  ;;  %v6674_v49 = vadd.f32 %v6673_v36, %v6672_v30  ;;  %vm16769_vm1 = vmmov %vm16767_vm15  ;;  %vm4185_vm11 = vcmp.eq.s32.totalorder %v13387_v51, %v9821_v11 }
 0x48b   :  { %3452 = vbcast.lane.b32.xlu0 %v16762_v44, 256  ;;  %v6791_v28 = vrot.slane %v6790_v42, 2  ;;  %v6699_v9 = vrot.slane %v6698_v38, 4  ;;  %vm4184_vm2 = vcmp.eq.s32.totalorder %v2328_v35, %v9821_v11  ;;  %v6806_v59 = vrot.slane %v6805_v29, 2 }
 0x48c   :  { %v8793_v12 = vsel %vm4184_vm2, 1.0, %v16541_v4  ;;  %v7443_v58 = vsel %vm7401_vm0, %v6734_v32, %v6719_v60  ;;  %v6689_v26 = vadd.f32 %v6688_v40, %v6687_v33  ;;  %vm4195_vm9 = vcmp.eq.s32.totalorder %v13395_v0, %v9821_v11 }
 0x48d   :  { %v6792_v27 = vadd.f32 %v6791_v28, %v6790_v42  ;;  %v6700_v57 = vadd.f32 %v6699_v9, %v6698_v38  ;;  %v6818_v24 = vadd.f32 %v8793_v12, %v6817_v31  ;;  %v6807_v47 = vadd.f32 %v6806_v59, %v6805_v29  ;;  %v16765_v42 = vld [vmem:[#allocation76_spill] sm:$0xff] }
 0x48e   :  { %v13402_v61 = vpop.permute.xlu0 %2420  ;;  %v13405_v23 = vpop.permute.xlu1 %2338  ;;  %3456 = vbcast.lane.b32.xlu1 %v16762_v44, 264  ;;  %v7438_v55 = vsel %vm7405_vm6, %v16765_v42, %v16764_v48  ;;  %v6779_v31 = vadd.f32 %v6778_v21, %v6777_v20  ;;  %v7444_v2 = vsel %vm7403_vm5, %v6749_v8, %v7443_v58  ;;  %v16770_v42 = vld [vmem:[#allocation48_spill] sm:$0xff]  ;;  %v16771_v58 = vld [vmem:[#allocation54_spill] sm:$0xff]  ;;  %v8804_v0 = vsel %vm4195_vm9, 1.0, %v16541_v4 }
 0x48f   :  { %2436 = vbcast.lane.b32.xlu0 %v16667_v1, 288  ;;  %v6793_v3 = vrot.slane %v6792_v27, 1  ;;  %v6701_v19 = vrot.slane %v6700_v57, 2  ;;  %v6819_v15 = vrot.slane %v6818_v24, 4  ;;  %v7445_v17 = vsel %vm7405_vm6, %v6764_v37, %v7444_v2 }
 0x490   :  { %v6808_v30 = vrot.slane %v6807_v47, 1  ;;  %v7439_v32 = vsel %vm7407_vm7, %v6659_v34, %v7438_v55  ;;  %vm4186_vm4 = vcmp.eq.s32.totalorder %v13405_v23, %v9821_v11  ;;  %vm4205_vm13 = vcmp.eq.s32.totalorder %v13402_v61, %v9821_v11 }
 0x491   :  { %v6702_v38 = vadd.f32 %v6701_v19, %v6700_v57  ;;  %v6820_v5 = vadd.f32 %v6819_v15, %v6818_v24  ;;  %v6794_v29 = vadd.f32 %v6793_v3, %v6792_v27  ;;  %v7440_v36 = vsel %vm16475_vm8, %v6674_v49, %v7439_v32 }
 0x492   :  { %v13414_v35 = vpop.permute.xlu0 %2678  ;;  %v13416_v28 = vpop.permute.xlu1 %2381  ;;  %2518 = vbcast.lane.b32.xlu1 %v16698_v45, 280  ;;  %v7441_v33 = vsel %vm16766_vm3, %v6689_v26, %v7440_v36  ;;  %v7446_v27 = vsel %vm7407_vm7, %v6779_v31, %v7445_v17  ;;  %v6809_v21 = vadd.f32 %v6808_v30, %v6807_v47  ;;  %v16773_v26 = vld [vmem:[#allocation60_spill] sm:$0xff]  ;;  %v8795_v51 = vsel %vm4186_vm4, 1.0, %v16541_v4 }
 0x493   :  { %2600 = vbcast.lane.b32.xlu0 %v16738_v6, 272  ;;  %v6821_v9 = vrot.slane %v6820_v5, 2  ;;  %v6703_v25 = vrot.slane %v6702_v38, 1  ;;  %v7447_v8 = vsel %vm16475_vm8, %v6794_v29, %v7446_v27  ;;  %vm4196_vm2 = vcmp.eq.s32.totalorder %v13416_v28, %v9821_v11 }
 0x494   :  { %v7448_v19 = vsel %vm16768_vm12, %v6809_v21, %v7447_v8  ;;  %v16788_v8 = vld [vmem:[#allocation55_spill] sm:$0xff]  ;;  %vm4265_vm3 = vcmp.eq.s32.totalorder %v13414_v35, %v9821_v11  ;;  %v8814_v23 = vsel %vm4205_vm13, 1.0, %v16541_v4  ;;  %v8805_v28 = vsel %vm4196_vm2, 1.0, %v16541_v4 }
 0x495   :  { %v6822_v59 = vadd.f32 %v6821_v9, %v6820_v5  ;;  %v6704_v20 = vadd.f32 %v6703_v25, %v6702_v38 }
 0x496   :  { %v13423_v12 = vpop.permute.xlu0 %2721  ;;  %v13426_v57 = vpop.permute.xlu1 %2424  ;;  %2694 = vbcast.lane.b32.xlu1 %v16669_v62, 288 }
 0x497   :  { %2737 = vbcast.lane.b32.xlu0 %v16673_v39, 288  ;;  %v7442_v24 = vsel %vm16767_vm15, %v6704_v20, %v7441_v33  ;;  %v6823_v60 = vrot.slane %v6822_v59, 1  ;;  %vm4206_vm15 = vcmp.eq.s32.totalorder %v13426_v57, %v9821_v11 }
 0x498   :  { %9355 = vmatprep.mubr.f32.mxu0 %v7442_v24 }
 0x499   :  { %v6824_v37 = vadd.f32 %v6823_v60, %v6822_v59 }
 0x49a   :  { %v13434_v40 = vpop.permute.xlu0 %2342  ;;  %v13436_v3 = vpop.permute.xlu1 %2682  ;;  %2819 = vbcast.lane.b32.xlu1 %v16712_v54, 280 }
 0x49b   :  { %2901 = vbcast.lane.b32.xlu0 %v16750_v7, 272  ;;  %v7449_v15 = vsel %vm16769_vm1, %v6824_v37, %v7448_v19  ;;  %v16791_v19 = vld [vmem:[#allocation61_spill] sm:$0xff]  ;;  %vm4187_vm12 = vcmp.eq.s32.totalorder %v13434_v40, %v9821_v11  ;;  %vm4266_vm1 = vcmp.eq.s32.totalorder %v13436_v3, %v9821_v11  ;;  %v8815_v40 = vsel %vm4206_vm15, 1.0, %v16541_v4 }
 0x49c   :  { %9356 = vmatmul.mubr.f32.gmra.mrb[4].mxu0 %v7449_v15  ;;  %v8796_v3 = vsel %vm4187_vm12, 1.0, %v16541_v4 }
 0x49e   :  { %v13442_v34 = vpop.permute.xlu0 %2463  ;;  %v13444_v48 = vpop.permute.xlu1 %2725  ;;  %2979 = vbcast.lane.b32.xlu1 %v16770_v42, 256 }
 0x49f   :  { %2983 = vbcast.lane.b32.xlu0 %v16770_v42, 264  ;;  %vm4215_vm9 = vcmp.eq.s32.totalorder %v13442_v34, %v9821_v11 }
 0x4a0   :  { %v8824_v34 = vsel %vm4215_vm9, 1.0, %v16541_v4 }
 0x4a2   :  { %v13448_v47 = vpop.permute.xlu0 %2764  ;;  %v13450_v55 = vpop.permute.xlu1 %2385  ;;  %3116 = vbcast.lane.b32.xlu1 %v16751_v13, 272 }
 0x4a3   :  { %3194 = vbcast.lane.b32.xlu0 %v16771_v58, 256  ;;  %vm4197_vm4 = vcmp.eq.s32.totalorder %v13450_v55, %v9821_v11  ;;  %vm4285_vm13 = vcmp.eq.s32.totalorder %v13448_v47, %v9821_v11 }
 0x4a6   :  { %v13454_v49 = vpop.permute.xlu0 %2428  ;;  %v13456_v38 = vpop.permute.xlu1 %2467  ;;  %3198 = vbcast.lane.b32.xlu1 %v16771_v58, 264 }
 0x4a7   :  { %3374 = vbcast.lane.b32.xlu0 %v16752_v53, 272  ;;  %vm4207_vm2 = vcmp.eq.s32.totalorder %v13454_v49, %v9821_v11 }
 0x4aa   :  { %v13460_v5 = vpop.permute.xlu0 %2510  ;;  %v13462_v31 = vpop.permute.xlu1 %2768  ;;  %3417 = vbcast.lane.b32.xlu1 %v16753_v10, 272 }
 0x4ab   :  { %16772 = vst [vmem:[#allocation77_spill] sm:$0xff] %v13462_v31  ;;  %3495 = vbcast.lane.b32.xlu0 %v16773_v26, 256  ;;  %vm4226_vm15 = vcmp.eq.s32.totalorder %v13460_v5, %v9821_v11 }
 0x4ae   :  { %v13466_v2 = vpop.permute.xlu0 %2729  ;;  %v13468_v29 = vpop.permute.xlu1 %2506  ;;  %3499 = vbcast.lane.b32.xlu1 %v16773_v26, 264 }
 0x4af   :  { %16774 = vst [vmem:[#allocation14_spill] sm:$0xff] %v13466_v2  ;;  %16775 = vst [vmem:[#allocation17_spill] sm:$0xff] %v13468_v29  ;;  %2354 = vbcast.lane.b32.xlu0 %v16754_v14, 296 }
 0x4b2   :  { %v13472_v9 = vpop.permute.xlu0 %2811  ;;  %v13474_v25 = vpop.permute.xlu1 %2686  ;;  %2397 = vbcast.lane.b32.xlu1 %v16756_v22, 296 }
 0x4b3   :  { %16776 = vst [vmem:[#allocation18_spill] sm:$0xff] %v13472_v9  ;;  %16777 = vst [vmem:[#allocation21_spill] sm:$0xff] %v13474_v25  ;;  %2479 = vbcast.lane.b32.xlu0 %v16755_v43, 288  ;;  %v16876_v9 = vld [vmem:[#allocation15_spill] sm:$0xff] }
 0x4b6   :  { %v13478_v17 = vpop.permute.xlu0 %2389  ;;  %v13480_v30 = vpop.permute.xlu1 %2807  ;;  %2561 = vbcast.lane.b32.xlu1 %v16758_v41, 280 }
 0x4b7   :  { %16778 = vst [vmem:[#allocation16_spill] sm:$0xff] %v13478_v17  ;;  %16779 = vst [vmem:[#allocation19_spill] sm:$0xff] %v13480_v30  ;;  %2643 = vbcast.lane.b32.xlu0 %v16757_v46, 272  ;;  %v16871_v30 = vld [vmem:[#allocation10_spill] sm:$0xff] }
 0x4ba   :  { %v13484_v32 = vpop.permute.xlu0 %2549  ;;  %v13486_v59 = vpop.permute.xlu1 %2346  ;;  %2780 = vbcast.lane.b32.xlu1 %v16759_v18, 288  ;;  %v16950_v49 = vld [vmem:[#allocation21_spill] sm:$0xff] }
 0x4bb   :  { %16780 = vst [vmem:[#allocation20_spill] sm:$0xff] %v13484_v32  ;;  %16781 = vst [vmem:[#allocation22_spill] sm:$0xff] %v13486_v59  ;;  %2862 = vbcast.lane.b32.xlu0 %v16733_v16, 280 }
 0x4be   :  { %v13490_v20 = vpop.permute.xlu0 %2772  ;;  %v13492_v36 = vpop.permute.xlu1 %2471  ;;  %2944 = vbcast.lane.b32.xlu1 %v16760_v50, 272  ;;  %v16952_v5 = vld [vmem:[#allocation16_spill] sm:$0xff] }
 0x4bf   :  { %16782 = vst [vmem:[#allocation44_spill] sm:$0xff] %v13490_v20  ;;  %16783 = vst [vmem:[#allocation25_spill] sm:$0xff] %v13492_v36  ;;  %3034 = vbcast.lane.b32.xlu0 %v16736_v52, 280  ;;  %v7648_v36 = vld [vmem:[%s16360_s4 + $0x28] sm:$0xff]  ;;  %vm4198_vm9 = vcmp.eq.s32.totalorder %v16952_v5, %v9821_v11 }
 0x4c2   :  { %v13496_v33 = vpop.permute.xlu0 %2854  ;;  %v13498_v27 = vpop.permute.xlu1 %2553  ;;  %3077 = vbcast.lane.b32.xlu1 %v16737_v56, 280 }
 0x4c3   :  { %16784 = vst [vmem:[#allocation26_spill] sm:$0xff] %v13496_v33  ;;  %16785 = vst [vmem:[#allocation27_spill] sm:$0xff] %v13498_v27  ;;  %3159 = vbcast.lane.b32.xlu0 %v16761_v63, 272  ;;  %v7645_v33 = vld [vmem:[%s16360_s4 + $0x10] sm:$0xff] }
 0x4c6   :  { %v13502_v24 = vpop.permute.xlu0 %3026  ;;  %v13504_v60 = vpop.permute.xlu1 %2850  ;;  %3237 = vbcast.lane.b32.xlu1 %v16788_v8, 256 }
 0x4c7   :  { %16786 = vst [vmem:[#allocation29_spill] sm:$0xff] %v13502_v24  ;;  %16787 = vst [vmem:[#allocation30_spill] sm:$0xff] %v13504_v60  ;;  %3241 = vbcast.lane.b32.xlu0 %v16788_v8, 264 }
 0x4ca   :  { %v13508_v21 = vpop.permute.xlu0 %3069  ;;  %v13510_v37 = vpop.permute.xlu1 %3022  ;;  %3460 = vbcast.lane.b32.xlu1 %v16762_v44, 272 }
 0x4cb   :  { %16789 = vst [vmem:[#allocation28_spill] sm:$0xff] %v13508_v21  ;;  %16790 = vst [vmem:[#allocation24_spill] sm:$0xff] %v13510_v37  ;;  %3538 = vbcast.lane.b32.xlu0 %v16791_v19, 256 }
 0x4ce   :  { %v13514_v15 = vpop.permute.xlu0 %2514  ;;  %v13516_v27 = vpop.permute.xlu1 %3065  ;;  %3542 = vbcast.lane.b32.xlu1 %v16791_v19, 264 }
 0x4cf   :  { %16792 = vst [vmem:[#allocation23_spill] sm:$0xff] %v13514_v15  ;;  %16793 = vst [vmem:[#allocation31_spill] sm:$0xff] %v13516_v27  ;;  %2440 = vbcast.lane.b32.xlu0 %v16667_v1, 296 }
 0x4d2   :  { %v13520_v60 = vpop.permute.xlu0 %2596  ;;  %v13522_v24 = vpop.permute.xlu1 %2432  ;;  %2522 = vbcast.lane.b32.xlu1 %v16698_v45, 288 }
 0x4d3   :  { %16794 = vst [vmem:[#allocation32_spill] sm:$0xff] %v13520_v60  ;;  %16795 = vst [vmem:[#allocation83_spill] sm:$0xff] %v13522_v24  ;;  %2604 = vbcast.lane.b32.xlu0 %v16738_v6, 280 }
 0x4d6   :  { %v13526_v21 = vpop.permute.xlu0 %2733  ;;  %v13528_v37 = vpop.permute.xlu1 %2592  ;;  %2698 = vbcast.lane.b32.xlu1 %v16669_v62, 296 }
 0x4d7   :  { %16796 = vst [vmem:[#allocation84_spill] sm:$0xff] %v13526_v21  ;;  %16797 = vst [vmem:[#allocation85_spill] sm:$0xff] %v13528_v37  ;;  %2741 = vbcast.lane.b32.xlu0 %v16673_v39, 296  ;;  %v7643_v21 = vld [vmem:[%s16360_s4] sm:$0xff]  ;;  %v7644_v37 = vld [vmem:[%s16360_s4 + $0x8] sm:$0xff] }
 0x4da   :  { %v13532_v27 = vpop.permute.xlu0 %2893  ;;  %v13534_v15 = vpop.permute.xlu1 %2690  ;;  %2823 = vbcast.lane.b32.xlu1 %v16712_v54, 288 }
 0x4db   :  { %16798 = vst [vmem:[#allocation86_spill] sm:$0xff] %v13532_v27  ;;  %16799 = vst [vmem:[#allocation87_spill] sm:$0xff] %v13534_v15  ;;  %2905 = vbcast.lane.b32.xlu0 %v16750_v7, 280  ;;  %v9502_v27 = vpack.c.bf16 %v7644_v37, %v7643_v21  ;;  %v16446_v15 = vmov 0.0|0.0   ;;  %v16804_v21 = vld [vmem:[#allocation56_spill] sm:$0xff] }
 0x4dc   :  { %9501 = vmatprep.subr.bf16.mxu1 %v16446_v15  ;;  %9549 = vmatprep.subr.bf16.mxu0 %v16446_v15 }
 0x4dd   :  { %9503 = vmatpush3.bf16.msra.mxu1 %v9502_v27 }
 0x4de   :  { %v13538_v24 = vpop.permute.xlu0 %3108  ;;  %v13546_v60 = vpop.permute.xlu1 %2815  ;;  %2987 = vbcast.lane.b32.xlu1 %v16770_v42, 272  ;;  %9504 = vmatprep.subr.bf16.mxu1 %v16446_v15 }
 0x4df   :  { %16800 = vst [vmem:[#allocation88_spill] sm:$0xff] %v13538_v24  ;;  %16801 = vst [vmem:[#allocation89_spill] sm:$0xff] %v13546_v60  ;;  %3120 = vbcast.lane.b32.xlu0 %v16751_v13, 280  ;;  %v7646_v60 = vld [vmem:[%s16360_s4 + $0x18] sm:$0xff] }
 0x4e0   :  { %v9505_v37 = vpack.c.bf16 %v7646_v60, %v7645_v33 }
 0x4e2   :  { %v13552_v24 = vpop.permute.xlu0 %3366  ;;  %v13561_v32 = vpop.permute.xlu1 %2897  ;;  %3202 = vbcast.lane.b32.xlu1 %v16771_v58, 272  ;;  %9506 = vmatpush3.bf16.msra.mxu1 %v9505_v37  ;;  %v7649_v37 = vld [vmem:[%s16360_s4 + $0x30] sm:$0xff] }
 0x4e3   :  { %16802 = vst [vmem:[#allocation45_spill] sm:$0xff] %v13552_v24  ;;  %16803 = vst [vmem:[#allocation91_spill] sm:$0xff] %v13561_v32  ;;  %3280 = vbcast.lane.b32.xlu0 %v16804_v21, 256  ;;  %9507 = vmatprep.subr.bf16.mxu1 %v16446_v15  ;;  %v7647_v24 = vld [vmem:[%s16360_s4 + $0x20] sm:$0xff] }
 0x4e4   :  { %v9508_v33 = vpack.c.bf16 %v7648_v36, %v7647_v24 }
 0x4e6   :  { %v13565_v27 = vpop.permute.xlu0 %3409  ;;  %v13574_v20 = vpop.permute.xlu1 %3112  ;;  %3284 = vbcast.lane.b32.xlu1 %v16804_v21, 264  ;;  %9509 = vmatpush3.bf16.msra.mxu1 %v9508_v33  ;;  %v7651_v33 = vld [vmem:[%s16360_s4 + $0x40] sm:$0xff] }
 0x4e7   :  { %16805 = vst [vmem:[#allocation90_spill] sm:$0xff] %v13565_v27  ;;  %16806 = vst [vmem:[#allocation50_spill] sm:$0xff] %v13574_v20  ;;  %3378 = vbcast.lane.b32.xlu0 %v16752_v53, 280  ;;  %9510 = vmatprep.subr.bf16.mxu1 %v16446_v15  ;;  %v7650_v27 = vld [vmem:[%s16360_s4 + $0x38] sm:$0xff] }
 0x4e8   :  { %v9511_v36 = vpack.c.bf16 %v7650_v27, %v7649_v37 }
 0x4ea   :  { %v13578_v60 = vpop.permute.xlu0 %2350  ;;  %v13587_v32 = vpop.permute.xlu1 %3370  ;;  %3421 = vbcast.lane.b32.xlu1 %v16753_v10, 280  ;;  %9512 = vmatpush3.bf16.msra.mxu1 %v9511_v36  ;;  %v7653_v36 = vld [vmem:[%s16360_s4 + $0x50] sm:$0xff] }
 0x4eb   :  { %16807 = vst [vmem:[#allocation51_spill] sm:$0xff] %v13578_v60  ;;  %16808 = vst [vmem:[#allocation39_spill] sm:$0xff] %v13587_v32  ;;  %3503 = vbcast.lane.b32.xlu0 %v16773_v26, 272  ;;  %9513 = vmatprep.subr.bf16.mxu1 %v16446_v15  ;;  %v7652_v60 = vld [vmem:[%s16360_s4 + $0x48] sm:$0xff]  ;;  %v16811_v32 = vld [vmem:[#allocation62_spill] sm:$0xff] }
 0x4ec   :  { %v9514_v27 = vpack.c.bf16 %v7652_v60, %v7651_v33 }
 0x4ee   :  { %v13591_v24 = vpop.permute.xlu0 %2475  ;;  %v13600_v20 = vpop.permute.xlu1 %3413  ;;  %3581 = vbcast.lane.b32.xlu1 %v16811_v32, 256  ;;  %9515 = vmatpush3.bf16.msra.mxu1 %v9514_v27  ;;  %v7655_v27 = vld [vmem:[%s16360_s4 + $0x60] sm:$0xff] }
 0x4ef   :  { %16809 = vst [vmem:[#allocation35_spill] sm:$0xff] %v13591_v24  ;;  %16810 = vst [vmem:[#allocation7_spill] sm:$0xff] %v13600_v20  ;;  %3585 = vbcast.lane.b32.xlu0 %v16811_v32, 264  ;;  %9516 = vmatprep.subr.bf16.mxu1 %v16446_v15  ;;  %v7654_v24 = vld [vmem:[%s16360_s4 + $0x58] sm:$0xff] }
 0x4f0   :  { %v9517_v60 = vpack.c.bf16 %v7654_v24, %v7653_v36 }
 0x4f2   :  { %v13604_v37 = vpop.permute.xlu0 %2635  ;;  %v13613_v59 = vpop.permute.xlu1 %2393  ;;  %2358 = vbcast.lane.b32.xlu1 %v16754_v14, 304  ;;  %9518 = vmatpush3.bf16.msra.mxu1 %v9517_v60  ;;  %v7657_v60 = vld [vmem:[%s16360_s4 + $0x70] sm:$0xff] }
 0x4f3   :  { %16812 = vst [vmem:[#allocation41_spill] sm:$0xff] %v13604_v37  ;;  %16813 = vst [vmem:[#allocation8_spill] sm:$0xff] %v13613_v59  ;;  %2401 = vbcast.lane.b32.xlu0 %v16756_v22, 304  ;;  %9519 = vmatprep.subr.bf16.mxu1 %v16446_v15  ;;  %v7656_v37 = vld [vmem:[%s16360_s4 + $0x68] sm:$0xff] }
 0x4f4   :  { %v9520_v24 = vpack.c.bf16 %v7656_v37, %v7655_v27 }
 0x4f6   :  { %v13617_v33 = vpop.permute.xlu0 %2776  ;;  %v13626_v20 = vpop.permute.xlu1 %2557  ;;  %2483 = vbcast.lane.b32.xlu1 %v16755_v43, 296  ;;  %9521 = vmatpush3.bf16.msra.mxu1 %v9520_v24 }
 0x4f7   :  { %16814 = vst [vmem:[#allocation67_spill] sm:$0xff] %v13617_v33  ;;  %16815 = vst [vmem:[#allocation42_spill] sm:$0xff] %v13626_v20  ;;  %2565 = vbcast.lane.b32.xlu0 %v16758_v41, 288  ;;  %9522 = vmatprep.subr.bf16.mxu1 %v16446_v15  ;;  %v7658_v33 = vld [vmem:[%s16360_s4 + $0x78] sm:$0xff]  ;;  %v16848_v20 = vld [vmem:[#allocation64_spill] sm:$0xff] }
 0x4f8   :  { %v9523_v37 = vpack.c.bf16 %v7658_v33, %v7657_v60 }
 0x4fa   :  { %v13630_v36 = vpop.permute.xlu0 %2936  ;;  %v13639_v59 = vpop.permute.xlu1 %2639  ;;  %2647 = vbcast.lane.b32.xlu1 %v16757_v46, 280  ;;  %9524 = vmatpush3.bf16.msra.mxu1 %v9523_v37 }
 0x4fb   :  { %16816 = vst [vmem:[#allocation11_spill] sm:$0xff] %v13630_v36  ;;  %16817 = vst [vmem:[#allocation9_spill] sm:$0xff] %v13639_v59  ;;  %2784 = vbcast.lane.b32.xlu0 %v16759_v18, 296  ;;  %9525 = vmatprep.subr.bf16.mxu1 %v16446_v15 }
 0x4fe   :  { %v13643_v27 = vpop.permute.xlu0 %3030  ;;  %v13648_v24 = vpop.permute.xlu1 %2858  ;;  %2866 = vbcast.lane.b32.xlu1 %v16733_v16, 288 }
 0x4ff   :  { %16818 = vst [vmem:[#allocation68_spill] sm:$0xff] %v13643_v27  ;;  %16819 = vst [vmem:[#allocation66_spill] sm:$0xff] %v13648_v24  ;;  %2948 = vbcast.lane.b32.xlu0 %v16760_v50, 280  ;;  %v16826_v24 = vld [vmem:[#allocation57_spill] sm:$0xff]  ;;  %v16831_v27 = vld [vmem:[#allocation63_spill] sm:$0xff] }
 0x502   :  { %v13652_v36 = vpop.permute.xlu0 %3151  ;;  %v13654_v59 = vpop.permute.xlu1 %2940  ;;  %3038 = vbcast.lane.b32.xlu1 %v16736_v52, 288 }
 0x503   :  { %16820 = vst [vmem:[#allocation5_spill] sm:$0xff] %v13652_v36  ;;  %16821 = vst [vmem:[#allocation46_spill] sm:$0xff] %v13654_v59  ;;  %3081 = vbcast.lane.b32.xlu0 %v16737_v56, 288 }
 0x506   :  { %v13658_v33 = vpop.permute.xlu0 %3452  ;;  %v13660_v60 = vpop.permute.xlu1 %3073  ;;  %3163 = vbcast.lane.b32.xlu1 %v16761_v63, 280 }
 0x507   :  { %16822 = vst [vmem:[#allocation52_spill] sm:$0xff] %v13658_v33  ;;  %16823 = vst [vmem:[#allocation58_spill] sm:$0xff] %v13660_v60  ;;  %3245 = vbcast.lane.b32.xlu0 %v16788_v8, 272 }
 0x50a   :  { %v13664_v37 = vpop.permute.xlu0 %2436  ;;  %v13666_v15 = vpop.permute.xlu1 %3155  ;;  %3323 = vbcast.lane.b32.xlu1 %v16826_v24, 256 }
 0x50b   :  { %16824 = vst [vmem:[#allocation33_spill] sm:$0xff] %v13664_v37  ;;  %16825 = vst [vmem:[#allocation36_spill] sm:$0xff] %v13666_v15  ;;  %3327 = vbcast.lane.b32.xlu0 %v16826_v24, 264 }
 0x50e   :  { %v13670_v36 = vpop.permute.xlu0 %2600  ;;  %v13672_v59 = vpop.permute.xlu1 %3456  ;;  %3464 = vbcast.lane.b32.xlu1 %v16762_v44, 280 }
 0x50f   :  { %16827 = vst [vmem:[#allocation34_spill] sm:$0xff] %v13670_v36  ;;  %16828 = vst [vmem:[#allocation40_spill] sm:$0xff] %v13672_v59  ;;  %3546 = vbcast.lane.b32.xlu0 %v16791_v19, 272 }
 0x512   :  { %v13676_v33 = vpop.permute.xlu0 %2737  ;;  %v13678_v60 = vpop.permute.xlu1 %2518  ;;  %3624 = vbcast.lane.b32.xlu1 %v16831_v27, 256 }
 0x513   :  { %16829 = vst [vmem:[#allocation38_spill] sm:$0xff] %v13676_v33  ;;  %16830 = vst [vmem:[#allocation43_spill] sm:$0xff] %v13678_v60  ;;  %3628 = vbcast.lane.b32.xlu0 %v16831_v27, 264 }
 0x516   :  { %v13682_v15 = vpop.permute.xlu0 %2901  ;;  %v13684_v37 = vpop.permute.xlu1 %2694  ;;  %2444 = vbcast.lane.b32.xlu1 %v16667_v1, 304 }
 0x517   :  { %16832 = vst [vmem:[#allocation47_spill] sm:$0xff] %v13682_v15  ;;  %16833 = vst [vmem:[#allocation53_spill] sm:$0xff] %v13684_v37  ;;  %2526 = vbcast.lane.b32.xlu0 %v16698_v45, 296 }
 0x51a   :  { %v13688_v59 = vpop.permute.xlu0 %2983  ;;  %v13690_v36 = vpop.permute.xlu1 %2819  ;;  %2608 = vbcast.lane.b32.xlu1 %v16738_v6, 288 }
 0x51b   :  { %16834 = vst [vmem:[#allocation59_spill] sm:$0xff] %v13688_v59  ;;  %16835 = vst [vmem:[#allocation37_spill] sm:$0xff] %v13690_v36  ;;  %2702 = vbcast.lane.b32.xlu0 %v16669_v62, 304 }
 0x51e   :  { %v13694_v60 = vpop.permute.xlu0 %3194  ;;  %v13696_v33 = vpop.permute.xlu1 %2979  ;;  %2745 = vbcast.lane.b32.xlu1 %v16673_v39, 304 }
 0x51f   :  { %16836 = vst [vmem:[#allocation75_spill] sm:$0xff] %v13694_v60  ;;  %16837 = vst [vmem:[#allocation76_spill] sm:$0xff] %v13696_v33  ;;  %2827 = vbcast.lane.b32.xlu0 %v16712_v54, 296 }
 0x522   :  { %v13700_v37 = vpop.permute.xlu0 %3374  ;;  %v13702_v15 = vpop.permute.xlu1 %3116  ;;  %2909 = vbcast.lane.b32.xlu1 %v16750_v7, 288 }
 0x523   :  { %16838 = vst [vmem:[#allocation48_spill] sm:$0xff] %v13700_v37  ;;  %16839 = vst [vmem:[#allocation55_spill] sm:$0xff] %v13702_v15  ;;  %2991 = vbcast.lane.b32.xlu0 %v16770_v42, 280 }
 0x526   :  { %v13706_v59 = vpop.permute.xlu0 %3495  ;;  %v13708_v36 = vpop.permute.xlu1 %3198  ;;  %3124 = vbcast.lane.b32.xlu1 %v16751_v13, 288 }
 0x527   :  { %16840 = vst [vmem:[#allocation61_spill] sm:$0xff] %v13706_v59  ;;  %16841 = vst [vmem:[#allocation56_spill] sm:$0xff] %v13708_v36  ;;  %3206 = vbcast.lane.b32.xlu0 %v16771_v58, 280 }
 0x52a   :  { %v13712_v60 = vpop.permute.xlu0 %2354  ;;  %v13714_v33 = vpop.permute.xlu1 %3417  ;;  %3288 = vbcast.lane.b32.xlu1 %v16804_v21, 272 }
 0x52b   :  { %16842 = vst [vmem:[#allocation63_spill] sm:$0xff] %v13712_v60  ;;  %16843 = vst [vmem:[#allocation92_spill] sm:$0xff] %v13714_v33  ;;  %3382 = vbcast.lane.b32.xlu0 %v16752_v53, 288 }
 0x52e   :  { %v13718_v15 = vpop.permute.xlu0 %2479  ;;  %v13720_v37 = vpop.permute.xlu1 %3499  ;;  %3425 = vbcast.lane.b32.xlu1 %v16753_v10, 288 }
 0x52f   :  { %16844 = vst [vmem:[#allocation93_spill] sm:$0xff] %v13718_v15  ;;  %16845 = vst [vmem:[#allocation94_spill] sm:$0xff] %v13720_v37  ;;  %3507 = vbcast.lane.b32.xlu0 %v16773_v26, 280 }
 0x532   :  { %v13724_v59 = vpop.permute.xlu0 %2643  ;;  %v13726_v36 = vpop.permute.xlu1 %2397  ;;  %3589 = vbcast.lane.b32.xlu1 %v16811_v32, 272 }
 0x533   :  { %16846 = vst [vmem:[#allocation95_spill] sm:$0xff] %v13724_v59  ;;  %16847 = vst [vmem:[#allocation96_spill] sm:$0xff] %v13726_v36  ;;  %3667 = vbcast.lane.b32.xlu0 %v16848_v20, 256 }
 0x536   :  { %v13730_v33 = vpop.permute.xlu0 %2862  ;;  %v13732_v60 = vpop.permute.xlu1 %2561  ;;  %3671 = vbcast.lane.b32.xlu1 %v16848_v20, 264 }
 0x537   :  { %16849 = vst [vmem:[#allocation97_spill] sm:$0xff] %v13730_v33  ;;  %16850 = vst [vmem:[#allocation98_spill] sm:$0xff] %v13732_v60  ;;  %2362 = vbcast.lane.b32.xlu0 %v16754_v14, 312 }
 0x53a   :  { %v13736_v37 = vpop.permute.xlu0 %3034  ;;  %v13738_v15 = vpop.permute.xlu1 %2780  ;;  %2405 = vbcast.lane.b32.xlu1 %v16756_v22, 312 }
 0x53b   :  { %16851 = vst [vmem:[#allocation99_spill] sm:$0xff] %v13736_v37  ;;  %16852 = vst [vmem:[#allocation100_spill] sm:$0xff] %v13738_v15  ;;  %2487 = vbcast.lane.b32.xlu0 %v16755_v43, 304 }
 0x53e   :  { %v13742_v59 = vpop.permute.xlu0 %3159  ;;  %v13744_v36 = vpop.permute.xlu1 %2944  ;;  %2569 = vbcast.lane.b32.xlu1 %v16758_v41, 296 }
 0x53f   :  { %16853 = vst [vmem:[#allocation101_spill] sm:$0xff] %v13742_v59  ;;  %16854 = vst [vmem:[#allocation102_spill] sm:$0xff] %v13744_v36  ;;  %2651 = vbcast.lane.b32.xlu0 %v16757_v46, 288 }
 0x542   :  { %v13748_v60 = vpop.permute.xlu0 %3241  ;;  %v13750_v33 = vpop.permute.xlu1 %3077  ;;  %2788 = vbcast.lane.b32.xlu1 %v16759_v18, 304 }
 0x543   :  { %16855 = vst [vmem:[#allocation103_spill] sm:$0xff] %v13748_v60  ;;  %16856 = vst [vmem:[#allocation104_spill] sm:$0xff] %v13750_v33  ;;  %2870 = vbcast.lane.b32.xlu0 %v16733_v16, 296 }
 0x546   :  { %v13754_v15 = vpop.permute.xlu0 %3538  ;;  %v13756_v37 = vpop.permute.xlu1 %3237  ;;  %2952 = vbcast.lane.b32.xlu1 %v16760_v50, 288 }
 0x547   :  { %16857 = vst [vmem:[#allocation105_spill] sm:$0xff] %v13754_v15  ;;  %16858 = vst [vmem:[#allocation106_spill] sm:$0xff] %v13756_v37  ;;  %3042 = vbcast.lane.b32.xlu0 %v16736_v52, 296 }
 0x54a   :  { %v13760_v36 = vpop.permute.xlu0 %2440  ;;  %v13762_v59 = vpop.permute.xlu1 %3460  ;;  %3085 = vbcast.lane.b32.xlu1 %v16737_v56, 296 }
 0x54b   :  { %16859 = vst [vmem:[#allocation107_spill] sm:$0xff] %v13760_v36  ;;  %16860 = vst [vmem:[#allocation108_spill] sm:$0xff] %v13762_v59  ;;  %3167 = vbcast.lane.b32.xlu0 %v16761_v63, 288 }
 0x54e   :  { %v13766_v60 = vpop.permute.xlu0 %2604  ;;  %v13768_v33 = vpop.permute.xlu1 %3542  ;;  %3249 = vbcast.lane.b32.xlu1 %v16788_v8, 280 }
 0x54f   :  { %16861 = vst [vmem:[#allocation109_spill] sm:$0xff] %v13766_v60  ;;  %16862 = vst [vmem:[#allocation110_spill] sm:$0xff] %v13768_v33  ;;  %3331 = vbcast.lane.b32.xlu0 %v16826_v24, 272 }
 0x552   :  { %v13772_v15 = vpop.permute.xlu0 %2741  ;;  %v13774_v37 = vpop.permute.xlu1 %2522  ;;  %3468 = vbcast.lane.b32.xlu1 %v16762_v44, 288 }
 0x553   :  { %16863 = vst [vmem:[#allocation111_spill] sm:$0xff] %v13772_v15  ;;  %16864 = vst [vmem:[#allocation112_spill] sm:$0xff] %v13774_v37  ;;  %3550 = vbcast.lane.b32.xlu0 %v16791_v19, 280  ;;  %v16870_v15 = vld [vmem:[#allocation13_spill] sm:$0xff] }
 0x554   :  { %v7630_v17 = vadd.f32 %v16871_v30, %v16870_v15 }
 0x556   :  { %v13778_v59 = vpop.permute.xlu0 %2905  ;;  %v13780_v36 = vpop.permute.xlu1 %2698  ;;  %3632 = vbcast.lane.b32.xlu1 %v16831_v27, 272  ;;  %v7631_v29 = vadd.f32 %v16876_v9, %v7630_v17 }
 0x557   :  { %16865 = vst [vmem:[#allocation113_spill] sm:$0xff] %v13778_v59  ;;  %16866 = vst [vmem:[#allocation114_spill] sm:$0xff] %v13780_v36  ;;  %2448 = vbcast.lane.b32.xlu0 %v16667_v1, 312  ;;  %v16873_v36 = vld [vmem:[#allocation78_spill] sm:$0xff] }
 0x558   :  { %vm234_vm14 = vcmp.gt.f32.partialorder %v16873_v36, 0.0 }
 0x559   :  { %v8309_v30 = vsel %vm234_vm14, 1.0, %v16541_v4  ;;  %vm4275_vm14 = vcmp.eq.s32.totalorder %v13423_v12, %v9821_v11  ;;  %v8874_v12 = vsel %vm4265_vm3, 1.0, %v16541_v4  ;;  %vm4216_vm3 = vcmp.eq.s32.totalorder %v13456_v38, %v9821_v11 }
 0x55a   :  { %v13784_v60 = vpop.permute.xlu0 %3120  ;;  %v13786_v33 = vpop.permute.xlu1 %2823  ;;  %2530 = vbcast.lane.b32.xlu1 %v16698_v45, 304  ;;  %v8816_v38 = vsel %vm4207_vm2, 1.0, %v16541_v4 }
 0x55b   :  { %16867 = vst [vmem:[#allocation115_spill] sm:$0xff] %v13784_v60  ;;  %16868 = vst [vmem:[#allocation116_spill] sm:$0xff] %v13786_v33  ;;  %2612 = vbcast.lane.b32.xlu0 %v16738_v6, 296  ;;  %v16875_v33 = vld [vmem:[#allocation69_spill] sm:$0xff] }
 0x55c   :  { %v175_v25 = vmax.f32 %v16875_v33, 1.0 }
 0x55e   :  { %v13790_v37 = vpop.permute.xlu0 %3280  ;;  %v13794_v59 = vpop.permute.xlu1 %2987  ;;  %2706 = vbcast.lane.b32.xlu1 %v16669_v62, 312  ;;  %9686 = vrcp.f32 %v175_v25 }
 0x55f   :  { %16869 = vst [vmem:[#allocation117_spill] sm:$0xff] %v13790_v37  ;;  %16872 = vst [vmem:[#allocation13_spill] sm:$0xff] %v13794_v59  ;;  %2749 = vbcast.lane.b32.xlu0 %v16673_v39, 312  ;;  %v7632_v37 = vadd.f32 %v8309_v30, %v7631_v29 }
 0x561   :  { %v7633_v9 = vmax.f32 %v7632_v37, 1.0 }
 0x562   :  { %v13799_v60 = vpop.permute.xlu0 %3378  ;;  %v13803_v2 = vpop.permute.xlu1 %3202  ;;  %2831 = vbcast.lane.b32.xlu1 %v16712_v54, 304 }
 0x563   :  { %16874 = vst [vmem:[#allocation10_spill] sm:$0xff] %v13799_v60  ;;  %16877 = vst [vmem:[#allocation78_spill] sm:$0xff] %v13803_v2  ;;  %2913 = vbcast.lane.b32.xlu0 %v16750_v7, 296  ;;  %9688 = vrcp.f32 %v7633_v9  ;;  %v9708_v9 = vld [vmem:[%s16359_s3] ss:$0 sm:$0xff] }
 0x566   :  { %v13808_v15 = vpop.permute.xlu0 %3503  ;;  %v13810_v59 = vpop.permute.xlu1 %3284  ;;  %2995 = vbcast.lane.b32.xlu1 %v16770_v42, 288 }
 0x567   :  { %16878 = vst [vmem:[#allocation69_spill] sm:$0xff] %v13808_v15  ;;  %16879 = vst [vmem:[#allocation15_spill] sm:$0xff] %v13810_v59  ;;  %3128 = vbcast.lane.b32.xlu0 %v16751_v13, 296 }
 0x568   :  { %v9687_v59 = vpop.eup %9686 }
 0x56a   :  { %v13814_v36 = vpop.permute.xlu0 %3585  ;;  %v13816_v17 = vpop.permute.xlu1 %3421  ;;  %3210 = vbcast.lane.b32.xlu1 %v16771_v58, 288 }
 0x56b   :  { %16880 = vst [vmem:[#allocation118_spill] sm:$0xff] %v13814_v36  ;;  %16881 = vst [vmem:[#allocation119_spill] sm:$0xff] %v13816_v17  ;;  %3292 = vbcast.lane.b32.xlu0 %v16804_v21, 280 }
 0x56e   :  { %v13820_v33 = vpop.permute.xlu0 %2401  ;;  %v13822_v25 = vpop.permute.xlu1 %3581  ;;  %3386 = vbcast.lane.b32.xlu1 %v16752_v53, 296 }
 0x56f   :  { %16882 = vst [vmem:[#allocation120_spill] sm:$0xff] %v13820_v33  ;;  %16883 = vst [vmem:[#allocation121_spill] sm:$0xff] %v13822_v25  ;;  %3429 = vbcast.lane.b32.xlu0 %v16753_v10, 296  ;;  %v13826_v29 = vpop.f32.mrb[4].mxu0 }
 0x570   :  { %16884 = vst [vmem:[#allocation122_spill] sm:$0xff] %v13826_v29  ;;  %v7574_v36 = vpop.f32.mrb[5].mxu0 }
 0x571   :  { %v7607_v17 = vmul.f32 %v9687_v59, %v7574_v36  ;;  %v16887_v59 = vld [vmem:[#allocation12_spill] sm:$0xff] }
 0x572   :  { %v13828_v37 = vpop.permute.xlu0 %2565  ;;  %v13830_v15 = vpop.permute.xlu1 %2358  ;;  %3511 = vbcast.lane.b32.xlu1 %v16773_v26, 288 }
 0x573   :  { %16885 = vst [vmem:[#allocation123_spill] sm:$0xff] %v13828_v37  ;;  %16886 = vst [vmem:[#allocation124_spill] sm:$0xff] %v13830_v15  ;;  %3593 = vbcast.lane.b32.xlu0 %v16811_v32, 280  ;;  %v7624_v25 = vadd.f32 %v9708_v9, %v7607_v17  ;;  %v9689_v15 = vpop.eup %9688 }
 0x575   :  { %v7637_v33 = vmul.f32 %v8309_v30, %v7624_v25 }
 0x576   :  { %v13837_v2 = vpop.permute.xlu0 %2784  ;;  %v13839_v29 = vpop.permute.xlu1 %2483  ;;  %3675 = vbcast.lane.b32.xlu1 %v16848_v20, 272 }
 0x577   :  { %2366 = vbcast.lane.b32.xlu0 %v16754_v14, 320  ;;  %v7640_v36 = vadd.f32 %v16887_v59, %v7637_v33 }
 0x579   :  { %v7642_v60 = vmul.f32 %v9689_v15, %v7640_v36 }
 0x57a   :  { %v13844_v37 = vpop.permute.xlu0 %2948  ;;  %v13846_v31 = vpop.permute.xlu1 %2647  ;;  %2409 = vbcast.lane.b32.xlu1 %v16756_v22, 320 }
 0x57b   :  { %16888 = vst [vmem:[#allocation12_spill] sm:$0xff] %v13844_v37  ;;  %16889 = vst [vmem:[#allocation125_spill] sm:$0xff] %v13846_v31  ;;  %2491 = vbcast.lane.b32.xlu0 %v16755_v43, 312  ;;  %9397 = vmatmul.mubr.f32.vlgmr.msra.gmra.mrb[0].mxu1 %v7642_v60 }
 0x57c   :  { %9431 = vmatprep.mubr.msk.f32.mxu1 %vm16474_vm10, %v16541_v4 }
 0x57e   :  { %v13852_v30 = vpop.permute.xlu0 %3081  ;;  %v13854_v17 = vpop.permute.xlu1 %2866  ;;  %2573 = vbcast.lane.b32.xlu1 %v16758_v41, 304 }
 0x57f   :  { %2655 = vbcast.lane.b32.xlu0 %v16757_v46, 296 }
 0x582   :  { %v13858_v33 = vpop.permute.xlu0 %3245  ;;  %v13860_v15 = vpop.permute.xlu1 %3038  ;;  %2792 = vbcast.lane.b32.xlu1 %v16759_v18, 312 }
 0x583   :  { %2874 = vbcast.lane.b32.xlu0 %v16733_v16, 304 }
 0x586   :  { %v13864_v60 = vpop.permute.xlu0 %3327  ;;  %v13866_v25 = vpop.permute.xlu1 %3163  ;;  %2956 = vbcast.lane.b32.xlu1 %v16760_v50, 296 }
 0x587   :  { %16890 = vst [vmem:[#allocation126_spill] sm:$0xff] %v13864_v60  ;;  %16891 = vst [vmem:[#allocation127_spill] sm:$0xff] %v13866_v25  ;;  %3046 = vbcast.lane.b32.xlu0 %v16736_v52, 304  ;;  %v16980_v25 = vld [vmem:[#allocation91_spill] sm:$0xff] }
 0x58a   :  { %v13870_v9 = vpop.permute.xlu0 %3546  ;;  %v13872_v59 = vpop.permute.xlu1 %3323  ;;  %3089 = vbcast.lane.b32.xlu1 %v16737_v56, 304 }
 0x58b   :  { %16892 = vst [vmem:[#allocation128_spill] sm:$0xff] %v13870_v9  ;;  %16893 = vst [vmem:[#allocation129_spill] sm:$0xff] %v13872_v59  ;;  %3171 = vbcast.lane.b32.xlu0 %v16761_v63, 296 }
 0x58e   :  { %v13876_v36 = vpop.permute.xlu0 %3628  ;;  %v13878_v37 = vpop.permute.xlu1 %3464  ;;  %3253 = vbcast.lane.b32.xlu1 %v16788_v8, 288 }
 0x58f   :  { %16894 = vst [vmem:[#allocation130_spill] sm:$0xff] %v13876_v36  ;;  %16895 = vst [vmem:[#allocation131_spill] sm:$0xff] %v13878_v37  ;;  %3335 = vbcast.lane.b32.xlu0 %v16826_v24, 280 }
 0x592   :  { %v13882_v31 = vpop.permute.xlu0 %2526  ;;  %v13884_v60 = vpop.permute.xlu1 %3624  ;;  %3472 = vbcast.lane.b32.xlu1 %v16762_v44, 296 }
 0x593   :  { %16896 = vst [vmem:[#allocation132_spill] sm:$0xff] %v13882_v31  ;;  %16897 = vst [vmem:[#allocation133_spill] sm:$0xff] %v13884_v60  ;;  %3554 = vbcast.lane.b32.xlu0 %v16791_v19, 288 }
 0x596   :  { %v13888_v59 = vpop.permute.xlu0 %2702  ;;  %v13890_v9 = vpop.permute.xlu1 %2444  ;;  %3636 = vbcast.lane.b32.xlu1 %v16831_v27, 280 }
 0x597   :  { %16898 = vst [vmem:[#allocation134_spill] sm:$0xff] %v13888_v59  ;;  %16899 = vst [vmem:[#allocation135_spill] sm:$0xff] %v13890_v9  ;;  %2452 = vbcast.lane.b32.xlu0 %v16667_v1, 320 }
 0x59a   :  { %v13894_v36 = vpop.permute.xlu0 %2827  ;;  %v13896_v37 = vpop.permute.xlu1 %2608  ;;  %2534 = vbcast.lane.b32.xlu1 %v16698_v45, 312 }
 0x59b   :  { %16900 = vst [vmem:[#allocation136_spill] sm:$0xff] %v13894_v36  ;;  %16901 = vst [vmem:[#allocation137_spill] sm:$0xff] %v13896_v37  ;;  %2616 = vbcast.lane.b32.xlu0 %v16738_v6, 304 }
 0x59e   :  { %v13900_v60 = vpop.permute.xlu0 %2991  ;;  %v13902_v31 = vpop.permute.xlu1 %2745  ;;  %2710 = vbcast.lane.b32.xlu1 %v16669_v62, 320 }
 0x59f   :  { %16902 = vst [vmem:[#allocation138_spill] sm:$0xff] %v13900_v60  ;;  %16903 = vst [vmem:[#allocation139_spill] sm:$0xff] %v13902_v31  ;;  %2753 = vbcast.lane.b32.xlu0 %v16673_v39, 320 }
 0x5a2   :  { %v13906_v9 = vpop.permute.xlu0 %3206  ;;  %v13908_v59 = vpop.permute.xlu1 %2909  ;;  %2835 = vbcast.lane.b32.xlu1 %v16712_v54, 312 }
 0x5a3   :  { %16904 = vst [vmem:[#allocation140_spill] sm:$0xff] %v13906_v9  ;;  %16905 = vst [vmem:[#allocation141_spill] sm:$0xff] %v13908_v59  ;;  %2917 = vbcast.lane.b32.xlu0 %v16750_v7, 304 }
 0x5a6   :  { %v13912_v37 = vpop.permute.xlu0 %3382  ;;  %v13914_v36 = vpop.permute.xlu1 %3124  ;;  %2999 = vbcast.lane.b32.xlu1 %v16770_v42, 296 }
 0x5a7   :  { %16906 = vst [vmem:[#allocation142_spill] sm:$0xff] %v13912_v37  ;;  %16907 = vst [vmem:[#allocation143_spill] sm:$0xff] %v13914_v36  ;;  %3132 = vbcast.lane.b32.xlu0 %v16751_v13, 304 }
 0x5aa   :  { %v13918_v31 = vpop.permute.xlu0 %3507  ;;  %v13920_v60 = vpop.permute.xlu1 %3288  ;;  %3214 = vbcast.lane.b32.xlu1 %v16771_v58, 296 }
 0x5ab   :  { %16908 = vst [vmem:[#allocation144_spill] sm:$0xff] %v13918_v31  ;;  %16909 = vst [vmem:[#allocation145_spill] sm:$0xff] %v13920_v60  ;;  %3296 = vbcast.lane.b32.xlu0 %v16804_v21, 288 }
 0x5ae   :  { %v13924_v59 = vpop.permute.xlu0 %3667  ;;  %v13926_v9 = vpop.permute.xlu1 %3425  ;;  %3390 = vbcast.lane.b32.xlu1 %v16752_v53, 304 }
 0x5af   :  { %16910 = vst [vmem:[#allocation146_spill] sm:$0xff] %v13924_v59  ;;  %16911 = vst [vmem:[#allocation147_spill] sm:$0xff] %v13926_v9  ;;  %3433 = vbcast.lane.b32.xlu0 %v16753_v10, 304 }
 0x5b2   :  { %v13930_v36 = vpop.permute.xlu0 %2362  ;;  %v13932_v37 = vpop.permute.xlu1 %3589  ;;  %3515 = vbcast.lane.b32.xlu1 %v16773_v26, 296 }
 0x5b3   :  { %16912 = vst [vmem:[#allocation148_spill] sm:$0xff] %v13930_v36  ;;  %16913 = vst [vmem:[#allocation149_spill] sm:$0xff] %v13932_v37  ;;  %3597 = vbcast.lane.b32.xlu0 %v16811_v32, 288 }
 0x5b6   :  { %v13936_v60 = vpop.permute.xlu0 %2487  ;;  %v13938_v31 = vpop.permute.xlu1 %3671  ;;  %3679 = vbcast.lane.b32.xlu1 %v16848_v20, 280 }
 0x5b7   :  { %16914 = vst [vmem:[#allocation150_spill] sm:$0xff] %v13936_v60  ;;  %16915 = vst [vmem:[#allocation151_spill] sm:$0xff] %v13938_v31  ;;  %2370 = vbcast.lane.b32.xlu0 %v16754_v14, 328 }
 0x5ba   :  { %v13942_v59 = vpop.permute.xlu0 %2651  ;;  %v13944_v9 = vpop.permute.xlu1 %2405  ;;  %2413 = vbcast.lane.b32.xlu1 %v16756_v22, 328 }
 0x5bb   :  { %16916 = vst [vmem:[#allocation152_spill] sm:$0xff] %v13942_v59  ;;  %16917 = vst [vmem:[#allocation153_spill] sm:$0xff] %v13944_v9  ;;  %2495 = vbcast.lane.b32.xlu0 %v16755_v43, 320 }
 0x5be   :  { %v13948_v37 = vpop.permute.xlu0 %2870  ;;  %v13950_v36 = vpop.permute.xlu1 %2569  ;;  %2577 = vbcast.lane.b32.xlu1 %v16758_v41, 312 }
 0x5bf   :  { %16918 = vst [vmem:[#allocation154_spill] sm:$0xff] %v13948_v37  ;;  %16919 = vst [vmem:[#allocation155_spill] sm:$0xff] %v13950_v36  ;;  %2659 = vbcast.lane.b32.xlu0 %v16757_v46, 304  ;;  %v16960_v37 = vld [vmem:[#allocation20_spill] sm:$0xff] }
 0x5c2   :  { %v13954_v31 = vpop.permute.xlu0 %3042  ;;  %v13956_v14 = vpop.permute.xlu1 %2788  ;;  %2796 = vbcast.lane.b32.xlu1 %v16759_v18, 320 }
 0x5c3   :  { %16920 = vst [vmem:[#allocation156_spill] sm:$0xff] %v13954_v31  ;;  %16921 = vst [vmem:[#allocation157_spill] sm:$0xff] %v13956_v14  ;;  %2878 = vbcast.lane.b32.xlu0 %v16733_v16, 312 }
 0x5c6   :  { %v13960_v59 = vpop.permute.xlu0 %3167  ;;  %v13962_v9 = vpop.permute.xlu1 %2952  ;;  %2960 = vbcast.lane.b32.xlu1 %v16760_v50, 304 }
 0x5c7   :  { %16922 = vst [vmem:[#allocation158_spill] sm:$0xff] %v13960_v59  ;;  %16923 = vst [vmem:[#allocation159_spill] sm:$0xff] %v13962_v9  ;;  %3050 = vbcast.lane.b32.xlu0 %v16736_v52, 312 }
 0x5ca   :  { %v13966_v22 = vpop.permute.xlu0 %3331  ;;  %v13968_v36 = vpop.permute.xlu1 %3085  ;;  %3093 = vbcast.lane.b32.xlu1 %v16737_v56, 312 }
 0x5cb   :  { %16924 = vst [vmem:[#allocation160_spill] sm:$0xff] %v13966_v22  ;;  %16925 = vst [vmem:[#allocation161_spill] sm:$0xff] %v13968_v36  ;;  %3175 = vbcast.lane.b32.xlu0 %v16761_v63, 304 }
 0x5ce   :  { %v13972_v14 = vpop.permute.xlu0 %3550  ;;  %v13974_v31 = vpop.permute.xlu1 %3249  ;;  %3257 = vbcast.lane.b32.xlu1 %v16788_v8, 296 }
 0x5cf   :  { %16926 = vst [vmem:[#allocation162_spill] sm:$0xff] %v13972_v14  ;;  %16927 = vst [vmem:[#allocation163_spill] sm:$0xff] %v13974_v31  ;;  %3339 = vbcast.lane.b32.xlu0 %v16826_v24, 288 }
 0x5d2   :  { %v13978_v9 = vpop.permute.xlu0 %2448  ;;  %v13980_v59 = vpop.permute.xlu1 %3468  ;;  %3476 = vbcast.lane.b32.xlu1 %v16762_v44, 304 }
 0x5d3   :  { %16928 = vst [vmem:[#allocation164_spill] sm:$0xff] %v13978_v9  ;;  %16929 = vst [vmem:[#allocation165_spill] sm:$0xff] %v13980_v59  ;;  %3558 = vbcast.lane.b32.xlu0 %v16791_v19, 296 }
 0x5d6   :  { %v13984_v36 = vpop.permute.xlu0 %2612  ;;  %v13986_v22 = vpop.permute.xlu1 %3632  ;;  %3640 = vbcast.lane.b32.xlu1 %v16831_v27, 288 }
 0x5d7   :  { %16930 = vst [vmem:[#allocation166_spill] sm:$0xff] %v13984_v36  ;;  %16931 = vst [vmem:[#allocation167_spill] sm:$0xff] %v13986_v22  ;;  %2456 = vbcast.lane.b32.xlu0 %v16667_v1, 328 }
 0x5da   :  { %v13990_v31 = vpop.permute.xlu0 %2749  ;;  %v13992_v14 = vpop.permute.xlu1 %2530  ;;  %2538 = vbcast.lane.b32.xlu1 %v16698_v45, 320 }
 0x5db   :  { %16932 = vst [vmem:[#allocation168_spill] sm:$0xff] %v13990_v31  ;;  %16933 = vst [vmem:[#allocation169_spill] sm:$0xff] %v13992_v14  ;;  %2620 = vbcast.lane.b32.xlu0 %v16738_v6, 312 }
 0x5de   :  { %v13996_v59 = vpop.permute.xlu0 %2913  ;;  %v13998_v9 = vpop.permute.xlu1 %2706  ;;  %2714 = vbcast.lane.b32.xlu1 %v16669_v62, 328 }
 0x5df   :  { %16934 = vst [vmem:[#allocation170_spill] sm:$0xff] %v13996_v59  ;;  %16935 = vst [vmem:[#allocation171_spill] sm:$0xff] %v13998_v9  ;;  %2757 = vbcast.lane.b32.xlu0 %v16673_v39, 328  ;;  %v8894_v59 = vsel %vm4285_vm13, 1.0, %v16541_v4 }
 0x5e2   :  { %v14002_v36 = vpop.permute.xlu0 %3128  ;;  %v14004_v1 = vpop.permute.xlu1 %2831  ;;  %2839 = vbcast.lane.b32.xlu1 %v16712_v54, 320 }
 0x5e3   :  { %16936 = vst [vmem:[#allocation172_spill] sm:$0xff] %v14002_v36  ;;  %16937 = vst [vmem:[#allocation173_spill] sm:$0xff] %v14004_v1  ;;  %2921 = vbcast.lane.b32.xlu0 %v16750_v7, 312 }
 0x5e6   :  { %v14008_v14 = vpop.permute.xlu0 %3292  ;;  %v14010_v22 = vpop.permute.xlu1 %2995  ;;  %3003 = vbcast.lane.b32.xlu1 %v16770_v42, 304 }
 0x5e7   :  { %16938 = vst [vmem:[#allocation174_spill] sm:$0xff] %v14008_v14  ;;  %16939 = vst [vmem:[#allocation175_spill] sm:$0xff] %v14010_v22  ;;  %3136 = vbcast.lane.b32.xlu0 %v16751_v13, 312  ;;  %v8794_v22 = vsel %vm4185_vm11, 1.0, %v16541_v4  ;;  %vm4276_vm11 = vcmp.eq.s32.totalorder %v13444_v48, %v9821_v11  ;;  %v8875_v48 = vsel %vm4266_vm1, 1.0, %v16541_v4 }
 0x5e8   :  { %v6825_v35 = vadd.f32 %v8795_v51, %v8794_v22  ;;  %v8884_v22 = vsel %vm4275_vm14, 1.0, %v16541_v4  ;;  %v8885_v55 = vsel %vm4276_vm11, 1.0, %v16541_v4  ;;  %v6840_v51 = vadd.f32 %v8805_v28, %v8804_v0  ;;  %v16946_v0 = vld [vmem:[#allocation77_spill] sm:$0xff]  ;;  %v16949_v28 = vld [vmem:[#allocation18_spill] sm:$0xff] }
 0x5e9   :  { %v6945_v14 = vadd.f32 %v8875_v48, %v8874_v12  ;;  %v6960_v36 = vadd.f32 %v8885_v55, %v8884_v22  ;;  %vm4286_vm12 = vcmp.eq.s32.totalorder %v16946_v0, %v9821_v11  ;;  %vm4296_vm11 = vcmp.eq.s32.totalorder %v16949_v28, %v9821_v11  ;;  %v16953_v12 = vld [vmem:[#allocation19_spill] sm:$0xff]  ;;  %v16956_v55 = vld [vmem:[#allocation44_spill] sm:$0xff] }
 0x5ea   :  { %v14018_v62 = vpop.permute.xlu0 %3429  ;;  %v14022_v39 = vpop.permute.xlu1 %3210  ;;  %3218 = vbcast.lane.b32.xlu1 %v16771_v58, 304  ;;  %vm4295_vm13 = vcmp.eq.s32.totalorder %v16953_v12, %v9821_v11  ;;  %v8825_v48 = vsel %vm4216_vm3, 1.0, %v16541_v4  ;;  %v8835_v22 = vsel %vm4226_vm15, 1.0, %v16541_v4  ;;  %vm4287_vm2 = vcmp.eq.s32.totalorder %v16956_v55, %v9821_v11 }
 0x5eb   :  { %16940 = vst [vmem:[#allocation176_spill] sm:$0xff] %v14018_v62  ;;  %16941 = vst [vmem:[#allocation177_spill] sm:$0xff] %v14022_v39  ;;  %3300 = vbcast.lane.b32.xlu0 %v16804_v21, 296  ;;  %v6855_v39 = vadd.f32 %v8815_v40, %v8814_v23  ;;  %v6826_v62 = vadd.f32 %v8796_v3, %v6825_v35  ;;  %v16947_v23 = vld [vmem:[#allocation14_spill] sm:$0xff]  ;;  %v16948_v35 = vld [vmem:[#allocation17_spill] sm:$0xff]  ;;  %v8895_v5 = vsel %vm4286_vm12, 1.0, %v16541_v4 }
 0x5ec   :  { %vm4277_vm1 = vcmp.eq.s32.totalorder %v16947_v23, %v9821_v11  ;;  %vm4225_vm14 = vcmp.eq.s32.totalorder %v16948_v35, %v9821_v11  ;;  %v16954_v40 = vld [vmem:[#allocation22_spill] sm:$0xff]  ;;  %v8807_v55 = vsel %vm4198_vm9, 1.0, %v16541_v4  ;;  %v8904_v23 = vsel %vm4295_vm13, 1.0, %v16541_v4 }
 0x5ed   :  { %vm4188_vm10 = vcmp.eq.s32.totalorder %v16954_v40, %v9821_v11  ;;  %v8834_v12 = vsel %vm4225_vm14, 1.0, %v16541_v4  ;;  %v8905_v40 = vsel %vm4296_vm11, 1.0, %v16541_v4  ;;  %v6856_v35 = vadd.f32 %v8816_v38, %v6855_v39 }
 0x5ee   :  { %v14045_v61 = vpop.permute.xlu0 %3593  ;;  %v14051_v57 = vpop.permute.xlu1 %3386  ;;  %3394 = vbcast.lane.b32.xlu1 %v16752_v53, 312  ;;  %v6885_v31 = vadd.f32 %v8835_v22, %v8834_v12  ;;  %v16970_v22 = vld [vmem:[#allocation31_spill] sm:$0xff] }
 0x5ef   :  { %16942 = vst [vmem:[#allocation178_spill] sm:$0xff] %v14045_v61  ;;  %16943 = vst [vmem:[#allocation179_spill] sm:$0xff] %v14051_v57  ;;  %3437 = vbcast.lane.b32.xlu0 %v16753_v10, 312  ;;  %v8806_v57 = vsel %vm4197_vm4, 1.0, %v16541_v4  ;;  %vm4267_vm4 = vcmp.eq.s32.totalorder %v16950_v49, %v9821_v11  ;;  %v6975_v49 = vadd.f32 %v8895_v5, %v8894_v59  ;;  %v16962_v59 = vld [vmem:[#allocation27_spill] sm:$0xff]  ;;  %v16971_v5 = vld [vmem:[#allocation32_spill] sm:$0xff] }
 0x5f0   :  { %v6841_v47 = vadd.f32 %v8806_v57, %v6840_v51  ;;  %v16957_v51 = vld [vmem:[#allocation25_spill] sm:$0xff]  ;;  %v8876_v0 = vsel %vm4267_vm4, 1.0, %v16541_v4  ;;  %vm4236_vm3 = vcmp.eq.s32.totalorder %v16962_v59, %v9821_v11  ;;  %vm4355_vm4 = vcmp.eq.s32.totalorder %v16970_v22, %v9821_v11  ;;  %v16972_v12 = vld [vmem:[#allocation83_spill] sm:$0xff] }
 0x5f1   :  { %vm4217_vm8 = vcmp.eq.s32.totalorder %v16957_v51, %v9821_v11  ;;  %v8797_v51 = vsel %vm4188_vm10, 1.0, %v16541_v4  ;;  %vm4235_vm10 = vcmp.eq.s32.totalorder %v16960_v37, %v9821_v11  ;;  %v14142_v60 = vadd.f32 %v8876_v0, %v6945_v14  ;;  %v16964_v14 = vld [vmem:[#allocation29_spill] sm:$0xff] }
 0x5f2   :  { %v14066_v61 = vpop.permute.xlu0 %2366  ;;  %v14068_v1 = vpop.permute.xlu1 %3511  ;;  %3519 = vbcast.lane.b32.xlu1 %v16773_v26, 304  ;;  %v8826_v28 = vsel %vm4217_vm8, 1.0, %v16541_v4  ;;  %v14144_v39 = vadd.f32 %v8807_v55, %v6841_v47  ;;  %v14148_v38 = vadd.f32 %v8797_v51, %v6826_v62  ;;  %v8844_v37 = vsel %vm4235_vm10, 1.0, %v16541_v4  ;;  %v16965_v62 = vld [vmem:[#allocation30_spill] sm:$0xff]  ;;  %v16966_v47 = vld [vmem:[#allocation24_spill] sm:$0xff] }
 0x5f3   :  { %16944 = vst [vmem:[#allocation180_spill] sm:$0xff] %v14066_v61  ;;  %16945 = vst [vmem:[#allocation181_spill] sm:$0xff] %v14068_v1  ;;  %3601 = vbcast.lane.b32.xlu0 %v16811_v32, 296  ;;  %v6870_v1 = vadd.f32 %v8825_v48, %v8824_v34  ;;  %v14146_v34 = vadd.f32 %v8905_v40, %v8904_v23  ;;  %vm4346_vm15 = vcmp.eq.s32.totalorder %v16964_v14, %v9821_v11  ;;  %v16973_v40 = vld [vmem:[#allocation84_spill] sm:$0xff] }
 0x5f4   :  { %vm4305_vm12 = vcmp.eq.s32.totalorder %v16965_v62, %v9821_v11  ;;  %vm4246_vm9 = vcmp.eq.s32.totalorder %v16971_v5, %v9821_v11  ;;  %vm4208_vm13 = vcmp.eq.s32.totalorder %v16972_v12, %v9821_v11  ;;  %v8845_v0 = vsel %vm4236_vm3, 1.0, %v16541_v4  ;;  %v16977_v5 = vld [vmem:[#allocation87_spill] sm:$0xff] }
 0x5f5   :  { %v8955_v55 = vsel %vm4346_vm15, 1.0, %v16541_v4  ;;  %v8914_v23 = vsel %vm4305_vm12, 1.0, %v16541_v4  ;;  %v8964_v62 = vsel %vm4355_vm4, 1.0, %v16541_v4  ;;  %v8817_v59 = vsel %vm4208_vm13, 1.0, %v16541_v4 }
 0x5f6   :  { %v14090_v57 = vpop.permute.xlu0 %2491  ;;  %v14099_v3 = vpop.permute.xlu1 %3675  ;;  %3683 = vbcast.lane.b32.xlu1 %v16848_v20, 288  ;;  %v14208_v12 = vadd.f32 %v8845_v0, %v8844_v37  ;;  %vm4316_vm12 = vcmp.eq.s32.totalorder %v16980_v25, %v9821_v11  ;;  %v14226_v37 = vadd.f32 %v8817_v59, %v6856_v35  ;;  %v16984_v35 = vld [vmem:[#allocation45_spill] sm:$0xff]  ;;  %v16990_v59 = vld [vmem:[#allocation7_spill] sm:$0xff] }
 0x5f7   :  { %16951 = vst [vmem:[#allocation77_spill] sm:$0xff] %v14090_v57  ;;  %16955 = vst [vmem:[#allocation14_spill] sm:$0xff] %v14099_v3  ;;  %2499 = vbcast.lane.b32.xlu0 %v16755_v43, 328  ;;  %v8886_v43 = vsel %vm4277_vm1, 1.0, %v16541_v4  ;;  %v8896_v57 = vsel %vm4287_vm2, 1.0, %v16541_v4  ;;  %vm4345_vm1 = vcmp.eq.s32.totalorder %v16966_v47, %v9821_v11  ;;  %vm4278_vm2 = vcmp.eq.s32.totalorder %v16973_v40, %v9821_v11 }
 0x5f8   :  { %v6961_v9 = vadd.f32 %v8886_v43, %v6960_v36  ;;  %v14150_v48 = vadd.f32 %v8896_v57, %v6975_v49  ;;  %v16969_v57 = vld [vmem:[#allocation23_spill] sm:$0xff]  ;;  %v8954_v51 = vsel %vm4345_vm1, 1.0, %v16541_v4  ;;  %v8855_v47 = vsel %vm4246_vm9, 1.0, %v16541_v4 }
 0x5f9   :  { %vm4227_vm11 = vcmp.eq.s32.totalorder %v16969_v57, %v9821_v11  ;;  %v8887_v57 = vsel %vm4278_vm2, 1.0, %v16541_v4 }
 0x5fa   :  { %v14132_v3 = vpop.permute.xlu0 %2655  ;;  %v14136_v61 = vpop.permute.xlu1 %2409  ;;  %2581 = vbcast.lane.b32.xlu1 %v16758_v41, 320  ;;  %v8836_v14 = vsel %vm4227_vm11, 1.0, %v16541_v4 }
 0x5fb   :  { %16958 = vst [vmem:[#allocation17_spill] sm:$0xff] %v14132_v3  ;;  %16959 = vst [vmem:[#allocation18_spill] sm:$0xff] %v14136_v61  ;;  %2663 = vbcast.lane.b32.xlu0 %v16757_v46, 312  ;;  %v14152_v3 = vadd.f32 %v8826_v28, %v6870_v1  ;;  %v16961_v61 = vld [vmem:[#allocation26_spill] sm:$0xff] }
 0x5fc   :  { %vm4306_vm8 = vcmp.eq.s32.totalorder %v16961_v61, %v9821_v11  ;;  %v16968_v61 = vld [vmem:[#allocation28_spill] sm:$0xff] }
 0x5fd   :  { %vm4356_vm14 = vcmp.eq.s32.totalorder %v16968_v61, %v9821_v11  ;;  %v8915_v43 = vsel %vm4306_vm8, 1.0, %v16541_v4  ;;  %vm4268_vm8 = vcmp.eq.s32.totalorder %v16977_v5, %v9821_v11 }
 0x5fe   :  { %v14158_v36 = vpop.permute.xlu0 %2874  ;;  %v14167_v1 = vpop.permute.xlu1 %2573  ;;  %2800 = vbcast.lane.b32.xlu1 %v16759_v18, 328  ;;  %v16974_v18 = vld [vmem:[#allocation85_spill] sm:$0xff]  ;;  %v8965_v49 = vsel %vm4356_vm14, 1.0, %v16541_v4  ;;  %v14210_v40 = vadd.f32 %v8915_v43, %v8914_v23  ;;  %v14228_v43 = vadd.f32 %v8887_v57, %v6961_v9  ;;  %v16983_v23 = vld [vmem:[#allocation88_spill] sm:$0xff]  ;;  %vm4425_vm14 = vcmp.eq.s32.totalorder %v16984_v35, %v9821_v11  ;;  %v16985_v9 = vld [vmem:[#allocation50_spill] sm:$0xff] }
 0x5ff   :  { %16963 = vst [vmem:[#allocation21_spill] sm:$0xff] %v14158_v36  ;;  %16967 = vst [vmem:[#allocation16_spill] sm:$0xff] %v14167_v1  ;;  %2882 = vbcast.lane.b32.xlu0 %v16733_v16, 320  ;;  %vm4245_vm10 = vcmp.eq.s32.totalorder %v16974_v18, %v9821_v11  ;;  %v14212_v18 = vadd.f32 %v8955_v55, %v8954_v51  ;;  %v14216_v36 = vadd.f32 %v8836_v14, %v6885_v31  ;;  %v16987_v14 = vld [vmem:[#allocation51_spill] sm:$0xff] }
 0x600   :  { %v8854_v22 = vsel %vm4245_vm10, 1.0, %v16541_v4  ;;  %v14218_v1 = vadd.f32 %v8965_v49, %v8964_v62  ;;  %v8877_v55 = vsel %vm4268_vm8, 1.0, %v16541_v4  ;;  %vm4365_vm1 = vcmp.eq.s32.totalorder %v16983_v23, %v9821_v11  ;;  %v16986_v49 = vld [vmem:[#allocation90_spill] sm:$0xff] }
 0x601   :  { %v14230_v0 = vadd.f32 %v8855_v47, %v8854_v22  ;;  %vm4366_vm11 = vcmp.eq.s32.totalorder %v16985_v9, %v9821_v11  ;;  %vm4435_vm4 = vcmp.eq.s32.totalorder %v16986_v49, %v9821_v11  ;;  %vm4189_vm9 = vcmp.eq.s32.totalorder %v16987_v14, %v9821_v11  ;;  %v16988_v47 = vld [vmem:[#allocation39_spill] sm:$0xff] }
 0x602   :  { %v14193_v28 = vpop.permute.xlu0 %3046  ;;  %v14199_v61 = vpop.permute.xlu1 %2792  ;;  %2964 = vbcast.lane.b32.xlu1 %v16760_v50, 312  ;;  %v14251_v62 = vadd.f32 %v8877_v55, %v14142_v60  ;;  %vm4426_vm13 = vcmp.eq.s32.totalorder %v16988_v47, %v9821_v11  ;;  %vm4436_vm10 = vcmp.eq.s32.totalorder %v16990_v59, %v9821_v11  ;;  %v8974_v22 = vsel %vm4365_vm1, 1.0, %v16541_v4  ;;  %v16993_v47 = vld [vmem:[#allocation8_spill] sm:$0xff]  ;;  %v16994_v59 = vld [vmem:[#allocation67_spill] sm:$0xff] }
 0x603   :  { %16975 = vst [vmem:[#allocation19_spill] sm:$0xff] %v14193_v28  ;;  %16976 = vst [vmem:[#allocation22_spill] sm:$0xff] %v14199_v61  ;;  %3054 = vbcast.lane.b32.xlu0 %v16736_v52, 320  ;;  %v16978_v28 = vld [vmem:[#allocation89_spill] sm:$0xff]  ;;  %v16979_v61 = vld [vmem:[#allocation86_spill] sm:$0xff]  ;;  %v9034_v35 = vsel %vm4425_vm14, 1.0, %v16541_v4  ;;  %vm4199_vm8 = vcmp.eq.s32.totalorder %v16993_v47, %v9821_v11 }
 0x604   :  { %vm4297_vm3 = vcmp.eq.s32.totalorder %v16978_v28, %v9821_v11  ;;  %vm4315_vm15 = vcmp.eq.s32.totalorder %v16979_v61, %v9821_v11  ;;  %v8925_v28 = vsel %vm4316_vm12, 1.0, %v16541_v4  ;;  %v16989_v61 = vld [vmem:[#allocation35_spill] sm:$0xff]  ;;  %v8975_v60 = vsel %vm4366_vm11, 1.0, %v16541_v4 }
 0x605   :  { %v8906_v25 = vsel %vm4297_vm3, 1.0, %v16541_v4  ;;  %v8924_v51 = vsel %vm4315_vm15, 1.0, %v16541_v4  ;;  %vm4218_vm2 = vcmp.eq.s32.totalorder %v16989_v61, %v9821_v11  ;;  %v9044_v49 = vsel %vm4435_vm4, 1.0, %v16541_v4 }
 0x606   :  { %v14224_v5 = vpop.permute.xlu0 %3171  ;;  %v14233_v31 = vpop.permute.xlu1 %2956  ;;  %3097 = vbcast.lane.b32.xlu1 %v16737_v56, 320  ;;  %v14263_v23 = vadd.f32 %v8906_v25, %v14146_v34  ;;  %v14271_v9 = vadd.f32 %v8925_v28, %v8924_v51  ;;  %v8798_v14 = vsel %vm4189_vm9, 1.0, %v16541_v4  ;;  %v9035_v34 = vsel %vm4426_vm13, 1.0, %v16541_v4  ;;  %v16995_v51 = vld [vmem:[#allocation41_spill] sm:$0xff]  ;;  %v16996_v28 = vld [vmem:[#allocation42_spill] sm:$0xff] }
 0x607   :  { %16981 = vst [vmem:[#allocation44_spill] sm:$0xff] %v14224_v5  ;;  %16982 = vst [vmem:[#allocation25_spill] sm:$0xff] %v14233_v31  ;;  %3179 = vbcast.lane.b32.xlu0 %v16761_v63, 312  ;;  %v8827_v25 = vsel %vm4218_vm2, 1.0, %v16541_v4  ;;  %v9045_v61 = vsel %vm4436_vm10, 1.0, %v16541_v4  ;;  %vm4288_vm3 = vcmp.eq.s32.totalorder %v16994_v59, %v9821_v11  ;;  %v14282_v31 = vadd.f32 %v8975_v60, %v8974_v22  ;;  %v17000_v22 = vld [vmem:[#allocation66_spill] sm:$0xff] }
 0x608   :  { %vm4255_vm15 = vcmp.eq.s32.totalorder %v16995_v51, %v9821_v11  ;;  %vm4237_vm12 = vcmp.eq.s32.totalorder %v16996_v28, %v9821_v11  ;;  %v8808_v5 = vsel %vm4199_vm8, 1.0, %v16541_v4  ;;  %vm4307_vm11 = vcmp.eq.s32.totalorder %v17000_v22, %v9821_v11 }
 0x609   :  { %v14304_v51 = vadd.f32 %v9035_v34, %v9034_v35  ;;  %v14307_v28 = vadd.f32 %v8827_v25, %v14152_v3  ;;  %v8846_v22 = vsel %vm4237_vm12, 1.0, %v16541_v4  ;;  %v14324_v35 = vadd.f32 %v8808_v5, %v14144_v39  ;;  %v17003_v25 = vld [vmem:[#allocation46_spill] sm:$0xff] }
 0x60a   :  { %v14259_v57 = vpop.permute.xlu0 %3335  ;;  %v14267_v55 = vpop.permute.xlu1 %3089  ;;  %3261 = vbcast.lane.b32.xlu1 %v16788_v8, 304  ;;  %v8916_v34 = vsel %vm4307_vm11, 1.0, %v16541_v4  ;;  %vm4326_vm9 = vcmp.eq.s32.totalorder %v17003_v25, %v9821_v11  ;;  %v14344_v5 = vadd.f32 %v8846_v22, %v14208_v12  ;;  %v17011_v12 = vld [vmem:[#allocation52_spill] sm:$0xff] }
 0x60b   :  { %16991 = vst [vmem:[#allocation20_spill] sm:$0xff] %v14259_v57  ;;  %16992 = vst [vmem:[#allocation26_spill] sm:$0xff] %v14267_v55  ;;  %3343 = vbcast.lane.b32.xlu0 %v16826_v24, 296  ;;  %v16997_v55 = vld [vmem:[#allocation9_spill] sm:$0xff]  ;;  %v14293_v57 = vadd.f32 %v8798_v14, %v14148_v38  ;;  %v16999_v24 = vld [vmem:[#allocation68_spill] sm:$0xff]  ;;  %v14309_v38 = vadd.f32 %v9045_v61, %v9044_v49  ;;  %v8864_v14 = vsel %vm4255_vm15, 1.0, %v16541_v4 }
 0x60c   :  { %vm4256_vm1 = vcmp.eq.s32.totalorder %v16997_v55, %v9821_v11  ;;  %vm4347_vm14 = vcmp.eq.s32.totalorder %v16999_v24, %v9821_v11  ;;  %v8897_v24 = vsel %vm4288_vm3, 1.0, %v16541_v4  ;;  %v17006_v55 = vld [vmem:[#allocation33_spill] sm:$0xff]  ;;  %vm4445_vm3 = vcmp.eq.s32.totalorder %v17011_v12, %v9821_v11 }
 0x60d   :  { %v8865_v3 = vsel %vm4256_vm1, 1.0, %v16541_v4  ;;  %v8956_v49 = vsel %vm4347_vm14, 1.0, %v16541_v4  ;;  %v14333_v59 = vadd.f32 %v8897_v24, %v14150_v48  ;;  %vm4209_vm2 = vcmp.eq.s32.totalorder %v17006_v55, %v9821_v11  ;;  %v17009_v48 = vld [vmem:[#allocation5_spill] sm:$0xff]  ;;  %v17010_v55 = vld [vmem:[#allocation36_spill] sm:$0xff] }
 0x60e   :  { %v14290_v47 = vpop.permute.xlu0 %3554  ;;  %v14300_v60 = vpop.permute.xlu1 %3253  ;;  %3480 = vbcast.lane.b32.xlu1 %v16762_v44, 312  ;;  %vm4375_vm10 = vcmp.eq.s32.totalorder %v17009_v48, %v9821_v11  ;;  %v14352_v24 = vadd.f32 %v8956_v49, %v14212_v18  ;;  %vm4376_vm8 = vcmp.eq.s32.totalorder %v17010_v55, %v9821_v11  ;;  %v8818_v22 = vsel %vm4209_vm2, 1.0, %v16541_v4  ;;  %v17014_v49 = vld [vmem:[#allocation40_spill] sm:$0xff]  ;;  %v17016_v48 = vld [vmem:[#allocation43_spill] sm:$0xff]  ;;  %v17021_v12 = vld [vmem:[#allocation37_spill] sm:$0xff] }
 0x60f   :  { %16998 = vst [vmem:[#allocation27_spill] sm:$0xff] %v14290_v47  ;;  %17001 = vst [vmem:[#allocation29_spill] sm:$0xff] %v14300_v60  ;;  %3562 = vbcast.lane.b32.xlu0 %v16791_v19, 304  ;;  %v17002_v60 = vld [vmem:[#allocation11_spill] sm:$0xff]  ;;  %v14347_v47 = vadd.f32 %v8865_v3, %v8864_v14  ;;  %v17012_v3 = vld [vmem:[#allocation34_spill] sm:$0xff]  ;;  %vm4446_vm12 = vcmp.eq.s32.totalorder %v17014_v49, %v9821_v11  ;;  %vm4228_vm14 = vcmp.eq.s32.totalorder %v17016_v48, %v9821_v11 }
 0x610   :  { %vm4325_vm4 = vcmp.eq.s32.totalorder %v17002_v60, %v9821_v11  ;;  %v17005_v60 = vld [vmem:[#allocation58_spill] sm:$0xff]  ;;  %vm4247_vm15 = vcmp.eq.s32.totalorder %v17012_v3, %v9821_v11  ;;  %v17020_v49 = vld [vmem:[#allocation53_spill] sm:$0xff] }
 0x611   :  { %vm4357_vm13 = vcmp.eq.s32.totalorder %v17005_v60, %v9821_v11  ;;  %v8934_v25 = vsel %vm4325_vm4, 1.0, %v16541_v4  ;;  %17008 = vst [vmem:[#allocation28_spill] sm:$0xff] %v14347_v47  ;;  %v14355_v60 = vadd.f32 %v8916_v34, %v14210_v40  ;;  %v8984_v40 = vsel %vm4375_vm10, 1.0, %v16541_v4  ;;  %v17015_v34 = vld [vmem:[#allocation38_spill] sm:$0xff] }
 0x612   :  { %v14330_v61 = vpop.permute.xlu0 %2452  ;;  %v14339_v39 = vpop.permute.xlu1 %3472  ;;  %3644 = vbcast.lane.b32.xlu1 %v16831_v27, 296  ;;  %v8966_v14 = vsel %vm4357_vm13, 1.0, %v16541_v4  ;;  %vm4279_vm1 = vcmp.eq.s32.totalorder %v17015_v34, %v9821_v11  ;;  %vm4269_vm4 = vcmp.eq.s32.totalorder %v17020_v49, %v9821_v11  ;;  %v9054_v34 = vsel %vm4445_vm3, 1.0, %v16541_v4 }
 0x613   :  { %17004 = vst [vmem:[#allocation30_spill] sm:$0xff] %v14330_v61  ;;  %17007 = vst [vmem:[#allocation24_spill] sm:$0xff] %v14339_v39  ;;  %2542 = vbcast.lane.b32.xlu0 %v16698_v45, 328  ;;  %v8935_v45 = vsel %vm4326_vm9, 1.0, %v16541_v4  ;;  %v17019_v39 = vld [vmem:[#allocation47_spill] sm:$0xff]  ;;  %v14391_v48 = vadd.f32 %v8966_v14, %v14218_v1  ;;  %v8837_v49 = vsel %vm4228_vm14, 1.0, %v16541_v4  ;;  %vm4298_vm9 = vcmp.eq.s32.totalorder %v17021_v12, %v9821_v11 }
 0x614   :  { %v14379_v47 = vadd.f32 %v8935_v45, %v8934_v25  ;;  %vm4317_vm11 = vcmp.eq.s32.totalorder %v17019_v39, %v9821_v11  ;;  %v8856_v25 = vsel %vm4247_vm15, 1.0, %v16541_v4  ;;  %v9055_v39 = vsel %vm4446_vm12, 1.0, %v16541_v4  ;;  %v17026_v61 = vld [vmem:[#allocation76_spill] sm:$0xff] }
 0x615   :  { %v8888_v45 = vsel %vm4279_vm1, 1.0, %v16541_v4  ;;  %v8878_v14 = vsel %vm4269_vm4, 1.0, %v16541_v4  ;;  %vm4335_vm2 = vcmp.eq.s32.totalorder %v17026_v61, %v9821_v11  ;;  %v17031_v12 = vld [vmem:[#allocation56_spill] sm:$0xff] }
 0x616   :  { %v14366_v18 = vpop.permute.xlu0 %2616  ;;  %v14375_v55 = vpop.permute.xlu1 %3636  ;;  %2624 = vbcast.lane.b32.xlu1 %v16738_v6, 320  ;;  %17018 = vst [vmem:[#allocation32_spill] sm:$0xff] %v14379_v47  ;;  %vm4386_vm15 = vcmp.eq.s32.totalorder %v17031_v12, %v9821_v11  ;;  %v17037_v12 = vld [vmem:[#allocation94_spill] sm:$0xff] }
 0x617   :  { %17013 = vst [vmem:[#allocation23_spill] sm:$0xff] %v14366_v18  ;;  %17017 = vst [vmem:[#allocation31_spill] sm:$0xff] %v14375_v55  ;;  %2843 = vbcast.lane.b32.xlu0 %v16712_v54, 328  ;;  %v8985_v18 = vsel %vm4376_vm8, 1.0, %v16541_v4  ;;  %v14394_v54 = vadd.f32 %v8818_v22, %v14226_v37  ;;  %v8926_v37 = vsel %vm4317_vm11, 1.0, %v16541_v4  ;;  %v17023_v22 = vld [vmem:[#allocation59_spill] sm:$0xff]  ;;  %v14418_v55 = vadd.f32 %v8856_v25, %v14230_v0 }
 0x618   :  { %v14407_v1 = vadd.f32 %v8985_v18, %v8984_v40  ;;  %vm4336_vm13 = vcmp.eq.s32.totalorder %v17023_v22, %v9821_v11  ;;  %v17027_v18 = vld [vmem:[#allocation48_spill] sm:$0xff]  ;;  %v17028_v40 = vld [vmem:[#allocation55_spill] sm:$0xff]  ;;  %v14429_v22 = vadd.f32 %v8888_v45, %v14228_v43  ;;  %v8907_v0 = vsel %vm4298_vm9, 1.0, %v16541_v4 }
 0x619   :  { %17025 = vst [vmem:[#allocation85_spill] sm:$0xff] %v14418_v55  ;;  %vm4427_vm10 = vcmp.eq.s32.totalorder %v17027_v18, %v9821_v11  ;;  %vm4367_vm8 = vcmp.eq.s32.totalorder %v17028_v40, %v9821_v11  ;;  %v14439_v61 = vadd.f32 %v8926_v37, %v14271_v9  ;;  %v14442_v25 = vadd.f32 %v8878_v14, %v14251_v62  ;;  %v17033_v37 = vld [vmem:[#allocation63_spill] sm:$0xff]  ;;  %v17034_v14 = vld [vmem:[#allocation92_spill] sm:$0xff]  ;;  %v17035_v18 = vld [vmem:[#allocation93_spill] sm:$0xff] }
 0x61a   :  { %v14405_v47 = vpop.permute.xlu0 %2753  ;;  %v14413_v3 = vpop.permute.xlu1 %2534  ;;  %2925 = vbcast.lane.b32.xlu1 %v16750_v7, 320  ;;  %v9036_v45 = vsel %vm4427_vm10, 1.0, %v16541_v4  ;;  %v14459_v62 = vadd.f32 %v8907_v0, %v14263_v23  ;;  %vm4190_vm12 = vcmp.eq.s32.totalorder %v17033_v37, %v9821_v11  ;;  %vm4437_vm1 = vcmp.eq.s32.totalorder %v17034_v14, %v9821_v11  ;;  %v17038_v23 = vld [vmem:[#allocation96_spill] sm:$0xff] }
 0x61b   :  { %17022 = vst [vmem:[#allocation83_spill] sm:$0xff] %v14405_v47  ;;  %17024 = vst [vmem:[#allocation84_spill] sm:$0xff] %v14413_v3  ;;  %3007 = vbcast.lane.b32.xlu0 %v16770_v42, 312  ;;  %v14426_v47 = vadd.f32 %v9055_v39, %v9054_v34  ;;  %v14432_v3 = vadd.f32 %v8837_v49, %v14216_v36  ;;  %v8945_v34 = vsel %vm4336_vm13, 1.0, %v16541_v4  ;;  %v17029_v39 = vld [vmem:[#allocation75_spill] sm:$0xff]  ;;  %v8944_v36 = vsel %vm4335_vm2, 1.0, %v16541_v4 }
 0x61c   :  { %vm4385_vm3 = vcmp.eq.s32.totalorder %v17029_v39, %v9821_v11  ;;  %v8976_v49 = vsel %vm4367_vm8, 1.0, %v16541_v4  ;;  %vm4219_vm14 = vcmp.eq.s32.totalorder %v17035_v18, %v9821_v11  ;;  %v17036_v39 = vld [vmem:[#allocation61_spill] sm:$0xff]  ;;  %vm4456_vm4 = vcmp.eq.s32.totalorder %v17037_v12, %v9821_v11 }
 0x61d   :  { %v8994_v40 = vsel %vm4385_vm3, 1.0, %v16541_v4  ;;  %vm4455_vm11 = vcmp.eq.s32.totalorder %v17036_v39, %v9821_v11  ;;  %vm4200_vm9 = vcmp.eq.s32.totalorder %v17038_v23, %v9821_v11  ;;  %v14474_v0 = vadd.f32 %v8945_v34, %v8944_v36  ;;  %v17040_v23 = vld [vmem:[#allocation97_spill] sm:$0xff] }
 0x61e   :  { %v14447_v43 = vpop.permute.xlu0 %2917  ;;  %v14454_v9 = vpop.permute.xlu1 %2710  ;;  %3140 = vbcast.lane.b32.xlu1 %v16751_v13, 320  ;;  %v14477_v37 = vadd.f32 %v9036_v45, %v14304_v51  ;;  %v14480_v14 = vadd.f32 %v8976_v49, %v14282_v31  ;;  %v8995_v18 = vsel %vm4386_vm15, 1.0, %v16541_v4  ;;  %v8799_v39 = vsel %vm4190_vm12, 1.0, %v16541_v4  ;;  %v17042_v45 = vld [vmem:[#allocation98_spill] sm:$0xff] }
 0x61f   :  { %17030 = vst [vmem:[#allocation87_spill] sm:$0xff] %v14447_v43  ;;  %17032 = vst [vmem:[#allocation89_spill] sm:$0xff] %v14454_v9  ;;  %3222 = vbcast.lane.b32.xlu0 %v16771_v58, 312  ;;  %v9046_v43 = vsel %vm4437_vm1, 1.0, %v16541_v4  ;;  %v8828_v12 = vsel %vm4219_vm14, 1.0, %v16541_v4  ;;  %vm4308_vm13 = vcmp.eq.s32.totalorder %v17040_v23, %v9821_v11  ;;  %v9064_v31 = vsel %vm4455_vm11, 1.0, %v16541_v4 }
 0x620   :  { %v9065_v51 = vsel %vm4456_vm4, 1.0, %v16541_v4  ;;  %v8809_v36 = vsel %vm4200_vm9, 1.0, %v16541_v4  ;;  %vm4238_vm2 = vcmp.eq.s32.totalorder %v17042_v45, %v9821_v11  ;;  %v14499_v49 = vadd.f32 %v8995_v18, %v8994_v40  ;;  %v17044_v23 = vld [vmem:[#allocation100_spill] sm:$0xff] }
 0x621   :  { %vm4289_vm8 = vcmp.eq.s32.totalorder %v17044_v23, %v9821_v11  ;;  %v14508_v9 = vadd.f32 %v8799_v39, %v14293_v57  ;;  %v14514_v58 = vadd.f32 %v8828_v12, %v14307_v28  ;;  %v8917_v40 = vsel %vm4308_vm13, 1.0, %v16541_v4  ;;  %v17047_v57 = vld [vmem:[#allocation104_spill] sm:$0xff] }
 0x622   :  { %v14483_v55 = vpop.permute.xlu0 %3132  ;;  %v14490_v34 = vpop.permute.xlu1 %2835  ;;  %3304 = vbcast.lane.b32.xlu1 %v16804_v21, 304  ;;  %v14522_v45 = vadd.f32 %v8809_v36, %v14324_v35  ;;  %vm4358_vm15 = vcmp.eq.s32.totalorder %v17047_v57, %v9821_v11  ;;  %v17049_v35 = vld [vmem:[#allocation103_spill] sm:$0xff]  ;;  %v14537_v12 = vadd.f32 %v8917_v40, %v14355_v60  ;;  %v17052_v36 = vld [vmem:[#allocation108_spill] sm:$0xff]  ;;  %v17054_v60 = vld [vmem:[#allocation110_spill] sm:$0xff] }
 0x623   :  { %17039 = vst [vmem:[#allocation86_spill] sm:$0xff] %v14483_v55  ;;  %17041 = vst [vmem:[#allocation91_spill] sm:$0xff] %v14490_v34  ;;  %3398 = vbcast.lane.b32.xlu0 %v16752_v53, 320  ;;  %v17043_v55 = vld [vmem:[#allocation99_spill] sm:$0xff]  ;;  %v17045_v34 = vld [vmem:[#allocation101_spill] sm:$0xff]  ;;  %v14511_v53 = vadd.f32 %v9046_v43, %v14309_v38  ;;  %v8898_v38 = vsel %vm4289_vm8, 1.0, %v16541_v4  ;;  %vm4396_vm12 = vcmp.eq.s32.totalorder %v17049_v35, %v9821_v11 }
 0x624   :  { %vm4348_vm10 = vcmp.eq.s32.totalorder %v17043_v55, %v9821_v11  ;;  %vm4377_vm3 = vcmp.eq.s32.totalorder %v17045_v34, %v9821_v11  ;;  %v14519_v55 = vadd.f32 %v9065_v51, %v9064_v31  ;;  %v8847_v34 = vsel %vm4238_vm2, 1.0, %v16541_v4  ;;  %v17050_v31 = vld [vmem:[#allocation106_spill] sm:$0xff]  ;;  %v17051_v51 = vld [vmem:[#allocation107_spill] sm:$0xff] }
 0x625   :  { %v8957_v28 = vsel %vm4348_vm10, 1.0, %v16541_v4  ;;  %v8986_v43 = vsel %vm4377_vm3, 1.0, %v16541_v4  ;;  %vm4395_vm1 = vcmp.eq.s32.totalorder %v17050_v31, %v9821_v11  ;;  %vm4210_vm14 = vcmp.eq.s32.totalorder %v17051_v51, %v9821_v11 }
 0x626   :  { %v14517_v18 = vpop.permute.xlu0 %3296  ;;  %v14527_v39 = vpop.permute.xlu1 %2999  ;;  %3441 = vbcast.lane.b32.xlu1 %v16753_v10, 320  ;;  %vm4447_vm11 = vcmp.eq.s32.totalorder %v17052_v36, %v9821_v11  ;;  %v14546_v23 = vadd.f32 %v8847_v34, %v14344_v5  ;;  %v8967_v57 = vsel %vm4358_vm15, 1.0, %v16541_v4  ;;  %vm4466_vm9 = vcmp.eq.s32.totalorder %v17054_v60, %v9821_v11  ;;  %v17059_v60 = vld [vmem:[#allocation113_spill] sm:$0xff] }
 0x627   :  { %17046 = vst [vmem:[#allocation88_spill] sm:$0xff] %v14517_v18  ;;  %17048 = vst [vmem:[#allocation45_spill] sm:$0xff] %v14527_v39  ;;  %3523 = vbcast.lane.b32.xlu0 %v16773_v26, 312  ;;  %v17053_v39 = vld [vmem:[#allocation105_spill] sm:$0xff]  ;;  %v14556_v35 = vadd.f32 %v8957_v28, %v14352_v24  ;;  %v14559_v31 = vadd.f32 %v8898_v38, %v14333_v59  ;;  %v14562_v51 = vadd.f32 %v8986_v43, %v14407_v1  ;;  %v17057_v59 = vld [vmem:[#allocation111_spill] sm:$0xff] }
 0x628   :  { %vm4465_vm4 = vcmp.eq.s32.totalorder %v17053_v39, %v9821_v11  ;;  %v9005_v5 = vsel %vm4396_vm12, 1.0, %v16541_v4  ;;  %v9004_v39 = vsel %vm4395_vm1, 1.0, %v16541_v4  ;;  %v8819_v36 = vsel %vm4210_vm14, 1.0, %v16541_v4  ;;  %v17058_v43 = vld [vmem:[#allocation112_spill] sm:$0xff] }
 0x629   :  { %v9056_v24 = vsel %vm4447_vm11, 1.0, %v16541_v4  ;;  %vm4280_vm13 = vcmp.eq.s32.totalorder %v17057_v59, %v9821_v11  ;;  %v14575_v1 = vadd.f32 %v8967_v57, %v14391_v48  ;;  %v9074_v28 = vsel %vm4465_vm4, 1.0, %v16541_v4  ;;  %v17062_v59 = vld [vmem:[#allocation116_spill] sm:$0xff] }
 0x62a   :  { %v14553_v40 = vpop.permute.xlu0 %3433  ;;  %v14565_v34 = vpop.permute.xlu1 %3214  ;;  %3605 = vbcast.lane.b32.xlu1 %v16811_v32, 304  ;;  %v9075_v38 = vsel %vm4466_vm9, 1.0, %v16541_v4  ;;  %vm4229_vm2 = vcmp.eq.s32.totalorder %v17058_v43, %v9821_v11  ;;  %vm4318_vm10 = vcmp.eq.s32.totalorder %v17059_v60, %v9821_v11  ;;  %vm4299_vm15 = vcmp.eq.s32.totalorder %v17062_v59, %v9821_v11 }
 0x62b   :  { %17055 = vst [vmem:[#allocation50_spill] sm:$0xff] %v14553_v40  ;;  %17056 = vst [vmem:[#allocation90_spill] sm:$0xff] %v14565_v34  ;;  %3687 = vbcast.lane.b32.xlu0 %v16848_v20, 296  ;;  %v17060_v40 = vld [vmem:[#allocation114_spill] sm:$0xff]  ;;  %v17061_v34 = vld [vmem:[#allocation115_spill] sm:$0xff]  ;;  %v14591_v57 = vadd.f32 %v9005_v5, %v9004_v39  ;;  %v14594_v18 = vadd.f32 %v8819_v36, %v14394_v54  ;;  %v14597_v43 = vadd.f32 %v9056_v24, %v14426_v47 }
 0x62c   :  { %vm4270_vm8 = vcmp.eq.s32.totalorder %v17060_v40, %v9821_v11  ;;  %vm4368_vm3 = vcmp.eq.s32.totalorder %v17061_v34, %v9821_v11  ;;  %v8889_v20 = vsel %vm4280_vm13, 1.0, %v16541_v4  ;;  %v14604_v32 = vadd.f32 %v9075_v38, %v9074_v28  ;;  %v17065_v5 = vld [vmem:[#allocation13_spill] sm:$0xff]  ;;  %v17066_v54 = vld [vmem:[#allocation10_spill] sm:$0xff] }
 0x62d   :  { %vm4337_vm12 = vcmp.eq.s32.totalorder %v17065_v5, %v9821_v11  ;;  %vm4428_vm1 = vcmp.eq.s32.totalorder %v17066_v54, %v9821_v11  ;;  %v8927_v47 = vsel %vm4318_vm10, 1.0, %v16541_v4  ;;  %v8977_v39 = vsel %vm4368_vm3, 1.0, %v16541_v4  ;;  %v17067_v28 = vld [vmem:[#allocation117_spill] sm:$0xff]  ;;  %v17068_v38 = vld [vmem:[#allocation78_spill] sm:$0xff] }
 0x62e   :  { %v14589_v48 = vpop.permute.xlu0 %3597  ;;  %v14600_v26 = vpop.permute.xlu1 %3390  ;;  %2585 = vbcast.lane.b32.xlu1 %v16758_v41, 328  ;;  %v8879_v41 = vsel %vm4270_vm8, 1.0, %v16541_v4  ;;  %v8908_v36 = vsel %vm4299_vm15, 1.0, %v16541_v4  ;;  %v14628_v24 = vadd.f32 %v8889_v20, %v14429_v22  ;;  %vm4405_vm14 = vcmp.eq.s32.totalorder %v17067_v28, %v9821_v11  ;;  %v17069_v40 = vld [vmem:[#allocation69_spill] sm:$0xff]  ;;  %v17070_v20 = vld [vmem:[#allocation15_spill] sm:$0xff] }
 0x62f   :  { %17063 = vst [vmem:[#allocation51_spill] sm:$0xff] %v14589_v48  ;;  %17064 = vst [vmem:[#allocation39_spill] sm:$0xff] %v14600_v26  ;;  %2667 = vbcast.lane.b32.xlu0 %v16757_v46, 320  ;;  %v8838_v48 = vsel %vm4229_vm2, 1.0, %v16541_v4  ;;  %vm4387_vm11 = vcmp.eq.s32.totalorder %v17068_v38, %v9821_v11  ;;  %vm4457_vm4 = vcmp.eq.s32.totalorder %v17069_v40, %v9821_v11  ;;  %v8946_v59 = vsel %vm4337_vm12, 1.0, %v16541_v4 }
 0x630   :  { %v14639_v34 = vadd.f32 %v8838_v48, %v14432_v3  ;;  %v9037_v5 = vsel %vm4428_vm1, 1.0, %v16541_v4  ;;  %vm4406_vm9 = vcmp.eq.s32.totalorder %v17070_v20, %v9821_v11  ;;  %v14650_v54 = vadd.f32 %v8927_v47, %v14439_v61 }
 0x631   :  { %v14653_v28 = vadd.f32 %v8879_v41, %v14442_v25  ;;  %v14656_v3 = vadd.f32 %v8977_v39, %v14480_v14  ;;  %v14659_v48 = vadd.f32 %v8908_v36, %v14459_v62  ;;  %v9014_v38 = vsel %vm4405_vm14, 1.0, %v16541_v4  ;;  %v17073_v62 = vld [vmem:[#allocation120_spill] sm:$0xff]  ;;  %v17074_v41 = vld [vmem:[#allocation118_spill] sm:$0xff]  ;;  %v17075_v39 = vld [vmem:[#allocation121_spill] sm:$0xff] }
 0x632   :  { %v14636_v60 = vpop.permute.xlu0 %2370  ;;  %v14645_v22 = vpop.permute.xlu1 %3515  ;;  %2886 = vbcast.lane.b32.xlu1 %v16733_v16, 328  ;;  %v8996_v40 = vsel %vm4387_vm11, 1.0, %v16541_v4  ;;  %v9066_v20 = vsel %vm4457_vm4, 1.0, %v16541_v4  ;;  %v17072_v16 = vld [vmem:[#allocation119_spill] sm:$0xff]  ;;  %v14667_v61 = vadd.f32 %v8946_v59, %v14474_v0  ;;  %v14670_v25 = vadd.f32 %v9037_v5, %v14477_v37 }
 0x633   :  { %17071 = vst [vmem:[#allocation35_spill] sm:$0xff] %v14645_v22  ;;  %2968 = vbcast.lane.b32.xlu0 %v16760_v50, 320  ;;  %vm4438_vm13 = vcmp.eq.s32.totalorder %v17072_v16, %v9821_v11  ;;  %v9015_v14 = vsel %vm4406_vm9, 1.0, %v16541_v4  ;;  %vm4201_vm2 = vcmp.eq.s32.totalorder %v17073_v62, %v9821_v11  ;;  %vm4476_vm10 = vcmp.eq.s32.totalorder %v17074_v41, %v9821_v11  ;;  %v17076_v36 = vld [vmem:[#allocation123_spill] sm:$0xff]  ;;  %v17078_v16 = vld [vmem:[#allocation124_spill] sm:$0xff] }
 0x634   :  { %vm4475_vm8 = vcmp.eq.s32.totalorder %v17075_v39, %v9821_v11  ;;  %vm4239_vm3 = vcmp.eq.s32.totalorder %v17076_v36, %v9821_v11  ;;  %v14688_v37 = vadd.f32 %v8996_v40, %v14499_v49  ;;  %v14691_v59 = vadd.f32 %v9066_v20, %v14519_v55 }
 0x635   :  { %v9047_v5 = vsel %vm4438_vm13, 1.0, %v16541_v4  ;;  %vm4191_vm15 = vcmp.eq.s32.totalorder %v17078_v16, %v9821_v11  ;;  %v14696_v62 = vadd.f32 %v9015_v14, %v9014_v38  ;;  %v8810_v41 = vsel %vm4201_vm2, 1.0, %v16541_v4  ;;  %v17080_v14 = vld [vmem:[#allocation127_spill] sm:$0xff] }
 0x636   :  { %v14675_v47 = vpop.permute.xlu0 %2495  ;;  %v14683_v0 = vpop.permute.xlu1 %3679  ;;  %3058 = vbcast.lane.b32.xlu1 %v16736_v52, 328  ;;  %vm4290_vm12 = vcmp.eq.s32.totalorder %v13837_v2, %v9821_v11  ;;  %vm4220_vm1 = vcmp.eq.s32.totalorder %v13839_v29, %v9821_v11  ;;  %v9085_v52 = vsel %vm4476_vm10, 1.0, %v16541_v4  ;;  %v8848_v49 = vsel %vm4239_vm3, 1.0, %v16541_v4 }
 0x637   :  { %17077 = vst [vmem:[#allocation7_spill] sm:$0xff] %v14683_v0  ;;  %3101 = vbcast.lane.b32.xlu0 %v16737_v56, 328  ;;  %v9084_v56 = vsel %vm4475_vm8, 1.0, %v16541_v4  ;;  %vm4359_vm14 = vcmp.eq.s32.totalorder %v13852_v30, %v9821_v11  ;;  %v14711_v38 = vadd.f32 %v9047_v5, %v14511_v53  ;;  %v8800_v40 = vsel %vm4191_vm15, 1.0, %v16541_v4  ;;  %v17081_v5 = vld [vmem:[#allocation128_spill] sm:$0xff] }
 0x638   :  { %vm4309_vm11 = vcmp.eq.s32.totalorder %v13854_v17, %v9821_v11  ;;  %vm4397_vm4 = vcmp.eq.s32.totalorder %v13858_v33, %v9821_v11  ;;  %v14723_v29 = vadd.f32 %v8810_v41, %v14522_v45  ;;  %v8899_v53 = vsel %vm4290_vm12, 1.0, %v16541_v4  ;;  %v17118_v0 = vld [vmem:[#allocation156_spill] sm:$0xff] }
 0x639   :  { %v8829_v30 = vsel %vm4220_vm1, 1.0, %v16541_v4  ;;  %vm4349_vm9 = vcmp.eq.s32.totalorder %v13860_v15, %v9821_v11  ;;  %v14729_v17 = vadd.f32 %v9085_v52, %v9084_v56  ;;  %v14732_v33 = vadd.f32 %v8848_v49, %v14546_v23  ;;  %v17085_v56 = vld [vmem:[#allocation57_spill] sm:$0xff] }
 0x63a   :  { %v14708_v55 = vpop.permute.xlu0 %2659  ;;  %v14718_v2 = vpop.permute.xlu1 %2413  ;;  %3183 = vbcast.lane.b32.xlu1 %v16761_v63, 320  ;;  %v8968_v20 = vsel %vm4359_vm14, 1.0, %v16541_v4  ;;  %vm4378_vm13 = vcmp.eq.s32.totalorder %v17080_v14, %v9821_v11  ;;  %v14738_v45 = vadd.f32 %v8800_v40, %v14508_v9  ;;  %v8918_v39 = vsel %vm4309_vm11, 1.0, %v16541_v4  ;;  %v17083_v9 = vld [vmem:[#allocation126_spill] sm:$0xff]  ;;  %v17086_v40 = vld [vmem:[#allocation129_spill] sm:$0xff] }
 0x63b   :  { %17079 = vst [vmem:[#allocation8_spill] sm:$0xff] %v14708_v55  ;;  %3265 = vbcast.lane.b32.xlu0 %v16788_v8, 312  ;;  %v9006_v36 = vsel %vm4397_vm4, 1.0, %v16541_v4  ;;  %vm4467_vm2 = vcmp.eq.s32.totalorder %v17081_v5, %v9821_v11  ;;  %v14747_v23 = vadd.f32 %v8899_v53, %v14559_v31  ;;  %v14750_v16 = vadd.f32 %v8829_v30, %v14514_v58  ;;  %v17087_v58 = vld [vmem:[#allocation131_spill] sm:$0xff]  ;;  %v17088_v5 = vld [vmem:[#allocation132_spill] sm:$0xff] }
 0x63c   :  { %v8958_v41 = vsel %vm4349_vm9, 1.0, %v16541_v4  ;;  %vm4416_vm10 = vcmp.eq.s32.totalorder %v17083_v9, %v9821_v11  ;;  %v14760_v49 = vadd.f32 %v8968_v20, %v14575_v1  ;;  %v8987_v31 = vsel %vm4378_vm13, 1.0, %v16541_v4  ;;  %v17089_v9 = vld [vmem:[#allocation130_spill] sm:$0xff]  ;;  %v17096_v55 = vld [vmem:[#allocation139_spill] sm:$0xff] }
 0x63d   :  { %vm4415_vm8 = vcmp.eq.s32.totalorder %v17086_v40, %v9821_v11  ;;  %vm4448_vm3 = vcmp.eq.s32.totalorder %v17087_v58, %v9821_v11  ;;  %v14768_v53 = vadd.f32 %v8918_v39, %v14537_v12  ;;  %v14771_v30 = vadd.f32 %v9006_v36, %v14591_v57  ;;  %v17090_v40 = vld [vmem:[#allocation133_spill] sm:$0xff] }
 0x63e   :  { %v14744_v15 = vpop.permute.xlu0 %2878  ;;  %v14755_v52 = vpop.permute.xlu1 %2577  ;;  %3347 = vbcast.lane.b32.xlu1 %v17085_v56, 304  ;;  %v9076_v14 = vsel %vm4467_vm2, 1.0, %v16541_v4  ;;  %vm4230_vm15 = vcmp.eq.s32.totalorder %v17088_v5, %v9821_v11  ;;  %v14777_v1 = vadd.f32 %v8958_v41, %v14556_v35  ;;  %v9025_v20 = vsel %vm4416_vm10, 1.0, %v16541_v4  ;;  %v17092_v35 = vld [vmem:[#allocation134_spill] sm:$0xff] }
 0x63f   :  { %17082 = vst [vmem:[#allocation67_spill] sm:$0xff] %v14744_v15  ;;  %17084 = vst [vmem:[#allocation41_spill] sm:$0xff] %v14755_v52  ;;  %3484 = vbcast.lane.b32.xlu0 %v16762_v44, 320  ;;  %vm4486_vm12 = vcmp.eq.s32.totalorder %v17089_v9, %v9821_v11  ;;  %vm4485_vm1 = vcmp.eq.s32.totalorder %v17090_v40, %v9821_v11  ;;  %v14787_v57 = vadd.f32 %v8987_v31, %v14562_v51  ;;  %v17093_v51 = vld [vmem:[#allocation135_spill] sm:$0xff]  ;;  %v17094_v31 = vld [vmem:[#allocation136_spill] sm:$0xff] }
 0x640   :  { %v9024_v39 = vsel %vm4415_vm8, 1.0, %v16541_v4  ;;  %v9057_v36 = vsel %vm4448_vm3, 1.0, %v16541_v4  ;;  %vm4271_vm14 = vcmp.eq.s32.totalorder %v17092_v35, %v9821_v11  ;;  %v14798_v58 = vadd.f32 %v9076_v14, %v14604_v32  ;;  %v17095_v35 = vld [vmem:[#allocation138_spill] sm:$0xff] }
 0x641   :  { %v8839_v5 = vsel %vm4230_vm15, 1.0, %v16541_v4  ;;  %vm4211_vm11 = vcmp.eq.s32.totalorder %v17093_v51, %v9821_v11  ;;  %vm4300_vm4 = vcmp.eq.s32.totalorder %v17094_v31, %v9821_v11  ;;  %v9095_v9 = vsel %vm4486_vm12, 1.0, %v16541_v4 }
 0x642   :  { %v14784_v12 = vpop.permute.xlu0 %3050  ;;  %v14793_v41 = vpop.permute.xlu1 %2796  ;;  %3566 = vbcast.lane.b32.xlu1 %v16791_v19, 312  ;;  %v9094_v40 = vsel %vm4485_vm1, 1.0, %v16541_v4  ;;  %vm4338_vm9 = vcmp.eq.s32.totalorder %v17095_v35, %v9821_v11  ;;  %vm4281_vm13 = vcmp.eq.s32.totalorder %v17096_v55, %v9821_v11  ;;  %v14811_v32 = vadd.f32 %v9025_v20, %v9024_v39  ;;  %v17098_v55 = vld [vmem:[#allocation141_spill] sm:$0xff]  ;;  %v17100_v39 = vld [vmem:[#allocation142_spill] sm:$0xff] }
 0x643   :  { %17091 = vst [vmem:[#allocation42_spill] sm:$0xff] %v14784_v12  ;;  %3648 = vbcast.lane.b32.xlu0 %v16831_v27, 304  ;;  %v14814_v14 = vadd.f32 %v9057_v36, %v14597_v43  ;;  %v8880_v51 = vsel %vm4271_vm14, 1.0, %v16541_v4  ;;  %v17097_v12 = vld [vmem:[#allocation140_spill] sm:$0xff]  ;;  %v14822_v15 = vadd.f32 %v8839_v5, %v14639_v34  ;;  %v8820_v35 = vsel %vm4211_vm11, 1.0, %v16541_v4 }
 0x644   :  { %vm4388_vm2 = vcmp.eq.s32.totalorder %v17097_v12, %v9821_v11  ;;  %v8909_v52 = vsel %vm4300_vm4, 1.0, %v16541_v4  ;;  %vm4319_vm10 = vcmp.eq.s32.totalorder %v17098_v55, %v9821_v11  ;;  %v14832_v43 = vadd.f32 %v9095_v9, %v9094_v40  ;;  %v17101_v55 = vld [vmem:[#allocation143_spill] sm:$0xff] }
 0x645   :  { %v8947_v12 = vsel %vm4338_vm9, 1.0, %v16541_v4  ;;  %v8890_v34 = vsel %vm4281_vm13, 1.0, %v16541_v4  ;;  %vm4429_vm8 = vcmp.eq.s32.totalorder %v17100_v39, %v9821_v11  ;;  %v14839_v36 = vadd.f32 %v8880_v51, %v14653_v28  ;;  %v17103_v39 = vld [vmem:[#allocation145_spill] sm:$0xff] }
 0x646   :  { %v14819_v31 = vpop.permute.xlu0 %3175  ;;  %v14828_v20 = vpop.permute.xlu1 %2960  ;;  %2628 = vbcast.lane.b32.xlu1 %v16738_v6, 328  ;;  %v8997_v5 = vsel %vm4388_vm2, 1.0, %v16541_v4  ;;  %vm4369_vm3 = vcmp.eq.s32.totalorder %v17101_v55, %v9821_v11  ;;  %v14847_v6 = vadd.f32 %v8820_v35, %v14594_v18  ;;  %v14850_v9 = vadd.f32 %v8909_v52, %v14659_v48  ;;  %v17105_v18 = vld [vmem:[#allocation147_spill] sm:$0xff] }
 0x647   :  { %17099 = vst [vmem:[#allocation9_spill] sm:$0xff] %v14828_v20  ;;  %2929 = vbcast.lane.b32.xlu0 %v16750_v7, 328  ;;  %v17102_v7 = vld [vmem:[#allocation144_spill] sm:$0xff]  ;;  %v8928_v40 = vsel %vm4319_vm10, 1.0, %v16541_v4  ;;  %vm4407_vm12 = vcmp.eq.s32.totalorder %v17103_v39, %v9821_v11  ;;  %v14858_v51 = vadd.f32 %v8947_v12, %v14667_v61  ;;  %v14861_v55 = vadd.f32 %v8890_v34, %v14628_v24  ;;  %v17108_v39 = vld [vmem:[#allocation149_spill] sm:$0xff] }
 0x648   :  { %vm4458_vm15 = vcmp.eq.s32.totalorder %v17102_v7, %v9821_v11  ;;  %v9038_v7 = vsel %vm4429_vm8, 1.0, %v16541_v4  ;;  %vm4439_vm1 = vcmp.eq.s32.totalorder %v17105_v18, %v9821_v11  ;;  %v14871_v52 = vadd.f32 %v8997_v5, %v14688_v37  ;;  %v17107_v24 = vld [vmem:[#allocation148_spill] sm:$0xff]  ;;  %v17110_v5 = vld [vmem:[#allocation146_spill] sm:$0xff] }
 0x649   :  { %v8978_v61 = vsel %vm4369_vm3, 1.0, %v16541_v4  ;;  %v9067_v35 = vsel %vm4458_vm15, 1.0, %v16541_v4  ;;  %vm4192_vm14 = vcmp.eq.s32.totalorder %v17107_v24, %v9821_v11  ;;  %v14878_v12 = vadd.f32 %v8928_v40, %v14650_v54  ;;  %v17111_v24 = vld [vmem:[#allocation151_spill] sm:$0xff] }
 0x64a   :  { %v14855_v28 = vpop.permute.xlu0 %3339  ;;  %v14866_v48 = vpop.permute.xlu1 %3093  ;;  %3011 = vbcast.lane.b32.xlu1 %v16770_v42, 320  ;;  %v9016_v34 = vsel %vm4407_vm12, 1.0, %v16541_v4  ;;  %vm4477_vm11 = vcmp.eq.s32.totalorder %v17108_v39, %v9821_v11  ;;  %v14886_v37 = vadd.f32 %v9038_v7, %v14670_v25  ;;  %vm4495_vm9 = vcmp.eq.s32.totalorder %v17110_v5, %v9821_v11  ;;  %v17113_v25 = vld [vmem:[#allocation153_spill] sm:$0xff]  ;;  %v17115_v5 = vld [vmem:[#allocation54_spill] sm:$0xff] }
 0x64b   :  { %17104 = vst [vmem:[#allocation68_spill] sm:$0xff] %v14855_v28  ;;  %17106 = vst [vmem:[#allocation66_spill] sm:$0xff] %v14866_v48  ;;  %3144 = vbcast.lane.b32.xlu0 %v16751_v13, 328  ;;  %v17109_v13 = vld [vmem:[#allocation150_spill] sm:$0xff]  ;;  %v9048_v18 = vsel %vm4439_vm1, 1.0, %v16541_v4  ;;  %vm4496_vm13 = vcmp.eq.s32.totalorder %v17111_v24, %v9821_v11  ;;  %v14896_v40 = vadd.f32 %v8978_v61, %v14656_v3  ;;  %v9086_v3 = vsel %vm4477_vm11, 1.0, %v16541_v4 }
 0x64c   :  { %vm4221_vm4 = vcmp.eq.s32.totalorder %v17109_v13, %v9821_v11  ;;  %v14899_v39 = vadd.f32 %v9067_v35, %v14691_v59  ;;  %v8801_v13 = vsel %vm4192_vm14, 1.0, %v16541_v4  ;;  %vm4202_vm2 = vcmp.eq.s32.totalorder %v17113_v25, %v9821_v11  ;;  %v17116_v59 = vld [vmem:[#allocation154_spill] sm:$0xff]  ;;  %v17117_v48 = vld [vmem:[#allocation155_spill] sm:$0xff] }
 0x64d   :  { %v14909_v24 = vadd.f32 %v9016_v34, %v14696_v62  ;;  %v8830_v61 = vsel %vm4221_vm4, 1.0, %v16541_v4  ;;  %vm4310_vm10 = vcmp.eq.s32.totalorder %v17116_v59, %v9821_v11  ;;  %v9104_v35 = vsel %vm4495_vm9, 1.0, %v16541_v4  ;;  %v17119_v59 = vld [vmem:[#allocation157_spill] sm:$0xff] }
 0x64e   :  { %v14893_v54 = vpop.permute.xlu0 %3558  ;;  %v14904_v7 = vpop.permute.xlu1 %3257  ;;  %3226 = vbcast.lane.b32.xlu1 %v17115_v5, 320  ;;  %v14917_v25 = vadd.f32 %v9048_v18, %v14711_v38  ;;  %v9105_v20 = vsel %vm4496_vm13, 1.0, %v16541_v4  ;;  %vm4240_vm8 = vcmp.eq.s32.totalorder %v17117_v48, %v9821_v11  ;;  %v14923_v62 = vadd.f32 %v8801_v13, %v14738_v45  ;;  %v17120_v45 = vld [vmem:[#allocation168_spill] sm:$0xff] }
 0x64f   :  { %17112 = vst [vmem:[#allocation11_spill] sm:$0xff] %v14893_v54  ;;  %17114 = vst [vmem:[#allocation46_spill] sm:$0xff] %v14904_v7  ;;  %3308 = vbcast.lane.b32.xlu0 %v16804_v21, 312  ;;  %v8811_v34 = vsel %vm4202_vm2, 1.0, %v16541_v4  ;;  %vm4350_vm3 = vcmp.eq.s32.totalorder %v17118_v0, %v9821_v11  ;;  %vm4291_vm15 = vcmp.eq.s32.totalorder %v17119_v59, %v9821_v11  ;;  %v8919_v48 = vsel %vm4310_vm10, 1.0, %v16541_v4  ;;  %v17122_v0 = vld [vmem:[#allocation49_spill] sm:$0xff] }
 0x650   :  { %v14933_v38 = vadd.f32 %v9086_v3, %v14729_v17  ;;  %v14936_v18 = vadd.f32 %v8830_v61, %v14750_v16  ;;  %vm4282_vm12 = vcmp.eq.s32.totalorder %v17120_v45, %v9821_v11  ;;  %v14945_v59 = vadd.f32 %v9105_v20, %v9104_v35  ;;  %v17123_v17 = vld [vmem:[#allocation158_spill] sm:$0xff]  ;;  %v17124_v16 = vld [vmem:[#allocation160_spill] sm:$0xff]  ;;  %v17127_v35 = vld [vmem:[#allocation161_spill] sm:$0xff] }
 0x651   :  { %v8849_v26 = vsel %vm4240_vm8, 1.0, %v16541_v4  ;;  %vm4379_vm1 = vcmp.eq.s32.totalorder %v17123_v17, %v9821_v11  ;;  %vm4417_vm14 = vcmp.eq.s32.totalorder %v17124_v16, %v9821_v11  ;;  %v14953_v3 = vadd.f32 %v8811_v34, %v14723_v29 }
 0x652   :  { %v14930_v22 = vpop.permute.xlu0 %2456  ;;  %v14941_v13 = vpop.permute.xlu1 %3476  ;;  %3402 = vbcast.lane.b32.xlu1 %v17122_v0, 328  ;;  %v8959_v61 = vsel %vm4350_vm3, 1.0, %v16541_v4  ;;  %v8900_v45 = vsel %vm4291_vm15, 1.0, %v16541_v4  ;;  %v14960_v20 = vadd.f32 %v8919_v48, %v14768_v53  ;;  %vm4360_vm4 = vcmp.eq.s32.totalorder %v17127_v35, %v9821_v11  ;;  %v17128_v0 = vld [vmem:[#allocation162_spill] sm:$0xff]  ;;  %v17131_v53 = vld [vmem:[#allocation164_spill] sm:$0xff] }
 0x653   :  { %17121 = vst [vmem:[#allocation58_spill] sm:$0xff] %v14941_v13  ;;  %3445 = vbcast.lane.b32.xlu0 %v16753_v10, 328  ;;  %v17125_v10 = vld [vmem:[#allocation83_spill] sm:$0xff]  ;;  %vm4468_vm9 = vcmp.eq.s32.totalorder %v17128_v0, %v9821_v11  ;;  %v8891_v17 = vsel %vm4282_vm12, 1.0, %v16541_v4  ;;  %v14970_v34 = vadd.f32 %v8849_v26, %v14732_v33  ;;  %v8988_v16 = vsel %vm4379_vm1, 1.0, %v16541_v4  ;;  %v17133_v35 = vld [vmem:[#allocation62_spill] sm:$0xff] }
 0x654   :  { %vm4283_vm11 = vcmp.eq.s32.totalorder %v17125_v10, %v9821_v11  ;;  %17126 = vst [vmem:[#allocation33_spill] sm:$0xff] %v14960_v20  ;;  %v9026_v13 = vsel %vm4417_vm14, 1.0, %v16541_v4  ;;  %vm4212_vm13 = vcmp.eq.s32.totalorder %v17131_v53, %v9821_v11  ;;  %v17134_v20 = vld [vmem:[#allocation60_spill] sm:$0xff]  ;;  %v14981_v0 = vadd.f32 %v8959_v61, %v14777_v1  ;;  %v17136_v26 = vld [vmem:[#allocation171_spill] sm:$0xff]  ;;  %v17138_v10 = vld [vmem:[#allocation89_spill] sm:$0xff] }
 0x655   :  { %17130 = vst [vmem:[#allocation36_spill] sm:$0xff] %v14970_v34  ;;  %vm4272_vm2 = vcmp.eq.s32.totalorder %v17136_v26, %v9821_v11  ;;  %v8892_v33 = vsel %vm4283_vm11, 1.0, %v16541_v4  ;;  %v8969_v53 = vsel %vm4360_vm4, 1.0, %v16541_v4  ;;  %v9077_v34 = vsel %vm4468_vm9, 1.0, %v16541_v4 }
 0x656   :  { %v14967_v29 = vpop.permute.xlu0 %2620  ;;  %v14976_v48 = vpop.permute.xlu1 %3640  ;;  %3527 = vbcast.lane.b32.xlu1 %v17134_v20, 320  ;;  %17135 = vst [vmem:[#allocation34_spill] sm:$0xff] %v14981_v0  ;;  %v6966_v1 = vadd.f32 %v8891_v17, %v14861_v55  ;;  %v15001_v61 = vadd.f32 %v9026_v13, %v14811_v32  ;;  %vm4273_vm8 = vcmp.eq.s32.totalorder %v17138_v10, %v9821_v11  ;;  %v17139_v0 = vld [vmem:[#allocation165_spill] sm:$0xff]  ;;  %v8881_v7 = vsel %vm4272_vm2, 1.0, %v16541_v4 }
 0x657   :  { %17129 = vst [vmem:[#allocation5_spill] sm:$0xff] %v14967_v29  ;;  %17132 = vst [vmem:[#allocation52_spill] sm:$0xff] %v14976_v48  ;;  %3609 = vbcast.lane.b32.xlu0 %v17133_v35, 312  ;;  %v14984_v29 = vadd.f32 %v8900_v45, %v14747_v23  ;;  %v17137_v48 = vld [vmem:[#allocation163_spill] sm:$0xff]  ;;  %v14998_v23 = vadd.f32 %v8988_v16, %v14787_v57  ;;  %v8821_v45 = vsel %vm4212_vm13, 1.0, %v16541_v4  ;;  %v17141_v57 = vld [vmem:[#allocation64_spill] sm:$0xff] }
 0x658   :  { %vm4398_vm10 = vcmp.eq.s32.totalorder %v17137_v48, %v9821_v11  ;;  %vm4449_vm3 = vcmp.eq.s32.totalorder %v17139_v0, %v9821_v11  ;;  %v6967_v54 = vadd.f32 %v8892_v33, %v6966_v1  ;;  %v15015_v32 = vadd.f32 %v8969_v53, %v14760_v49  ;;  %v17143_v33 = vld [vmem:[#allocation18_spill] sm:$0xff] }
 0x659   :  { %v15018_v13 = vadd.f32 %v9077_v34, %v14798_v58  ;;  %v9007_v17 = vsel %vm4398_vm10, 1.0, %v16541_v4  ;;  %v6861_v0 = vadd.f32 %v8821_v45, %v14847_v6  ;;  %vm4203_vm12 = vcmp.eq.s32.totalorder %v17143_v33, %v9821_v11  ;;  %v17144_v58 = vld [vmem:[#allocation167_spill] sm:$0xff]  ;;  %v17145_v48 = vld [vmem:[#allocation30_spill] sm:$0xff]  ;;  %v17147_v6 = vld [vmem:[#allocation169_spill] sm:$0xff] }
 0x65a   :  { %v2758_v26 = vpop.permute.xlu0 %2757  ;;  %v15010_v55 = vpop.permute.xlu1 %2538  ;;  %3691 = vbcast.lane.b32.xlu1 %v17141_v57, 304  ;;  %17142 = vst [vmem:[#allocation38_spill] sm:$0xff] %v15015_v32  ;;  %v9058_v49 = vsel %vm4449_vm3, 1.0, %v16541_v4  ;;  %vm4487_vm1 = vcmp.eq.s32.totalorder %v17144_v58, %v9821_v11  ;;  %v6951_v34 = vadd.f32 %v8881_v7, %v14839_v36  ;;  %vm4213_vm14 = vcmp.eq.s32.totalorder %v17145_v48, %v9821_v11  ;;  %v17148_v45 = vld [vmem:[#allocation180_spill] sm:$0xff] }
 0x65b   :  { %vm4284_vm15 = vcmp.eq.s32.totalorder %v2758_v26, %v9821_v11  ;;  %17140 = vst [vmem:[#allocation40_spill] sm:$0xff] %v15010_v55  ;;  %2671 = vbcast.lane.b32.xlu0 %v16757_v46, 328  ;;  %v8882_v46 = vsel %vm4273_vm8, 1.0, %v16541_v4  ;;  %vm4231_vm11 = vcmp.eq.s32.totalorder %v17147_v6, %v9821_v11  ;;  %vm4193_vm4 = vcmp.eq.s32.totalorder %v17148_v45, %v9821_v11 }
 0x65c   :  { %v8893_v16 = vsel %vm4284_vm15, 1.0, %v16541_v4  ;;  %vm4204_vm9 = vcmp.eq.s32.totalorder %v14718_v2, %v9821_v11  ;;  %v8812_v36 = vsel %vm4203_vm12, 1.0, %v16541_v4  ;;  %v6952_v7 = vadd.f32 %v8882_v46, %v6951_v34  ;;  %v17150_v34 = vld [vmem:[#allocation170_spill] sm:$0xff] }
 0x65d   :  { %v6968_v1 = vadd.f32 %v8893_v16, %v6967_v54  ;;  %vm4214_vm13 = vcmp.eq.s32.totalorder %v14930_v22, %v9821_v11  ;;  %v8822_v26 = vsel %vm4213_vm14, 1.0, %v16541_v4  ;;  %vm4194_vm10 = vcmp.eq.s32.totalorder %v14636_v60, %v9821_v11 }
 0x65e   :  { %v15035_v53 = vpop.permute.xlu0 %2921  ;;  %v2715_v10 = vpop.permute.xlu1 %2714  ;;  %2972 = vbcast.lane.b32.xlu1 %v16760_v50, 328  ;;  %v9096_v50 = vsel %vm4487_vm1, 1.0, %v16541_v4  ;;  %v8813_v33 = vsel %vm4204_vm9, 1.0, %v16541_v4  ;;  %vm4320_vm8 = vcmp.eq.s32.totalorder %v17150_v34, %v9821_v11  ;;  %v6847_v48 = vadd.f32 %v8812_v36, %v14953_v3 }
 0x65f   :  { %17146 = vst [vmem:[#allocation43_spill] sm:$0xff] %v15035_v53  ;;  %v6969_v54 = vrot.slane %v6968_v1, 4  ;;  %3187 = vbcast.lane.b32.xlu0 %v16761_v63, 328  ;;  %vm4274_vm2 = vcmp.eq.s32.totalorder %v2715_v10, %v9821_v11  ;;  %v8802_v63 = vsel %vm4193_vm4, 1.0, %v16541_v4  ;;  %v8840_v58 = vsel %vm4231_vm11, 1.0, %v16541_v4 }
 0x660   :  { %v8883_v16 = vsel %vm4274_vm2, 1.0, %v16541_v4  ;;  %v6862_v10 = vadd.f32 %v8822_v26, %v6861_v0  ;;  %v8803_v3 = vsel %vm4194_vm10, 1.0, %v16541_v4  ;;  %v6832_v34 = vadd.f32 %v8802_v63, %v14923_v62 }
 0x661   :  { %v6970_v2 = vadd.f32 %v6969_v54, %v6968_v1  ;;  %v6953_v22 = vadd.f32 %v8883_v16, %v6952_v7  ;;  %v8823_v1 = vsel %vm4214_vm13, 1.0, %v16541_v4  ;;  %v17152_v7 = vld [vmem:[#allocation172_spill] sm:$0xff]  ;;  %v17153_v16 = vld [vmem:[#allocation173_spill] sm:$0xff]  ;;  %v6848_v32 = vadd.f32 %v8813_v33, %v6847_v48 }
 0x662   :  { %v15059_v46 = vpop.permute.xlu0 %3136  ;;  %v15065_v54 = vpop.permute.xlu1 %2839  ;;  %3269 = vbcast.lane.b32.xlu1 %v16788_v8, 320  ;;  %vm4370_vm3 = vcmp.eq.s32.totalorder %v17152_v7, %v9821_v11  ;;  %vm4301_vm15 = vcmp.eq.s32.totalorder %v17153_v16, %v9821_v11  ;;  %v6863_v6 = vadd.f32 %v8823_v1, %v6862_v10  ;;  %v15086_v60 = vadd.f32 %v9007_v17, %v14771_v30  ;;  %v17157_v10 = vld [vmem:[#allocation176_spill] sm:$0xff] }
 0x663   :  { %17149 = vst [vmem:[#allocation47_spill] sm:$0xff] %v15059_v46  ;;  %v6971_v45 = vrot.slane %v6970_v2, 2  ;;  %17151 = vst [vmem:[#allocation53_spill] sm:$0xff] %v15065_v54  ;;  %3351 = vbcast.lane.b32.xlu0 %v17085_v56, 312  ;;  %v6954_v36 = vrot.slane %v6953_v22, 4  ;;  %v8929_v46 = vsel %vm4320_vm8, 1.0, %v16541_v4  ;;  %v15089_v54 = vadd.f32 %v9058_v49, %v14814_v14 }
 0x664   :  { %v6833_v55 = vadd.f32 %v8803_v3, %v6832_v34  ;;  %v15096_v62 = vadd.f32 %v9096_v50, %v14832_v43  ;;  %v8910_v30 = vsel %vm4301_vm15, 1.0, %v16541_v4  ;;  %v15107_v17 = vadd.f32 %v8840_v58, %v14822_v15  ;;  %v17155_v50 = vld [vmem:[#allocation175_spill] sm:$0xff] }
 0x665   :  { %v6972_v53 = vadd.f32 %v6971_v45, %v6970_v2  ;;  %v6955_v0 = vadd.f32 %v6954_v36, %v6953_v22  ;;  %v8979_v2 = vsel %vm4370_vm3, 1.0, %v16541_v4  ;;  %v15110_v49 = vadd.f32 %v8929_v46, %v14878_v12  ;;  %v17156_v12 = vld [vmem:[#allocation77_spill] sm:$0xff]  ;;  %v17159_v36 = vld [vmem:[#allocation178_spill] sm:$0xff] }
 0x666   :  { %v15083_v26 = vpop.permute.xlu0 %3300  ;;  %v15091_v28 = vpop.permute.xlu1 %3003  ;;  %3488 = vbcast.lane.b32.xlu1 %v16762_v44, 328  ;;  %v17154_v44 = vld [vmem:[#allocation174_spill] sm:$0xff]  ;;  %v6849_v43 = vrot.slane %v6848_v32, 4  ;;  %vm4339_vm1 = vcmp.eq.s32.totalorder %v17155_v50, %v9821_v11  ;;  %v6864_v63 = vrot.slane %v6863_v6, 4  ;;  %v15119_v1 = vadd.f32 %v8979_v2, %v14896_v40  ;;  %v17158_v40 = vld [vmem:[#allocation177_spill] sm:$0xff] }
 0x667   :  { %3570 = vbcast.lane.b32.xlu0 %v16791_v19, 320  ;;  %v6956_v14 = vrot.slane %v6955_v0, 2  ;;  %vm4408_vm12 = vcmp.eq.s32.totalorder %v17154_v44, %v9821_v11  ;;  %v6973_v33 = vrot.slane %v6972_v53, 1  ;;  %v15122_v15 = vadd.f32 %v8910_v30, %v14850_v9 }
 0x668   :  { %vm4222_vm14 = vcmp.eq.s32.totalorder %v17156_v12, %v9821_v11  ;;  %v6834_v46 = vrot.slane %v6833_v55, 4  ;;  %v9017_v58 = vsel %vm4408_vm12, 1.0, %v16541_v4  ;;  %vm4440_vm11 = vcmp.eq.s32.totalorder %v17157_v10, %v9821_v11 }
 0x669   :  { %v6957_v22 = vadd.f32 %v6956_v14, %v6955_v0  ;;  %vm4389_vm4 = vcmp.eq.s32.totalorder %v17158_v40, %v9821_v11  ;;  %v8948_v3 = vsel %vm4339_vm1, 1.0, %v16541_v4  ;;  %vm4478_vm9 = vcmp.eq.s32.totalorder %v17159_v36, %v9821_v11 }
 0x66a   :  { %v15116_v48 = vpop.permute.xlu0 %3437  ;;  %v15126_v45 = vpop.permute.xlu1 %3218  ;;  %3652 = vbcast.lane.b32.xlu1 %v16831_v27, 312  ;;  %vm4223_vm13 = vcmp.eq.s32.totalorder %v14675_v47, %v9821_v11  ;;  %v8831_v7 = vsel %vm4222_vm14, 1.0, %v16541_v4  ;;  %v6865_v16 = vadd.f32 %v6864_v63, %v6863_v6  ;;  %v6974_v34 = vadd.f32 %v6973_v33, %v6972_v53  ;;  %v17160_v53 = vld [vmem:[#allocation179_spill] sm:$0xff]  ;;  %v17162_v33 = vld [vmem:[#allocation14_spill] sm:$0xff] }
 0x66b   :  { %3015 = vbcast.lane.b32.xlu0 %v16770_v42, 328  ;;  %v6958_v9 = vrot.slane %v6957_v22, 1  ;;  %v6850_v42 = vadd.f32 %v6849_v43, %v6848_v32  ;;  %v15147_v30 = vadd.f32 %v9017_v58, %v14909_v24  ;;  %v9049_v14 = vsel %vm4440_vm11, 1.0, %v16541_v4 }
 0x66c   :  { %v8998_v44 = vsel %vm4389_vm4, 1.0, %v16541_v4  ;;  %v6835_v50 = vadd.f32 %v6834_v46, %v6833_v55  ;;  %v15156_v32 = vadd.f32 %v8948_v3, %v14858_v51  ;;  %vm4430_vm2 = vcmp.eq.s32.totalorder %v17160_v53, %v9821_v11 }
 0x66d   :  { %v6959_v0 = vadd.f32 %v6958_v9, %v6957_v22  ;;  %v8832_v24 = vsel %vm4223_vm13, 1.0, %v16541_v4  ;;  %v9087_v55 = vsel %vm4478_vm9, 1.0, %v16541_v4  ;;  %v6876_v51 = vadd.f32 %v8831_v7, %v14936_v18  ;;  %v17163_v18 = vld [vmem:[#allocation22_spill] sm:$0xff]  ;;  %v17164_v7 = vld [vmem:[#allocation44_spill] sm:$0xff] }
 0x66e   :  { %v15144_v2 = vpop.permute.xlu0 %3601  ;;  %v15151_v12 = vpop.permute.xlu1 %3394  ;;  %3230 = vbcast.lane.b32.xlu1 %v17115_v5, 328  ;;  %v17161_v5 = vld [vmem:[#allocation181_spill] sm:$0xff]  ;;  %v6851_v43 = vrot.slane %v6850_v42, 2  ;;  %v15175_v63 = vadd.f32 %v9049_v14, %v14917_v25  ;;  %v15178_v47 = vadd.f32 %v8998_v44, %v14871_v52  ;;  %vm4497_vm8 = vcmp.eq.s32.totalorder %v17162_v33, %v9821_v11  ;;  %v17166_v14 = vld [vmem:[#allocation27_spill] sm:$0xff] }
 0x66f   :  { %3312 = vbcast.lane.b32.xlu0 %v16804_v21, 320  ;;  %v15165_v6 = vsel %vm7401_vm0, %v6974_v34, %v6959_v0  ;;  %vm4459_vm10 = vcmp.eq.s32.totalorder %v17161_v5, %v9821_v11  ;;  %v6866_v22 = vrot.slane %v6865_v16, 2  ;;  %v9039_v58 = vsel %vm4430_vm2, 1.0, %v16541_v4  ;;  %v17165_v0 = vld [vmem:[#allocation20_spill] sm:$0xff] }
 0x670   :  { %v6836_v10 = vrot.slane %v6835_v50, 2  ;;  %v6877_v40 = vadd.f32 %v8832_v24, %v6876_v51  ;;  %v15189_v52 = vadd.f32 %v9087_v55, %v14933_v38  ;;  %v9068_v25 = vsel %vm4459_vm10, 1.0, %v16541_v4  ;;  %v17167_v55 = vld [vmem:[#allocation29_spill] sm:$0xff] }
 0x671   :  { %vm4292_vm15 = vcmp.eq.s32.totalorder %v17163_v18, %v9821_v11  ;;  %v9106_v36 = vsel %vm4497_vm8, 1.0, %v16541_v4  ;;  %vm4380_vm12 = vcmp.eq.s32.totalorder %v17164_v7, %v9821_v11  ;;  %v6852_v34 = vadd.f32 %v6851_v43, %v6850_v42 }
 0x672   :  { %v2500_v46 = vpop.permute.xlu0 %2499  ;;  %v15184_v9 = vpop.permute.xlu1 %3519  ;;  %3531 = vbcast.lane.b32.xlu1 %v17134_v20, 328  ;;  %v15202_v38 = vadd.f32 %v9039_v58, %v14886_v37  ;;  %vm4418_vm1 = vcmp.eq.s32.totalorder %v17165_v0, %v9821_v11  ;;  %vm4469_vm14 = vcmp.eq.s32.totalorder %v17166_v14, %v9821_v11  ;;  %v6867_v44 = vadd.f32 %v6866_v22, %v6865_v16 }
 0x673   :  { %vm4224_vm3 = vcmp.eq.s32.totalorder %v2500_v46, %v9821_v11  ;;  %3613 = vbcast.lane.b32.xlu0 %v17133_v35, 320  ;;  %v8901_v24 = vsel %vm4292_vm15, 1.0, %v16541_v4  ;;  %vm4399_vm11 = vcmp.eq.s32.totalorder %v17167_v55, %v9821_v11  ;;  %v6837_v5 = vadd.f32 %v6836_v10, %v6835_v50  ;;  %v17168_v50 = vld [vmem:[#allocation24_spill] sm:$0xff] }
 0x674   :  { %v8833_v3 = vsel %vm4224_vm3, 1.0, %v16541_v4  ;;  %v15218_v37 = vadd.f32 %v9068_v25, %v14899_v39  ;;  %v15221_v16 = vadd.f32 %v9106_v36, %v14945_v59  ;;  %v8989_v43 = vsel %vm4380_vm12, 1.0, %v16541_v4  ;;  %v17169_v25 = vld [vmem:[#allocation31_spill] sm:$0xff] }
 0x675   :  { %v6878_v20 = vadd.f32 %v8833_v3, %v6877_v40  ;;  %vm4450_vm4 = vcmp.eq.s32.totalorder %v17168_v50, %v9821_v11  ;;  %v9027_v33 = vsel %vm4418_vm1, 1.0, %v16541_v4  ;;  %v6853_v22 = vrot.slane %v6852_v34, 1 }
 0x676   :  { %v15208_v53 = vpop.permute.xlu0 %2663  ;;  %v15213_v51 = vpop.permute.xlu1 %3683  ;;  %3695 = vbcast.lane.b32.xlu1 %v17141_v57, 312  ;;  %v6981_v39 = vadd.f32 %v8901_v24, %v14984_v29  ;;  %v9008_v58 = vsel %vm4399_vm11, 1.0, %v16541_v4  ;;  %vm4293_vm9 = vcmp.eq.s32.totalorder %v14793_v41, %v9821_v11  ;;  %v6868_v59 = vrot.slane %v6867_v44, 1 }
 0x677   :  { %v6879_v42 = vrot.slane %v6878_v20, 4  ;;  %3273 = vbcast.lane.b32.xlu0 %v16788_v8, 328  ;;  %v9078_v8 = vsel %vm4469_vm14, 1.0, %v16541_v4  ;;  %v9059_v40 = vsel %vm4450_vm4, 1.0, %v16541_v4  ;;  %vm4488_vm13 = vcmp.eq.s32.totalorder %v17169_v25, %v9821_v11 }
 0x678   :  { %v6838_v18 = vrot.slane %v6837_v5, 1  ;;  %v7114_v29 = vadd.f32 %v8989_v43, %v14998_v23  ;;  %v7172_v41 = vadd.f32 %v9027_v33, %v15001_v61  ;;  %v15247_v7 = vadd.f32 %v9078_v8, %v15018_v13 }
 0x679   :  { %v6880_v46 = vadd.f32 %v6879_v42, %v6878_v20  ;;  %v17170_v20 = vld [vmem:[#allocation84_spill] sm:$0xff]  ;;  %v6854_v0 = vadd.f32 %v6853_v22, %v6852_v34  ;;  %v8902_v14 = vsel %vm4293_vm9, 1.0, %v16541_v4  ;;  %vm4381_vm10 = vcmp.eq.s32.totalorder %v14819_v31, %v9821_v11  ;;  %v17171_v42 = vld [vmem:[#allocation87_spill] sm:$0xff] }
 0x67a   :  { %v15235_v10 = vpop.permute.xlu0 %2882  ;;  %v15240_v36 = vpop.permute.xlu1 %2581  ;;  %3355 = vbcast.lane.b32.xlu1 %v17085_v56, 320  ;;  %vm4232_vm2 = vcmp.eq.s32.totalorder %v17170_v20, %v9821_v11  ;;  %v15258_v23 = vadd.f32 %v9059_v40, %v15089_v54  ;;  %v9097_v61 = vsel %vm4488_vm13, 1.0, %v16541_v4  ;;  %v6869_v13 = vadd.f32 %v6868_v59, %v6867_v44  ;;  %v17172_v54 = vld [vmem:[#allocation86_spill] sm:$0xff]  ;;  %v17176_v20 = vld [vmem:[#allocation11_spill] sm:$0xff] }
 0x67b   :  { %v6881_v3 = vrot.slane %v6880_v46, 2  ;;  %3574 = vbcast.lane.b32.xlu0 %v16791_v19, 328  ;;  %v15255_v19 = vadd.f32 %v9008_v58, %v15086_v60  ;;  %v8841_v34 = vsel %vm4232_vm2, 1.0, %v16541_v4  ;;  %vm4321_vm8 = vcmp.eq.s32.totalorder %v17171_v42, %v9821_v11 }
 0x67c   :  { %v6839_v43 = vadd.f32 %v6838_v18, %v6837_v5  ;;  %vm4371_vm3 = vcmp.eq.s32.totalorder %v17172_v54, %v9821_v11  ;;  %v6982_v33 = vadd.f32 %v8902_v14, %v6981_v39  ;;  %v8990_v44 = vsel %vm4381_vm10, 1.0, %v16541_v4  ;;  %v17173_v5 = vld [vmem:[#allocation68_spill] sm:$0xff] }
 0x67d   :  { %v6882_v24 = vadd.f32 %v6881_v3, %v6880_v46  ;;  %vm4419_vm12 = vcmp.eq.s32.totalorder %v17173_v5, %v9821_v11  ;;  %v17174_v46 = vld [vmem:[#allocation91_spill] sm:$0xff]  ;;  %v17175_v39 = vld [vmem:[#allocation88_spill] sm:$0xff]  ;;  %v7115_v40 = vadd.f32 %v8990_v44, %v7114_v29  ;;  %vm4470_vm4 = vcmp.eq.s32.totalorder %v17176_v20, %v9821_v11  ;;  %v17178_v44 = vld [vmem:[#allocation58_spill] sm:$0xff] }
 0x67e   :  { %v15264_v55 = vpop.permute.xlu0 %3054  ;;  %v2801_v60 = vpop.permute.xlu1 %2800  ;;  %3656 = vbcast.lane.b32.xlu1 %v16831_v27, 320  ;;  %v7450_v8 = vsel %vm7401_vm0, %v6854_v0, %v6839_v43  ;;  %vm4302_vm1 = vcmp.eq.s32.totalorder %v17174_v46, %v9821_v11  ;;  %vm4409_vm14 = vcmp.eq.s32.totalorder %v17175_v39, %v9821_v11  ;;  %v9028_v3 = vsel %vm4419_vm12, 1.0, %v16541_v4  ;;  %v17180_v39 = vld [vmem:[#allocation45_spill] sm:$0xff] }
 0x67f   :  { %v6883_v50 = vrot.slane %v6882_v24, 1  ;;  %3316 = vbcast.lane.b32.xlu0 %v16804_v21, 328  ;;  %vm4294_vm15 = vcmp.eq.s32.totalorder %v2801_v60, %v9821_v11  ;;  %v7451_v31 = vsel %vm7403_vm5, %v6869_v13, %v7450_v8  ;;  %v15300_v29 = vadd.f32 %v9097_v61, %v15096_v62  ;;  %v17177_v13 = vld [vmem:[#allocation46_spill] sm:$0xff] }
 0x680   :  { %v8903_v21 = vsel %vm4294_vm15, 1.0, %v16541_v4  ;;  %vm4400_vm9 = vcmp.eq.s32.totalorder %v17177_v13, %v9821_v11  ;;  %v8930_v43 = vsel %vm4321_vm8, 1.0, %v16541_v4  ;;  %v8911_v62 = vsel %vm4302_vm1, 1.0, %v16541_v4 }
 0x681   :  { %v6884_v22 = vadd.f32 %v6883_v50, %v6882_v24  ;;  %v6983_v58 = vadd.f32 %v8903_v21, %v6982_v33  ;;  %v6891_v24 = vadd.f32 %v8841_v34, %v15107_v17  ;;  %v8980_v50 = vsel %vm4371_vm3, 1.0, %v16541_v4  ;;  %v17179_v21 = vld [vmem:[#allocation40_spill] sm:$0xff] }
 0x682   :  { %v3180_v59 = vpop.permute.xlu0 %3179  ;;  %v15288_v25 = vpop.permute.xlu1 %2964  ;;  %3617 = vbcast.lane.b32.xlu1 %v17133_v35, 328  ;;  %v9018_v34 = vsel %vm4409_vm14, 1.0, %v16541_v4  ;;  %v7173_v60 = vadd.f32 %v9028_v3, %v7172_v41  ;;  %v9079_v42 = vsel %vm4470_vm4, 1.0, %v16541_v4  ;;  %v9009_v54 = vsel %vm4400_vm9, 1.0, %v16541_v4 }
 0x683   :  { %vm4382_vm11 = vcmp.eq.s32.totalorder %v3180_v59, %v9821_v11  ;;  %3699 = vbcast.lane.b32.xlu0 %v17141_v57, 320  ;;  %v15293_v18 = vsel %vm7405_vm6, %v6884_v22, %v7451_v31  ;;  %v6984_v0 = vrot.slane %v6983_v58, 4  ;;  %vm4451_vm2 = vcmp.eq.s32.totalorder %v17178_v44, %v9821_v11 }
 0x684   :  { %v8991_v14 = vsel %vm4382_vm11, 1.0, %v16541_v4  ;;  %v15334_v41 = vadd.f32 %v8930_v43, %v15110_v49  ;;  %v15337_v22 = vadd.f32 %v8980_v50, %v15119_v1  ;;  %vm4233_vm10 = vcmp.eq.s32.totalorder %v17179_v21, %v9821_v11 }
 0x685   :  { %v15305_v35 = vadd.f32 %v8991_v14, %v7115_v40  ;;  %v6985_v17 = vadd.f32 %v6984_v0, %v6983_v58  ;;  %v15345_v46 = vadd.f32 %v9018_v34, %v15147_v30  ;;  %vm4340_vm8 = vcmp.eq.s32.totalorder %v17180_v39, %v9821_v11  ;;  %v17182_v14 = vld [vmem:[#allocation90_spill] sm:$0xff] }
 0x686   :  { %v3344_v61 = vpop.permute.xlu0 %3343  ;;  %v15325_v33 = vpop.permute.xlu1 %3097  ;;  %3359 = vbcast.lane.b32.xlu1 %v17085_v56, 328  ;;  %v6996_v56 = vadd.f32 %v8911_v62, %v15122_v15  ;;  %v7249_v49 = vadd.f32 %v9079_v42, %v15247_v7  ;;  %v7144_v1 = vadd.f32 %v9009_v54, %v15255_v19  ;;  %v9060_v31 = vsel %vm4451_vm2, 1.0, %v16541_v4  ;;  %v17181_v7 = vld [vmem:[#allocation53_spill] sm:$0xff]  ;;  %v17184_v62 = vld [vmem:[#allocation39_spill] sm:$0xff] }
 0x687   :  { %vm4420_vm13 = vcmp.eq.s32.totalorder %v3344_v61, %v9821_v11  ;;  %3660 = vbcast.lane.b32.xlu0 %v16831_v27, 328  ;;  %v6986_v8 = vrot.slane %v6985_v17, 2  ;;  %v8842_v15 = vsel %vm4233_vm10, 1.0, %v16541_v4  ;;  %v8949_v20 = vsel %vm4340_vm8, 1.0, %v16541_v4 }
 0x688   :  { %v9029_v5 = vsel %vm4420_vm13, 1.0, %v16541_v4  ;;  %vm4303_vm12 = vcmp.eq.s32.totalorder %v17181_v7, %v9821_v11  ;;  %vm4390_vm1 = vcmp.eq.s32.totalorder %v17182_v14, %v9821_v11  ;;  %vm4431_vm11 = vcmp.eq.s32.totalorder %v17184_v62, %v9821_v11 }
 0x689   :  { %v15341_v27 = vadd.f32 %v9029_v5, %v7173_v60  ;;  %v6987_v58 = vadd.f32 %v6986_v8, %v6985_v17  ;;  %v7220_v17 = vadd.f32 %v9060_v31, %v15258_v23  ;;  %v6892_v61 = vadd.f32 %v8842_v15, %v6891_v24 }
 0x68a   :  { %v3563_v59 = vpop.permute.xlu0 %3562  ;;  %v3262_v40 = vpop.permute.xlu1 %3261  ;;  %3703 = vbcast.lane.b32.xlu1 %v17141_v57, 328  ;;  %v17183_v57 = vld [vmem:[#allocation52_spill] sm:$0xff]  ;;  %v8912_v60 = vsel %vm4303_vm12, 1.0, %v16541_v4  ;;  %vm4341_vm13 = vcmp.eq.s32.totalorder %v15091_v28, %v9821_v11  ;;  %v7054_v8 = vadd.f32 %v8949_v20, %v15156_v32  ;;  %v8999_v5 = vsel %vm4390_vm1, 1.0, %v16541_v4 }
 0x68b   :  { %vm4471_vm3 = vcmp.eq.s32.totalorder %v3563_v59, %v9821_v11  ;;  %v6988_v30 = vrot.slane %v6987_v58, 1  ;;  %vm4401_vm15 = vcmp.eq.s32.totalorder %v3262_v40, %v9821_v11  ;;  %vm4489_vm14 = vcmp.eq.s32.totalorder %v17183_v57, %v9821_v11 }
 0x68c   :  { %v9080_v3 = vsel %vm4471_vm3, 1.0, %v16541_v4  ;;  %v9010_v0 = vsel %vm4401_vm15, 1.0, %v16541_v4  ;;  %v9098_v44 = vsel %vm4489_vm14, 1.0, %v16541_v4  ;;  %v9040_v21 = vsel %vm4431_vm11, 1.0, %v16541_v4 }
 0x68d   :  { %v15360_v19 = vadd.f32 %v9080_v3, %v7249_v49  ;;  %v6989_v13 = vadd.f32 %v6988_v30, %v6987_v58  ;;  %v15367_v43 = vadd.f32 %v9010_v0, %v7144_v1  ;;  %v17185_v58 = vld [vmem:[#allocation43_spill] sm:$0xff]  ;;  %v6997_v59 = vadd.f32 %v8912_v60, %v6996_v56  ;;  %v17188_v0 = vld [vmem:[#allocation50_spill] sm:$0xff] }
 0x68e   :  { %v2543_v50 = vpop.permute.xlu0 %2542  ;;  %v3481_v34 = vpop.permute.xlu1 %3480  ;;  %vm4322_vm2 = vcmp.eq.s32.totalorder %v17185_v58, %v9821_v11  ;;  %v7278_v32 = vadd.f32 %v9098_v44, %v15300_v29  ;;  %v8950_v1 = vsel %vm4341_vm13, 1.0, %v16541_v4  ;;  %vm4391_vm3 = vcmp.eq.s32.totalorder %v15126_v45, %v9821_v11  ;;  %v17186_v56 = vld [vmem:[#allocation35_spill] sm:$0xff] }
 0x68f   :  { %vm4234_vm4 = vcmp.eq.s32.totalorder %v2543_v50, %v9821_v11  ;;  %vm4452_vm9 = vcmp.eq.s32.totalorder %v3481_v34, %v9821_v11  ;;  %v15378_v54 = vsel %vm7403_vm5, %v6989_v13, %v15165_v6  ;;  %vm4460_vm15 = vcmp.eq.s32.totalorder %v17186_v56, %v9821_v11  ;;  %v17187_v29 = vld [vmem:[#allocation47_spill] sm:$0xff] }
 0x690   :  { %v8843_v42 = vsel %vm4234_vm4, 1.0, %v16541_v4  ;;  %v9061_v24 = vsel %vm4452_vm9, 1.0, %v16541_v4  ;;  %v8931_v3 = vsel %vm4322_vm2, 1.0, %v16541_v4  ;;  %vm4372_vm12 = vcmp.eq.s32.totalorder %v17187_v29, %v9821_v11 }
 0x691   :  { %v6893_v23 = vadd.f32 %v8843_v42, %v6892_v61  ;;  %v15390_v39 = vadd.f32 %v9061_v24, %v7220_v17  ;;  %vm4441_vm1 = vcmp.eq.s32.totalorder %v17188_v0, %v9821_v11  ;;  %v7055_v14 = vadd.f32 %v8950_v1, %v7054_v8  ;;  %v17190_v1 = vld [vmem:[#allocation7_spill] sm:$0xff] }
 0x692   :  { %v2844_v6 = vpop.permute.xlu0 %2843  ;;  %v3645_v49 = vpop.permute.xlu1 %3644  ;;  %v7129_v62 = vadd.f32 %v8999_v5, %v15178_v47  ;;  %v7190_v17 = vadd.f32 %v9040_v21, %v15202_v38  ;;  %v9000_v61 = vsel %vm4391_vm3, 1.0, %v16541_v4  ;;  %vm4432_vm11 = vcmp.eq.s32.totalorder %v15151_v12, %v9821_v11  ;;  %v17189_v21 = vld [vmem:[#allocation16_spill] sm:$0xff] }
 0x693   :  { %v6894_v28 = vrot.slane %v6893_v23, 4  ;;  %vm4304_vm10 = vcmp.eq.s32.totalorder %v2844_v6, %v9821_v11  ;;  %vm4490_vm8 = vcmp.eq.s32.totalorder %v3645_v49, %v9821_v11  ;;  %v9069_v47 = vsel %vm4460_vm15, 1.0, %v16541_v4 }
 0x694   :  { %v8913_v31 = vsel %vm4304_vm10, 1.0, %v16541_v4  ;;  %v9099_v30 = vsel %vm4490_vm8, 1.0, %v16541_v4  ;;  %v7026_v38 = vadd.f32 %v8931_v3, %v15334_v41  ;;  %v8981_v45 = vsel %vm4372_vm12, 1.0, %v16541_v4 }
 0x695   :  { %v6895_v40 = vadd.f32 %v6894_v28, %v6893_v23  ;;  %v6998_v15 = vadd.f32 %v8913_v31, %v6997_v59  ;;  %v15407_v20 = vadd.f32 %v9099_v30, %v7278_v32  ;;  %vm4410_vm4 = vcmp.eq.s32.totalorder %v15083_v26, %v9821_v11 }
 0x696   :  { %v3008_v7 = vpop.permute.xlu0 %3007  ;;  %v15412_v50 = vpop.permute.xlu1 %2624  ;;  %v7130_v23 = vadd.f32 %v9000_v61, %v7129_v62  ;;  %vm4241_vm13 = vcmp.eq.s32.totalorder %v17189_v21, %v9821_v11  ;;  %v9041_v41 = vsel %vm4432_vm11, 1.0, %v16541_v4  ;;  %vm4461_vm2 = vcmp.eq.s32.totalorder %v15184_v9, %v9821_v11  ;;  %v17191_v62 = vld [vmem:[#allocation51_spill] sm:$0xff]  ;;  %v17194_v21 = vld [vmem:[#allocation26_spill] sm:$0xff] }
 0x697   :  { %v6896_v57 = vrot.slane %v6895_v40, 2  ;;  %v6999_v13 = vrot.slane %v6998_v15, 4  ;;  %vm4342_vm14 = vcmp.eq.s32.totalorder %v3008_v7, %v9821_v11  ;;  %v7234_v32 = vadd.f32 %v9069_v47, %v15218_v37 }
 0x698   :  { %v8951_v34 = vsel %vm4342_vm14, 1.0, %v16541_v4  ;;  %vm4498_vm8 = vcmp.eq.s32.totalorder %v17190_v1, %v9821_v11  ;;  %v7101_v31 = vadd.f32 %v8981_v45, %v15337_v22  ;;  %v7191_v30 = vadd.f32 %v9041_v41, %v7190_v17 }
 0x699   :  { %v6897_v60 = vadd.f32 %v6896_v57, %v6895_v40  ;;  %v7000_v42 = vadd.f32 %v6999_v13, %v6998_v15  ;;  %v15423_v44 = vadd.f32 %v8951_v34, %v7055_v14  ;;  %v9019_v37 = vsel %vm4410_vm4, 1.0, %v16541_v4 }
 0x69a   :  { %v3223_v12 = vpop.permute.xlu0 %3222  ;;  %v2926_v5 = vpop.permute.xlu1 %2925  ;;  %v9070_v22 = vsel %vm4461_vm2, 1.0, %v16541_v4  ;;  %vm4499_vm12 = vcmp.eq.s32.totalorder %v15213_v51, %v9821_v11  ;;  %v9050_v26 = vsel %vm4441_vm1, 1.0, %v16541_v4  ;;  %v9107_v9 = vsel %vm4498_vm8, 1.0, %v16541_v4 }
 0x69b   :  { %v6898_v24 = vrot.slane %v6897_v60, 1  ;;  %v7001_v8 = vrot.slane %v7000_v42, 2  ;;  %vm4392_vm9 = vcmp.eq.s32.totalorder %v3223_v12, %v9821_v11  ;;  %vm4323_vm10 = vcmp.eq.s32.totalorder %v2926_v5, %v9821_v11  ;;  %v17192_v12 = vld [vmem:[#allocation21_spill] sm:$0xff] }
 0x69c   :  { %v9001_v6 = vsel %vm4392_vm9, 1.0, %v16541_v4  ;;  %v8932_v49 = vsel %vm4323_vm10, 1.0, %v16541_v4  ;;  %vm4442_vm14 = vcmp.eq.s32.totalorder %v15116_v48, %v9821_v11  ;;  %vm4479_vm11 = vcmp.eq.s32.totalorder %v17191_v62, %v9821_v11  ;;  %v17193_v5 = vld [vmem:[#allocation41_spill] sm:$0xff] }
 0x69d   :  { %v6899_v58 = vadd.f32 %v6898_v24, %v6897_v60  ;;  %v7002_v59 = vadd.f32 %v7001_v8, %v7000_v42  ;;  %v15444_v28 = vadd.f32 %v9001_v6, %v7130_v23  ;;  %v15451_v40 = vadd.f32 %v8932_v49, %v7026_v38  ;;  %v17195_v49 = vld [vmem:[#allocation95_spill] sm:$0xff] }
 0x69e   :  { %v3399_v15 = vpop.permute.xlu0 %3398  ;;  %v3141_v3 = vpop.permute.xlu1 %3140  ;;  %v7235_v17 = vadd.f32 %v9070_v22, %v7234_v32  ;;  %v7159_v34 = vadd.f32 %v9019_v37, %v15345_v46  ;;  %v9108_v60 = vsel %vm4499_vm12, 1.0, %v16541_v4  ;;  %v7292_v42 = vadd.f32 %v9107_v9, %v15221_v16  ;;  %v17198_v22 = vld [vmem:[#allocation66_spill] sm:$0xff] }
 0x69f   :  { %v7003_v56 = vrot.slane %v7002_v59, 1  ;;  %vm4433_vm3 = vcmp.eq.s32.totalorder %v3399_v15, %v9821_v11  ;;  %v15456_v29 = vsel %vm7407_vm7, %v6899_v58, %v15293_v18  ;;  %vm4373_vm15 = vcmp.eq.s32.totalorder %v3141_v3, %v9821_v11  ;;  %v17197_v3 = vld [vmem:[#allocation67_spill] sm:$0xff] }
 0x6a0   :  { %v9042_v7 = vsel %vm4433_vm3, 1.0, %v16541_v4  ;;  %v8982_v57 = vsel %vm4373_vm15, 1.0, %v16541_v4  ;;  %v9051_v47 = vsel %vm4442_vm14, 1.0, %v16541_v4  ;;  %vm4311_vm9 = vcmp.eq.s32.totalorder %v17192_v12, %v9821_v11 }
 0x6a1   :  { %v7004_v14 = vadd.f32 %v7003_v56, %v7002_v59  ;;  %v15470_v18 = vadd.f32 %v9042_v7, %v7191_v30  ;;  %v15483_v13 = vadd.f32 %v8982_v57, %v7101_v31  ;;  %vm4480_vm2 = vcmp.eq.s32.totalorder %v15144_v2, %v9821_v11  ;;  %v17196_v30 = vld [vmem:[#allocation36_spill] sm:$0xff] }
 0x6a2   :  { %v3524_v51 = vpop.permute.xlu0 %3523  ;;  %v3305_v61 = vpop.permute.xlu1 %3304  ;;  %v8850_v16 = vsel %vm4241_vm13, 1.0, %v16541_v4  ;;  %v9088_v24 = vsel %vm4479_vm11, 1.0, %v16541_v4  ;;  %v7293_v8 = vadd.f32 %v9108_v60, %v7292_v42  ;;  %vm4242_vm8 = vcmp.eq.s32.totalorder %v17193_v5, %v9821_v11 }
 0x6a3   :  { %vm4462_vm4 = vcmp.eq.s32.totalorder %v3524_v51, %v9821_v11  ;;  %v15490_v0 = vsel %vm7405_vm6, %v7004_v14, %v15378_v54  ;;  %vm4411_vm1 = vcmp.eq.s32.totalorder %v3305_v61, %v9821_v11  ;;  %v7205_v54 = vadd.f32 %v9050_v26, %v15175_v63 }
 0x6a4   :  { %v9071_v48 = vsel %vm4462_vm4, 1.0, %v16541_v4  ;;  %v9020_v45 = vsel %vm4411_vm1, 1.0, %v16541_v4  ;;  %vm4361_vm13 = vcmp.eq.s32.totalorder %v17194_v21, %v9821_v11  ;;  %v9089_v6 = vsel %vm4480_vm2, 1.0, %v16541_v4  ;;  %v17205_v21 = vld [vmem:[#allocation34_spill] sm:$0xff] }
 0x6a5   :  { %v15498_v38 = vadd.f32 %v9071_v48, %v7235_v17  ;;  %v15506_v46 = vadd.f32 %v9020_v45, %v7159_v34  ;;  %v7206_v2 = vadd.f32 %v9051_v47, %v7205_v54  ;;  %vm4257_vm15 = vcmp.eq.s32.totalorder %v17195_v49, %v9821_v11  ;;  %v17200_v34 = vld [vmem:[#allocation33_spill] sm:$0xff]  ;;  %v17201_v48 = vld [vmem:[#allocation38_spill] sm:$0xff] }
 0x6a6   :  { %v3688_v23 = vpop.permute.xlu0 %3687  ;;  %v3442_v63 = vpop.permute.xlu1 %3441  ;;  %v8920_v32 = vsel %vm4311_vm9, 1.0, %v16541_v4  ;;  %v7263_v1 = vadd.f32 %v9088_v24, %v15189_v52  ;;  %vm4243_vm12 = vcmp.eq.s32.totalorder %v15240_v36, %v9821_v11  ;;  %v6905_v56 = vadd.f32 %v8850_v16, %v17196_v30  ;;  %v17199_v36 = vld [vmem:[#allocation19_spill] sm:$0xff]  ;;  %v17202_v47 = vld [vmem:[#allocation42_spill] sm:$0xff] }
 0x6a7   :  { %vm4500_vm10 = vcmp.eq.s32.totalorder %v3688_v23, %v9821_v11  ;;  %vm4443_vm3 = vcmp.eq.s32.totalorder %v3442_v63, %v9821_v11  ;;  %vm4312_vm14 = vcmp.eq.s32.totalorder %v17197_v3, %v9821_v11  ;;  %v8851_v37 = vsel %vm4242_vm8, 1.0, %v16541_v4  ;;  %v17204_v63 = vld [vmem:[#allocation137_spill] sm:$0xff]  ;;  %v17206_v49 = vld [vmem:[#allocation166_spill] sm:$0xff] }
 0x6a8   :  { %v9109_v41 = vsel %vm4500_vm10, 1.0, %v16541_v4  ;;  %v9052_v59 = vsel %vm4443_vm3, 1.0, %v16541_v4  ;;  %vm4362_vm11 = vcmp.eq.s32.totalorder %v17198_v22, %v9821_v11  ;;  %vm4351_vm4 = vcmp.eq.s32.totalorder %v17199_v36, %v9821_v11 }
 0x6a9   :  { %v15524_v58 = vadd.f32 %v9109_v41, %v7293_v8  ;;  %v15536_v31 = vadd.f32 %v9052_v59, %v7206_v2  ;;  %v8970_v7 = vsel %vm4361_vm13, 1.0, %v16541_v4  ;;  %v7264_v14 = vadd.f32 %v9089_v6, %v7263_v1  ;;  %v17203_v8 = vld [vmem:[#allocation109_spill] sm:$0xff] }
 0x6aa   :  { %v15538_v15 = vpop.permute.xlu0 %2667  ;;  %v3606_v52 = vpop.permute.xlu1 %3605  ;;  %vm4313_vm9 = vcmp.eq.s32.totalorder %v15235_v10, %v9821_v11  ;;  %v8852_v57 = vsel %vm4243_vm12, 1.0, %v16541_v4  ;;  %vm4363_vm2 = vcmp.eq.s32.totalorder %v15325_v33, %v9821_v11  ;;  %v8921_v9 = vsel %vm4312_vm14, 1.0, %v16541_v4 }
 0x6ab   :  { %vm4481_vm1 = vcmp.eq.s32.totalorder %v3606_v52, %v9821_v11  ;;  %v6906_v51 = vadd.f32 %v8851_v37, %v6905_v56  ;;  %v8971_v62 = vsel %vm4362_vm11, 1.0, %v16541_v4  ;;  %v7010_v60 = vadd.f32 %v8920_v32, %v17200_v34 }
 0x6ac   :  { %v9090_v26 = vsel %vm4481_vm1, 1.0, %v16541_v4  ;;  %v8960_v10 = vsel %vm4351_vm4, 1.0, %v16541_v4  ;;  %v7085_v42 = vadd.f32 %v8970_v7, %v17201_v48  ;;  %vm4352_vm10 = vcmp.eq.s32.totalorder %v17202_v47, %v9821_v11  ;;  %v17207_v48 = vld [vmem:[#allocation85_spill] sm:$0xff] }
 0x6ad   :  { %v15564_v17 = vadd.f32 %v9090_v26, %v7264_v14  ;;  %v8922_v45 = vsel %vm4313_vm9, 1.0, %v16541_v4  ;;  %v6907_v12 = vadd.f32 %v8852_v57, %v6906_v51  ;;  %v8972_v54 = vsel %vm4363_vm2, 1.0, %v16541_v4 }
 0x6ae   :  { %v15566_v61 = vpop.permute.xlu0 %2968  ;;  %v2586_v33 = vpop.permute.xlu1 %2585  ;;  %v7011_v23 = vadd.f32 %v8921_v9, %v7010_v60  ;;  %v7086_v16 = vadd.f32 %v8971_v62, %v7085_v42  ;;  %vm4353_vm3 = vcmp.eq.s32.totalorder %v15264_v55, %v9821_v11  ;;  %vm4248_vm13 = vcmp.eq.s32.totalorder %v17203_v8, %v9821_v11 }
 0x6af   :  { %vm4244_vm8 = vcmp.eq.s32.totalorder %v2586_v33, %v9821_v11  ;;  %vm4249_vm12 = vcmp.eq.s32.totalorder %v17204_v63, %v9821_v11  ;;  %v8961_v5 = vsel %vm4352_vm10, 1.0, %v16541_v4  ;;  %v7070_v6 = vadd.f32 %v8960_v10, %v17205_v21  ;;  %v17208_v63 = vld [vmem:[#allocation23_spill] sm:$0xff] }
 0x6b0   :  { %v8853_v24 = vsel %vm4244_vm8, 1.0, %v16541_v4  ;;  %v7012_v59 = vadd.f32 %v8922_v45, %v7011_v23  ;;  %v7087_v32 = vadd.f32 %v8972_v54, %v7086_v16  ;;  %v8962_v55 = vsel %vm4353_vm3, 1.0, %v16541_v4 }
 0x6b1   :  { %v6908_v2 = vadd.f32 %v8853_v24, %v6907_v12  ;;  %v15593_v3 = vsel %vm4257_vm15, 1.0, %v16541_v4  ;;  %v7071_v37 = vadd.f32 %v8961_v5, %v7070_v6  ;;  %v8857_v36 = vsel %vm4248_vm13, 1.0, %v16541_v4 }
 0x6b2   :  { %v3102_v41 = vpop.permute.xlu0 %3101  ;;  %v2887_v1 = vpop.permute.xlu1 %2886  ;;  %v8858_v7 = vsel %vm4249_vm12, 1.0, %v16541_v4  ;;  %vm4250_vm15 = vcmp.eq.s32.totalorder %v17206_v49, %v9821_v11  ;;  %v6917_v42 = vadd.f32 %v8857_v36, %v17207_v48  ;;  %vm4251_vm9 = vcmp.eq.s32.totalorder %v17208_v63, %v9821_v11  ;;  %v17209_v36 = vld [vmem:[#allocation5_spill] sm:$0xff]  ;;  %v17211_v48 = vld [vmem:[#allocation102_spill] sm:$0xff] }
 0x6b3   :  { %vm4364_vm14 = vcmp.eq.s32.totalorder %v3102_v41, %v9821_v11  ;;  %v6909_v30 = vrot.slane %v6908_v2, 4  ;;  %vm4314_vm11 = vcmp.eq.s32.totalorder %v2887_v1, %v9821_v11  ;;  %v7072_v9 = vadd.f32 %v8962_v55, %v7071_v37 }
 0x6b4   :  { %v8973_v56 = vsel %vm4364_vm14, 1.0, %v16541_v4  ;;  %v8923_v52 = vsel %vm4314_vm11, 1.0, %v16541_v4  ;;  %v8859_v12 = vsel %vm4250_vm15, 1.0, %v16541_v4  ;;  %v6918_v8 = vadd.f32 %v8858_v7, %v6917_v42 }
 0x6b5   :  { %v7088_v22 = vadd.f32 %v8973_v56, %v7087_v32  ;;  %v6910_v14 = vadd.f32 %v6909_v30, %v6908_v2  ;;  %v7013_v57 = vadd.f32 %v8923_v52, %v7012_v59  ;;  %v8860_v52 = vsel %vm4251_vm9, 1.0, %v16541_v4 }
 0x6b6   :  { %v3266_v26 = vpop.permute.xlu0 %3265  ;;  %v3059_v62 = vpop.permute.xlu1 %3058  ;;  %v6919_v59 = vadd.f32 %v8859_v12, %v6918_v8  ;;  %vm4252_vm8 = vcmp.eq.s32.totalorder %v17209_v36, %v9821_v11  ;;  %vm4253_vm12 = vcmp.eq.s32.totalorder %v15412_v50, %v9821_v11  ;;  %vm17210_vm14 = vcmask 1045509   ;;  %v17212_v12 = vld [vmem:[#allocation125_spill] sm:$0xff] }
 0x6b7   :  { %v7089_v51 = vrot.slane %v7088_v22, 4  ;;  %vm4402_vm4 = vcmp.eq.s32.totalorder %v3266_v26, %v9821_v11  ;;  %v6911_v34 = vrot.slane %v6910_v14, 2  ;;  %v7014_v60 = vrot.slane %v7013_v57, 4 }
 0x6b8   :  { %v9011_v10 = vsel %vm4402_vm4, 1.0, %v16541_v4  ;;  %vm4354_vm1 = vcmp.eq.s32.totalorder %v3059_v62, %v9821_v11  ;;  %vm4327_vm11 = vcmp.eq.s32.totalorder %v17211_v48, %v9821_v11  ;;  %v6920_v42 = vadd.f32 %v8860_v52, %v6919_v59 }
 0x6b9   :  { %v7090_v47 = vadd.f32 %v7089_v51, %v7088_v22  ;;  %v15611_v33 = vadd.f32 %v9011_v10, %v15367_v43  ;;  %v8963_v45 = vsel %vm4354_vm1, 1.0, %v16541_v4  ;;  %v6912_v54 = vadd.f32 %v6911_v34, %v6910_v14 }
 0x6ba   :  { %v7015_v23 = vadd.f32 %v7014_v60, %v7013_v57  ;;  %v7073_v16 = vadd.f32 %v8963_v45, %v7072_v9  ;;  %v3485_v24 = vpop.permute.xlu0 %3484  ;;  %v3184_v2 = vpop.permute.xlu1 %3183  ;;  %vm4258_vm1 = vcmp.eq.s32.totalorder %v17212_v12, %v9821_v11 }
 0x6bb   :  { %v7091_v5 = vrot.slane %v7090_v47, 2  ;;  %vm4453_vm2 = vcmp.eq.s32.totalorder %v3485_v24, %v9821_v11  ;;  %v6913_v41 = vrot.slane %v6912_v54, 1  ;;  %vm4383_vm10 = vcmp.eq.s32.totalorder %v3184_v2, %v9821_v11 }
 0x6bc   :  { %v7016_v21 = vrot.slane %v7015_v23, 2  ;;  %v7074_v43 = vrot.slane %v7073_v16, 4  ;;  %v9062_v6 = vsel %vm4453_vm2, 1.0, %v16541_v4  ;;  %v8992_v37 = vsel %vm4383_vm10, 1.0, %v16541_v4 }
 0x6bd   :  { %v7092_v32 = vadd.f32 %v7091_v5, %v7090_v47  ;;  %v15620_v1 = vadd.f32 %v9062_v6, %v15390_v39  ;;  %v6914_v55 = vadd.f32 %v6913_v41, %v6912_v54  ;;  %v15631_v7 = vadd.f32 %v8992_v37, %v15305_v35  ;;  %v17213_v41 = vld [vmem:[#allocation152_spill] sm:$0xff] }
 0x6be   :  { %v7017_v30 = vadd.f32 %v7016_v21, %v7015_v23  ;;  %v7075_v56 = vadd.f32 %v7074_v43, %v7073_v16  ;;  %v3649_v22 = vpop.permute.xlu0 %3648  ;;  %v3348_v39 = vpop.permute.xlu1 %3347  ;;  %v8862_v54 = vsel %vm4253_vm12, 1.0, %v16541_v4  ;;  %v8936_v2 = vsel %vm4327_vm11, 1.0, %v16541_v4  ;;  %v17215_v37 = vld [vmem:[#allocation12_spill] sm:$0xff] }
 0x6bf   :  { %vm4491_vm3 = vcmp.eq.s32.totalorder %v3649_v22, %v9821_v11  ;;  %vm4421_vm13 = vcmp.eq.s32.totalorder %v3348_v39, %v9821_v11  ;;  %v15644_v35 = vsel %vm17210_vm14, %v6914_v55, %v15456_v29  ;;  %v7093_v51 = vrot.slane %v7092_v32, 1  ;;  %v17216_v22 = vld [vmem:[#allocation17_spill] sm:$0xff] }
 0x6c0   :  { %v7018_v14 = vrot.slane %v7017_v30, 1  ;;  %v7076_v57 = vrot.slane %v7075_v56, 2  ;;  %v9100_v26 = vsel %vm4491_vm3, 1.0, %v16541_v4  ;;  %v9030_v9 = vsel %vm4421_vm13, 1.0, %v16541_v4 }
 0x6c1   :  { %v15639_v49 = vadd.f32 %v9100_v26, %v15407_v20  ;;  %v15647_v60 = vadd.f32 %v9030_v9, %v15341_v27  ;;  %v8861_v20 = vsel %vm4252_vm8, 1.0, %v16541_v4  ;;  %v7094_v8 = vadd.f32 %v7093_v51, %v7092_v32  ;;  %v17218_v26 = vld [vmem:[#allocation32_spill] sm:$0xff] }
 0x6c2   :  { %v7019_v62 = vadd.f32 %v7018_v14, %v7017_v30  ;;  %v7077_v34 = vadd.f32 %v7076_v57, %v7075_v56  ;;  %v2930_v10 = vpop.permute.xlu0 %2929  ;;  %v3567_v29 = vpop.permute.xlu1 %3566  ;;  %v6921_v24 = vadd.f32 %v8861_v20, %v6920_v42  ;;  %vm4259_vm9 = vcmp.eq.s32.totalorder %v17213_v41, %v9821_v11  ;;  %v17214_v30 = vld [vmem:[#allocation28_spill] sm:$0xff] }
 0x6c3   :  { %vm4324_vm15 = vcmp.eq.s32.totalorder %v2930_v10, %v9821_v11  ;;  %vm4472_vm4 = vcmp.eq.s32.totalorder %v3567_v29, %v9821_v11  ;;  %v8867_v6 = vsel %vm4258_vm1, 1.0, %v16541_v4  ;;  %v6931_v56 = vadd.f32 %v15593_v3, %v17214_v30  ;;  %v17219_v10 = vld [vmem:[#allocation8_spill] sm:$0xff] }
 0x6c4   :  { %v7078_v47 = vrot.slane %v7077_v34, 1  ;;  %v8933_v45 = vsel %vm4324_vm15, 1.0, %v16541_v4  ;;  %v15660_v27 = vsel %vm7407_vm7, %v7019_v62, %v15490_v0  ;;  %v9081_v16 = vsel %vm4472_vm4, 1.0, %v16541_v4 }
 0x6c5   :  { %v7028_v23 = vadd.f32 %v8933_v45, %v15451_v40  ;;  %v15671_v5 = vadd.f32 %v9081_v16, %v15360_v19  ;;  %v6922_v21 = vadd.f32 %v8862_v54, %v6921_v24  ;;  %vm4328_vm8 = vcmp.eq.s32.totalorder %v17215_v37, %v9821_v11 }
 0x6c6   :  { %v7079_v63 = vadd.f32 %v7078_v47, %v7077_v34  ;;  %v3145_v0 = vpop.permute.xlu0 %3144  ;;  %v2629_v40 = vpop.permute.xlu1 %2628  ;;  %vm4260_vm3 = vcmp.eq.s32.totalorder %v17216_v22, %v9821_v11  ;;  %v8868_v39 = vsel %vm4259_vm9, 1.0, %v16541_v4  ;;  %v7036_v9 = vadd.f32 %v8936_v2, %v17218_v26 }
 0x6c7   :  { %v7029_v50 = vrot.slane %v7028_v23, 4  ;;  %vm4374_vm2 = vcmp.eq.s32.totalorder %v3145_v0, %v9821_v11  ;;  %vm4254_vm10 = vcmp.eq.s32.totalorder %v2629_v40, %v9821_v11  ;;  %v6932_v51 = vadd.f32 %v8867_v6, %v6931_v56  ;;  %v17220_v40 = vld [vmem:[#allocation25_spill] sm:$0xff] }
 0x6c8   :  { %v15681_v43 = vsel %vm7401_vm0, %v7094_v8, %v7079_v63  ;;  %v8983_v19 = vsel %vm4374_vm2, 1.0, %v16541_v4  ;;  %v8863_v55 = vsel %vm4254_vm10, 1.0, %v16541_v4  ;;  %v8869_v34 = vsel %vm4260_vm3, 1.0, %v16541_v4 }
 0x6c9   :  { %v7030_v59 = vadd.f32 %v7029_v50, %v7028_v23  ;;  %v7103_v32 = vadd.f32 %v8983_v19, %v15483_v13  ;;  %v6923_v52 = vadd.f32 %v8863_v55, %v6922_v21  ;;  %v17217_v13 = vld [vmem:[#allocation159_spill] sm:$0xff]  ;;  %vm4261_vm12 = vcmp.eq.s32.totalorder %v17219_v10, %v9821_v11 }
 0x6ca   :  { %v15697_v36 = vpop.permute.xlu0 %3308  ;;  %vm4329_vm13 = vcmp.eq.s32.totalorder %v17217_v13, %v9821_v11  ;;  %v15705_v3 = vpop.permute.xlu1 %3011  ;;  %v8937_v20 = vsel %vm4328_vm8, 1.0, %v16541_v4  ;;  %v6933_v29 = vadd.f32 %v8868_v39, %v6932_v51  ;;  %vm4262_vm14 = vcmp.eq.s32.totalorder %v15208_v53, %v9821_v11 }
 0x6cb   :  { %v7031_v14 = vrot.slane %v7030_v59, 2  ;;  %v7104_v57 = vrot.slane %v7103_v32, 4  ;;  %v6924_v62 = vrot.slane %v6923_v52, 4  ;;  %v8938_v47 = vsel %vm4329_vm13, 1.0, %v16541_v4 }
 0x6cc   :  { %v6934_v24 = vadd.f32 %v8869_v34, %v6933_v29  ;;  %v8870_v8 = vsel %vm4261_vm12, 1.0, %v16541_v4  ;;  %vm4263_vm15 = vcmp.eq.s32.totalorder %v15538_v15, %v9821_v11  ;;  %v7037_v53 = vadd.f32 %v8937_v20, %v7036_v9 }
 0x6cd   :  { %v7032_v48 = vadd.f32 %v7031_v14, %v7030_v59  ;;  %v7105_v42 = vadd.f32 %v7104_v57, %v7103_v32  ;;  %v6925_v45 = vadd.f32 %v6924_v62, %v6923_v52  ;;  %vm4330_vm4 = vcmp.eq.s32.totalorder %v17220_v40, %v9821_v11  ;;  %v17222_v57 = vld [vmem:[#allocation9_spill] sm:$0xff] }
 0x6ce   :  { %v3446_v12 = vpop.permute.xlu0 %3445  ;;  %v15719_v16 = vpop.permute.xlu1 %3226  ;;  %v8871_v21 = vsel %vm4262_vm14, 1.0, %v16541_v4  ;;  %v6935_v59 = vadd.f32 %v8870_v8, %v6934_v24  ;;  %vm17221_vm1 = vcmask 1045509   ;;  %v7038_v56 = vadd.f32 %v8938_v47, %v7037_v53 }
 0x6cf   :  { %v7033_v54 = vrot.slane %v7032_v48, 1  ;;  %v7106_v23 = vrot.slane %v7105_v42, 2  ;;  %vm4444_vm11 = vcmp.eq.s32.totalorder %v3446_v12, %v9821_v11  ;;  %v6926_v63 = vrot.slane %v6925_v45, 2 }
 0x6d0   :  { %v9053_v0 = vsel %vm4444_vm11, 1.0, %v16541_v4  ;;  %v6936_v22 = vadd.f32 %v8871_v21, %v6935_v59  ;;  %v8939_v14 = vsel %vm4330_vm4, 1.0, %v16541_v4  ;;  %vm4331_vm2 = vcmp.eq.s32.totalorder %v17222_v57, %v9821_v11 }
 0x6d1   :  { %v7034_v2 = vadd.f32 %v7033_v54, %v7032_v48  ;;  %v7107_v41 = vadd.f32 %v7106_v23, %v7105_v42  ;;  %v7208_v50 = vadd.f32 %v9053_v0, %v15536_v31  ;;  %v6927_v19 = vadd.f32 %v6926_v63, %v6925_v45 }
 0x6d2   :  { %v15729_v6 = vpop.permute.xlu0 %3609  ;;  %v3403_v30 = vpop.permute.xlu1 %3402  ;;  %v8872_v31 = vsel %vm4263_vm15, 1.0, %v16541_v4  ;;  %vm4332_vm8 = vcmp.eq.s32.totalorder %v15288_v25, %v9821_v11  ;;  %vm17223_vm3 = vcmask 1046534   ;;  %v8940_v20 = vsel %vm4331_vm2, 1.0, %v16541_v4 }
 0x6d3   :  { %v7108_v32 = vrot.slane %v7107_v41, 1  ;;  %v7209_v55 = vrot.slane %v7208_v50, 4  ;;  %v15733_v15 = vsel %vm17221_vm1, %v7034_v2, %v15660_v27  ;;  %v6928_v37 = vrot.slane %v6927_v19, 1 }
 0x6d4   :  { %vm4434_vm9 = vcmp.eq.s32.totalorder %v3403_v30, %v9821_v11  ;;  %v6937_v51 = vadd.f32 %v8872_v31, %v6936_v22  ;;  %v7039_v47 = vadd.f32 %v8939_v14, %v7038_v56  ;;  %vm4333_vm13 = vcmp.eq.s32.totalorder %v15566_v61, %v9821_v11 }
 0x6d5   :  { %v7109_v52 = vadd.f32 %v7108_v32, %v7107_v41  ;;  %v7210_v39 = vadd.f32 %v7209_v55, %v7208_v50  ;;  %v9043_v13 = vsel %vm4434_vm9, 1.0, %v16541_v4  ;;  %v6929_v9 = vadd.f32 %v6928_v37, %v6927_v19 }
 0x6d6   :  { %v7193_v27 = vadd.f32 %v9043_v13, %v15470_v18  ;;  %v2672_v26 = vpop.permute.xlu0 %2671  ;;  %v15746_v34 = vpop.permute.xlu1 %3527  ;;  %v8941_v54 = vsel %vm4332_vm8, 1.0, %v16541_v4  ;;  %v7040_v24 = vadd.f32 %v8940_v20, %v7039_v47  ;;  %v8942_v63 = vsel %vm4333_vm13, 1.0, %v16541_v4 }
 0x6d7   :  { %v7211_v62 = vrot.slane %v7210_v39, 2  ;;  %vm4264_vm10 = vcmp.eq.s32.totalorder %v2672_v26, %v9821_v11  ;;  %v15750_v10 = vsel %vm7403_vm5, %v7109_v52, %v15681_v43  ;;  %v7455_v18 = vsel %vm17223_vm3, %v6929_v9, %v15644_v35 }
 0x6d8   :  { %v7194_v48 = vrot.slane %v7193_v27, 4  ;;  %v8873_v42 = vsel %vm4264_vm10, 1.0, %v16541_v4  ;;  %v7041_v61 = vadd.f32 %v8941_v54, %v7040_v24  ;;  %vm4343_vm11 = vcmp.eq.s32.totalorder %v15705_v3, %v9821_v11 }
 0x6d9   :  { %v6938_v29 = vadd.f32 %v8873_v42, %v6937_v51  ;;  %v7212_v45 = vadd.f32 %v7211_v62, %v7210_v39  ;;  %v8952_v14 = vsel %vm4343_vm11, 1.0, %v16541_v4  ;;  %vm17224_vm4 = vcmask 1047559  }
 0x6da   :  { %v7195_v12 = vadd.f32 %v7194_v48, %v7193_v27  ;;  %v3188_v43 = vpop.permute.xlu0 %3187  ;;  %v15762_v25 = vpop.permute.xlu1 %3691  ;;  %v7042_v59 = vadd.f32 %v8942_v63, %v7041_v61  ;;  %v7057_v62 = vadd.f32 %v8952_v14, %v15423_v44  ;;  %vm4393_vm1 = vcmp.eq.s32.totalorder %v15719_v16, %v9821_v11 }
 0x6db   :  { %v6939_v23 = vrot.slane %v6938_v29, 4  ;;  %vm4384_vm12 = vcmp.eq.s32.totalorder %v3188_v43, %v9821_v11  ;;  %v7213_v41 = vrot.slane %v7212_v45, 1  ;;  %vm4412_vm9 = vcmp.eq.s32.totalorder %v15697_v36, %v9821_v11 }
 0x6dc   :  { %v7196_v8 = vrot.slane %v7195_v12, 2  ;;  %v8993_v35 = vsel %vm4384_vm12, 1.0, %v16541_v4  ;;  %v9002_v16 = vsel %vm4393_vm1, 1.0, %v16541_v4  ;;  %vm4463_vm2 = vcmp.eq.s32.totalorder %v15746_v34, %v9821_v11 }
 0x6dd   :  { %v6940_v0 = vadd.f32 %v6939_v23, %v6938_v29  ;;  %v7118_v2 = vadd.f32 %v8993_v35, %v15631_v7  ;;  %v7214_v7 = vadd.f32 %v7213_v41, %v7212_v45  ;;  %vm4482_vm8 = vcmp.eq.s32.totalorder %v15729_v6, %v9821_v11 }
 0x6de   :  { %v7197_v50 = vadd.f32 %v7196_v8, %v7195_v12  ;;  %v15767_v53 = vpop.permute.xlu0 %3351  ;;  %v2973_v19 = vpop.permute.xlu1 %2972  ;;  %v7132_v61 = vadd.f32 %v9002_v16, %v15444_v28  ;;  %v9072_v41 = vsel %vm4463_vm2, 1.0, %v16541_v4  ;;  %vm17225_vm12 = vcmask 1046534  }
 0x6df   :  { %v6941_v40 = vrot.slane %v6940_v0, 2  ;;  %v7119_v21 = vrot.slane %v7118_v2, 4  ;;  %vm4334_vm14 = vcmp.eq.s32.totalorder %v2973_v19, %v9821_v11  ;;  %vm4501_vm1 = vcmp.eq.s32.totalorder %v15762_v25, %v9821_v11 }
 0x6e0   :  { %v7198_v32 = vrot.slane %v7197_v50, 1  ;;  %v8943_v56 = vsel %vm4334_vm14, 1.0, %v16541_v4 }
 0x6e1   :  { %v6942_v55 = vadd.f32 %v6941_v40, %v6940_v0  ;;  %v7120_v30 = vadd.f32 %v7119_v21, %v7118_v2  ;;  %v7043_v37 = vadd.f32 %v8943_v56, %v7042_v59  ;;  %v9021_v0 = vsel %vm4412_vm9, 1.0, %v16541_v4 }
 0x6e2   :  { %v7199_v31 = vadd.f32 %v7198_v32, %v7197_v50  ;;  %v3571_v22 = vpop.permute.xlu0 %3570  ;;  %v3270_v39 = vpop.permute.xlu1 %3269  ;;  %v7161_v19 = vadd.f32 %v9021_v0, %v15506_v46  ;;  %v9091_v59 = vsel %vm4482_vm8, 1.0, %v16541_v4  ;;  %vm4422_vm9 = vcmp.eq.s32.totalorder %v15767_v53, %v9821_v11 }
 0x6e3   :  { %v7121_v52 = vrot.slane %v7120_v30, 2  ;;  %v6943_v13 = vrot.slane %v6942_v55, 1  ;;  %v7044_v27 = vrot.slane %v7043_v37, 4  ;;  %vm4403_vm10 = vcmp.eq.s32.totalorder %v3270_v39, %v9821_v11 }
 0x6e4   :  { %v15775_v57 = vsel %vm7401_vm0, %v7214_v7, %v7199_v31  ;;  %vm4473_vm3 = vcmp.eq.s32.totalorder %v3571_v22, %v9821_v11  ;;  %v9012_v40 = vsel %vm4403_vm10, 1.0, %v16541_v4 }
 0x6e5   :  { %v7122_v26 = vadd.f32 %v7121_v52, %v7120_v30  ;;  %v6944_v9 = vadd.f32 %v6943_v13, %v6942_v55  ;;  %v7045_v3 = vadd.f32 %v7044_v27, %v7043_v37  ;;  %v7237_v55 = vadd.f32 %v9072_v41, %v15498_v38 }
 0x6e6   :  { %v3016_v51 = vpop.permute.xlu0 %3015  ;;  %v3489_v20 = vpop.permute.xlu1 %3488  ;;  %v9082_v30 = vsel %vm4473_vm3, 1.0, %v16541_v4  ;;  %v7147_v37 = vadd.f32 %v9012_v40, %v15611_v33  ;;  %v7266_v38 = vadd.f32 %v9091_v59, %v15564_v17 }
 0x6e7   :  { %v7123_v48 = vrot.slane %v7122_v26, 1  ;;  %vm4344_vm15 = vcmp.eq.s32.totalorder %v3016_v51, %v9821_v11  ;;  %v7456_v42 = vsel %vm17224_vm4, %v6944_v9, %v7455_v18  ;;  %v7046_v29 = vrot.slane %v7045_v3, 2 }
 0x6e8   :  { %v8953_v47 = vsel %vm4344_vm15, 1.0, %v16541_v4  ;;  %9358 = vmatprep.mubr.f32.mxu0 %v7456_v42  ;;  %vm4454_vm0 = vcmp.eq.s32.totalorder %v3489_v20, %v9821_v11  ;;  %v7252_v33 = vadd.f32 %v9082_v30, %v15671_v5 }
 0x6e9   :  { %v7124_v45 = vadd.f32 %v7123_v48, %v7122_v26  ;;  %v7058_v12 = vadd.f32 %v8953_v47, %v7057_v62  ;;  %v9063_v43 = vsel %vm4454_vm0, 1.0, %v16541_v4  ;;  %v7047_v44 = vadd.f32 %v7046_v29, %v7045_v3 }
 0x6ea   :  { %v7223_v54 = vadd.f32 %v9063_v43, %v15620_v1  ;;  %v3313_v23 = vpop.permute.xlu0 %3312  ;;  %v15788_v24 = vpop.permute.xlu1 %3652  ;;  %vm17226_vm0 = vcmask 1047559  }
 0x6eb   :  { %v7059_v18 = vrot.slane %v7058_v12, 4  ;;  %v15792_v8 = vsel %vm7405_vm6, %v7124_v45, %v15750_v10  ;;  %v7048_v35 = vrot.slane %v7047_v44, 1  ;;  %vm4413_vm14 = vcmp.eq.s32.totalorder %v3313_v23, %v9821_v11 }
 0x6ec   :  { %v7224_v63 = vrot.slane %v7223_v54, 4  ;;  %v9022_v62 = vsel %vm4413_vm14, 1.0, %v16541_v4  ;;  %vm4492_vm2 = vcmp.eq.s32.totalorder %v15788_v24, %v9821_v11 }
 0x6ed   :  { %v7060_v1 = vadd.f32 %v7059_v18, %v7058_v12  ;;  %v7049_v10 = vadd.f32 %v7048_v35, %v7047_v44  ;;  %v7162_v43 = vadd.f32 %v9022_v62, %v7161_v19  ;;  %v9101_v0 = vsel %vm4492_vm2, 1.0, %v16541_v4 }
 0x6ee   :  { %v7225_v36 = vadd.f32 %v7224_v63, %v7223_v54  ;;  %v15801_v2 = vpop.permute.xlu0 %3613  ;;  %v3231_v50 = vpop.permute.xlu1 %3230  ;;  %v7281_v59 = vadd.f32 %v9101_v0, %v15639_v49 }
 0x6ef   :  { %v7061_v34 = vrot.slane %v7060_v1, 2  ;;  %vm4394_vm13 = vcmp.eq.s32.totalorder %v3231_v50, %v9821_v11  ;;  %v7462_v6 = vsel %vm17225_vm12, %v7049_v10, %v15733_v15  ;;  %vm4483_vm10 = vcmp.eq.s32.totalorder %v15801_v2, %v9821_v11 }
 0x6f0   :  { %v7226_v21 = vrot.slane %v7225_v36, 2  ;;  %v9003_v28 = vsel %vm4394_vm13, 1.0, %v16541_v4  ;;  %v9031_v2 = vsel %vm4422_vm9, 1.0, %v16541_v4  ;;  %v9092_v41 = vsel %vm4483_vm10, 1.0, %v16541_v4 }
 0x6f1   :  { %v7062_v32 = vadd.f32 %v7061_v34, %v7060_v1  ;;  %v7133_v7 = vadd.f32 %v9003_v28, %v7132_v61  ;;  %v7267_v28 = vadd.f32 %v9092_v41, %v7266_v38  ;;  %vm17231_vm9 = vcmask 1047559  }
 0x6f2   :  { %v7227_v56 = vadd.f32 %v7226_v21, %v7225_v36  ;;  %v3274_v31 = vpop.permute.xlu0 %3273  ;;  %v3532_v15 = vpop.permute.xlu1 %3531  ;;  %vm17232_vm2 = vmmov %vm17231_vm9  ;;  %vm17233_vm10 = vmmov 0  }
 0x6f3   :  { %vm4404_vm11 = vcmp.eq.s32.totalorder %v3274_v31, %v9821_v11  ;;  %v7063_v46 = vrot.slane %v7062_v32, 1  ;;  %v7134_v52 = vrot.slane %v7133_v7, 4  ;;  %vm4464_vm15 = vcmp.eq.s32.totalorder %v3532_v15, %v9821_v11 }
 0x6f4   :  { %v7228_v22 = vrot.slane %v7227_v56, 1  ;;  %v9013_v39 = vsel %vm4404_vm11, 1.0, %v16541_v4  ;;  %v9073_v14 = vsel %vm4464_vm15, 1.0, %v16541_v4  ;;  %vm17227_vm11 = vcmask 1045509  }
 0x6f5   :  { %v7148_v13 = vadd.f32 %v9013_v39, %v7147_v37  ;;  %v7064_v27 = vadd.f32 %v7063_v46, %v7062_v32  ;;  %v7135_v9 = vadd.f32 %v7134_v52, %v7133_v7  ;;  %v7238_v3 = vadd.f32 %v9073_v14, %v7237_v55 }
 0x6f6   :  { %v7229_v26 = vadd.f32 %v7228_v22, %v7227_v56  ;;  %v3575_v51 = vpop.permute.xlu0 %3574  ;;  %v15828_v17 = vpop.permute.xlu1 %3695 }
 0x6f7   :  { %v7149_v48 = vrot.slane %v7148_v13, 4  ;;  %vm4474_vm4 = vcmp.eq.s32.totalorder %v3575_v51, %v9821_v11  ;;  %v7463_v42 = vsel %vm17226_vm0, %v7064_v27, %v7462_v6  ;;  %v7136_v20 = vrot.slane %v7135_v9, 2  ;;  %vm17229_vm0 = vmmov %vm17227_vm11 }
 0x6f8   :  { %v7239_v5 = vrot.slane %v7238_v3, 4  ;;  %v9083_v29 = vsel %vm4474_vm4, 1.0, %v16541_v4  ;;  %9359 = vmatmul.mubr.f32.gmra.mrb[6].mxu0 %v7463_v42  ;;  %v7472_v12 = vsel %vm7403_vm5, %v7229_v26, %v15775_v57  ;;  %v9110_v57 = vsel %vm4501_vm1, 1.0, %v16541_v4 }
 0x6f9   :  { %v7150_v47 = vadd.f32 %v7149_v48, %v7148_v13  ;;  %v7253_v45 = vadd.f32 %v9083_v29, %v7252_v33  ;;  %v7137_v44 = vadd.f32 %v7136_v20, %v7135_v9  ;;  %vm4502_vm13 = vcmp.eq.s32.totalorder %v15828_v17, %v9821_v11 }
 0x6fa   :  { %v7240_v54 = vadd.f32 %v7239_v5, %v7238_v3  ;;  %v3317_v23 = vpop.permute.xlu0 %3316  ;;  %v3356_v35 = vpop.permute.xlu1 %3355  ;;  %v7176_v26 = vadd.f32 %v9031_v2, %v15647_v60  ;;  %v9111_v3 = vsel %vm4502_vm13, 1.0, %v16541_v4  ;;  %v7295_v20 = vadd.f32 %v9110_v57, %v15524_v58 }
 0x6fb   :  { %v7151_v18 = vrot.slane %v7150_v47, 2  ;;  %v7254_v16 = vrot.slane %v7253_v45, 4  ;;  %vm4414_vm8 = vcmp.eq.s32.totalorder %v3317_v23, %v9821_v11  ;;  %v7138_v63 = vrot.slane %v7137_v44, 1 }
 0x6fc   :  { %v7241_v1 = vrot.slane %v7240_v54, 2  ;;  %v9023_v24 = vsel %vm4414_vm8, 1.0, %v16541_v4  ;;  %vm4423_vm5 = vcmp.eq.s32.totalorder %v3356_v35, %v9821_v11  ;;  %vm17228_vm4 = vcmask 1046534  }
 0x6fd   :  { %v7152_v36 = vadd.f32 %v7151_v18, %v7150_v47  ;;  %v7255_v10 = vadd.f32 %v7254_v16, %v7253_v45  ;;  %v7163_v61 = vadd.f32 %v9023_v24, %v7162_v43  ;;  %v7139_v34 = vadd.f32 %v7138_v63, %v7137_v44  ;;  %vm17230_vm1 = vmmov %vm17228_vm4 }
 0x6fe   :  { %v7242_v50 = vadd.f32 %v7241_v1, %v7240_v54  ;;  %v3700_v25 = vpop.permute.xlu0 %3699  ;;  %v3657_v19 = vpop.permute.xlu1 %3656  ;;  %v9032_v31 = vsel %vm4423_vm5, 1.0, %v16541_v4  ;;  %v7296_v43 = vadd.f32 %v9111_v3, %v7295_v20  ;;  %v9131_v20 = vld [vmem:[%s16360_s4 + $0xf8] sm:$0xff] }
 0x6ff   :  { %v7153_v40 = vrot.slane %v7152_v36, 1  ;;  %v7256_v21 = vrot.slane %v7255_v10, 2  ;;  %v7164_v6 = vrot.slane %v7163_v61, 4  ;;  %vm4493_vm3 = vcmp.eq.s32.totalorder %v3657_v19, %v9821_v11 }
 0x700   :  { %v7243_v32 = vrot.slane %v7242_v50, 1  ;;  %v7467_v53 = vsel %vm7407_vm7, %v7139_v34, %v15792_v8  ;;  %v9102_v37 = vsel %vm4493_vm3, 1.0, %v16541_v4  ;;  %vm4503_vm15 = vcmp.eq.s32.totalorder %v3700_v25, %v9821_v11 }
 0x701   :  { %v7154_v55 = vadd.f32 %v7153_v40, %v7152_v36  ;;  %v7257_v30 = vadd.f32 %v7256_v21, %v7255_v10  ;;  %v7165_v56 = vadd.f32 %v7164_v6, %v7163_v61  ;;  %v7282_v22 = vadd.f32 %v9102_v37, %v7281_v59 }
 0x702   :  { %v7244_v7 = vadd.f32 %v7243_v32, %v7242_v50  ;;  %v3661_v15 = vpop.permute.xlu0 %3660  ;;  %v3618_v52 = vpop.permute.xlu1 %3617  ;;  %v7177_v5 = vadd.f32 %v9032_v31, %v7176_v26  ;;  %v9112_v60 = vsel %vm4503_vm15, 1.0, %v16541_v4  ;;  %v9118_v31 = vld [vmem:[%s16360_s4 + $0x90] sm:$0xff]  ;;  %vm8271_vm15 = vcmask 785408  }
 0x703   :  { %v7258_v49 = vrot.slane %v7257_v30, 1  ;;  %v7166_v46 = vrot.slane %v7165_v56, 2  ;;  %vm4494_vm12 = vcmp.eq.s32.totalorder %v3661_v15, %v9821_v11  ;;  %vm4484_vm14 = vcmp.eq.s32.totalorder %v3618_v52, %v9821_v11  ;;  %v9119_v15 = vld [vmem:[%s16360_s4 + $0x98] sm:$0xff]  ;;  %v9121_v52 = vld [vmem:[%s16360_s4 + $0xa8] sm:$0xff]  ;;  %v9126_v26 = vld [vmem:[%s16360_s4 + $0xd0] sm:$0xff] }
 0x704   :  { %v9103_v8 = vsel %vm4494_vm12, 1.0, %v16541_v4  ;;  %v7468_v39 = vsel %vm17227_vm11, %v7154_v55, %v7467_v53  ;;  %v7473_v38 = vsel %vm7405_vm6, %v7244_v7, %v7472_v12  ;;  %v9093_v33 = vsel %vm4484_vm14, 1.0, %v16541_v4  ;;  %v9117_v7 = vld [vmem:[%s16360_s4 + $0x88] sm:$0xff] }
 0x705   :  { %v7259_v13 = vadd.f32 %v7258_v49, %v7257_v30  ;;  %v7167_v14 = vadd.f32 %v7166_v46, %v7165_v56  ;;  %v7283_v27 = vadd.f32 %v9103_v8, %v7282_v22  ;;  %v7268_v9 = vadd.f32 %v9093_v33, %v7267_v28  ;;  %v9116_v56 = vld [vmem:[%s16360_s4 + $0x80] sm:$0xff] }
 0x706   :  { %v3360_v48 = vpop.permute.xlu1 %3359  ;;  %v7297_v16 = vadd.f32 %v9112_v60, %v7296_v43  ;;  %v9526_v37 = vpack.c.bf16 %v9117_v7, %v9116_v56  ;;  %v9529_v49 = vpack.c.bf16 %v9119_v15, %v9118_v31  ;;  %v17234_v46 = vmov 0.0|0.0   ;;  %v9120_v22 = vld [vmem:[%s16360_s4 + $0xa0] sm:$0xff] }
 0x707   :  { %v7168_v51 = vrot.slane %v7167_v14, 1  ;;  %v7284_v62 = vrot.slane %v7283_v27, 4  ;;  %v7474_v42 = vsel %vm7407_vm7, %v7259_v13, %v7473_v38  ;;  %v7269_v29 = vrot.slane %v7268_v9, 4  ;;  %v9123_v38 = vld [vmem:[%s16360_s4 + $0xb8] sm:$0xff] }
 0x708   :  { %vm4424_vm6 = vcmp.eq.s32.totalorder %v3360_v48, %v9821_v11  ;;  %9527 = vmatpush3.bf16.msra.mxu1 %v9526_v37  ;;  %v9532_v8 = vpack.c.bf16 %v9121_v52, %v9120_v22  ;;  %vm7839_vm12 = vcmp.lt.s32.totalorder %v9821_v11, 32  ;;  %vm8267_vm14 = vcmask 261120  }
 0x709   :  { %v7285_v47 = vadd.f32 %v7284_v62, %v7283_v27  ;;  %v9033_v45 = vsel %vm4424_vm6, 1.0, %v16541_v4  ;;  %v7169_v12 = vadd.f32 %v7168_v51, %v7167_v14  ;;  %v7270_v17 = vadd.f32 %v7269_v29, %v7268_v9  ;;  %9528 = vmatprep.subr.bf16.mxu1 %v17234_v46  ;;  %v9124_v14 = vld [vmem:[%s16360_s4 + $0xc0] sm:$0xff]  ;;  %v9125_v27 = vld [vmem:[%s16360_s4 + $0xc8] sm:$0xff]  ;;  %v9127_v9 = vld [vmem:[%s16360_s4 + $0xd8] sm:$0xff] }
 0x70a   :  { %v7178_v44 = vadd.f32 %v9033_v45, %v7177_v5  ;;  %v3704_v23 = vpop.permute.xlu1 %3703  ;;  %v9538_v33 = vpack.c.bf16 %v9125_v27, %v9124_v14  ;;  %v9541_v3 = vpack.c.bf16 %v9127_v9, %v9126_v26  ;;  %v9128_v51 = vld [vmem:[%s16360_s4 + $0xe0] sm:$0xff]  ;;  %v9129_v62 = vld [vmem:[%s16360_s4 + $0xe8] sm:$0xff]  ;;  %v17235_v29 = vld [vmem:[#allocation70_spill] sm:$0xff]  ;;  %vm8269_vm11 = vcmask 523264  }
 0x70b   :  { %v7286_v54 = vrot.slane %v7285_v47, 2  ;;  %v7469_v18 = vsel %vm17228_vm4, %v7169_v12, %v7468_v39  ;;  %v7271_v35 = vrot.slane %v7270_v17, 2  ;;  %vm4504_vm7 = vcmp.eq.s32.totalorder %v3704_v23, %v9821_v11  ;;  %v9122_v39 = vld [vmem:[%s16360_s4 + $0xb0] sm:$0xff]  ;;  %v17237_v12 = vld [vmem:[#allocation71_spill] sm:$0xff] }
 0x70c   :  { %v7179_v58 = vrot.slane %v7178_v44, 4  ;;  %v9113_v63 = vsel %vm4504_vm7, 1.0, %v16541_v4  ;;  %9530 = vmatpush3.bf16.msra.mxu1 %v9529_v49  ;;  %v9535_v13 = vpack.c.bf16 %v9123_v38, %v9122_v39  ;;  %v9544_v48 = vpack.c.bf16 %v9129_v62, %v9128_v51  ;;  %v7845_v39 = vld [vmem:[%s16362_s6] sm:$0xff]  ;;  %v7846_v38 = vld [vmem:[%s16362_s6 + $0x8] sm:$0xff]  ;;  %v7848_v27 = vld [vmem:[%s16362_s6 + $0x18] sm:$0xff] }
 0x70d   :  { %v7287_v57 = vadd.f32 %v7286_v54, %v7285_v47  ;;  %v7272_v1 = vadd.f32 %v7271_v35, %v7270_v17  ;;  %v7298_v0 = vadd.f32 %v9113_v63, %v7297_v16  ;;  %9531 = vmatprep.subr.bf16.mxu1 %v17234_v46  ;;  %v176_v60 = vmax.f32 %v17235_v29, 1.0  ;;  %v17236_v47 = vld [vmem:[#allocation72_spill] sm:$0xff]  ;;  %v7850_v51 = vld [vmem:[%s16362_s6 + $0x28] sm:$0xff]  ;;  %v7852_v29 = vld [vmem:[%s16362_s6 + $0x38] sm:$0xff] }
 0x70e   :  { %v7180_v24 = vadd.f32 %v7179_v58, %v7178_v44  ;;  %v178_v45 = vmax.f32 %v17236_v47, 1.0  ;;  %v177_v43 = vmax.f32 %v17237_v12, 1.0  ;;  %v17238_v44 = vld [vmem:[#allocation122_spill] sm:$0xff]  ;;  %v17240_v63 = vld [vmem:[#allocation80_spill] sm:$0xff]  ;;  %v9550_v14 = vpack.c.bf16 %v7846_v38, %v7845_v39  ;;  %v7987_v39 = vld [vmem:[%s16364_s8 + $0x148] sm:$0xff] }
 0x70f   :  { %v7288_v36 = vrot.slane %v7287_v57, 1  ;;  %v7273_v10 = vrot.slane %v7272_v1, 1  ;;  %v7299_v2 = vrot.slane %v7298_v0, 4  ;;  %9690 = vrcp.f32 %v176_v60  ;;  %v7853_v47 = vld [vmem:[%s16362_s6 + $0x40] sm:$0xff] }
 0x710   :  { %v7181_v61 = vrot.slane %v7180_v24, 2  ;;  %9533 = vmatpush3.bf16.msra.mxu1 %v9532_v8  ;;  %9692 = vrcp.f32 %v178_v45  ;;  %vm236_vm5 = vcmp.gt.f32.partialorder %v17240_v63, 0.0  ;;  %9551 = vmatpush3.bf16.msra.mxu0 %v9550_v14  ;;  %v7854_v45 = vld [vmem:[%s16362_s6 + $0x48] sm:$0xff]  ;;  %v7962_v63 = vld [vmem:[%s16364_s8 + $0x80] sm:$0xff]  ;;  %v7988_v14 = vld [vmem:[%s16364_s8 + $0x150] sm:$0xff] }
 0x711   :  { %v7274_v41 = vadd.f32 %v7273_v10, %v7272_v1  ;;  %v7300_v50 = vadd.f32 %v7299_v2, %v7298_v0  ;;  %v7289_v25 = vadd.f32 %v7288_v36, %v7287_v57  ;;  %9534 = vmatprep.subr.bf16.mxu1 %v17234_v46  ;;  %9694 = vrcp.f32 %v177_v43  ;;  %v17239_v57 = vld [vmem:[#allocation79_spill] sm:$0xff]  ;;  %v15952_v1 = vld [vmem:[%s16359_s3] ss:$0 sm:$0xff]  ;;  %v17241_v36 = vld [vmem:[#allocation81_spill] sm:$0xff]  ;;  %9552 = vmatprep.subr.bf16.mxu0 %v17234_v46 }
 0x712   :  { %v7182_v34 = vadd.f32 %v7181_v61, %v7180_v24  ;;  %vm235_vm8 = vcmp.gt.f32.partialorder %v17239_v57, 0.0  ;;  %vm237_vm3 = vcmp.gt.f32.partialorder %v17241_v36, 0.0  ;;  %v9562_v43 = vpack.c.bf16 %v7854_v45, %v7853_v47  ;;  %v7995_v36 = vld [vmem:[%s16364_s8 + $0x188] sm:$0xff]  ;;  %v7993_v47 = vld [vmem:[%s16364_s8 + $0x178] sm:$0xff] }
 0x713   :  { %v7301_v40 = vrot.slane %v7300_v50, 2  ;;  %v7475_v6 = vsel %vm17229_vm0, %v7274_v41, %v7474_v42  ;;  %v9130_v42 = vld [vmem:[%s16360_s4 + $0xf0] sm:$0xff]  ;;  %v8310_v2 = vsel %vm235_vm8, 1.0, %v16541_v4  ;;  %v8311_v41 = vsel %vm236_vm5, 1.0, %v16541_v4 }
 0x714   :  { %v7183_v21 = vrot.slane %v7182_v34, 1  ;;  %v7476_v19 = vsel %vm17230_vm1, %v7289_v25, %v7475_v6  ;;  %9536 = vmatpush3.bf16.msra.mxu1 %v9535_v13  ;;  %v9547_v5 = vpack.c.bf16 %v9131_v20, %v9130_v42  ;;  %v8312_v25 = vsel %vm237_vm3, 1.0, %v16541_v4 }
 0x715   :  { %v7302_v59 = vadd.f32 %v7301_v40, %v7300_v50  ;;  %9537 = vmatprep.subr.bf16.mxu1 %v17234_v46 }
 0x716   :  { %v7184_v32 = vadd.f32 %v7183_v21, %v7182_v34 }
 0x717   :  { %v7303_v28 = vrot.slane %v7302_v59, 1 }
 0x718   :  { %v7470_v53 = vsel %vm17231_vm9, %v7184_v32, %v7469_v18  ;;  %9539 = vmatpush3.bf16.msra.mxu1 %v9538_v33  ;;  %v17243_v32 = vld [vmem:[#allocation74_spill] sm:$0xff] }
 0x719   :  { %9361 = vmatprep.mubr.f32.mxu0 %v7470_v53  ;;  %v7304_v55 = vadd.f32 %v7303_v28, %v7302_v59  ;;  %9540 = vmatprep.subr.bf16.mxu1 %v17234_v46  ;;  %v9691_v17 = vpop.eup %9690  ;;  %v17242_v59 = vld [vmem:[#allocation82_spill] sm:$0xff]  ;;  %v180_v53 = vmax.f32 %v17243_v32, 1.0  ;;  %v17244_v28 = vld [vmem:[#allocation73_spill] sm:$0xff]  ;;  %v7982_v32 = vld [vmem:[%s16364_s8 + $0x120] sm:$0xff] }
 0x71a   :  { %v7608_v54 = vmul.f32 %v9691_v17, %v17238_v44  ;;  %v9693_v23 = vpop.eup %9692  ;;  %vm238_vm13 = vcmp.gt.f32.partialorder %v17242_v59, 0.0  ;;  %v7855_v17 = vld [vmem:[%s16362_s6 + $0x50] sm:$0xff]  ;;  %v7856_v44 = vld [vmem:[%s16362_s6 + $0x58] sm:$0xff]  ;;  %v7999_v59 = vld [vmem:[%s16364_s8 + $0x1a8] sm:$0xff] }
 0x71b   :  { %v7477_v30 = vsel %vm17232_vm2, %v7304_v55, %v7476_v19  ;;  %v9695_v16 = vpop.eup %9694  ;;  %v7734_v19 = vadd.f32 %v8311_v41, %v8310_v2  ;;  %v179_v55 = vmax.f32 %v17244_v28, 1.0  ;;  %v8313_v56 = vsel %vm238_vm13, 1.0, %v16541_v4  ;;  %v7983_v28 = vld [vmem:[%s16364_s8 + $0x128] sm:$0xff] }
 0x71c   :  { %9362 = vmatmul.mubr.f32.gmra.mrb[8].mxu0 %v7477_v30  ;;  %9542 = vmatpush3.bf16.msra.mxu1 %v9541_v3  ;;  %v7625_v24 = vadd.f32 %v15952_v1, %v7608_v54  ;;  %9696 = vrcp.f32 %v180_v53  ;;  %v7849_v3 = vld [vmem:[%s16362_s6 + $0x20] sm:$0xff]  ;;  %v9565_v54 = vpack.c.bf16 %v7856_v44, %v7855_v17  ;;  %v17245_v17 = vld [vmem:[#allocation65_spill] sm:$0xff] }
 0x71d   :  { %9466 = vmatprep.mubr.msk.f32.mxu0 %vm17233_vm10, %v16541_v4  ;;  %9543 = vmatprep.subr.bf16.mxu1 %v17234_v46  ;;  %v7735_v30 = vadd.f32 %v8312_v25, %v7734_v19  ;;  %9698 = vrcp.f32 %v179_v55  ;;  %v7847_v4 = vld [vmem:[%s16362_s6 + $0x10] sm:$0xff]  ;;  %v9556_v42 = vpack.c.bf16 %v7850_v51, %v7849_v3  ;;  %v7998_v19 = vld [vmem:[%s16364_s8 + $0x1a0] sm:$0xff]  ;;  %v9615_v55 = vpack.c.bf16 %v7983_v28, %v7982_v32  ;;  %v8007_v3 = vld [vmem:[%s16364_s8 + $0x1e8] sm:$0xff] }
 0x71e   :  { %v7738_v34 = vmul.f32 %v8310_v2, %v7625_v24  ;;  %v9553_v26 = vpack.c.bf16 %v7848_v27, %v7847_v4  ;;  %v7963_v24 = vld [vmem:[%s16364_s8 + $0x88] sm:$0xff]  ;;  %v9613_v53 = vpack.c.bf16 %v7999_v59, %v7998_v19  ;;  %v8004_v4 = vld [vmem:[%s16364_s8 + $0x1d0] sm:$0xff]  ;;  %v7990_v51 = vld [vmem:[%s16364_s8 + $0x160] sm:$0xff]  ;;  %v171_v44 = vmax.f32 %v17245_v17, 1.0 }
 0x71f   :  { %v7736_v7 = vadd.f32 %v8313_v56, %v7735_v30  ;;  %v7979_v2 = vld [vmem:[%s16364_s8 + $0x108] sm:$0xff]  ;;  %v8000_v30 = vld [vmem:[%s16364_s8 + $0x1b0] sm:$0xff]  ;;  %v7950_v59 = vld [vmem:[%s16364_s8 + $0x20] sm:$0xff] }
 0x720   :  { %9545 = vmatpush3.bf16.msra.mxu1 %v9544_v48  ;;  %9554 = vmatpush3.bf16.msra.mxu0 %v9553_v26  ;;  %v7951_v32 = vld [vmem:[%s16364_s8 + $0x28] sm:$0xff]  ;;  %v7969_v28 = vld [vmem:[%s16364_s8 + $0xb8] sm:$0xff] }
 0x721   :  { %9546 = vmatprep.subr.bf16.mxu1 %v17234_v46  ;;  %v7737_v31 = vmax.f32 %v7736_v7, 1.0  ;;  %9555 = vmatprep.subr.bf16.mxu0 %v17234_v46  ;;  %v7984_v7 = vld [vmem:[%s16364_s8 + $0x130] sm:$0xff]  ;;  %v8011_v17 = vld [vmem:[%s16364_s8 + $0x208] sm:$0xff] }
 0x723   :  { %9700 = vrcp.f32 %v7737_v31 }
 0x724   :  { %9548 = vmatpush3.bf16.msra.mxu1 %v9547_v5  ;;  %v7851_v5 = vld [vmem:[%s16362_s6 + $0x30] sm:$0xff]  ;;  %9557 = vmatpush3.bf16.msra.mxu0 %v9556_v42 }
 0x725   :  { %v9559_v60 = vpack.c.bf16 %v7852_v29, %v7851_v5  ;;  %9558 = vmatprep.subr.bf16.mxu0 %v17234_v46  ;;  %v8009_v5 = vld [vmem:[%s16364_s8 + $0x1f8] sm:$0xff]  ;;  %v7992_v29 = vld [vmem:[%s16364_s8 + $0x170] sm:$0xff] }
 0x726   :  { %v9697_v37 = vpop.eup %9696  ;;  %v9635_v45 = vpack.c.bf16 %v7993_v47, %v7992_v29  ;;  %v7961_v29 = vld [vmem:[%s16364_s8 + $0x78] sm:$0xff]  ;;  %v8027_v47 = vld [vmem:[%s16364_s8 + $0x288] sm:$0xff] }
 0x727   :  { %v9699_v49 = vpop.eup %9698 }
 0x728   :  { %9560 = vmatpush3.bf16.msra.mxu0 %v9559_v60 }
 0x729   :  { %9561 = vmatprep.subr.bf16.mxu0 %v17234_v46 }
 0x72c   :  { %9563 = vmatpush3.bf16.msra.mxu0 %v9562_v43  ;;  %v7942_v43 = vld [vmem:[%s16357_s1 + $0x10] sm:$0xff] }
 0x72d   :  { %v9701_v48 = vpop.eup %9700  ;;  %9564 = vmatprep.subr.bf16.mxu0 %v17234_v46 }
 0x730   :  { %9566 = vmatpush3.bf16.msra.mxu0 %v9565_v54 }
 0x731   :  { %9567 = vmatprep.subr.bf16.mxu0 %v17234_v46 }
 0x7cb   :  { %v9360_v18 = vpop.f32.mrb[6].mxu0 }
 0x7cc   :  { %v7610_v35 = vmul.f32 %v9693_v23, %v9360_v18  ;;  %v7584_v58 = vpop.f32.mrb[7].mxu0  ;;  %v7857_v23 = vld [vmem:[%s16362_s6 + $0x60] sm:$0xff]  ;;  %v7858_v18 = vld [vmem:[%s16362_s6 + $0x68] sm:$0xff] }
 0x7cd   :  { %v7609_v0 = vmul.f32 %v9695_v16, %v7584_v58  ;;  %v9568_v16 = vpack.c.bf16 %v7858_v18, %v7857_v23  ;;  %v7860_v58 = vld [vmem:[%s16362_s6 + $0x78] sm:$0xff]  ;;  %v17246_v23 = vld [vmem:[#allocation6_spill] sm:$0xff] }
 0x7ce   :  { %v7627_v10 = vadd.f32 %v15952_v1, %v7610_v35  ;;  %v7859_v35 = vld [vmem:[%s16362_s6 + $0x70] sm:$0xff] }
 0x7cf   :  { %v7626_v61 = vadd.f32 %v15952_v1, %v7609_v0  ;;  %9569 = vmatpush3.bf16.msra.mxu0 %v9568_v16  ;;  %v9571_v57 = vpack.c.bf16 %v7860_v58, %v7859_v35  ;;  %v9573_v0 = vpack.c.bf16 %v7963_v24, %v7962_v63  ;;  %v9115_v16 = vld [vmem:[%s16361_s5] ss:$0 sm:$0xff]  ;;  %v9132_v35 = vld [vmem:[%s16361_s5 + $0x1] ss:$0 sm:$0xff]  ;;  %v7947_v24 = vld [vmem:[%s16364_s8 + $0x8] sm:$0xff] }
 0x7d0   :  { %v7740_v40 = vmul.f32 %v8312_v25, %v7627_v10  ;;  %9570 = vmatprep.subr.bf16.mxu0 %v17234_v46  ;;  %v7994_v46 = vld [vmem:[%s16364_s8 + $0x180] sm:$0xff]  ;;  %v7980_v25 = vld [vmem:[%s16364_s8 + $0x110] sm:$0xff]  ;;  %v9669_v58 = vadd.f32 %v9132_v35, %v9115_v16 }
 0x7d1   :  { %v7739_v50 = vmul.f32 %v8311_v41, %v7626_v61  ;;  %v7978_v10 = vld [vmem:[%s16364_s8 + $0x100] sm:$0xff]  ;;  %v9605_v61 = vpack.c.bf16 %v7995_v36, %v7994_v46  ;;  %v7964_v46 = vld [vmem:[%s16364_s8 + $0x90] sm:$0xff]  ;;  %v7965_v36 = vld [vmem:[%s16364_s8 + $0x98] sm:$0xff] }
 0x7d2   :  { %v9607_v41 = vpack.c.bf16 %v7979_v2, %v7978_v10  ;;  %v7946_v63 = vld [vmem:[%s16364_s8] sm:$0xff]  ;;  %v8012_v35 = vld [vmem:[%s16364_s8 + $0x210] sm:$0xff] }
 0x7d3   :  { %v7742_v21 = vadd.f32 %v7739_v50, %v7738_v34  ;;  %9572 = vmatpush3.bf16.msra.mxu0 %v9571_v57  ;;  %9606 = vmatprep.subr.bf16.mxu1 %v9605_v61  ;;  %v7996_v34 = vld [vmem:[%s16364_s8 + $0x190] sm:$0xff]  ;;  %v7997_v50 = vld [vmem:[%s16364_s8 + $0x198] sm:$0xff]  ;;  %v9575_v61 = vpack.c.bf16 %v7947_v24, %v7946_v63  ;;  %v8030_v63 = vld [vmem:[%s16364_s8 + $0x2a0] sm:$0xff] }
 0x7d4   :  { %9574 = vmatprep.subr.bf16.mxu0 %v9573_v0  ;;  %v8031_v24 = vld [vmem:[%s16364_s8 + $0x2a8] sm:$0xff] }
 0x7d5   :  { %v7743_v6 = vadd.f32 %v7742_v21, %v7740_v40  ;;  %v9609_v40 = vpack.c.bf16 %v7997_v50, %v7996_v34  ;;  %v7981_v21 = vld [vmem:[%s16364_s8 + $0x118] sm:$0xff]  ;;  %v7948_v34 = vld [vmem:[%s16364_s8 + $0x10] sm:$0xff] }
 0x7d6   :  { %v7949_v50 = vld [vmem:[%s16364_s8 + $0x18] sm:$0xff] }
 0x7ef   :  { %v9363_v15 = vpop.f32.mrb[8].mxu0 }
 0x7f0   :  { %v7612_v22 = vmul.f32 %v9697_v37, %v9363_v15  ;;  %v7594_v52 = vpop.f32.mrb[9].mxu0  ;;  %v7985_v37 = vld [vmem:[%s16364_s8 + $0x138] sm:$0xff] }
 0x7f1   :  { %v7611_v8 = vmul.f32 %v9699_v49, %v7594_v52  ;;  %v9619_v15 = vpack.c.bf16 %v7985_v37, %v7984_v7  ;;  %v8002_v49 = vld [vmem:[%s16364_s8 + $0x1c0] sm:$0xff]  ;;  %v7953_v7 = vld [vmem:[%s16364_s8 + $0x38] sm:$0xff]  ;;  %v7971_v37 = vld [vmem:[%s16364_s8 + $0xc8] sm:$0xff] }
 0x7f2   :  { %v7629_v13 = vadd.f32 %v15952_v1, %v7612_v22  ;;  %v8003_v22 = vld [vmem:[%s16364_s8 + $0x1c8] sm:$0xff]  ;;  %v7986_v52 = vld [vmem:[%s16364_s8 + $0x140] sm:$0xff] }
 0x7f3   :  { %v7628_v33 = vadd.f32 %v15952_v1, %v7611_v8  ;;  %v9621_v8 = vpack.c.bf16 %v8003_v22, %v8002_v49  ;;  %v9623_v38 = vpack.c.bf16 %v7987_v39, %v7986_v52  ;;  %v7954_v22 = vld [vmem:[%s16364_s8 + $0x40] sm:$0xff]  ;;  %v7955_v52 = vld [vmem:[%s16364_s8 + $0x48] sm:$0xff]  ;;  %v7973_v39 = vld [vmem:[%s16364_s8 + $0xd8] sm:$0xff] }
 0x7f4   :  { %9702 = vtanh.f32 %v7629_v13  ;;  %v8005_v13 = vld [vmem:[%s16364_s8 + $0x1d8] sm:$0xff] }
 0x7f5   :  { %v7741_v9 = vmul.f32 %v8313_v56, %v7628_v33  ;;  %v8001_v56 = vld [vmem:[%s16364_s8 + $0x1b8] sm:$0xff]  ;;  %v9625_v27 = vpack.c.bf16 %v8005_v13, %v8004_v4  ;;  %9704 = vrcp.f32 %v171_v44  ;;  %v7956_v13 = vld [vmem:[%s16364_s8 + $0x50] sm:$0xff] }
 0x7f6   :  { %v9617_v31 = vpack.c.bf16 %v8001_v56, %v8000_v30  ;;  %v7989_v33 = vld [vmem:[%s16364_s8 + $0x158] sm:$0xff]  ;;  %v7952_v56 = vld [vmem:[%s16364_s8 + $0x30] sm:$0xff] }
 0x7f7   :  { %v7744_v62 = vadd.f32 %v7743_v6, %v7741_v9  ;;  %v9611_v6 = vpack.c.bf16 %v7981_v21, %v7980_v25  ;;  %v9627_v26 = vpack.c.bf16 %v7989_v33, %v7988_v14  ;;  %v8006_v9 = vld [vmem:[%s16364_s8 + $0x1e0] sm:$0xff]  ;;  %v7941_v25 = vld [vmem:[%s16357_s1 + $0x8] sm:$0xff]  ;;  %v7957_v14 = vld [vmem:[%s16364_s8 + $0x58] sm:$0xff] }
 0x7f8   :  { %v7967_v21 = vld [vmem:[%s16364_s8 + $0xa8] sm:$0xff]  ;;  %v8028_v44 = vld [vmem:[%s16364_s8 + $0x290] sm:$0xff] }
 0x7f9   :  { %v7746_v20 = vmul.f32 %v9701_v48, %v7744_v62  ;;  %v9629_v62 = vpack.c.bf16 %v8007_v3, %v8006_v9  ;;  %v7991_v48 = vld [vmem:[%s16364_s8 + $0x168] sm:$0xff]  ;;  %v7958_v3 = vld [vmem:[%s16364_s8 + $0x60] sm:$0xff] }
 0x7fa   :  { %v9631_v42 = vpack.c.bf16 %v7991_v48, %v7990_v51  ;;  %v7975_v33 = vld [vmem:[%s16364_s8 + $0xe8] sm:$0xff]  ;;  %v7977_v48 = vld [vmem:[%s16364_s8 + $0xf8] sm:$0xff] }
 0x7fb   :  { %9432 = vmatmul.mubr.f32.vlgmr.msra.gmra.mrb[0].mxu1 %v7746_v20  ;;  %v8008_v20 = vld [vmem:[%s16364_s8 + $0x1f0] sm:$0xff]  ;;  %v7959_v51 = vld [vmem:[%s16364_s8 + $0x68] sm:$0xff] }
 0x7fc   :  { %9608 = vmatpush3.bf16.msra.mxu1 %v9607_v41  ;;  %v9633_v60 = vpack.c.bf16 %v8009_v5, %v8008_v20  ;;  %v9577_v41 = vpack.c.bf16 %v7965_v36, %v7964_v46  ;;  %v7960_v5 = vld [vmem:[%s16364_s8 + $0x70] sm:$0xff]  ;;  %v9645_v46 = vpack.c.bf16 %v8031_v24, %v8030_v63  ;;  %v8014_v36 = vld [vmem:[%s16364_s8 + $0x220] sm:$0xff] }
 0x7fd   :  { %9610 = vmatprep.subr.bf16.mxu1 %v9609_v40  ;;  %v7966_v40 = vld [vmem:[%s16364_s8 + $0xa0] sm:$0xff] }
 0x7fe   :  { %v9703_v12 = vpop.eup %9702  ;;  %v9581_v19 = vpack.c.bf16 %v7967_v21, %v7966_v40 }
 0x7ff   :  { %8264 = vrot.lane.b32.xlu1 %v9703_v12, %s9737_s2  ;;  %v7943_v12 = vld [vmem:[%s16357_s1 + $0x18] sm:$0xff]  ;;  %v9705_v54 = vpop.eup %9704 }
 0x800   :  { %9612 = vmatpush3.bf16.msra.mxu1 %v9611_v6  ;;  %8183 = vmatprep.mubr.f32.mxu1 %v7943_v12  ;;  %v7603_v18 = vmul.f32 %v9705_v54, %v17246_v23  ;;  %v9579_v6 = vpack.c.bf16 %v7949_v50, %v7948_v34  ;;  %v8029_v54 = vld [vmem:[%s16364_s8 + $0x298] sm:$0xff]  ;;  %v7940_v23 = vld [vmem:[%s16357_s1] sm:$0xff] }
 0x801   :  { %9614 = vmatprep.subr.bf16.mxu1 %v9613_v53  ;;  %v7968_v53 = vld [vmem:[%s16364_s8 + $0xb0] sm:$0xff]  ;;  %v9641_v16 = vpack.c.bf16 %v8029_v54, %v8028_v44  ;;  %v8017_v34 = vld [vmem:[%s16364_s8 + $0x238] sm:$0xff]  ;;  %v8034_v50 = vld [vmem:[%s16364_s8 + $0x2c0] sm:$0xff] }
 0x802   :  { %v7620_v57 = vadd.f32 %v15952_v1, %v7603_v18  ;;  %v9585_v30 = vpack.c.bf16 %v7969_v28, %v7968_v53 }
 0x804   :  { %9616 = vmatpush3.bf16.msra.mxu1 %v9615_v55  ;;  %v7842_v11 = vsel %vm7839_vm12, %v7620_v57, 0.0  ;;  %v9583_v55 = vpack.c.bf16 %v7951_v32, %v7950_v59  ;;  %v7945_v57 = vld [vmem:[%s16357_s1 + $0x28] sm:$0xff]  ;;  %v8036_v59 = vld [vmem:[%s16364_s8 + $0x2d0] sm:$0xff]  ;;  %v8037_v32 = vld [vmem:[%s16364_s8 + $0x2d8] sm:$0xff] }
 0x805   :  { %9618 = vmatprep.subr.bf16.mxu1 %v9617_v31  ;;  %v7970_v31 = vld [vmem:[%s16364_s8 + $0xc0] sm:$0xff]  ;;  %v9657_v28 = vpack.c.bf16 %v8037_v32, %v8036_v59 }
 0x806   :  { %v9589_v49 = vpack.c.bf16 %v7971_v37, %v7970_v31 }
 0x808   :  { %9620 = vmatpush3.bf16.msra.mxu1 %v9619_v15  ;;  %v9587_v15 = vpack.c.bf16 %v7953_v7, %v7952_v56  ;;  %v8038_v56 = vld [vmem:[%s16364_s8 + $0x2e0] sm:$0xff]  ;;  %v8039_v7 = vld [vmem:[%s16364_s8 + $0x2e8] sm:$0xff] }
 0x809   :  { %9622 = vmatprep.subr.bf16.mxu1 %v9621_v8  ;;  %v7972_v8 = vld [vmem:[%s16364_s8 + $0xd0] sm:$0xff]  ;;  %v9661_v37 = vpack.c.bf16 %v8039_v7, %v8038_v56 }
 0x80a   :  { %v9593_v4 = vpack.c.bf16 %v7973_v39, %v7972_v8 }
 0x80c   :  { %9624 = vmatpush3.bf16.msra.mxu1 %v9623_v38  ;;  %v9591_v38 = vpack.c.bf16 %v7955_v52, %v7954_v22  ;;  %v8040_v22 = vld [vmem:[%s16364_s8 + $0x2f0] sm:$0xff]  ;;  %v8041_v52 = vld [vmem:[%s16364_s8 + $0x2f8] sm:$0xff] }
 0x80d   :  { %9626 = vmatprep.subr.bf16.mxu1 %v9625_v27  ;;  %v7974_v27 = vld [vmem:[%s16364_s8 + $0xe0] sm:$0xff]  ;;  %v9665_v39 = vpack.c.bf16 %v8041_v52, %v8040_v22 }
 0x80e   :  { %v9597_v9 = vpack.c.bf16 %v7975_v33, %v7974_v27 }
 0x810   :  { %9628 = vmatpush3.bf16.msra.mxu1 %v9627_v26  ;;  %v9595_v26 = vpack.c.bf16 %v7957_v14, %v7956_v13  ;;  %v7944_v14 = vld [vmem:[%s16357_s1 + $0x20] sm:$0xff]  ;;  %s9739_s1 = smov [#allocation2]  }
 0x811   :  { %9630 = vmatprep.subr.bf16.mxu1 %v9629_v62  ;;  %v7976_v62 = vld [vmem:[%s16364_s8 + $0xf0] sm:$0xff] }
 0x812   :  { %v9601_v20 = vpack.c.bf16 %v7977_v48, %v7976_v62 }
 0x814   :  { %9632 = vmatpush3.bf16.msra.mxu1 %v9631_v42  ;;  %v9599_v42 = vpack.c.bf16 %v7959_v51, %v7958_v3 }
 0x815   :  { %9634 = vmatprep.subr.bf16.mxu1 %v9633_v60  ;;  %v8026_v60 = vld [vmem:[%s16364_s8 + $0x280] sm:$0xff] }
 0x816   :  { %v9637_v12 = vpack.c.bf16 %v8027_v47, %v8026_v60 }
 0x818   :  { %9636 = vmatpush3.bf16.msra.mxu1 %v9635_v45  ;;  %v9603_v45 = vpack.c.bf16 %v7961_v29, %v7960_v5 }
 0x81b   :  { %8184 = vmatmul.mubr.f32.vlgmr.msra.gmra.mrb[2].mxu1 %v7942_v43  ;;  %v8010_v43 = vld [vmem:[%s16364_s8 + $0x200] sm:$0xff] }
 0x81c   :  { %v9639_v18 = vpack.c.bf16 %v8011_v17, %v8010_v43 }
 0x871   :  { %v8265_v54 = vpop.permute.xlu1 %8264 }
 0x8ce   :  { %v7835_v0 = vpop.f32.mrb[0].mxu1 }
 0x8cf   :  { %v9670_v1 = vadd.f32 %v9669_v58, %v7835_v0  ;;  %v9433_v10 = vpop.f32.mrb[1].mxu1  ;;  %v8013_v58 = vld [vmem:[%s16364_s8 + $0x218] sm:$0xff] }
 0x8d0   :  { %v9643_v0 = vpack.c.bf16 %v8013_v58, %v8012_v35  ;;  %v8032_v10 = vld [vmem:[%s16364_s8 + $0x2b0] sm:$0xff] }
 0x8d1   :  { %v9671_v2 = vadd.f32 %v9670_v1, %v7842_v11  ;;  %v8015_v1 = vld [vmem:[%s16364_s8 + $0x228] sm:$0xff]  ;;  %v8033_v11 = vld [vmem:[%s16364_s8 + $0x2b8] sm:$0xff] }
 0x8d3   :  { %9467 = vmatmul.mubr.f32.vlgmr.msra.gmra.mrb[10].mxu0 %v9671_v2  ;;  %v9649_v2 = vpack.c.bf16 %v8033_v11, %v8032_v10 }
 0x8d4   :  { %9576 = vmatpush3.bf16.msra.mxu0 %v9575_v61  ;;  %8113 = vmatprep.mubr.f32.mxu0 %v7941_v25  ;;  %v9647_v61 = vpack.c.bf16 %v8015_v1, %v8014_v36  ;;  %v8035_v25 = vld [vmem:[%s16364_s8 + $0x2c8] sm:$0xff] }
 0x8d5   :  { %9578 = vmatprep.subr.bf16.mxu0 %v9577_v41  ;;  %v8016_v41 = vld [vmem:[%s16364_s8 + $0x230] sm:$0xff]  ;;  %v9653_v21 = vpack.c.bf16 %v8035_v25, %v8034_v50 }
 0x8d6   :  { %v9651_v40 = vpack.c.bf16 %v8017_v34, %v8016_v41 }
 0x8d8   :  { %9580 = vmatpush3.bf16.msra.mxu0 %v9579_v6  ;;  %v8018_v6 = vld [vmem:[%s16364_s8 + $0x240] sm:$0xff] }
 0x8d9   :  { %9582 = vmatprep.subr.bf16.mxu0 %v9581_v19  ;;  %v8019_v19 = vld [vmem:[%s16364_s8 + $0x248] sm:$0xff] }
 0x8da   :  { %v9655_v53 = vpack.c.bf16 %v8019_v19, %v8018_v6 }
 0x8dc   :  { %9584 = vmatpush3.bf16.msra.mxu0 %v9583_v55  ;;  %v8020_v55 = vld [vmem:[%s16364_s8 + $0x250] sm:$0xff] }
 0x8dd   :  { %9586 = vmatprep.subr.bf16.mxu0 %v9585_v30  ;;  %v8021_v30 = vld [vmem:[%s16364_s8 + $0x258] sm:$0xff] }
 0x8de   :  { %v9659_v31 = vpack.c.bf16 %v8021_v30, %v8020_v55 }
 0x8e0   :  { %9588 = vmatpush3.bf16.msra.mxu0 %v9587_v15  ;;  %v8022_v15 = vld [vmem:[%s16364_s8 + $0x260] sm:$0xff] }
 0x8e1   :  { %9590 = vmatprep.subr.bf16.mxu0 %v9589_v49  ;;  %v8023_v49 = vld [vmem:[%s16364_s8 + $0x268] sm:$0xff] }
 0x8e2   :  { %v9663_v8 = vpack.c.bf16 %v8023_v49, %v8022_v15 }
 0x8e4   :  { %9592 = vmatpush3.bf16.msra.mxu0 %v9591_v38  ;;  %v8024_v38 = vld [vmem:[%s16364_s8 + $0x270] sm:$0xff] }
 0x8e5   :  { %9594 = vmatprep.subr.bf16.mxu0 %v9593_v4  ;;  %v8025_v4 = vld [vmem:[%s16364_s8 + $0x278] sm:$0xff]  ;;  %s9738_s8 = smov 32  }
 0x8e6   :  { %v9667_v13 = vpack.c.bf16 %v8025_v4, %v8024_v38 }
 0x8e8   :  { %9596 = vmatpush3.bf16.msra.mxu0 %v9595_v26 }
 0x8e9   :  { %9598 = vmatprep.subr.bf16.mxu0 %v9597_v9  ;;  %v9133_v9 = vld [vmem:[%s16363_s7] ss:$0 sm:$0xff]  ;;  %s8280_s7 = sshll.u32 %s9739_s1, 4  ;;  %s8281_s7 = int_to_ptr.vmem [resolvable:$true] %s8280_s7 }
 0x8ea   :  { %p9715_p1 = scmp.lt.s32.totalorder %s8281_s7, %s8281_s7 }
 0x8ec   :  { %9600 = vmatpush3.bf16.msra.mxu0 %v9599_v42 }
 0x8ed   :  { %9602 = vmatprep.subr.bf16.mxu0 %v9601_v20  ;;  %v9134_v20 = vld [vmem:[%s16365_s9] ss:$0 sm:$0xff]  ;;  %s9710_s9 = scalar_lea.vmem %s8281_s7, 128 }
 0x8ee   :  { %v9279_v27 = vpop.f32.mrb[2].mxu1  ;;  %p9711_p0 = scmp.ne.s32.totalorder %s8281_s7, %s9710_s9  ;;  %p9716_p2 = scmp.lt.s32.totalorder %s9710_s9, %s9710_s9 }
 0x8ef   :  { %v9280_v33 = vpop.f32.mrb[3].mxu1 }
 0x8f0   :  { %9604 = vmatpush3.bf16.msra.mxu0 %v9603_v45  ;;  %v9281_v26 = vadd.f32 %v9280_v33, %v9279_v27  ;;  %p9717_p3 = por %p9716_p2, %p9715_p1 }
 0x8f1   :  { %9638 = vmatprep.subr.bf16.mxu0 %v9637_v12 }
 0x8f2   :  { %p9718_p4 = pnand %p9717_p3, %p9711_p0 }
 0x8f3   :  { %8114 = vmatmul.mubr.f32.vlgmr.msra.gmra.mrb[12].mxu0 %v7940_v23 }
 0x8f4   :  { %9640 = vmatpush3.bf16.msra.mxu0 %v9639_v18  ;;  %8253 = vmatprep.mubr.f32.mxu0 %v7945_v57 }
 0x8f5   :  { %9642 = vmatprep.subr.bf16.mxu0 %v9641_v16 }
 0x8f8   :  { %9644 = vmatpush3.bf16.msra.mxu0 %v9643_v0 }
 0x8f9   :  { %9646 = vmatprep.subr.bf16.mxu0 %v9645_v46 }
 0x8fc   :  { %9648 = vmatpush3.bf16.msra.mxu0 %v9647_v61 }
 0x8fd   :  { %9650 = vmatprep.subr.bf16.mxu0 %v9649_v2 }
 0x900   :  { %9652 = vmatpush3.bf16.msra.mxu0 %v9651_v40 }
 0x901   :  { %9654 = vmatprep.subr.bf16.mxu0 %v9653_v21 }
 0x904   :  { %9656 = vmatpush3.bf16.msra.mxu0 %v9655_v53 }
 0x905   :  { %9658 = vmatprep.subr.bf16.mxu0 %v9657_v28 }
 0x908   :  { %9660 = vmatpush3.bf16.msra.mxu0 %v9659_v31 }
 0x909   :  { %9662 = vmatprep.subr.bf16.mxu0 %v9661_v37 }
 0x90c   :  { %9664 = vmatpush3.bf16.msra.mxu0 %v9663_v8 }
 0x90d   :  { %9666 = vmatprep.subr.bf16.mxu0 %v9665_v39 }
 0x910   :  { %9668 = vmatpush3.bf16.msra.mxu0 %v9667_v13 }
 0x913   :  { %8254 = vmatmul.mubr.f32.vlgmr.msra.gmra.mrb[14].mxu0 %v7944_v14 }
 0x9a6   :  { %v7934_v3 = vpop.f32.mrb[10].mxu0 }
 0x9a7   :  { %v7935_v51 = vadd.f32 %v9133_v9, %v7934_v3  ;;  %v9468_v62 = vpop.f32.mrb[11].mxu0 }
 0x9a9   :  { %9706 = vtanh.f32 %v7935_v51 }
 0x9b3   :  { %v9707_v48 = vpop.eup %9706 }
 0x9b4   :  { %8260 = vrot.lane.b32.xlu0 %v9707_v48, %s9738_s8 }
 0x9c6   :  { %v9244_v42 = vpop.f32.mrb[12].mxu0 }
 0x9c7   :  { %v9245_v5 = vpop.f32.mrb[13].mxu0 }
 0x9c8   :  { %v9246_v29 = vadd.f32 %v9245_v5, %v9244_v42 }
 0x9ca   :  { %v8116_v60 = vadd.f32 %v9246_v29, %v9134_v20 }
 0x9cc   :  { %v8186_v47 = vadd.f32 %v9281_v26, %v8116_v60 }
 0x9e6   :  { %v9314_v45 = vpop.f32.mrb[14].mxu0 }
 0x9e7   :  { %v9315_v12 = vpop.f32.mrb[15].mxu0 }
 0x9e8   :  { %v9316_v43 = vadd.f32 %v9315_v12, %v9314_v45 }
 0x9ea   :  { %v8256_v17 = vadd.f32 %v9316_v43, %v8186_v47 }
 0xa26   :  { %v8261_v44 = vpop.permute.xlu0 %8260 }
 0xa27   :  { %v8268_v23 = vsel %vm8267_vm14, %v8256_v17, %v8261_v44 }
 0xa28   :  { %v8270_v18 = vsel %vm8269_vm11, %v8268_v23, %v8265_v54 }
 0xa29   :  { %v8272_v16 = vsel %vm8271_vm15, %v8270_v18, 0.0 }
 0xa2a   :  { %8273 = vst [vmem:[#allocation2] sm:$0xff] %v8272_v16 }
 0xa2b   :  { %9721 = shalt.err (!%p9718_p4)
}
 0xa2c   :  { %s9722_s6 = scalar_lea.hbm %s16366_s10, 128 }
 0xa2d   :  { %p9723_p5 = scmp.ne.s32.totalorder %s16366_s10, %s9722_s6  ;;  %p9726_p6 = scmp.lt.u32.totalorder %s9722_s6, %s16366_s10 }
 0xa2f   :  { %p9728_p7 = pnand %p9726_p6, %p9723_p5 }
 0xa31   :  { %9731 = shalt.err (!%p9728_p7)
}
 0xa32   :  { %8283 = dma.vmem_to_hbm [thread:$0]  %s8281_s7, 128, %s16366_s10, [#allocation3]  }
 0xa33   :  { %9732 = dma.done.wait [#allocation3], 128  }
 0xa34   :  { %9733 = vsyncadd [#allocation3], 4294967168 }
 0xa35   :  { %8287 = vsyncpa [#allocation3], 1 }

</bundles_post_ra>
